<compile_context>
chip_gen: v7x
topology: tpu7x:2x2x1
jax: 0.10.0
libtpu: 0.0.40
codegen_flags: <defaults>
</compile_context>

<pallas_src>
import numpy as np

import jax
import jax.numpy as jnp
from jax.experimental import pallas as pl
from jax.experimental.pallas import tpu as pltpu


# ----------------------------------------------------------------------------
# Trace-time helpers: geometry, BN folding, constant selection matrices
# ----------------------------------------------------------------------------
def _geometry(h, w):
    """Per-stage geometry: 3 stride-2 FE convs + the stride-1 encoder stage."""
    stages = []
    ch, cw = h, w
    for _ in range(3):                                   # k=3, s=2, p=1
        oh, ow = (ch - 1) // 2 + 1, (cw - 1) // 2 + 1
        stages.append(dict(hp=ch + 2, wp=cw + 2, oh=oh, ow=ow))
        ch, cw = oh, ow
    stages.append(dict(hp=ch + 2, wp=cw + 2, oh=ch, ow=cw))  # stride-1 encoders
    return stages


def _fold_conv(p, eps=1e-5):
    """Fold eval-mode BatchNorm into the conv. Returns (w_mat, bias) where
    w_mat rows are in (di, dj, cin) tap order, shape (9*Cin, Cout)."""
    scale = p["gamma"] * jax.lax.rsqrt(p["var"] + eps)
    w = p["w"] * scale[:, None, None, None]              # (Cout, Cin, 3, 3)
    b = (p["b"] - p["mean"]) * scale + p["beta"]
    cout, cin = w.shape[0], w.shape[1]
    w_mat = jnp.transpose(w, (2, 3, 1, 0)).reshape(9 * cin, cout)
    return w_mat, b.reshape(1, cout).astype(jnp.float32)


def _transition(hp_src, wp_src, h_dst, w_dst, stride=2):
    """0/1 matrix mapping conv outputs at every padded position of the source
    raster to the next stage's flattened zero-padded raster (+ guard rows)."""
    hp_d, wp_d = h_dst + 2, w_dst + 2
    g = wp_d + 1
    t = np.zeros((2 * g + hp_d * wp_d, hp_src * wp_src), np.float32)
    for i in range(h_dst):
        for j in range(w_dst):
            dst = g + (i + 1) * wp_d + (j + 1)
            src = (1 + stride * i) * wp_src + (1 + stride * j)
            t[dst, src] = 1.0
    return t


def _pool_matrix(hp, wp, oh, ow):
    """Row vector implementing AdaptiveAvgPool2d((1,1)) over the interior
    (real) positions of the padded raster."""
    m = np.zeros((1, hp * wp), np.float32)
    for i in range(oh):
        for j in range(ow):
            m[0, (i + 1) * wp + (j + 1)] = 1.0 / (oh * ow)
    return m


# ----------------------------------------------------------------------------
# Fused forward pass (single pallas_call)
# ----------------------------------------------------------------------------
def two_stage_detect_cnn(params, x_nchw):
    B, C, H, W = x_nchw.shape
    s1, s2, s3, s4 = _geometry(H, W)
    n1, n2 = s1["hp"] * s1["wp"], s2["hp"] * s2["wp"]
    n3, n4 = s3["hp"] * s3["wp"], s4["hp"] * s4["wp"]
    wpad1, wpad2, wpad3, wpad4 = s1["wp"], s2["wp"], s3["wp"], s4["wp"]
    g1 = wpad1 + 1

    # --- input: NCHW -> NHWC -> flattened zero-padded raster (+ guard rows)
    x = jnp.transpose(x_nchw, (0, 2, 3, 1)).astype(jnp.float32)
    xp = jnp.pad(x, ((0, 0), (1, 1), (1, 1), (0, 0)))
    x1 = jnp.pad(xp.reshape(B, n1, C), ((0, 0), (g1, g1), (0, 0)))  # f32

    # --- BN-folded conv weights (tap-major); encoder branch weights stacked
    w1, b1 = _fold_conv(params["fe1"])                   # (9*C, 32)
    w2, b2 = _fold_conv(params["fe2"])                   # (288, 64)
    w3, b3 = _fold_conv(params["fe3"])                   # (576, 128)
    we_b, be_b = _fold_conv(params["block_enc"])
    we_l, be_l = _fold_conv(params["ball_enc"])
    we_p, be_p = _fold_conv(params["pos_enc"])
    wenc = jnp.concatenate([we_b, we_l, we_p], axis=1).astype(jnp.bfloat16)
    benc = jnp.concatenate([be_b, be_l, be_p], axis=1)   # (1, 384) f32
    w1 = w1.astype(jnp.float32)   # sliced at non-8-aligned offsets -> keep f32
    w2 = w2.astype(jnp.bfloat16)
    w3 = w3.astype(jnp.bfloat16)

    # --- constant selection matrices (stride-2 subsample + re-pad, avg-pool)
    t12 = jnp.asarray(_transition(s1["hp"], wpad1, s1["oh"], s1["ow"]), jnp.bfloat16)
    t23 = jnp.asarray(_transition(s2["hp"], wpad2, s2["oh"], s2["ow"]), jnp.bfloat16)
    t3f = jnp.asarray(_transition(s3["hp"], wpad3, s3["oh"], s3["ow"]), jnp.bfloat16)
    pool = jnp.asarray(_pool_matrix(s4["hp"], wpad4, s4["oh"], s4["ow"]), jnp.bfloat16)

    # --- FC head weights (torch stores (out, in); kernel wants (in, out))
    wb1 = params["block_fc1"]["w"].T.astype(jnp.bfloat16)
    bb1 = params["block_fc1"]["b"].reshape(1, -1)
    wb2 = params["block_fc2"]["w"].T.astype(jnp.bfloat16)
    bb2 = params["block_fc2"]["b"].reshape(1, -1)
    wl1 = params["ball_fc1"]["w"].T.astype(jnp.bfloat16)
    bl1 = params["ball_fc1"]["b"].reshape(1, -1)
    wl2 = params["ball_fc2"]["w"].T.astype(jnp.bfloat16)
    bl2 = params["ball_fc2"]["b"].reshape(1, -1)
    wp1_t = params["pos_fc1"]["w"].T                     # (129, 256)
    wp1a = wp1_t[:128].astype(jnp.bfloat16)              # pooled-feature part
    wp1b = wp1_t[128:].astype(jnp.float32)               # ball-sigmoid row (1, 256)
    bp1 = params["pos_fc1"]["b"].reshape(1, -1)
    wpo2 = params["pos_fc2"]["w"].T.astype(jnp.bfloat16)
    bp2 = params["pos_fc2"]["b"].reshape(1, -1)

    cins = (C, 32, 64, 128)

    def conv3x3(x_ref, w_ref, b_ref, n_out, wpad, cin):
        """3x3 conv (pad=1) evaluated at every position of the flattened padded
        raster: sum of 9 shifted (n_out, cin)@(cin, cout) MXU matmuls, f32 acc,
        folded BN bias + ReLU."""
        g = wpad + 1
        acc = None
        for di in range(3):
            for dj in range(3):
                t = di * 3 + dj
                shift = (di - 1) * wpad + (dj - 1)
                xs = x_ref[g + shift:g + shift + n_out, :].astype(jnp.bfloat16)
                wt = w_ref[t * cin:(t + 1) * cin, :].astype(jnp.bfloat16)
                d = jnp.dot(xs, wt, preferred_element_type=jnp.float32)
                acc = d if acc is None else acc + d
        return jnp.maximum(acc + b_ref[...], 0.0)

    def kernel(x1_ref, w1_ref, b1_ref, t12_ref, w2_ref, b2_ref, t23_ref,
               w3_ref, b3_ref, t3f_ref, wenc_ref, benc_ref, pool_ref,
               wb1_ref, bb1_ref, wb2_ref, bb2_ref,
               wl1_ref, bl1_ref, wl2_ref, bl2_ref,
               wp1a_ref, wp1b_ref, bp1_ref, wpo2_ref, bp2_ref,
               blk_ref, pos_ref, ball_ref,
               x2_scr, x3_scr, x4_scr):
        # ---- feature extractor: 3 x (stride-2 conv + BN + ReLU)
        a1 = conv3x3(x1_ref, w1_ref, b1_ref, n1, wpad1, cins[0])     # (n1, 32)
        x2_scr[...] = jnp.dot(t12_ref[...], a1.astype(jnp.bfloat16),
                              preferred_element_type=jnp.float32)
        a2 = conv3x3(x2_scr, w2_ref, b2_ref, n2, wpad2, cins[1])     # (n2, 64)
        x3_scr[...] = jnp.dot(t23_ref[...], a2.astype(jnp.bfloat16),
                              preferred_element_type=jnp.float32)
        a3 = conv3x3(x3_scr, w3_ref, b3_ref, n3, wpad3, cins[2])     # (n3, 128)
        x4_scr[...] = jnp.dot(t3f_ref[...], a3.astype(jnp.bfloat16),
                              preferred_element_type=jnp.float32)

        # ---- three branch encoders stacked along N (lane-dense 3*128 = 384)
        enc = conv3x3(x4_scr, wenc_ref, benc_ref, n4, wpad4, cins[3])  # (n4,384)

        # ---- AdaptiveAvgPool2d((1,1)) of all three branches in one matmul
        pooled = jnp.dot(pool_ref[...], enc.astype(jnp.bfloat16),
                         preferred_element_type=jnp.float32)           # (1, 384)
        p_blk = pooled[:, 0:128].astype(jnp.bfloat16)
        p_ball = pooled[:, 128:256].astype(jnp.bfloat16)
        p_pos = pooled[:, 256:384].astype(jnp.bfloat16)

        # ---- block head (Dropout = eval-mode identity)
        hb = jnp.maximum(
            jnp.dot(p_blk, wb1_ref[...], preferred_element_type=jnp.float32)
            + bb1_ref[...], 0.0)
        blk = jax.nn.sigmoid(
            jnp.dot(hb.astype(jnp.bfloat16), wb2_ref[...],
                    preferred_element_type=jnp.float32) + bb2_ref[...])

        # ---- ball head
        hl = jnp.maximum(
            jnp.dot(p_ball, wl1_ref[...], preferred_element_type=jnp.float32)
            + bl1_ref[...], 0.0)
        ball = jax.nn.sigmoid(
            jnp.dot(hl.astype(jnp.bfloat16), wl2_ref[...],
                    preferred_element_type=jnp.float32) + bl2_ref[...])

        # ---- position head: cat([pos_feat, ball]) @ W == pos@Wa + ball*Wb
        hpos = jnp.maximum(
            jnp.dot(p_pos, wp1a_ref[...], preferred_element_type=jnp.float32)
            + ball * wp1b_ref[...] + bp1_ref[...], 0.0)
        pos = (jnp.dot(hpos.astype(jnp.bfloat16), wpo2_ref[...],
                       preferred_element_type=jnp.float32) + bp2_ref[...]) * ball

        blk_ref[...] = blk
        pos_ref[...] = pos
        ball_ref[...] = ball

    inputs = (x1, w1, b1, t12, w2, b2, t23, w3, b3, t3f, wenc, benc, pool,
              wb1, bb1, wb2, bb2, wl1, bl1, wl2, bl2,
              wp1a, wp1b, bp1, wpo2, bp2)

    def rep(a):  # weight / constant: same (full) block every grid step
        zero = (0,) * a.ndim
        return pl.BlockSpec(a.shape, lambda b, _z=zero: _z)

    in_specs = [pl.BlockSpec((None,) + tuple(x1.shape[1:]),
                             lambda b: (b, 0, 0))]          # per-image input
    in_specs += [rep(a) for a in inputs[1:]]

    out_shape = (jax.ShapeDtypeStruct((B, 1, 3), jnp.float32),
                 jax.ShapeDtypeStruct((B, 1, 2), jnp.float32),
                 jax.ShapeDtypeStruct((B, 1, 1), jnp.float32))
    out_specs = (pl.BlockSpec((None, 1, 3), lambda b: (b, 0, 0)),
                 pl.BlockSpec((None, 1, 2), lambda b: (b, 0, 0)),
                 pl.BlockSpec((None, 1, 1), lambda b: (b, 0, 0)))

    scratch_shapes = [pltpu.VMEM((t12.shape[0], 32), jnp.float32),
                      pltpu.VMEM((t23.shape[0], 64), jnp.float32),
                      pltpu.VMEM((t3f.shape[0], 128), jnp.float32)]

    blk, pos, ball = pl.pallas_call(
        kernel,
        out_shape=out_shape,
        grid=(B,),
        in_specs=in_specs,
        out_specs=out_specs,
        scratch_shapes=scratch_shapes,
        compiler_params=pltpu.CompilerParams(
            dimension_semantics=("parallel",)),
    )(*inputs)

    blk = blk.reshape(B, 3)
    pos = pos.reshape(B, 2)
    ball = ball.reshape(B, 1)
    return jnp.concatenate([blk, pos, ball], axis=1)


# ----------------------------------------------------------------------------
# Deterministic parameter initialization (matches module __init__ shapes)
# ----------------------------------------------------------------------------
def _conv_params(key, cout, cin):
    std = (2.0 / (cout * 9)) ** 0.5        # kaiming_normal, fan_out, relu
    return {
        "w": jax.random.normal(key, (cout, cin, 3, 3), jnp.float32) * std,
        "b": jnp.zeros((cout,), jnp.float32),
        "gamma": jnp.ones((cout,), jnp.float32),
        "beta": jnp.zeros((cout,), jnp.float32),
        "mean": jnp.zeros((cout,), jnp.float32),
        "var": jnp.ones((cout,), jnp.float32),
    }


def _linear_params(key, cout, cin, bias_val=0.0):
    std = (2.0 / cout) ** 0.5              # kaiming_normal, fan_out, relu
    return {
        "w": jax.random.normal(key, (cout, cin), jnp.float32) * std,  # (out, in)
        "b": jnp.full((cout,), bias_val, jnp.float32),
    }


def init_params(key, num_channels):
    ks = jax.random.split(key, 13)
    return {
        "fe1": _conv_params(ks[0], 32, num_channels),
        "fe2": _conv_params(ks[1], 64, 32),
        "fe3": _conv_params(ks[2], 128, 64),
        "block_enc": _conv_params(ks[3], 128, 128),
        "block_fc1": _linear_params(ks[4], 256, 128),
        "block_fc2": _linear_params(ks[5], 3, 256, bias_val=0.5),
        "ball_enc": _conv_params(ks[6], 128, 128),
        "ball_fc1": _linear_params(ks[7], 256, 128),
        "ball_fc2": _linear_params(ks[8], 1, 256, bias_val=0.0),
        "pos_enc": _conv_params(ks[9], 128, 128),
        "pos_fc1": _linear_params(ks[10], 256, 128 + 1),
        "pos_fc2": _linear_params(ks[11], 2, 256),
    }


# ----------------------------------------------------------------------------
# Pure-JAX (XLA) reference used only for the in-script self-check
# ----------------------------------------------------------------------------
def _reference_forward(params, x_nchw):
    def conv_bn_relu(x, p, stride, eps=1e-5):
        scale = p["gamma"] / jnp.sqrt(p["var"] + eps)
        w = p["w"] * scale[:, None, None, None]
        b = (p["b"] - p["mean"]) * scale + p["beta"]
        y = jax.lax.conv_general_dilated(
            x, jnp.transpose(w, (2, 3, 1, 0)),
            window_strides=(stride, stride), padding=((1, 1), (1, 1)),
            dimension_numbers=("NHWC", "HWIO", "NHWC"))
        return jax.nn.relu(y + b)

    def linear(x, p):
        return x @ p["w"].T + p["b"]

    x = jnp.transpose(x_nchw, (0, 2, 3, 1)).astype(jnp.float32)
    f = conv_bn_relu(x, params["fe1"], 2)
    f = conv_bn_relu(f, params["fe2"], 2)
    f = conv_bn_relu(f, params["fe3"], 2)

    bp = conv_bn_relu(f, params["block_enc"], 1).mean(axis=(1, 2))
    blk = jax.nn.sigmoid(
        linear(jax.nn.relu(linear(bp, params["block_fc1"])), params["block_fc2"]))
    lp = conv_bn_relu(f, params["ball_enc"], 1).mean(axis=(1, 2))
    ball = jax.nn.sigmoid(
        linear(jax.nn.relu(linear(lp, params["ball_fc1"])), params["ball_fc2"]))
    pp = conv_bn_relu(f, params["pos_enc"], 1).mean(axis=(1, 2))
    pos_in = jnp.concatenate([pp, ball], axis=1)
    pos = linear(jax.nn.relu(linear(pos_in, params["pos_fc1"])),
                 params["pos_fc2"]) * ball
    return jnp.concatenate([blk, pos, ball], axis=1)


# ----------------------------------------------------------------------------
if __name__ == "__main__":
    key = jax.random.PRNGKey(0)
    k_param, k_x = jax.random.split(key)

    batch, num_channels, H, W = 2, 4, 16, 16
    params = init_params(k_param, num_channels)
    x = jax.random.normal(k_x, (batch, num_channels, H, W), jnp.float32)

    out = jax.jit(two_stage_detect_cnn)(params, x)
    out = jax.block_until_ready(out)

    assert out.shape == (batch, 6), out.shape
    assert bool(jnp.all(jnp.isfinite(out)))

    # self-check against a plain-XLA f32 reference (bf16 weights => loose tol)
    ref = jax.block_until_ready(jax.jit(_reference_forward)(params, x))
    np.testing.assert_allclose(np.asarray(out), np.asarray(ref),
                               atol=5e-2, rtol=0.0)

    print("KERNEL_OK")
</pallas_src>

<mosaic_0001>
module attributes {stable_mosaic.version = 11 : i64} {
  func.func @kernel(%arg0: i32, %arg1: memref<1x362x4xf32, #tpu.memory_space<vmem>>, %arg2: memref<36x32xf32, #tpu.memory_space<vmem>>, %arg3: memref<1x32xf32, #tpu.memory_space<vmem>>, %arg4: memref<122x324xbf16, #tpu.memory_space<vmem>>, %arg5: memref<288x64xbf16, #tpu.memory_space<vmem>>, %arg6: memref<1x64xf32, #tpu.memory_space<vmem>>, %arg7: memref<50x100xbf16, #tpu.memory_space<vmem>>, %arg8: memref<576x128xbf16, #tpu.memory_space<vmem>>, %arg9: memref<1x128xf32, #tpu.memory_space<vmem>>, %arg10: memref<26x36xbf16, #tpu.memory_space<vmem>>, %arg11: memref<1152x384xbf16, #tpu.memory_space<vmem>>, %arg12: memref<1x384xf32, #tpu.memory_space<vmem>>, %arg13: memref<1x16xbf16, #tpu.memory_space<vmem>>, %arg14: memref<128x256xbf16, #tpu.memory_space<vmem>>, %arg15: memref<1x256xf32, #tpu.memory_space<vmem>>, %arg16: memref<256x3xbf16, #tpu.memory_space<vmem>>, %arg17: memref<1x3xf32, #tpu.memory_space<vmem>>, %arg18: memref<128x256xbf16, #tpu.memory_space<vmem>>, %arg19: memref<1x256xf32, #tpu.memory_space<vmem>>, %arg20: memref<256x1xbf16, #tpu.memory_space<vmem>>, %arg21: memref<1x1xf32, #tpu.memory_space<vmem>>, %arg22: memref<128x256xbf16, #tpu.memory_space<vmem>>, %arg23: memref<1x256xf32, #tpu.memory_space<vmem>>, %arg24: memref<1x256xf32, #tpu.memory_space<vmem>>, %arg25: memref<256x2xbf16, #tpu.memory_space<vmem>>, %arg26: memref<1x2xf32, #tpu.memory_space<vmem>>, %arg27: memref<1x1x3xf32, #tpu.memory_space<vmem>>, %arg28: memref<1x1x2xf32, #tpu.memory_space<vmem>>, %arg29: memref<1x1x1xf32, #tpu.memory_space<vmem>>, %arg30: memref<122x32xf32, #tpu.memory_space<vmem>>, %arg31: memref<50x64xf32, #tpu.memory_space<vmem>>, %arg32: memref<26x128xf32, #tpu.memory_space<vmem>>) attributes {dimension_semantics = [#tpu.dimension_semantics<parallel>], iteration_bounds = array<i64: 2>, scalar_prefetch = 0 : i64, scratch_operands = 3 : i64, tpu.core_type = #tpu.core_type<tc>, window_params = [{transform_indices = @transform_0, window_bounds = array<i64: 1, 362, 4>}, {pipeline_mode = #tpu.pipeline_mode<synchronous>, transform_indices = @transform_1, window_bounds = array<i64: 36, 32>}, {pipeline_mode = #tpu.pipeline_mode<synchronous>, transform_indices = @transform_2, window_bounds = array<i64: 1, 32>}, {pipeline_mode = #tpu.pipeline_mode<synchronous>, transform_indices = @transform_3, window_bounds = array<i64: 122, 324>}, {pipeline_mode = #tpu.pipeline_mode<synchronous>, transform_indices = @transform_4, window_bounds = array<i64: 288, 64>}, {pipeline_mode = #tpu.pipeline_mode<synchronous>, transform_indices = @transform_5, window_bounds = array<i64: 1, 64>}, {pipeline_mode = #tpu.pipeline_mode<synchronous>, transform_indices = @transform_6, window_bounds = array<i64: 50, 100>}, {pipeline_mode = #tpu.pipeline_mode<synchronous>, transform_indices = @transform_7, window_bounds = array<i64: 576, 128>}, {pipeline_mode = #tpu.pipeline_mode<synchronous>, transform_indices = @transform_8, window_bounds = array<i64: 1, 128>}, {pipeline_mode = #tpu.pipeline_mode<synchronous>, transform_indices = @transform_9, window_bounds = array<i64: 26, 36>}, {pipeline_mode = #tpu.pipeline_mode<synchronous>, transform_indices = @transform_10, window_bounds = array<i64: 1152, 384>}, {pipeline_mode = #tpu.pipeline_mode<synchronous>, transform_indices = @transform_11, window_bounds = array<i64: 1, 384>}, {pipeline_mode = #tpu.pipeline_mode<synchronous>, transform_indices = @transform_12, window_bounds = array<i64: 1, 16>}, {pipeline_mode = #tpu.pipeline_mode<synchronous>, transform_indices = @transform_13, window_bounds = array<i64: 128, 256>}, {pipeline_mode = #tpu.pipeline_mode<synchronous>, transform_indices = @transform_14, window_bounds = array<i64: 1, 256>}, {pipeline_mode = #tpu.pipeline_mode<synchronous>, transform_indices = @transform_15, window_bounds = array<i64: 256, 3>}, {pipeline_mode = #tpu.pipeline_mode<synchronous>, transform_indices = @transform_16, window_bounds = array<i64: 1, 3>}, {pipeline_mode = #tpu.pipeline_mode<synchronous>, transform_indices = @transform_17, window_bounds = array<i64: 128, 256>}, {pipeline_mode = #tpu.pipeline_mode<synchronous>, transform_indices = @transform_18, window_bounds = array<i64: 1, 256>}, {pipeline_mode = #tpu.pipeline_mode<synchronous>, transform_indices = @transform_19, window_bounds = array<i64: 256, 1>}, {pipeline_mode = #tpu.pipeline_mode<synchronous>, transform_indices = @transform_20, window_bounds = array<i64: 1, 1>}, {pipeline_mode = #tpu.pipeline_mode<synchronous>, transform_indices = @transform_21, window_bounds = array<i64: 128, 256>}, {pipeline_mode = #tpu.pipeline_mode<synchronous>, transform_indices = @transform_22, window_bounds = array<i64: 1, 256>}, {pipeline_mode = #tpu.pipeline_mode<synchronous>, transform_indices = @transform_23, window_bounds = array<i64: 1, 256>}, {pipeline_mode = #tpu.pipeline_mode<synchronous>, transform_indices = @transform_24, window_bounds = array<i64: 256, 2>}, {pipeline_mode = #tpu.pipeline_mode<synchronous>, transform_indices = @transform_25, window_bounds = array<i64: 1, 2>}, {transform_indices = @transform_26, window_bounds = array<i64: 1, 1, 3>}, {transform_indices = @transform_27, window_bounds = array<i64: 1, 1, 2>}, {transform_indices = @transform_28, window_bounds = array<i64: 1, 1, 1>}]} {
    %c0 = arith.constant 0 : index
    %c0_0 = arith.constant 0 : index
    %c0_1 = arith.constant 0 : index
    %0 = vector.load %arg1[%c0, %c0_0, %c0_1] : memref<1x362x4xf32, #tpu.memory_space<vmem>>, vector<1x324x4xf32>
    %1 = vector.shape_cast %0 : vector<1x324x4xf32> to vector<324x4xf32>
    %2 = arith.truncf %1 : vector<324x4xf32> to vector<324x4xbf16>
    %c0_2 = arith.constant 0 : index
    %c0_3 = arith.constant 0 : index
    %3 = vector.load %arg2[%c0_2, %c0_3] : memref<36x32xf32, #tpu.memory_space<vmem>>, vector<4x32xf32>
    %4 = arith.truncf %3 : vector<4x32xf32> to vector<4x32xbf16>
    %cst = arith.constant dense<0.000000e+00> : vector<324x32xf32>
    %5 = tpu.matmul %2, %4, %cst {dimension_numbers = #tpu.dot_dimension_numbers<[1], [0], [0], [1], [0, 0, 1, 1], [], []>} : vector<324x4xbf16>, vector<4x32xbf16>, vector<324x32xf32> -> vector<324x32xf32>
    %c0_4 = arith.constant 0 : index
    %c1 = arith.constant 1 : index
    %c0_5 = arith.constant 0 : index
    %6 = vector.load %arg1[%c0_4, %c1, %c0_5] : memref<1x362x4xf32, #tpu.memory_space<vmem>>, vector<1x324x4xf32>
    %7 = vector.shape_cast %6 : vector<1x324x4xf32> to vector<324x4xf32>
    %8 = arith.truncf %7 : vector<324x4xf32> to vector<324x4xbf16>
    %c4 = arith.constant 4 : index
    %c0_6 = arith.constant 0 : index
    %9 = vector.load %arg2[%c4, %c0_6] : memref<36x32xf32, #tpu.memory_space<vmem>>, vector<4x32xf32>
    %10 = arith.truncf %9 : vector<4x32xf32> to vector<4x32xbf16>
    %cst_7 = arith.constant dense<0.000000e+00> : vector<324x32xf32>
    %11 = tpu.matmul %8, %10, %cst_7 {dimension_numbers = #tpu.dot_dimension_numbers<[1], [0], [0], [1], [0, 0, 1, 1], [], []>} : vector<324x4xbf16>, vector<4x32xbf16>, vector<324x32xf32> -> vector<324x32xf32>
    %12 = arith.addf %5, %11 : vector<324x32xf32>
    %c0_8 = arith.constant 0 : index
    %c2 = arith.constant 2 : index
    %c0_9 = arith.constant 0 : index
    %13 = vector.load %arg1[%c0_8, %c2, %c0_9] : memref<1x362x4xf32, #tpu.memory_space<vmem>>, vector<1x324x4xf32>
    %14 = vector.shape_cast %13 : vector<1x324x4xf32> to vector<324x4xf32>
    %15 = arith.truncf %14 : vector<324x4xf32> to vector<324x4xbf16>
    %c8 = arith.constant 8 : index
    %c0_10 = arith.constant 0 : index
    %16 = vector.load %arg2[%c8, %c0_10] : memref<36x32xf32, #tpu.memory_space<vmem>>, vector<4x32xf32>
    %17 = arith.truncf %16 : vector<4x32xf32> to vector<4x32xbf16>
    %cst_11 = arith.constant dense<0.000000e+00> : vector<324x32xf32>
    %18 = tpu.matmul %15, %17, %cst_11 {dimension_numbers = #tpu.dot_dimension_numbers<[1], [0], [0], [1], [0, 0, 1, 1], [], []>} : vector<324x4xbf16>, vector<4x32xbf16>, vector<324x32xf32> -> vector<324x32xf32>
    %19 = arith.addf %12, %18 : vector<324x32xf32>
    %c0_12 = arith.constant 0 : index
    %c18 = arith.constant 18 : index
    %c0_13 = arith.constant 0 : index
    %20 = vector.load %arg1[%c0_12, %c18, %c0_13] : memref<1x362x4xf32, #tpu.memory_space<vmem>>, vector<1x324x4xf32>
    %21 = vector.shape_cast %20 : vector<1x324x4xf32> to vector<324x4xf32>
    %22 = arith.truncf %21 : vector<324x4xf32> to vector<324x4xbf16>
    %c12 = arith.constant 12 : index
    %c0_14 = arith.constant 0 : index
    %23 = vector.load %arg2[%c12, %c0_14] : memref<36x32xf32, #tpu.memory_space<vmem>>, vector<4x32xf32>
    %24 = arith.truncf %23 : vector<4x32xf32> to vector<4x32xbf16>
    %cst_15 = arith.constant dense<0.000000e+00> : vector<324x32xf32>
    %25 = tpu.matmul %22, %24, %cst_15 {dimension_numbers = #tpu.dot_dimension_numbers<[1], [0], [0], [1], [0, 0, 1, 1], [], []>} : vector<324x4xbf16>, vector<4x32xbf16>, vector<324x32xf32> -> vector<324x32xf32>
    %26 = arith.addf %19, %25 : vector<324x32xf32>
    %c0_16 = arith.constant 0 : index
    %c19 = arith.constant 19 : index
    %c0_17 = arith.constant 0 : index
    %27 = vector.load %arg1[%c0_16, %c19, %c0_17] : memref<1x362x4xf32, #tpu.memory_space<vmem>>, vector<1x324x4xf32>
    %28 = vector.shape_cast %27 : vector<1x324x4xf32> to vector<324x4xf32>
    %29 = arith.truncf %28 : vector<324x4xf32> to vector<324x4xbf16>
    %c16 = arith.constant 16 : index
    %c0_18 = arith.constant 0 : index
    %30 = vector.load %arg2[%c16, %c0_18] : memref<36x32xf32, #tpu.memory_space<vmem>>, vector<4x32xf32>
    %31 = arith.truncf %30 : vector<4x32xf32> to vector<4x32xbf16>
    %cst_19 = arith.constant dense<0.000000e+00> : vector<324x32xf32>
    %32 = tpu.matmul %29, %31, %cst_19 {dimension_numbers = #tpu.dot_dimension_numbers<[1], [0], [0], [1], [0, 0, 1, 1], [], []>} : vector<324x4xbf16>, vector<4x32xbf16>, vector<324x32xf32> -> vector<324x32xf32>
    %33 = arith.addf %26, %32 : vector<324x32xf32>
    %c0_20 = arith.constant 0 : index
    %c20 = arith.constant 20 : index
    %c0_21 = arith.constant 0 : index
    %34 = vector.load %arg1[%c0_20, %c20, %c0_21] : memref<1x362x4xf32, #tpu.memory_space<vmem>>, vector<1x324x4xf32>
    %35 = vector.shape_cast %34 : vector<1x324x4xf32> to vector<324x4xf32>
    %36 = arith.truncf %35 : vector<324x4xf32> to vector<324x4xbf16>
    %c20_22 = arith.constant 20 : index
    %c0_23 = arith.constant 0 : index
    %37 = vector.load %arg2[%c20_22, %c0_23] : memref<36x32xf32, #tpu.memory_space<vmem>>, vector<4x32xf32>
    %38 = arith.truncf %37 : vector<4x32xf32> to vector<4x32xbf16>
    %cst_24 = arith.constant dense<0.000000e+00> : vector<324x32xf32>
    %39 = tpu.matmul %36, %38, %cst_24 {dimension_numbers = #tpu.dot_dimension_numbers<[1], [0], [0], [1], [0, 0, 1, 1], [], []>} : vector<324x4xbf16>, vector<4x32xbf16>, vector<324x32xf32> -> vector<324x32xf32>
    %40 = arith.addf %33, %39 : vector<324x32xf32>
    %c0_25 = arith.constant 0 : index
    %c36 = arith.constant 36 : index
    %c0_26 = arith.constant 0 : index
    %41 = vector.load %arg1[%c0_25, %c36, %c0_26] : memref<1x362x4xf32, #tpu.memory_space<vmem>>, vector<1x324x4xf32>
    %42 = vector.shape_cast %41 : vector<1x324x4xf32> to vector<324x4xf32>
    %43 = arith.truncf %42 : vector<324x4xf32> to vector<324x4xbf16>
    %c24 = arith.constant 24 : index
    %c0_27 = arith.constant 0 : index
    %44 = vector.load %arg2[%c24, %c0_27] : memref<36x32xf32, #tpu.memory_space<vmem>>, vector<4x32xf32>
    %45 = arith.truncf %44 : vector<4x32xf32> to vector<4x32xbf16>
    %cst_28 = arith.constant dense<0.000000e+00> : vector<324x32xf32>
    %46 = tpu.matmul %43, %45, %cst_28 {dimension_numbers = #tpu.dot_dimension_numbers<[1], [0], [0], [1], [0, 0, 1, 1], [], []>} : vector<324x4xbf16>, vector<4x32xbf16>, vector<324x32xf32> -> vector<324x32xf32>
    %47 = arith.addf %40, %46 : vector<324x32xf32>
    %c0_29 = arith.constant 0 : index
    %c37 = arith.constant 37 : index
    %c0_30 = arith.constant 0 : index
    %48 = vector.load %arg1[%c0_29, %c37, %c0_30] : memref<1x362x4xf32, #tpu.memory_space<vmem>>, vector<1x324x4xf32>
    %49 = vector.shape_cast %48 : vector<1x324x4xf32> to vector<324x4xf32>
    %50 = arith.truncf %49 : vector<324x4xf32> to vector<324x4xbf16>
    %c28 = arith.constant 28 : index
    %c0_31 = arith.constant 0 : index
    %51 = vector.load %arg2[%c28, %c0_31] : memref<36x32xf32, #tpu.memory_space<vmem>>, vector<4x32xf32>
    %52 = arith.truncf %51 : vector<4x32xf32> to vector<4x32xbf16>
    %cst_32 = arith.constant dense<0.000000e+00> : vector<324x32xf32>
    %53 = tpu.matmul %50, %52, %cst_32 {dimension_numbers = #tpu.dot_dimension_numbers<[1], [0], [0], [1], [0, 0, 1, 1], [], []>} : vector<324x4xbf16>, vector<4x32xbf16>, vector<324x32xf32> -> vector<324x32xf32>
    %54 = arith.addf %47, %53 : vector<324x32xf32>
    %c0_33 = arith.constant 0 : index
    %c38 = arith.constant 38 : index
    %c0_34 = arith.constant 0 : index
    %55 = vector.load %arg1[%c0_33, %c38, %c0_34] : memref<1x362x4xf32, #tpu.memory_space<vmem>>, vector<1x324x4xf32>
    %56 = vector.shape_cast %55 : vector<1x324x4xf32> to vector<324x4xf32>
    %57 = arith.truncf %56 : vector<324x4xf32> to vector<324x4xbf16>
    %c32 = arith.constant 32 : index
    %c0_35 = arith.constant 0 : index
    %58 = vector.load %arg2[%c32, %c0_35] : memref<36x32xf32, #tpu.memory_space<vmem>>, vector<4x32xf32>
    %59 = arith.truncf %58 : vector<4x32xf32> to vector<4x32xbf16>
    %cst_36 = arith.constant dense<0.000000e+00> : vector<324x32xf32>
    %60 = tpu.matmul %57, %59, %cst_36 {dimension_numbers = #tpu.dot_dimension_numbers<[1], [0], [0], [1], [0, 0, 1, 1], [], []>} : vector<324x4xbf16>, vector<4x32xbf16>, vector<324x32xf32> -> vector<324x32xf32>
    %61 = arith.addf %54, %60 : vector<324x32xf32>
    %c0_37 = arith.constant 0 : index
    %c0_38 = arith.constant 0 : index
    %62 = vector.load %arg3[%c0_37, %c0_38] : memref<1x32xf32, #tpu.memory_space<vmem>>, vector<1x32xf32>
    %63 = vector.broadcast %62 : vector<1x32xf32> to vector<324x32xf32>
    %64 = arith.addf %61, %63 : vector<324x32xf32>
    %cst_39 = arith.constant 0.000000e+00 : f32
    %65 = vector.broadcast %cst_39 : f32 to vector<324x32xf32>
    %66 = arith.maximumf %64, %65 : vector<324x32xf32>
    %c0_40 = arith.constant 0 : index
    %c0_41 = arith.constant 0 : index
    %67 = vector.load %arg4[%c0_40, %c0_41] : memref<122x324xbf16, #tpu.memory_space<vmem>>, vector<122x324xbf16>
    %68 = arith.truncf %66 : vector<324x32xf32> to vector<324x32xbf16>
    %cst_42 = arith.constant dense<0.000000e+00> : vector<122x32xf32>
    %69 = tpu.matmul %67, %68, %cst_42 {dimension_numbers = #tpu.dot_dimension_numbers<[1], [0], [0], [1], [0, 0, 1, 1], [], []>} : vector<122x324xbf16>, vector<324x32xbf16>, vector<122x32xf32> -> vector<122x32xf32>
    %c0_43 = arith.constant 0 : index
    %c0_44 = arith.constant 0 : index
    %70 = vector.load %arg30[%c0_43, %c0_44] : memref<122x32xf32, #tpu.memory_space<vmem>>, vector<122x32xf32>
    tpu.vector_store %arg30[%c0_43, %c0_44], %69 {strides = array<i32>} : memref<122x32xf32, #tpu.memory_space<vmem>>, vector<122x32xf32>,
    %c0_45 = arith.constant 0 : index
    %c0_46 = arith.constant 0 : index
    %71 = vector.load %arg30[%c0_45, %c0_46] : memref<122x32xf32, #tpu.memory_space<vmem>>, vector<100x32xf32>
    %72 = arith.truncf %71 : vector<100x32xf32> to vector<100x32xbf16>
    %c0_47 = arith.constant 0 : index
    %c0_48 = arith.constant 0 : index
    %73 = vector.load %arg5[%c0_47, %c0_48] : memref<288x64xbf16, #tpu.memory_space<vmem>>, vector<32x64xbf16>
    %cst_49 = arith.constant dense<0.000000e+00> : vector<100x64xf32>
    %74 = tpu.matmul %72, %73, %cst_49 {dimension_numbers = #tpu.dot_dimension_numbers<[1], [0], [0], [1], [0, 0, 1, 1], [], []>} : vector<100x32xbf16>, vector<32x64xbf16>, vector<100x64xf32> -> vector<100x64xf32>
    %c1_50 = arith.constant 1 : index
    %c0_51 = arith.constant 0 : index
    %75 = vector.load %arg30[%c1_50, %c0_51] : memref<122x32xf32, #tpu.memory_space<vmem>>, vector<100x32xf32>
    %76 = arith.truncf %75 : vector<100x32xf32> to vector<100x32xbf16>
    %c32_52 = arith.constant 32 : index
    %c0_53 = arith.constant 0 : index
    %77 = vector.load %arg5[%c32_52, %c0_53] : memref<288x64xbf16, #tpu.memory_space<vmem>>, vector<32x64xbf16>
    %cst_54 = arith.constant dense<0.000000e+00> : vector<100x64xf32>
    %78 = tpu.matmul %76, %77, %cst_54 {dimension_numbers = #tpu.dot_dimension_numbers<[1], [0], [0], [1], [0, 0, 1, 1], [], []>} : vector<100x32xbf16>, vector<32x64xbf16>, vector<100x64xf32> -> vector<100x64xf32>
    %79 = arith.addf %74, %78 : vector<100x64xf32>
    %c2_55 = arith.constant 2 : index
    %c0_56 = arith.constant 0 : index
    %80 = vector.load %arg30[%c2_55, %c0_56] : memref<122x32xf32, #tpu.memory_space<vmem>>, vector<100x32xf32>
    %81 = arith.truncf %80 : vector<100x32xf32> to vector<100x32xbf16>
    %c64 = arith.constant 64 : index
    %c0_57 = arith.constant 0 : index
    %82 = vector.load %arg5[%c64, %c0_57] : memref<288x64xbf16, #tpu.memory_space<vmem>>, vector<32x64xbf16>
    %cst_58 = arith.constant dense<0.000000e+00> : vector<100x64xf32>
    %83 = tpu.matmul %81, %82, %cst_58 {dimension_numbers = #tpu.dot_dimension_numbers<[1], [0], [0], [1], [0, 0, 1, 1], [], []>} : vector<100x32xbf16>, vector<32x64xbf16>, vector<100x64xf32> -> vector<100x64xf32>
    %84 = arith.addf %79, %83 : vector<100x64xf32>
    %c10 = arith.constant 10 : index
    %c0_59 = arith.constant 0 : index
    %85 = vector.load %arg30[%c10, %c0_59] : memref<122x32xf32, #tpu.memory_space<vmem>>, vector<100x32xf32>
    %86 = arith.truncf %85 : vector<100x32xf32> to vector<100x32xbf16>
    %c96 = arith.constant 96 : index
    %c0_60 = arith.constant 0 : index
    %87 = vector.load %arg5[%c96, %c0_60] : memref<288x64xbf16, #tpu.memory_space<vmem>>, vector<32x64xbf16>
    %cst_61 = arith.constant dense<0.000000e+00> : vector<100x64xf32>
    %88 = tpu.matmul %86, %87, %cst_61 {dimension_numbers = #tpu.dot_dimension_numbers<[1], [0], [0], [1], [0, 0, 1, 1], [], []>} : vector<100x32xbf16>, vector<32x64xbf16>, vector<100x64xf32> -> vector<100x64xf32>
    %89 = arith.addf %84, %88 : vector<100x64xf32>
    %c11 = arith.constant 11 : index
    %c0_62 = arith.constant 0 : index
    %90 = vector.load %arg30[%c11, %c0_62] : memref<122x32xf32, #tpu.memory_space<vmem>>, vector<100x32xf32>
    %91 = arith.truncf %90 : vector<100x32xf32> to vector<100x32xbf16>
    %c128 = arith.constant 128 : index
    %c0_63 = arith.constant 0 : index
    %92 = vector.load %arg5[%c128, %c0_63] : memref<288x64xbf16, #tpu.memory_space<vmem>>, vector<32x64xbf16>
    %cst_64 = arith.constant dense<0.000000e+00> : vector<100x64xf32>
    %93 = tpu.matmul %91, %92, %cst_64 {dimension_numbers = #tpu.dot_dimension_numbers<[1], [0], [0], [1], [0, 0, 1, 1], [], []>} : vector<100x32xbf16>, vector<32x64xbf16>, vector<100x64xf32> -> vector<100x64xf32>
    %94 = arith.addf %89, %93 : vector<100x64xf32>
    %c12_65 = arith.constant 12 : index
    %c0_66 = arith.constant 0 : index
    %95 = vector.load %arg30[%c12_65, %c0_66] : memref<122x32xf32, #tpu.memory_space<vmem>>, vector<100x32xf32>
    %96 = arith.truncf %95 : vector<100x32xf32> to vector<100x32xbf16>
    %c160 = arith.constant 160 : index
    %c0_67 = arith.constant 0 : index
    %97 = vector.load %arg5[%c160, %c0_67] : memref<288x64xbf16, #tpu.memory_space<vmem>>, vector<32x64xbf16>
    %cst_68 = arith.constant dense<0.000000e+00> : vector<100x64xf32>
    %98 = tpu.matmul %96, %97, %cst_68 {dimension_numbers = #tpu.dot_dimension_numbers<[1], [0], [0], [1], [0, 0, 1, 1], [], []>} : vector<100x32xbf16>, vector<32x64xbf16>, vector<100x64xf32> -> vector<100x64xf32>
    %99 = arith.addf %94, %98 : vector<100x64xf32>
    %c20_69 = arith.constant 20 : index
    %c0_70 = arith.constant 0 : index
    %100 = vector.load %arg30[%c20_69, %c0_70] : memref<122x32xf32, #tpu.memory_space<vmem>>, vector<100x32xf32>
    %101 = arith.truncf %100 : vector<100x32xf32> to vector<100x32xbf16>
    %c192 = arith.constant 192 : index
    %c0_71 = arith.constant 0 : index
    %102 = vector.load %arg5[%c192, %c0_71] : memref<288x64xbf16, #tpu.memory_space<vmem>>, vector<32x64xbf16>
    %cst_72 = arith.constant dense<0.000000e+00> : vector<100x64xf32>
    %103 = tpu.matmul %101, %102, %cst_72 {dimension_numbers = #tpu.dot_dimension_numbers<[1], [0], [0], [1], [0, 0, 1, 1], [], []>} : vector<100x32xbf16>, vector<32x64xbf16>, vector<100x64xf32> -> vector<100x64xf32>
    %104 = arith.addf %99, %103 : vector<100x64xf32>
    %c21 = arith.constant 21 : index
    %c0_73 = arith.constant 0 : index
    %105 = vector.load %arg30[%c21, %c0_73] : memref<122x32xf32, #tpu.memory_space<vmem>>, vector<100x32xf32>
    %106 = arith.truncf %105 : vector<100x32xf32> to vector<100x32xbf16>
    %c224 = arith.constant 224 : index
    %c0_74 = arith.constant 0 : index
    %107 = vector.load %arg5[%c224, %c0_74] : memref<288x64xbf16, #tpu.memory_space<vmem>>, vector<32x64xbf16>
    %cst_75 = arith.constant dense<0.000000e+00> : vector<100x64xf32>
    %108 = tpu.matmul %106, %107, %cst_75 {dimension_numbers = #tpu.dot_dimension_numbers<[1], [0], [0], [1], [0, 0, 1, 1], [], []>} : vector<100x32xbf16>, vector<32x64xbf16>, vector<100x64xf32> -> vector<100x64xf32>
    %109 = arith.addf %104, %108 : vector<100x64xf32>
    %c22 = arith.constant 22 : index
    %c0_76 = arith.constant 0 : index
    %110 = vector.load %arg30[%c22, %c0_76] : memref<122x32xf32, #tpu.memory_space<vmem>>, vector<100x32xf32>
    %111 = arith.truncf %110 : vector<100x32xf32> to vector<100x32xbf16>
    %c256 = arith.constant 256 : index
    %c0_77 = arith.constant 0 : index
    %112 = vector.load %arg5[%c256, %c0_77] : memref<288x64xbf16, #tpu.memory_space<vmem>>, vector<32x64xbf16>
    %cst_78 = arith.constant dense<0.000000e+00> : vector<100x64xf32>
    %113 = tpu.matmul %111, %112, %cst_78 {dimension_numbers = #tpu.dot_dimension_numbers<[1], [0], [0], [1], [0, 0, 1, 1], [], []>} : vector<100x32xbf16>, vector<32x64xbf16>, vector<100x64xf32> -> vector<100x64xf32>
    %114 = arith.addf %109, %113 : vector<100x64xf32>
    %c0_79 = arith.constant 0 : index
    %c0_80 = arith.constant 0 : index
    %115 = vector.load %arg6[%c0_79, %c0_80] : memref<1x64xf32, #tpu.memory_space<vmem>>, vector<1x64xf32>
    %116 = vector.broadcast %115 : vector<1x64xf32> to vector<100x64xf32>
    %117 = arith.addf %114, %116 : vector<100x64xf32>
    %cst_81 = arith.constant 0.000000e+00 : f32
    %118 = vector.broadcast %cst_81 : f32 to vector<100x64xf32>
    %119 = arith.maximumf %117, %118 : vector<100x64xf32>
    %c0_82 = arith.constant 0 : index
    %c0_83 = arith.constant 0 : index
    %120 = vector.load %arg7[%c0_82, %c0_83] : memref<50x100xbf16, #tpu.memory_space<vmem>>, vector<50x100xbf16>
    %121 = arith.truncf %119 : vector<100x64xf32> to vector<100x64xbf16>
    %cst_84 = arith.constant dense<0.000000e+00> : vector<50x64xf32>
    %122 = tpu.matmul %120, %121, %cst_84 {dimension_numbers = #tpu.dot_dimension_numbers<[1], [0], [0], [1], [0, 0, 1, 1], [], []>} : vector<50x100xbf16>, vector<100x64xbf16>, vector<50x64xf32> -> vector<50x64xf32>
    %c0_85 = arith.constant 0 : index
    %c0_86 = arith.constant 0 : index
    %123 = vector.load %arg31[%c0_85, %c0_86] : memref<50x64xf32, #tpu.memory_space<vmem>>, vector<50x64xf32>
    tpu.vector_store %arg31[%c0_85, %c0_86], %122 {strides = array<i32>} : memref<50x64xf32, #tpu.memory_space<vmem>>, vector<50x64xf32>,
    %c0_87 = arith.constant 0 : index
    %c0_88 = arith.constant 0 : index
    %124 = vector.load %arg31[%c0_87, %c0_88] : memref<50x64xf32, #tpu.memory_space<vmem>>, vector<36x64xf32>
    %125 = arith.truncf %124 : vector<36x64xf32> to vector<36x64xbf16>
    %c0_89 = arith.constant 0 : index
    %c0_90 = arith.constant 0 : index
    %126 = vector.load %arg8[%c0_89, %c0_90] : memref<576x128xbf16, #tpu.memory_space<vmem>>, vector<64x128xbf16>
    %cst_91 = arith.constant dense<0.000000e+00> : vector<36x128xf32>
    %127 = tpu.matmul %125, %126, %cst_91 {dimension_numbers = #tpu.dot_dimension_numbers<[1], [0], [0], [1], [0, 0, 1, 1], [], []>} : vector<36x64xbf16>, vector<64x128xbf16>, vector<36x128xf32> -> vector<36x128xf32>
    %c1_92 = arith.constant 1 : index
    %c0_93 = arith.constant 0 : index
    %128 = vector.load %arg31[%c1_92, %c0_93] : memref<50x64xf32, #tpu.memory_space<vmem>>, vector<36x64xf32>
    %129 = arith.truncf %128 : vector<36x64xf32> to vector<36x64xbf16>
    %c64_94 = arith.constant 64 : index
    %c0_95 = arith.constant 0 : index
    %130 = vector.load %arg8[%c64_94, %c0_95] : memref<576x128xbf16, #tpu.memory_space<vmem>>, vector<64x128xbf16>
    %cst_96 = arith.constant dense<0.000000e+00> : vector<36x128xf32>
    %131 = tpu.matmul %129, %130, %cst_96 {dimension_numbers = #tpu.dot_dimension_numbers<[1], [0], [0], [1], [0, 0, 1, 1], [], []>} : vector<36x64xbf16>, vector<64x128xbf16>, vector<36x128xf32> -> vector<36x128xf32>
    %132 = arith.addf %127, %131 : vector<36x128xf32>
    %c2_97 = arith.constant 2 : index
    %c0_98 = arith.constant 0 : index
    %133 = vector.load %arg31[%c2_97, %c0_98] : memref<50x64xf32, #tpu.memory_space<vmem>>, vector<36x64xf32>
    %134 = arith.truncf %133 : vector<36x64xf32> to vector<36x64xbf16>
    %c128_99 = arith.constant 128 : index
    %c0_100 = arith.constant 0 : index
    %135 = vector.load %arg8[%c128_99, %c0_100] : memref<576x128xbf16, #tpu.memory_space<vmem>>, vector<64x128xbf16>
    %cst_101 = arith.constant dense<0.000000e+00> : vector<36x128xf32>
    %136 = tpu.matmul %134, %135, %cst_101 {dimension_numbers = #tpu.dot_dimension_numbers<[1], [0], [0], [1], [0, 0, 1, 1], [], []>} : vector<36x64xbf16>, vector<64x128xbf16>, vector<36x128xf32> -> vector<36x128xf32>
    %137 = arith.addf %132, %136 : vector<36x128xf32>
    %c6 = arith.constant 6 : index
    %c0_102 = arith.constant 0 : index
    %138 = vector.load %arg31[%c6, %c0_102] : memref<50x64xf32, #tpu.memory_space<vmem>>, vector<36x64xf32>
    %139 = arith.truncf %138 : vector<36x64xf32> to vector<36x64xbf16>
    %c192_103 = arith.constant 192 : index
    %c0_104 = arith.constant 0 : index
    %140 = vector.load %arg8[%c192_103, %c0_104] : memref<576x128xbf16, #tpu.memory_space<vmem>>, vector<64x128xbf16>
    %cst_105 = arith.constant dense<0.000000e+00> : vector<36x128xf32>
    %141 = tpu.matmul %139, %140, %cst_105 {dimension_numbers = #tpu.dot_dimension_numbers<[1], [0], [0], [1], [0, 0, 1, 1], [], []>} : vector<36x64xbf16>, vector<64x128xbf16>, vector<36x128xf32> -> vector<36x128xf32>
    %142 = arith.addf %137, %141 : vector<36x128xf32>
    %c7 = arith.constant 7 : index
    %c0_106 = arith.constant 0 : index
    %143 = vector.load %arg31[%c7, %c0_106] : memref<50x64xf32, #tpu.memory_space<vmem>>, vector<36x64xf32>
    %144 = arith.truncf %143 : vector<36x64xf32> to vector<36x64xbf16>
    %c256_107 = arith.constant 256 : index
    %c0_108 = arith.constant 0 : index
    %145 = vector.load %arg8[%c256_107, %c0_108] : memref<576x128xbf16, #tpu.memory_space<vmem>>, vector<64x128xbf16>
    %cst_109 = arith.constant dense<0.000000e+00> : vector<36x128xf32>
    %146 = tpu.matmul %144, %145, %cst_109 {dimension_numbers = #tpu.dot_dimension_numbers<[1], [0], [0], [1], [0, 0, 1, 1], [], []>} : vector<36x64xbf16>, vector<64x128xbf16>, vector<36x128xf32> -> vector<36x128xf32>
    %147 = arith.addf %142, %146 : vector<36x128xf32>
    %c8_110 = arith.constant 8 : index
    %c0_111 = arith.constant 0 : index
    %148 = vector.load %arg31[%c8_110, %c0_111] : memref<50x64xf32, #tpu.memory_space<vmem>>, vector<36x64xf32>
    %149 = arith.truncf %148 : vector<36x64xf32> to vector<36x64xbf16>
    %c320 = arith.constant 320 : index
    %c0_112 = arith.constant 0 : index
    %150 = vector.load %arg8[%c320, %c0_112] : memref<576x128xbf16, #tpu.memory_space<vmem>>, vector<64x128xbf16>
    %cst_113 = arith.constant dense<0.000000e+00> : vector<36x128xf32>
    %151 = tpu.matmul %149, %150, %cst_113 {dimension_numbers = #tpu.dot_dimension_numbers<[1], [0], [0], [1], [0, 0, 1, 1], [], []>} : vector<36x64xbf16>, vector<64x128xbf16>, vector<36x128xf32> -> vector<36x128xf32>
    %152 = arith.addf %147, %151 : vector<36x128xf32>
    %c12_114 = arith.constant 12 : index
    %c0_115 = arith.constant 0 : index
    %153 = vector.load %arg31[%c12_114, %c0_115] : memref<50x64xf32, #tpu.memory_space<vmem>>, vector<36x64xf32>
    %154 = arith.truncf %153 : vector<36x64xf32> to vector<36x64xbf16>
    %c384 = arith.constant 384 : index
    %c0_116 = arith.constant 0 : index
    %155 = vector.load %arg8[%c384, %c0_116] : memref<576x128xbf16, #tpu.memory_space<vmem>>, vector<64x128xbf16>
    %cst_117 = arith.constant dense<0.000000e+00> : vector<36x128xf32>
    %156 = tpu.matmul %154, %155, %cst_117 {dimension_numbers = #tpu.dot_dimension_numbers<[1], [0], [0], [1], [0, 0, 1, 1], [], []>} : vector<36x64xbf16>, vector<64x128xbf16>, vector<36x128xf32> -> vector<36x128xf32>
    %157 = arith.addf %152, %156 : vector<36x128xf32>
    %c13 = arith.constant 13 : index
    %c0_118 = arith.constant 0 : index
    %158 = vector.load %arg31[%c13, %c0_118] : memref<50x64xf32, #tpu.memory_space<vmem>>, vector<36x64xf32>
    %159 = arith.truncf %158 : vector<36x64xf32> to vector<36x64xbf16>
    %c448 = arith.constant 448 : index
    %c0_119 = arith.constant 0 : index
    %160 = vector.load %arg8[%c448, %c0_119] : memref<576x128xbf16, #tpu.memory_space<vmem>>, vector<64x128xbf16>
    %cst_120 = arith.constant dense<0.000000e+00> : vector<36x128xf32>
    %161 = tpu.matmul %159, %160, %cst_120 {dimension_numbers = #tpu.dot_dimension_numbers<[1], [0], [0], [1], [0, 0, 1, 1], [], []>} : vector<36x64xbf16>, vector<64x128xbf16>, vector<36x128xf32> -> vector<36x128xf32>
    %162 = arith.addf %157, %161 : vector<36x128xf32>
    %c14 = arith.constant 14 : index
    %c0_121 = arith.constant 0 : index
    %163 = vector.load %arg31[%c14, %c0_121] : memref<50x64xf32, #tpu.memory_space<vmem>>, vector<36x64xf32>
    %164 = arith.truncf %163 : vector<36x64xf32> to vector<36x64xbf16>
    %c512 = arith.constant 512 : index
    %c0_122 = arith.constant 0 : index
    %165 = vector.load %arg8[%c512, %c0_122] : memref<576x128xbf16, #tpu.memory_space<vmem>>, vector<64x128xbf16>
    %cst_123 = arith.constant dense<0.000000e+00> : vector<36x128xf32>
    %166 = tpu.matmul %164, %165, %cst_123 {dimension_numbers = #tpu.dot_dimension_numbers<[1], [0], [0], [1], [0, 0, 1, 1], [], []>} : vector<36x64xbf16>, vector<64x128xbf16>, vector<36x128xf32> -> vector<36x128xf32>
    %167 = arith.addf %162, %166 : vector<36x128xf32>
    %c0_124 = arith.constant 0 : index
    %c0_125 = arith.constant 0 : index
    %168 = vector.load %arg9[%c0_124, %c0_125] : memref<1x128xf32, #tpu.memory_space<vmem>>, vector<1x128xf32>
    %169 = vector.broadcast %168 : vector<1x128xf32> to vector<36x128xf32>
    %170 = arith.addf %167, %169 : vector<36x128xf32>
    %cst_126 = arith.constant 0.000000e+00 : f32
    %171 = vector.broadcast %cst_126 : f32 to vector<36x128xf32>
    %172 = arith.maximumf %170, %171 : vector<36x128xf32>
    %c0_127 = arith.constant 0 : index
    %c0_128 = arith.constant 0 : index
    %173 = vector.load %arg10[%c0_127, %c0_128] : memref<26x36xbf16, #tpu.memory_space<vmem>>, vector<26x36xbf16>
    %174 = arith.truncf %172 : vector<36x128xf32> to vector<36x128xbf16>
    %cst_129 = arith.constant dense<0.000000e+00> : vector<26x128xf32>
    %175 = tpu.matmul %173, %174, %cst_129 {dimension_numbers = #tpu.dot_dimension_numbers<[1], [0], [0], [1], [0, 0, 1, 1], [], []>} : vector<26x36xbf16>, vector<36x128xbf16>, vector<26x128xf32> -> vector<26x128xf32>
    %c0_130 = arith.constant 0 : index
    %c0_131 = arith.constant 0 : index
    %176 = vector.load %arg32[%c0_130, %c0_131] : memref<26x128xf32, #tpu.memory_space<vmem>>, vector<26x128xf32>
    tpu.vector_store %arg32[%c0_130, %c0_131], %175 {strides = array<i32>} : memref<26x128xf32, #tpu.memory_space<vmem>>, vector<26x128xf32>,
    %c0_132 = arith.constant 0 : index
    %c0_133 = arith.constant 0 : index
    %177 = vector.load %arg32[%c0_132, %c0_133] : memref<26x128xf32, #tpu.memory_space<vmem>>, vector<16x128xf32>
    %178 = arith.truncf %177 : vector<16x128xf32> to vector<16x128xbf16>
    %c0_134 = arith.constant 0 : index
    %c0_135 = arith.constant 0 : index
    %179 = vector.load %arg11[%c0_134, %c0_135] : memref<1152x384xbf16, #tpu.memory_space<vmem>>, vector<128x384xbf16>
    %cst_136 = arith.constant dense<0.000000e+00> : vector<16x384xf32>
    %180 = tpu.matmul %178, %179, %cst_136 {dimension_numbers = #tpu.dot_dimension_numbers<[1], [0], [0], [1], [0, 0, 1, 1], [], []>} : vector<16x128xbf16>, vector<128x384xbf16>, vector<16x384xf32> -> vector<16x384xf32>
    %c1_137 = arith.constant 1 : index
    %c0_138 = arith.constant 0 : index
    %181 = vector.load %arg32[%c1_137, %c0_138] : memref<26x128xf32, #tpu.memory_space<vmem>>, vector<16x128xf32>
    %182 = arith.truncf %181 : vector<16x128xf32> to vector<16x128xbf16>
    %c128_139 = arith.constant 128 : index
    %c0_140 = arith.constant 0 : index
    %183 = vector.load %arg11[%c128_139, %c0_140] : memref<1152x384xbf16, #tpu.memory_space<vmem>>, vector<128x384xbf16>
    %cst_141 = arith.constant dense<0.000000e+00> : vector<16x384xf32>
    %184 = tpu.matmul %182, %183, %cst_141 {dimension_numbers = #tpu.dot_dimension_numbers<[1], [0], [0], [1], [0, 0, 1, 1], [], []>} : vector<16x128xbf16>, vector<128x384xbf16>, vector<16x384xf32> -> vector<16x384xf32>
    %185 = arith.addf %180, %184 : vector<16x384xf32>
    %c2_142 = arith.constant 2 : index
    %c0_143 = arith.constant 0 : index
    %186 = vector.load %arg32[%c2_142, %c0_143] : memref<26x128xf32, #tpu.memory_space<vmem>>, vector<16x128xf32>
    %187 = arith.truncf %186 : vector<16x128xf32> to vector<16x128xbf16>
    %c256_144 = arith.constant 256 : index
    %c0_145 = arith.constant 0 : index
    %188 = vector.load %arg11[%c256_144, %c0_145] : memref<1152x384xbf16, #tpu.memory_space<vmem>>, vector<128x384xbf16>
    %cst_146 = arith.constant dense<0.000000e+00> : vector<16x384xf32>
    %189 = tpu.matmul %187, %188, %cst_146 {dimension_numbers = #tpu.dot_dimension_numbers<[1], [0], [0], [1], [0, 0, 1, 1], [], []>} : vector<16x128xbf16>, vector<128x384xbf16>, vector<16x384xf32> -> vector<16x384xf32>
    %190 = arith.addf %185, %189 : vector<16x384xf32>
    %c4_147 = arith.constant 4 : index
    %c0_148 = arith.constant 0 : index
    %191 = vector.load %arg32[%c4_147, %c0_148] : memref<26x128xf32, #tpu.memory_space<vmem>>, vector<16x128xf32>
    %192 = arith.truncf %191 : vector<16x128xf32> to vector<16x128xbf16>
    %c384_149 = arith.constant 384 : index
    %c0_150 = arith.constant 0 : index
    %193 = vector.load %arg11[%c384_149, %c0_150] : memref<1152x384xbf16, #tpu.memory_space<vmem>>, vector<128x384xbf16>
    %cst_151 = arith.constant dense<0.000000e+00> : vector<16x384xf32>
    %194 = tpu.matmul %192, %193, %cst_151 {dimension_numbers = #tpu.dot_dimension_numbers<[1], [0], [0], [1], [0, 0, 1, 1], [], []>} : vector<16x128xbf16>, vector<128x384xbf16>, vector<16x384xf32> -> vector<16x384xf32>
    %195 = arith.addf %190, %194 : vector<16x384xf32>
    %c5 = arith.constant 5 : index
    %c0_152 = arith.constant 0 : index
    %196 = vector.load %arg32[%c5, %c0_152] : memref<26x128xf32, #tpu.memory_space<vmem>>, vector<16x128xf32>
    %197 = arith.truncf %196 : vector<16x128xf32> to vector<16x128xbf16>
    %c512_153 = arith.constant 512 : index
    %c0_154 = arith.constant 0 : index
    %198 = vector.load %arg11[%c512_153, %c0_154] : memref<1152x384xbf16, #tpu.memory_space<vmem>>, vector<128x384xbf16>
    %cst_155 = arith.constant dense<0.000000e+00> : vector<16x384xf32>
    %199 = tpu.matmul %197, %198, %cst_155 {dimension_numbers = #tpu.dot_dimension_numbers<[1], [0], [0], [1], [0, 0, 1, 1], [], []>} : vector<16x128xbf16>, vector<128x384xbf16>, vector<16x384xf32> -> vector<16x384xf32>
    %200 = arith.addf %195, %199 : vector<16x384xf32>
    %c6_156 = arith.constant 6 : index
    %c0_157 = arith.constant 0 : index
    %201 = vector.load %arg32[%c6_156, %c0_157] : memref<26x128xf32, #tpu.memory_space<vmem>>, vector<16x128xf32>
    %202 = arith.truncf %201 : vector<16x128xf32> to vector<16x128xbf16>
    %c640 = arith.constant 640 : index
    %c0_158 = arith.constant 0 : index
    %203 = vector.load %arg11[%c640, %c0_158] : memref<1152x384xbf16, #tpu.memory_space<vmem>>, vector<128x384xbf16>
    %cst_159 = arith.constant dense<0.000000e+00> : vector<16x384xf32>
    %204 = tpu.matmul %202, %203, %cst_159 {dimension_numbers = #tpu.dot_dimension_numbers<[1], [0], [0], [1], [0, 0, 1, 1], [], []>} : vector<16x128xbf16>, vector<128x384xbf16>, vector<16x384xf32> -> vector<16x384xf32>
    %205 = arith.addf %200, %204 : vector<16x384xf32>
    %c8_160 = arith.constant 8 : index
    %c0_161 = arith.constant 0 : index
    %206 = vector.load %arg32[%c8_160, %c0_161] : memref<26x128xf32, #tpu.memory_space<vmem>>, vector<16x128xf32>
    %207 = arith.truncf %206 : vector<16x128xf32> to vector<16x128xbf16>
    %c768 = arith.constant 768 : index
    %c0_162 = arith.constant 0 : index
    %208 = vector.load %arg11[%c768, %c0_162] : memref<1152x384xbf16, #tpu.memory_space<vmem>>, vector<128x384xbf16>
    %cst_163 = arith.constant dense<0.000000e+00> : vector<16x384xf32>
    %209 = tpu.matmul %207, %208, %cst_163 {dimension_numbers = #tpu.dot_dimension_numbers<[1], [0], [0], [1], [0, 0, 1, 1], [], []>} : vector<16x128xbf16>, vector<128x384xbf16>, vector<16x384xf32> -> vector<16x384xf32>
    %210 = arith.addf %205, %209 : vector<16x384xf32>
    %c9 = arith.constant 9 : index
    %c0_164 = arith.constant 0 : index
    %211 = vector.load %arg32[%c9, %c0_164] : memref<26x128xf32, #tpu.memory_space<vmem>>, vector<16x128xf32>
    %212 = arith.truncf %211 : vector<16x128xf32> to vector<16x128xbf16>
    %c896 = arith.constant 896 : index
    %c0_165 = arith.constant 0 : index
    %213 = vector.load %arg11[%c896, %c0_165] : memref<1152x384xbf16, #tpu.memory_space<vmem>>, vector<128x384xbf16>
    %cst_166 = arith.constant dense<0.000000e+00> : vector<16x384xf32>
    %214 = tpu.matmul %212, %213, %cst_166 {dimension_numbers = #tpu.dot_dimension_numbers<[1], [0], [0], [1], [0, 0, 1, 1], [], []>} : vector<16x128xbf16>, vector<128x384xbf16>, vector<16x384xf32> -> vector<16x384xf32>
    %215 = arith.addf %210, %214 : vector<16x384xf32>
    %c10_167 = arith.constant 10 : index
    %c0_168 = arith.constant 0 : index
    %216 = vector.load %arg32[%c10_167, %c0_168] : memref<26x128xf32, #tpu.memory_space<vmem>>, vector<16x128xf32>
    %217 = arith.truncf %216 : vector<16x128xf32> to vector<16x128xbf16>
    %c1024 = arith.constant 1024 : index
    %c0_169 = arith.constant 0 : index
    %218 = vector.load %arg11[%c1024, %c0_169] : memref<1152x384xbf16, #tpu.memory_space<vmem>>, vector<128x384xbf16>
    %cst_170 = arith.constant dense<0.000000e+00> : vector<16x384xf32>
    %219 = tpu.matmul %217, %218, %cst_170 {dimension_numbers = #tpu.dot_dimension_numbers<[1], [0], [0], [1], [0, 0, 1, 1], [], []>} : vector<16x128xbf16>, vector<128x384xbf16>, vector<16x384xf32> -> vector<16x384xf32>
    %220 = arith.addf %215, %219 : vector<16x384xf32>
    %c0_171 = arith.constant 0 : index
    %c0_172 = arith.constant 0 : index
    %221 = vector.load %arg12[%c0_171, %c0_172] : memref<1x384xf32, #tpu.memory_space<vmem>>, vector<1x384xf32>
    %222 = vector.broadcast %221 : vector<1x384xf32> to vector<16x384xf32>
    %223 = arith.addf %220, %222 : vector<16x384xf32>
    %cst_173 = arith.constant 0.000000e+00 : f32
    %224 = vector.broadcast %cst_173 : f32 to vector<16x384xf32>
    %225 = arith.maximumf %223, %224 : vector<16x384xf32>
    %c0_174 = arith.constant 0 : index
    %c0_175 = arith.constant 0 : index
    %226 = vector.load %arg13[%c0_174, %c0_175] : memref<1x16xbf16, #tpu.memory_space<vmem>>, vector<1x16xbf16>
    %227 = arith.truncf %225 : vector<16x384xf32> to vector<16x384xbf16>
    %cst_176 = arith.constant dense<0.000000e+00> : vector<1x384xf32>
    %228 = tpu.matmul %226, %227, %cst_176 {dimension_numbers = #tpu.dot_dimension_numbers<[1], [0], [0], [1], [0, 0, 1, 1], [], []>} : vector<1x16xbf16>, vector<16x384xbf16>, vector<1x384xf32> -> vector<1x384xf32>
    %229 = vector.extract_strided_slice %228 {offsets = [0, 0], sizes = [1, 128], strides = [1, 1]} : vector<1x384xf32> to vector<1x128xf32>
    %230 = arith.truncf %229 : vector<1x128xf32> to vector<1x128xbf16>
    %231 = vector.extract_strided_slice %228 {offsets = [0, 128], sizes = [1, 128], strides = [1, 1]} : vector<1x384xf32> to vector<1x128xf32>
    %232 = arith.truncf %231 : vector<1x128xf32> to vector<1x128xbf16>
    %233 = vector.extract_strided_slice %228 {offsets = [0, 256], sizes = [1, 128], strides = [1, 1]} : vector<1x384xf32> to vector<1x128xf32>
    %234 = arith.truncf %233 : vector<1x128xf32> to vector<1x128xbf16>
    %c0_177 = arith.constant 0 : index
    %c0_178 = arith.constant 0 : index
    %235 = vector.load %arg14[%c0_177, %c0_178] : memref<128x256xbf16, #tpu.memory_space<vmem>>, vector<128x256xbf16>
    %cst_179 = arith.constant dense<0.000000e+00> : vector<1x256xf32>
    %236 = tpu.matmul %230, %235, %cst_179 {dimension_numbers = #tpu.dot_dimension_numbers<[1], [0], [0], [1], [0, 0, 1, 1], [], []>} : vector<1x128xbf16>, vector<128x256xbf16>, vector<1x256xf32> -> vector<1x256xf32>
    %c0_180 = arith.constant 0 : index
    %c0_181 = arith.constant 0 : index
    %237 = vector.load %arg15[%c0_180, %c0_181] : memref<1x256xf32, #tpu.memory_space<vmem>>, vector<1x256xf32>
    %238 = arith.addf %236, %237 : vector<1x256xf32>
    %cst_182 = arith.constant 0.000000e+00 : f32
    %239 = vector.broadcast %cst_182 : f32 to vector<1x256xf32>
    %240 = arith.maximumf %238, %239 : vector<1x256xf32>
    %241 = arith.truncf %240 : vector<1x256xf32> to vector<1x256xbf16>
    %c0_183 = arith.constant 0 : index
    %c0_184 = arith.constant 0 : index
    %242 = vector.load %arg16[%c0_183, %c0_184] : memref<256x3xbf16, #tpu.memory_space<vmem>>, vector<256x3xbf16>
    %cst_185 = arith.constant dense<0.000000e+00> : vector<1x3xf32>
    %243 = tpu.matmul %241, %242, %cst_185 {dimension_numbers = #tpu.dot_dimension_numbers<[1], [0], [0], [1], [0, 0, 1, 1], [], []>} : vector<1x256xbf16>, vector<256x3xbf16>, vector<1x3xf32> -> vector<1x3xf32>
    %c0_186 = arith.constant 0 : index
    %c0_187 = arith.constant 0 : index
    %244 = vector.load %arg17[%c0_186, %c0_187] : memref<1x3xf32, #tpu.memory_space<vmem>>, vector<1x3xf32>
    %245 = arith.addf %243, %244 : vector<1x3xf32>
    %246 = arith.negf %245 : vector<1x3xf32>
    %247 = math.exp %246 : vector<1x3xf32>
    %cst_188 = arith.constant 1.000000e+00 : f32
    %248 = vector.broadcast %cst_188 : f32 to vector<1x3xf32>
    %249 = arith.addf %248, %247 : vector<1x3xf32>
    %250 = arith.divf %248, %249 : vector<1x3xf32>
    %c0_189 = arith.constant 0 : index
    %c0_190 = arith.constant 0 : index
    %251 = vector.load %arg18[%c0_189, %c0_190] : memref<128x256xbf16, #tpu.memory_space<vmem>>, vector<128x256xbf16>
    %cst_191 = arith.constant dense<0.000000e+00> : vector<1x256xf32>
    %252 = tpu.matmul %232, %251, %cst_191 {dimension_numbers = #tpu.dot_dimension_numbers<[1], [0], [0], [1], [0, 0, 1, 1], [], []>} : vector<1x128xbf16>, vector<128x256xbf16>, vector<1x256xf32> -> vector<1x256xf32>
    %c0_192 = arith.constant 0 : index
    %c0_193 = arith.constant 0 : index
    %253 = vector.load %arg19[%c0_192, %c0_193] : memref<1x256xf32, #tpu.memory_space<vmem>>, vector<1x256xf32>
    %254 = arith.addf %252, %253 : vector<1x256xf32>
    %cst_194 = arith.constant 0.000000e+00 : f32
    %255 = vector.broadcast %cst_194 : f32 to vector<1x256xf32>
    %256 = arith.maximumf %254, %255 : vector<1x256xf32>
    %257 = arith.truncf %256 : vector<1x256xf32> to vector<1x256xbf16>
    %c0_195 = arith.constant 0 : index
    %c0_196 = arith.constant 0 : index
    %258 = vector.load %arg20[%c0_195, %c0_196] : memref<256x1xbf16, #tpu.memory_space<vmem>>, vector<256x1xbf16>
    %cst_197 = arith.constant dense<0.000000e+00> : vector<1x1xf32>
    %259 = tpu.matmul %257, %258, %cst_197 {dimension_numbers = #tpu.dot_dimension_numbers<[1], [0], [0], [1], [0, 0, 1, 1], [], []>} : vector<1x256xbf16>, vector<256x1xbf16>, vector<1x1xf32> -> vector<1x1xf32>
    %c0_198 = arith.constant 0 : index
    %c0_199 = arith.constant 0 : index
    %260 = vector.load %arg21[%c0_198, %c0_199] : memref<1x1xf32, #tpu.memory_space<vmem>>, vector<1x1xf32>
    %261 = arith.addf %259, %260 : vector<1x1xf32>
    %262 = arith.negf %261 : vector<1x1xf32>
    %263 = math.exp %262 : vector<1x1xf32>
    %cst_200 = arith.constant 1.000000e+00 : f32
    %264 = vector.broadcast %cst_200 : f32 to vector<1x1xf32>
    %265 = arith.addf %264, %263 : vector<1x1xf32>
    %266 = arith.divf %264, %265 : vector<1x1xf32>
    %c0_201 = arith.constant 0 : index
    %c0_202 = arith.constant 0 : index
    %267 = vector.load %arg22[%c0_201, %c0_202] : memref<128x256xbf16, #tpu.memory_space<vmem>>, vector<128x256xbf16>
    %cst_203 = arith.constant dense<0.000000e+00> : vector<1x256xf32>
    %268 = tpu.matmul %234, %267, %cst_203 {dimension_numbers = #tpu.dot_dimension_numbers<[1], [0], [0], [1], [0, 0, 1, 1], [], []>} : vector<1x128xbf16>, vector<128x256xbf16>, vector<1x256xf32> -> vector<1x256xf32>
    %c0_204 = arith.constant 0 : index
    %c0_205 = arith.constant 0 : index
    %269 = vector.load %arg23[%c0_204, %c0_205] : memref<1x256xf32, #tpu.memory_space<vmem>>, vector<1x256xf32>
    %270 = vector.broadcast %266 : vector<1x1xf32> to vector<1x256xf32>
    %271 = arith.mulf %270, %269 : vector<1x256xf32>
    %272 = arith.addf %268, %271 : vector<1x256xf32>
    %c0_206 = arith.constant 0 : index
    %c0_207 = arith.constant 0 : index
    %273 = vector.load %arg24[%c0_206, %c0_207] : memref<1x256xf32, #tpu.memory_space<vmem>>, vector<1x256xf32>
    %274 = arith.addf %272, %273 : vector<1x256xf32>
    %cst_208 = arith.constant 0.000000e+00 : f32
    %275 = vector.broadcast %cst_208 : f32 to vector<1x256xf32>
    %276 = arith.maximumf %274, %275 : vector<1x256xf32>
    %277 = arith.truncf %276 : vector<1x256xf32> to vector<1x256xbf16>
    %c0_209 = arith.constant 0 : index
    %c0_210 = arith.constant 0 : index
    %278 = vector.load %arg25[%c0_209, %c0_210] : memref<256x2xbf16, #tpu.memory_space<vmem>>, vector<256x2xbf16>
    %cst_211 = arith.constant dense<0.000000e+00> : vector<1x2xf32>
    %279 = tpu.matmul %277, %278, %cst_211 {dimension_numbers = #tpu.dot_dimension_numbers<[1], [0], [0], [1], [0, 0, 1, 1], [], []>} : vector<1x256xbf16>, vector<256x2xbf16>, vector<1x2xf32> -> vector<1x2xf32>
    %c0_212 = arith.constant 0 : index
    %c0_213 = arith.constant 0 : index
    %280 = vector.load %arg26[%c0_212, %c0_213] : memref<1x2xf32, #tpu.memory_space<vmem>>, vector<1x2xf32>
    %281 = arith.addf %279, %280 : vector<1x2xf32>
    %282 = vector.broadcast %266 : vector<1x1xf32> to vector<1x2xf32>
    %283 = arith.mulf %281, %282 : vector<1x2xf32>
    %c0_214 = arith.constant 0 : index
    %c0_215 = arith.constant 0 : index
    %c0_216 = arith.constant 0 : index
    %284 = vector.load %arg27[%c0_214, %c0_215, %c0_216] : memref<1x1x3xf32, #tpu.memory_space<vmem>>, vector<1x1x3xf32>
    %285 = vector.shape_cast %284 : vector<1x1x3xf32> to vector<1x3xf32>
    %286 = vector.shape_cast %250 : vector<1x3xf32> to vector<1x1x3xf32>
    tpu.vector_store %arg27[%c0_214, %c0_215, %c0_216], %286 {strides = array<i32>} : memref<1x1x3xf32, #tpu.memory_space<vmem>>, vector<1x1x3xf32>,
    %c0_217 = arith.constant 0 : index
    %c0_218 = arith.constant 0 : index
    %c0_219 = arith.constant 0 : index
    %287 = vector.load %arg28[%c0_217, %c0_218, %c0_219] : memref<1x1x2xf32, #tpu.memory_space<vmem>>, vector<1x1x2xf32>
    %288 = vector.shape_cast %287 : vector<1x1x2xf32> to vector<1x2xf32>
    %289 = vector.shape_cast %283 : vector<1x2xf32> to vector<1x1x2xf32>
    tpu.vector_store %arg28[%c0_217, %c0_218, %c0_219], %289 {strides = array<i32>} : memref<1x1x2xf32, #tpu.memory_space<vmem>>, vector<1x1x2xf32>,
    %c0_220 = arith.constant 0 : index
    %c0_221 = arith.constant 0 : index
    %c0_222 = arith.constant 0 : index
    %290 = vector.load %arg29[%c0_220, %c0_221, %c0_222] : memref<1x1x1xf32, #tpu.memory_space<vmem>>, vector<1x1x1xf32>
    %291 = vector.shape_cast %290 : vector<1x1x1xf32> to vector<1x1xf32>
    %292 = vector.shape_cast %266 : vector<1x1xf32> to vector<1x1x1xf32>
    tpu.vector_store %arg29[%c0_220, %c0_221, %c0_222], %292 {strides = array<i32>} : memref<1x1x1xf32, #tpu.memory_space<vmem>>, vector<1x1x1xf32>,
    return
  }
  func.func @transform_0(%arg0: i32) -> (i32, i32, i32) {
    %c0_i32 = arith.constant 0 : i32
    %c0_i32_0 = arith.constant 0 : i32
    %c0_i32_1 = arith.constant 0 : i32
    return %arg0, %c0_i32, %c0_i32_0 : i32, i32, i32
  }
  func.func @transform_1(%arg0: i32) -> (i32, i32) {
    %c0_i32 = arith.constant 0 : i32
    %c0_i32_0 = arith.constant 0 : i32
    %c0_i32_1 = arith.constant 0 : i32
    return %c0_i32, %c0_i32_0 : i32, i32
  }
  func.func @transform_2(%arg0: i32) -> (i32, i32) {
    %c0_i32 = arith.constant 0 : i32
    %c0_i32_0 = arith.constant 0 : i32
    %c0_i32_1 = arith.constant 0 : i32
    return %c0_i32, %c0_i32_0 : i32, i32
  }
  func.func @transform_3(%arg0: i32) -> (i32, i32) {
    %c0_i32 = arith.constant 0 : i32
    %c0_i32_0 = arith.constant 0 : i32
    %c0_i32_1 = arith.constant 0 : i32
    return %c0_i32, %c0_i32_0 : i32, i32
  }
  func.func @transform_4(%arg0: i32) -> (i32, i32) {
    %c0_i32 = arith.constant 0 : i32
    %c0_i32_0 = arith.constant 0 : i32
    %c0_i32_1 = arith.constant 0 : i32
    return %c0_i32, %c0_i32_0 : i32, i32
  }
  func.func @transform_5(%arg0: i32) -> (i32, i32) {
    %c0_i32 = arith.constant 0 : i32
    %c0_i32_0 = arith.constant 0 : i32
    %c0_i32_1 = arith.constant 0 : i32
    return %c0_i32, %c0_i32_0 : i32, i32
  }
  func.func @transform_6(%arg0: i32) -> (i32, i32) {
    %c0_i32 = arith.constant 0 : i32
    %c0_i32_0 = arith.constant 0 : i32
    %c0_i32_1 = arith.constant 0 : i32
    return %c0_i32, %c0_i32_0 : i32, i32
  }
  func.func @transform_7(%arg0: i32) -> (i32, i32) {
    %c0_i32 = arith.constant 0 : i32
    %c0_i32_0 = arith.constant 0 : i32
    %c0_i32_1 = arith.constant 0 : i32
    return %c0_i32, %c0_i32_0 : i32, i32
  }
  func.func @transform_8(%arg0: i32) -> (i32, i32) {
    %c0_i32 = arith.constant 0 : i32
    %c0_i32_0 = arith.constant 0 : i32
    %c0_i32_1 = arith.constant 0 : i32
    return %c0_i32, %c0_i32_0 : i32, i32
  }
  func.func @transform_9(%arg0: i32) -> (i32, i32) {
    %c0_i32 = arith.constant 0 : i32
    %c0_i32_0 = arith.constant 0 : i32
    %c0_i32_1 = arith.constant 0 : i32
    return %c0_i32, %c0_i32_0 : i32, i32
  }
  func.func @transform_10(%arg0: i32) -> (i32, i32) {
    %c0_i32 = arith.constant 0 : i32
    %c0_i32_0 = arith.constant 0 : i32
    %c0_i32_1 = arith.constant 0 : i32
    return %c0_i32, %c0_i32_0 : i32, i32
  }
  func.func @transform_11(%arg0: i32) -> (i32, i32) {
    %c0_i32 = arith.constant 0 : i32
    %c0_i32_0 = arith.constant 0 : i32
    %c0_i32_1 = arith.constant 0 : i32
    return %c0_i32, %c0_i32_0 : i32, i32
  }
  func.func @transform_12(%arg0: i32) -> (i32, i32) {
    %c0_i32 = arith.constant 0 : i32
    %c0_i32_0 = arith.constant 0 : i32
    %c0_i32_1 = arith.constant 0 : i32
    return %c0_i32, %c0_i32_0 : i32, i32
  }
  func.func @transform_13(%arg0: i32) -> (i32, i32) {
    %c0_i32 = arith.constant 0 : i32
    %c0_i32_0 = arith.constant 0 : i32
    %c0_i32_1 = arith.constant 0 : i32
    return %c0_i32, %c0_i32_0 : i32, i32
  }
  func.func @transform_14(%arg0: i32) -> (i32, i32) {
    %c0_i32 = arith.constant 0 : i32
    %c0_i32_0 = arith.constant 0 : i32
    %c0_i32_1 = arith.constant 0 : i32
    return %c0_i32, %c0_i32_0 : i32, i32
  }
  func.func @transform_15(%arg0: i32) -> (i32, i32) {
    %c0_i32 = arith.constant 0 : i32
    %c0_i32_0 = arith.constant 0 : i32
    %c0_i32_1 = arith.constant 0 : i32
    return %c0_i32, %c0_i32_0 : i32, i32
  }
  func.func @transform_16(%arg0: i32) -> (i32, i32) {
    %c0_i32 = arith.constant 0 : i32
    %c0_i32_0 = arith.constant 0 : i32
    %c0_i32_1 = arith.constant 0 : i32
    return %c0_i32, %c0_i32_0 : i32, i32
  }
  func.func @transform_17(%arg0: i32) -> (i32, i32) {
    %c0_i32 = arith.constant 0 : i32
    %c0_i32_0 = arith.constant 0 : i32
    %c0_i32_1 = arith.constant 0 : i32
    return %c0_i32, %c0_i32_0 : i32, i32
  }
  func.func @transform_18(%arg0: i32) -> (i32, i32) {
    %c0_i32 = arith.constant 0 : i32
    %c0_i32_0 = arith.constant 0 : i32
    %c0_i32_1 = arith.constant 0 : i32
    return %c0_i32, %c0_i32_0 : i32, i32
  }
  func.func @transform_19(%arg0: i32) -> (i32, i32) {
    %c0_i32 = arith.constant 0 : i32
    %c0_i32_0 = arith.constant 0 : i32
    %c0_i32_1 = arith.constant 0 : i32
    return %c0_i32, %c0_i32_0 : i32, i32
  }
  func.func @transform_20(%arg0: i32) -> (i32, i32) {
    %c0_i32 = arith.constant 0 : i32
    %c0_i32_0 = arith.constant 0 : i32
    %c0_i32_1 = arith.constant 0 : i32
    return %c0_i32, %c0_i32_0 : i32, i32
  }
  func.func @transform_21(%arg0: i32) -> (i32, i32) {
    %c0_i32 = arith.constant 0 : i32
    %c0_i32_0 = arith.constant 0 : i32
    %c0_i32_1 = arith.constant 0 : i32
    return %c0_i32, %c0_i32_0 : i32, i32
  }
  func.func @transform_22(%arg0: i32) -> (i32, i32) {
    %c0_i32 = arith.constant 0 : i32
    %c0_i32_0 = arith.constant 0 : i32
    %c0_i32_1 = arith.constant 0 : i32
    return %c0_i32, %c0_i32_0 : i32, i32
  }
  func.func @transform_23(%arg0: i32) -> (i32, i32) {
    %c0_i32 = arith.constant 0 : i32
    %c0_i32_0 = arith.constant 0 : i32
    %c0_i32_1 = arith.constant 0 : i32
    return %c0_i32, %c0_i32_0 : i32, i32
  }
  func.func @transform_24(%arg0: i32) -> (i32, i32) {
    %c0_i32 = arith.constant 0 : i32
    %c0_i32_0 = arith.constant 0 : i32
    %c0_i32_1 = arith.constant 0 : i32
    return %c0_i32, %c0_i32_0 : i32, i32
  }
  func.func @transform_25(%arg0: i32) -> (i32, i32) {
    %c0_i32 = arith.constant 0 : i32
    %c0_i32_0 = arith.constant 0 : i32
    %c0_i32_1 = arith.constant 0 : i32
    return %c0_i32, %c0_i32_0 : i32, i32
  }
  func.func @transform_26(%arg0: i32) -> (i32, i32, i32) {
    %c0_i32 = arith.constant 0 : i32
    %c0_i32_0 = arith.constant 0 : i32
    %c0_i32_1 = arith.constant 0 : i32
    return %arg0, %c0_i32, %c0_i32_0 : i32, i32, i32
  }
  func.func @transform_27(%arg0: i32) -> (i32, i32, i32) {
    %c0_i32 = arith.constant 0 : i32
    %c0_i32_0 = arith.constant 0 : i32
    %c0_i32_1 = arith.constant 0 : i32
    return %arg0, %c0_i32, %c0_i32_0 : i32, i32, i32
  }
  func.func @transform_28(%arg0: i32) -> (i32, i32, i32) {
    %c0_i32 = arith.constant 0 : i32
    %c0_i32_0 = arith.constant 0 : i32
    %c0_i32_1 = arith.constant 0 : i32
    return %arg0, %c0_i32, %c0_i32_0 : i32, i32, i32
  }
}

</mosaic_0001>

<bundles_post_ra>
// kernel: two_stage_detect_cnn.1
= control target key start
LH: loop header
LB: loop body
LE: loop exit
PB: predicated region body
PF: predicated region fallthrough
CT: control target
= control target key end

     0   :  { %s17991_s0 = inlined_call_operand.vmem [shape: f32[2,362,4], index: 0, kind: input, shape index: {}]   ;;  %s17992_s1 = inlined_call_operand.vmem [shape: f32[36,32], index: 1, kind: input, shape index: {}]   ;;  %s17993_s2 = inlined_call_operand.vmem [shape: f32[1,32], index: 2, kind: input, shape index: {}]   ;;  %s17994_s3 = inlined_call_operand.vmem [shape: bf16[122,324], index: 3, kind: input, shape index: {}]   ;;  %s17995_s4 = inlined_call_operand.vmem [shape: bf16[288,64], index: 4, kind: input, shape index: {}]   ;;  %s17996_s5 = inlined_call_operand.vmem [shape: f32[1,64], index: 5, kind: input, shape index: {}]   ;;  %s17997_s6 = inlined_call_operand.vmem [shape: bf16[50,100], index: 6, kind: input, shape index: {}]   ;;  %s17998_s7 = inlined_call_operand.vmem [shape: bf16[576,128], index: 7, kind: input, shape index: {}]   ;;  %s17999_s8 = inlined_call_operand.vmem [shape: f32[1,128], index: 8, kind: input, shape index: {}]   ;;  %s18000_s9 = inlined_call_operand.vmem [shape: bf16[26,36], index: 9, kind: input, shape index: {}]   ;;  %s18001_s10 = inlined_call_operand.vmem [shape: bf16[1152,384], index: 10, kind: input, shape index: {}]   ;;  %s18002_s11 = inlined_call_operand.vmem [shape: f32[1,384], index: 11, kind: input, shape index: {}]   ;;  %s18003_s12 = inlined_call_operand.vmem [shape: bf16[1,16], index: 12, kind: input, shape index: {}]   ;;  %s18004_s13 = inlined_call_operand.vmem [shape: bf16[128,256], index: 13, kind: input, shape index: {}]   ;;  %s18005_s14 = inlined_call_operand.vmem [shape: f32[1,256], index: 14, kind: input, shape index: {}]   ;;  %s18006_s15 = inlined_call_operand.vmem [shape: bf16[256,3], index: 15, kind: input, shape index: {}]   ;;  %s18007_s16 = inlined_call_operand.vmem [shape: f32[1,3], index: 16, kind: input, shape index: {}]   ;;  %s18008_s17 = inlined_call_operand.vmem [shape: bf16[128,256], index: 17, kind: input, shape index: {}]   ;;  %s18009_s18 = inlined_call_operand.vmem [shape: f32[1,256], index: 18, kind: input, shape index: {}]   ;;  %s18010_s19 = inlined_call_operand.vmem [shape: bf16[256,1], index: 19, kind: input, shape index: {}]   ;;  %s18011_s20 = inlined_call_operand.<no memory space> [shape: f32[1,1], index: 20, kind: input, shape index: {}]   ;;  %s18012_s21 = inlined_call_operand.vmem [shape: bf16[128,256], index: 21, kind: input, shape index: {}]   ;;  %s18013_s22 = inlined_call_operand.vmem [shape: f32[1,256], index: 22, kind: input, shape index: {}]   ;;  %s18014_s23 = inlined_call_operand.vmem [shape: f32[1,256], index: 23, kind: input, shape index: {}]   ;;  %s18015_s24 = inlined_call_operand.vmem [shape: bf16[256,2], index: 24, kind: input, shape index: {}]   ;;  %s18016_s25 = inlined_call_operand.vmem [shape: f32[1,2], index: 25, kind: input, shape index: {}]   ;;  %s18017_s26 = inlined_call_operand.vmem [shape: f32[2,1,3], index: 26, kind: output, shape index: {0}]   ;;  %s18018_s27 = inlined_call_operand.vmem [shape: f32[2,1,2], index: 27, kind: output, shape index: {1}]   ;;  %s18019_s28 = inlined_call_operand.vmem [shape: f32[2,1,1], index: 28, kind: output, shape index: {2}]  }
   0x1   :  { %18032 = sst [smem:[#allocation21_spill]] %s17991_s0  ;;  %v34_v0 = vstv %s18011_s20 }
   0x2   :  { %18033 = sst [smem:[#allocation22_spill]] %s17992_s1  ;;  %35 = vst [vmem:[#allocation5] sm:$0x1] %v34_v0 }
   0x3   :  { %18034 = sst [smem:[#allocation23_spill]] %s17993_s2 }
   0x4   :  { %18035 = sst [smem:[#allocation24_spill]] %s17994_s3 }
   0x5   :  { %18036 = sst [smem:[#allocation25_spill]] %s17995_s4 }
   0x6   :  { %18037 = sst [smem:[#allocation26_spill]] %s17996_s5 }
   0x7   :  { %18038 = sst [smem:[#allocation27_spill]] %s17997_s6 }
   0x8   :  { %18039 = sst [smem:[#allocation28_spill]] %s17998_s7 }
   0x9   :  { %18040 = sst [smem:[#allocation29_spill]] %s17999_s8 }
   0xa   :  { %18041 = sst [smem:[#allocation30_spill]] %s18000_s9  ;;  %s14228_s9 = smov 0  }
   0xb   :  { %18042 = sst [smem:[#allocation31_spill]] %s18001_s10 }
   0xc   :  { %18043 = sst [smem:[#allocation32_spill]] %s18002_s11 }
   0xd   :  { %18044 = sst [smem:[#allocation33_spill]] %s18003_s12 }
   0xe LB: > { %s10739_s30 = sadd.s32 4294967295, %s14075_s9   ;;  %p10743_p0 = scmp.ge.s32.totalorder %s14075_s9, 1  ;;  %s14075_s9 = sphi %s14228_s9, %s41_s9  }
   0xf   : > { %p769_p1 = scmp.lt.s32.totalorder %s14075_s9, 3 }
  0x11   : > { %p770_p2 = pnand %p10743_p0, %p769_p1 }
  0x13   : > { %773 = sbr.rel (%p770_p2) target bundleno = 4182 (0x1056), region = 124 }
  0x1a   : > { %s18045_s10 = sld [smem:[#allocation22_spill]]  ;;  %vm1054_vm0 = vcmask 1041408   ;;  %v18027_v3 = vmov 0.0   ;;  %p847_p3 = scmp.lt.s32.totalorder %s10739_s30, 1  ;;  %vm14078_vm1 = vmmov 0   ;;  %vm990_vm2 = vcmask 31744  }
  0x1b   : > { %12027 = vmatprep.subr.bf16.mxu0 %v18027_v3  ;;  %12113 = vmatprep.subr.bf16.mxu1 %v18027_v3  ;;  %s18046_s1 = sld [smem:[#allocation21_spill]]  ;;  %s18078_s5 = sld [smem:[#allocation23_spill]]  ;;  %vm4383_vm3 = vcmask 556032   ;;  %vm4605_vm4 = vcmask 261120   ;;  %vm4621_vm5 = vcmask 254976   ;;  %vm6084_vm6 = vcmask 818176  }
  0x1c   : > { %12029 = vmatprep.mubr.msk.bf16.mxu0 %vm14078_vm1, %v18027_v3  ;;  %12115 = vmatprep.mubr.msk.bf16.mxu1 %vm14078_vm1, %v18027_v3  ;;  %s18090_s30 = smov (!%p847_p3, %s10739_s30), 1  ;;  %s18079_s20 = sld [smem:[#allocation24_spill]]  ;;  %vm6164_vm7 = vcmask 523264   ;;  %vm6171_vm8 = vcmask 517120   ;;  %vm7187_vm9 = vcmask 293888   ;;  %vm9548_vm10 = vcmask 130048  }
  0x1d   : > { %s13548_s2 = smul.u32 368, %s18090_s30  ;;  %s18080_s0 = sld [smem:[#allocation25_spill]]  ;;  %vm10636_vm11 = vcmask 16384   ;;  %vm10640_vm12 = vcmask 0   ;;  %vm10638_vm13 = vcmask 8192  }
  0x1e   : > { %s18081_s7 = sld [smem:[#allocation27_spill]]  ;;  %s18083_s3 = sld [smem:[#allocation26_spill]] }
  0x1f   : > { %s18084_s8 = sld [smem:[#allocation30_spill]]  ;;  %s18085_s6 = sld [smem:[#allocation31_spill]] }
  0x20   : > { %v988_v1 = vld [vmem:[%s18045_s10 + $0x4] sm:$0xf]  ;;  %v924_v2 = vld [vmem:[%s18045_s10] sm:$0xf]  ;;  %v1586_v6 = vld [vmem:[%s18045_s10 + $0x8] sm:$0xf]  ;;  %s860_s29 = scalar_lea.vmem %s18019_s28, %s18090_s30 }
  0x21   : > { %v989_v4 = vpack.c.bf16 %v988_v1, %v988_v1  ;;  %v925_v5 = vpack.c.bf16 %v924_v2, %v924_v2  ;;  %v1587_v9 = vpack.c.bf16 %v1586_v6, %v1586_v6  ;;  %s14261_s4 = scalar_lea.vmem %s18046_s1, %s13548_s2  ;;  %v1957_v45 = vld [vmem:[%s18045_s10 + $0xc] sm:$0xf]  ;;  %s18086_s12 = sld [smem:[#allocation29_spill]] }
  0x22   : > { %v926_v10 = vld [vmem:[%s14261_s4 + $0x1] sm:$0xff]  ;;  %v927_v11 = vld [vmem:[%s14261_s4 + $0x9] sm:$0xff]  ;;  %v928_v17 = vld [vmem:[%s14261_s4 + $0x11] sm:$0xff]  ;;  %v1958_v46 = vpack.c.bf16 %v1957_v45, %v1957_v45  ;;  %s18087_s1 = sld [smem:[#allocation32_spill]]  ;;  %s18088_s11 = sld [smem:[#allocation33_spill]] }
  0x23   : > { %v1056_v7 = vsel %vm1054_vm0, %v989_v4, 0  ;;  %v1322_v8 = vsel %vm1054_vm0, %v925_v5, 0  ;;  %v862_v12 = vld [vmem:[%s14261_s4] sm:$0xff]  ;;  %v967_v13 = vpack.c.bf16 %v927_v11, %v926_v10  ;;  %v863_v14 = vld [vmem:[%s14261_s4 + $0x8] sm:$0xff]  ;;  %v1652_v16 = vsel %vm1054_vm0, %v1587_v9, 0  ;;  %v864_v19 = vld [vmem:[%s14261_s4 + $0x10] sm:$0xff] }
  0x24   : > { %12028 = vmatpush3.bf16.msra.mxu0 %v1056_v7  ;;  %12114 = vmatpush3.bf16.msra.mxu1 %v1322_v8  ;;  %v903_v15 = vpack.c.bf16 %v863_v14, %v862_v12  ;;  %v929_v18 = vld [vmem:[%s14261_s4 + $0x19] sm:$0xff]  ;;  %v930_v23 = vld [vmem:[%s14261_s4 + $0x21] sm:$0xff]  ;;  %v931_v24 = vld [vmem:[%s14261_s4 + $0x29] sm:$0xff]  ;;  %v2023_v48 = vsel %vm1054_vm0, %v1958_v46, 0 }
  0x25   : > { %12199 = vmatprep.subr.bf16.mxu0 %v18027_v3  ;;  %12285 = vmatprep.subr.bf16.mxu1 %v18027_v3  ;;  %v865_v20 = vld [vmem:[%s14261_s4 + $0x18] sm:$0xff]  ;;  %v968_v21 = vpack.c.bf16 %v929_v18, %v928_v17  ;;  %v866_v25 = vld [vmem:[%s14261_s4 + $0x20] sm:$0xff]  ;;  %v867_v26 = vld [vmem:[%s14261_s4 + $0x28] sm:$0xff]  ;;  %v969_v27 = vpack.c.bf16 %v931_v24, %v930_v23 }
  0x26   : > { %v904_v22 = vpack.c.bf16 %v865_v20, %v864_v19  ;;  %v905_v28 = vpack.c.bf16 %v867_v26, %v866_v25  ;;  %v932_v29 = vld [vmem:[%s14261_s4 + $0x31] sm:$0xff]  ;;  %v933_v30 = vld [vmem:[%s14261_s4 + $0x39] sm:$0xff]  ;;  %v934_v35 = vld [vmem:[%s14261_s4 + $0x41] sm:$0xff] }
  0x27   : > { %12030 = vmatmul.mubr.msk.bf16.vlgmr.msra.gmra.mrb[0].mxu0 %vm990_vm2, %v967_v13  ;;  %12116 = vmatmul.mubr.msk.bf16.vlgmr.msra.gmra.mrb[0].mxu1 %vm990_vm2, %v903_v15  ;;  %v868_v31 = vld [vmem:[%s14261_s4 + $0x30] sm:$0xff]  ;;  %v869_v32 = vld [vmem:[%s14261_s4 + $0x38] sm:$0xff]  ;;  %v970_v33 = vpack.c.bf16 %v933_v30, %v932_v29  ;;  %v870_v37 = vld [vmem:[%s14261_s4 + $0x40] sm:$0xff] }
  0x28   : > { %12033 = vmatprep.mubr.msk.bf16.mxu0 %vm14078_vm1, %v18027_v3  ;;  %12119 = vmatprep.mubr.msk.bf16.mxu1 %vm14078_vm1, %v18027_v3  ;;  %v906_v34 = vpack.c.bf16 %v869_v32, %v868_v31  ;;  %v935_v36 = vld [vmem:[%s14261_s4 + $0x49] sm:$0xff]  ;;  %v936_v41 = vld [vmem:[%s14261_s4 + $0x51] sm:$0xff]  ;;  %v937_v42 = vld [vmem:[%s14261_s4 + $0x59] sm:$0xff] }
  0x29   : > { %12200 = vmatpush3.bf16.msra.mxu0 %v1652_v16  ;;  %v871_v38 = vld [vmem:[%s14261_s4 + $0x48] sm:$0xff]  ;;  %v971_v39 = vpack.c.bf16 %v935_v36, %v934_v35  ;;  %v872_v43 = vld [vmem:[%s14261_s4 + $0x50] sm:$0xff]  ;;  %v873_v44 = vld [vmem:[%s14261_s4 + $0x58] sm:$0xff]  ;;  %v972_v47 = vpack.c.bf16 %v937_v42, %v936_v41  ;;  %12286 = vmatpush3.bf16.msra.mxu1 %v2023_v48 }
  0x2a   : > { %12371 = vmatprep.subr.bf16.mxu0 %v18027_v3  ;;  %v907_v40 = vpack.c.bf16 %v871_v38, %v870_v37  ;;  %v908_v49 = vpack.c.bf16 %v873_v44, %v872_v43  ;;  %12457 = vmatprep.subr.bf16.mxu1 %v18027_v3  ;;  %v938_v50 = vld [vmem:[%s14261_s4 + $0x61] sm:$0xff]  ;;  %v939_v51 = vld [vmem:[%s14261_s4 + $0x69] sm:$0xff]  ;;  %v940_v56 = vld [vmem:[%s14261_s4 + $0x71] sm:$0xff] }
  0x2b   : > { %v874_v52 = vld [vmem:[%s14261_s4 + $0x60] sm:$0xff]  ;;  %v875_v53 = vld [vmem:[%s14261_s4 + $0x68] sm:$0xff]  ;;  %v973_v54 = vpack.c.bf16 %v939_v51, %v938_v50  ;;  %v876_v58 = vld [vmem:[%s14261_s4 + $0x70] sm:$0xff] }
  0x2c   : > { %v909_v55 = vpack.c.bf16 %v875_v53, %v874_v52  ;;  %v941_v57 = vld [vmem:[%s14261_s4 + $0x79] sm:$0xff]  ;;  %v942_v62 = vld [vmem:[%s14261_s4 + $0x81] sm:$0xff]  ;;  %v943_v63 = vld [vmem:[%s14261_s4 + $0x89] sm:$0xff] }
  0x2d   : > { %v877_v59 = vld [vmem:[%s14261_s4 + $0x78] sm:$0xff]  ;;  %v974_v60 = vpack.c.bf16 %v941_v57, %v940_v56  ;;  %v878_v0 = vld [vmem:[%s14261_s4 + $0x80] sm:$0xff]  ;;  %v879_v1 = vld [vmem:[%s14261_s4 + $0x88] sm:$0xff]  ;;  %v975_v2 = vpack.c.bf16 %v943_v63, %v942_v62 }
  0x2e   : > { %v910_v61 = vpack.c.bf16 %v877_v59, %v876_v58  ;;  %v911_v4 = vpack.c.bf16 %v879_v1, %v878_v0  ;;  %v944_v5 = vld [vmem:[%s14261_s4 + $0x91] sm:$0xff]  ;;  %v945_v6 = vld [vmem:[%s14261_s4 + $0x99] sm:$0xff]  ;;  %v946_v11 = vld [vmem:[%s14261_s4 + $0xa1] sm:$0xff] }
  0x2f   : > { %12034 = vmatmul.mubr.msk.bf16.gmra.mrb[4].mxu0 %vm990_vm2, %v968_v21  ;;  %12120 = vmatmul.mubr.msk.bf16.gmra.mrb[4].mxu1 %vm990_vm2, %v904_v22  ;;  %v880_v7 = vld [vmem:[%s14261_s4 + $0x90] sm:$0xff]  ;;  %v881_v8 = vld [vmem:[%s14261_s4 + $0x98] sm:$0xff]  ;;  %v976_v9 = vpack.c.bf16 %v945_v6, %v944_v5  ;;  %v882_v13 = vld [vmem:[%s14261_s4 + $0xa0] sm:$0xff] }
  0x30   : > { %12037 = vmatprep.mubr.msk.bf16.mxu0 %vm14078_vm1, %v18027_v3  ;;  %12123 = vmatprep.mubr.msk.bf16.mxu1 %vm14078_vm1, %v18027_v3  ;;  %v912_v10 = vpack.c.bf16 %v881_v8, %v880_v7  ;;  %v947_v12 = vld [vmem:[%s14261_s4 + $0xa9] sm:$0xff]  ;;  %v948_v17 = vld [vmem:[%s14261_s4 + $0xb1] sm:$0xff]  ;;  %v949_v18 = vld [vmem:[%s14261_s4 + $0xb9] sm:$0xff] }
  0x31   : > { %v883_v14 = vld [vmem:[%s14261_s4 + $0xa8] sm:$0xff]  ;;  %v977_v15 = vpack.c.bf16 %v947_v12, %v946_v11  ;;  %v884_v19 = vld [vmem:[%s14261_s4 + $0xb0] sm:$0xff]  ;;  %v885_v20 = vld [vmem:[%s14261_s4 + $0xb8] sm:$0xff]  ;;  %v978_v21 = vpack.c.bf16 %v949_v18, %v948_v17 }
  0x32   : > { %v913_v16 = vpack.c.bf16 %v883_v14, %v882_v13  ;;  %v914_v22 = vpack.c.bf16 %v885_v20, %v884_v19  ;;  %v950_v23 = vld [vmem:[%s14261_s4 + $0xc1] sm:$0xff]  ;;  %v951_v24 = vld [vmem:[%s14261_s4 + $0xc9] sm:$0xff]  ;;  %v952_v29 = vld [vmem:[%s14261_s4 + $0xd1] sm:$0xff] }
  0x33   : > { %v886_v25 = vld [vmem:[%s14261_s4 + $0xc0] sm:$0xff]  ;;  %v887_v26 = vld [vmem:[%s14261_s4 + $0xc8] sm:$0xff]  ;;  %v888_v31 = vld [vmem:[%s14261_s4 + $0xd0] sm:$0xff] }
  0x34   : > { %v953_v30 = vld [vmem:[%s14261_s4 + $0xd9] sm:$0xff]  ;;  %v954_v35 = vld [vmem:[%s14261_s4 + $0xe1] sm:$0xff]  ;;  %v955_v36 = vld [vmem:[%s14261_s4 + $0xe9] sm:$0xff] }
  0x35   : > { %v889_v32 = vld [vmem:[%s14261_s4 + $0xd8] sm:$0xff]  ;;  %v890_v37 = vld [vmem:[%s14261_s4 + $0xe0] sm:$0xff]  ;;  %v891_v38 = vld [vmem:[%s14261_s4 + $0xe8] sm:$0xff] }
  0x36   : > { %v956_v41 = vld [vmem:[%s14261_s4 + $0xf1] sm:$0xff]  ;;  %v957_v42 = vld [vmem:[%s14261_s4 + $0xf9] sm:$0xff]  ;;  %v959_v48 = vld [vmem:[%s14261_s4 + $0x109] sm:$0xff] }
  0x37   : > { %12038 = vmatmul.mubr.msk.bf16.gmra.mrb[8].mxu0 %vm990_vm2, %v969_v27  ;;  %12124 = vmatmul.mubr.msk.bf16.gmra.mrb[8].mxu1 %vm990_vm2, %v905_v28  ;;  %v979_v27 = vpack.c.bf16 %v951_v24, %v950_v23  ;;  %v915_v28 = vpack.c.bf16 %v887_v26, %v886_v25  ;;  %v892_v43 = vld [vmem:[%s14261_s4 + $0xf0] sm:$0xff]  ;;  %v893_v44 = vld [vmem:[%s14261_s4 + $0xf8] sm:$0xff]  ;;  %v982_v45 = vpack.c.bf16 %v957_v42, %v956_v41  ;;  %v895_v50 = vld [vmem:[%s14261_s4 + $0x108] sm:$0xff] }
  0x38   : > { %12041 = vmatprep.mubr.msk.bf16.mxu0 %vm14078_vm1, %v18027_v3  ;;  %12127 = vmatprep.mubr.msk.bf16.mxu1 %vm14078_vm1, %v18027_v3  ;;  %v918_v46 = vpack.c.bf16 %v893_v44, %v892_v43  ;;  %v960_v53 = vld [vmem:[%s14261_s4 + $0x111] sm:$0xff]  ;;  %v962_v59 = vld [vmem:[%s14261_s4 + $0x121] sm:$0xff] }
  0x39   : > { %v897_v56 = vld [vmem:[%s14261_s4 + $0x118] sm:$0xff]  ;;  %v899_v62 = vld [vmem:[%s14261_s4 + $0x128] sm:$0xff]  ;;  %v966_v8 = vld [vmem:[%s14261_s4 + $0x141] sm:$0xf] }
  0x3a   : > { %v964_v1 = vld [vmem:[%s14261_s4 + $0x131] sm:$0xff]  ;;  %v1524_v12 = vld [vmem:[%s14261_s4 + $0x2] sm:$0xff]  ;;  %v1900_v25 = vld [vmem:[%s14261_s4 + $0x3a] sm:$0xff] }
  0x3b   : > { %v901_v5 = vld [vmem:[%s14261_s4 + $0x138] sm:$0xff]  ;;  %v1525_v13 = vld [vmem:[%s14261_s4 + $0xa] sm:$0xff] }
  0x3c   : > { %v1895_v14 = vld [vmem:[%s14261_s4 + $0x12] sm:$0xff]  ;;  %v1565_v18 = vpack.c.bf16 %v1525_v13, %v1524_v12 }
  0x3d   : > { %v1899_v24 = vld [vmem:[%s14261_s4 + $0x32] sm:$0xff] }
  0x3e   : > { %v1938_v26 = vpack.c.bf16 %v1900_v25, %v1899_v24 }
  0x3f   : > { %12042 = vmatmul.mubr.msk.bf16.gmra.mrb[12].mxu0 %vm990_vm2, %v970_v33  ;;  %12128 = vmatmul.mubr.msk.bf16.gmra.mrb[12].mxu1 %vm990_vm2, %v906_v34  ;;  %v980_v33 = vpack.c.bf16 %v953_v30, %v952_v29  ;;  %v916_v34 = vpack.c.bf16 %v889_v32, %v888_v31  ;;  %v1903_v30 = vld [vmem:[%s14261_s4 + $0x52] sm:$0xff]  ;;  %v1904_v31 = vld [vmem:[%s14261_s4 + $0x5a] sm:$0xff] }
  0x40   : > { %12045 = vmatprep.mubr.msk.bf16.mxu0 %vm14078_vm1, %v18027_v3  ;;  %12131 = vmatprep.mubr.msk.bf16.mxu1 %vm14078_vm1, %v18027_v3  ;;  %v1940_v32 = vpack.c.bf16 %v1904_v31, %v1903_v30 }
  0x47   : > { %12046 = vmatmul.mubr.msk.bf16.gmra.mrb[16].mxu0 %vm990_vm2, %v971_v39  ;;  %12132 = vmatmul.mubr.msk.bf16.gmra.mrb[16].mxu1 %vm990_vm2, %v907_v40  ;;  %v981_v39 = vpack.c.bf16 %v955_v36, %v954_v35  ;;  %v917_v40 = vpack.c.bf16 %v891_v38, %v890_v37  ;;  %v2699_v35 = vld [vmem:[%s18045_s10 + $0x14] sm:$0xf] }
  0x48   : > { %12049 = vmatprep.mubr.msk.bf16.mxu0 %vm14078_vm1, %v18027_v3  ;;  %12135 = vmatprep.mubr.msk.bf16.mxu1 %vm14078_vm1, %v18027_v3  ;;  %v2700_v37 = vpack.c.bf16 %v2699_v35, %v2699_v35 }
  0x4a   : > { %v2765_v38 = vsel %vm1054_vm0, %v2700_v37, 0 }
  0x4f   : > { %12050 = vmatmul.mubr.msk.bf16.gmra.mrb[20].mxu0 %vm990_vm2, %v972_v47  ;;  %12136 = vmatmul.mubr.msk.bf16.gmra.mrb[20].mxu1 %vm990_vm2, %v908_v49  ;;  %v958_v47 = vld [vmem:[%s14261_s4 + $0x101] sm:$0xff] }
  0x50   : > { %12053 = vmatprep.mubr.msk.bf16.mxu0 %vm14078_vm1, %v18027_v3  ;;  %12139 = vmatprep.mubr.msk.bf16.mxu1 %vm14078_vm1, %v18027_v3  ;;  %v894_v49 = vld [vmem:[%s14261_s4 + $0x100] sm:$0xff]  ;;  %v983_v51 = vpack.c.bf16 %v959_v48, %v958_v47 }
  0x51   : > { %v919_v52 = vpack.c.bf16 %v895_v50, %v894_v49 }
  0x57   : > { %12054 = vmatmul.mubr.msk.bf16.gmra.mrb[24].mxu0 %vm990_vm2, %v973_v54  ;;  %12140 = vmatmul.mubr.msk.bf16.gmra.mrb[24].mxu1 %vm990_vm2, %v909_v55  ;;  %v961_v54 = vld [vmem:[%s14261_s4 + $0x119] sm:$0xff]  ;;  %v896_v55 = vld [vmem:[%s14261_s4 + $0x110] sm:$0xff] }
  0x58   : > { %12057 = vmatprep.mubr.msk.bf16.mxu0 %vm14078_vm1, %v18027_v3  ;;  %12143 = vmatprep.mubr.msk.bf16.mxu1 %vm14078_vm1, %v18027_v3  ;;  %v984_v57 = vpack.c.bf16 %v961_v54, %v960_v53  ;;  %v920_v58 = vpack.c.bf16 %v897_v56, %v896_v55  ;;  %v1910_v53 = vld [vmem:[%s14261_s4 + $0x8a] sm:$0xff] }
  0x5f   : > { %12058 = vmatmul.mubr.msk.bf16.gmra.mrb[28].mxu0 %vm990_vm2, %v974_v60  ;;  %12144 = vmatmul.mubr.msk.bf16.gmra.mrb[28].mxu1 %vm990_vm2, %v910_v61  ;;  %v963_v60 = vld [vmem:[%s14261_s4 + $0x129] sm:$0xff]  ;;  %v898_v61 = vld [vmem:[%s14261_s4 + $0x120] sm:$0xff] }
  0x60   : > { %12061 = vmatprep.mubr.msk.bf16.mxu0 %vm14078_vm1, %v18027_v3  ;;  %12147 = vmatprep.mubr.msk.bf16.mxu1 %vm14078_vm1, %v18027_v3  ;;  %v985_v63 = vpack.c.bf16 %v963_v60, %v962_v59  ;;  %v921_v0 = vpack.c.bf16 %v899_v62, %v898_v61 }
  0x67   : > { %12062 = vmatmul.mubr.msk.bf16.gmra.mrb[32].mxu0 %vm990_vm2, %v975_v2  ;;  %12148 = vmatmul.mubr.msk.bf16.gmra.mrb[32].mxu1 %vm990_vm2, %v911_v4  ;;  %v965_v2 = vld [vmem:[%s14261_s4 + $0x139] sm:$0xff]  ;;  %v900_v4 = vld [vmem:[%s14261_s4 + $0x130] sm:$0xff] }
  0x68   : > { %12065 = vmatprep.mubr.msk.bf16.mxu0 %vm14078_vm1, %v18027_v3  ;;  %12151 = vmatprep.mubr.msk.bf16.mxu1 %vm14078_vm1, %v18027_v3  ;;  %v986_v6 = vpack.c.bf16 %v965_v2, %v964_v1  ;;  %v922_v7 = vpack.c.bf16 %v901_v5, %v900_v4  ;;  %v1911_v1 = vld [vmem:[%s14261_s4 + $0x92] sm:$0xff]  ;;  %v1912_v2 = vld [vmem:[%s14261_s4 + $0x9a] sm:$0xff] }
  0x6f   : > { %12066 = vmatmul.mubr.msk.bf16.gmra.mrb[36].mxu0 %vm990_vm2, %v976_v9  ;;  %12152 = vmatmul.mubr.msk.bf16.gmra.mrb[36].mxu1 %vm990_vm2, %v912_v10  ;;  %v902_v9 = vld [vmem:[%s14261_s4 + $0x140] sm:$0xf]  ;;  %v987_v10 = vpack.c.bf16 %v966_v8, %v966_v8 }
  0x70   : > { %12069 = vmatprep.mubr.msk.bf16.mxu0 %vm14078_vm1, %v18027_v3  ;;  %12155 = vmatprep.mubr.msk.bf16.mxu1 %vm14078_vm1, %v18027_v3  ;;  %v923_v11 = vpack.c.bf16 %v902_v9, %v902_v9 }
  0x77   : > { %12070 = vmatmul.mubr.msk.bf16.gmra.mrb[40].mxu0 %vm990_vm2, %v977_v15  ;;  %12156 = vmatmul.mubr.msk.bf16.gmra.mrb[40].mxu1 %vm990_vm2, %v913_v16  ;;  %v1896_v15 = vld [vmem:[%s14261_s4 + $0x1a] sm:$0xff]  ;;  %v2328_v16 = vld [vmem:[%s18045_s10 + $0x10] sm:$0xf] }
  0x78   : > { %12073 = vmatprep.mubr.msk.bf16.mxu0 %vm14078_vm1, %v18027_v3  ;;  %12159 = vmatprep.mubr.msk.bf16.mxu1 %vm14078_vm1, %v18027_v3  ;;  %v2329_v17 = vpack.c.bf16 %v2328_v16, %v2328_v16  ;;  %v1936_v19 = vpack.c.bf16 %v1896_v15, %v1895_v14  ;;  %v1913_v15 = vld [vmem:[%s14261_s4 + $0xa2] sm:$0xff]  ;;  %v1914_v16 = vld [vmem:[%s14261_s4 + $0xaa] sm:$0xff] }
  0x7a   : > { %v2394_v20 = vsel %vm1054_vm0, %v2329_v17, 0 }
  0x7f   : > { %12074 = vmatmul.mubr.msk.bf16.gmra.mrb[44].mxu0 %vm990_vm2, %v978_v21  ;;  %12160 = vmatmul.mubr.msk.bf16.gmra.mrb[44].mxu1 %vm990_vm2, %v914_v22  ;;  %v1897_v21 = vld [vmem:[%s14261_s4 + $0x22] sm:$0xff]  ;;  %v1898_v22 = vld [vmem:[%s14261_s4 + $0x2a] sm:$0xff] }
  0x80   : > { %12077 = vmatprep.mubr.msk.bf16.mxu0 %vm14078_vm1, %v18027_v3  ;;  %12163 = vmatprep.mubr.msk.bf16.mxu1 %vm14078_vm1, %v18027_v3  ;;  %v1937_v23 = vpack.c.bf16 %v1898_v22, %v1897_v21 }
  0x87   : > { %12078 = vmatmul.mubr.msk.bf16.gmra.mrb[48].mxu0 %vm990_vm2, %v979_v27  ;;  %12164 = vmatmul.mubr.msk.bf16.gmra.mrb[48].mxu1 %vm990_vm2, %v915_v28  ;;  %v1901_v27 = vld [vmem:[%s14261_s4 + $0x42] sm:$0xff]  ;;  %v1902_v28 = vld [vmem:[%s14261_s4 + $0x4a] sm:$0xff] }
  0x88   : > { %12081 = vmatprep.mubr.msk.bf16.mxu0 %vm14078_vm1, %v18027_v3  ;;  %12167 = vmatprep.mubr.msk.bf16.mxu1 %vm14078_vm1, %v18027_v3  ;;  %v1939_v29 = vpack.c.bf16 %v1902_v28, %v1901_v27  ;;  %v1915_v28 = vld [vmem:[%s14261_s4 + $0xb2] sm:$0xff] }
  0x8f   : > { %12082 = vmatmul.mubr.msk.bf16.gmra.mrb[52].mxu0 %vm990_vm2, %v980_v33  ;;  %12168 = vmatmul.mubr.msk.bf16.gmra.mrb[52].mxu1 %vm990_vm2, %v916_v34  ;;  %v1905_v33 = vld [vmem:[%s14261_s4 + $0x62] sm:$0xff]  ;;  %v1906_v34 = vld [vmem:[%s14261_s4 + $0x6a] sm:$0xff] }
  0x90   : > { %12085 = vmatprep.mubr.msk.bf16.mxu0 %vm14078_vm1, %v18027_v3  ;;  %12171 = vmatprep.mubr.msk.bf16.mxu1 %vm14078_vm1, %v18027_v3  ;;  %v1941_v36 = vpack.c.bf16 %v1906_v34, %v1905_v33 }
  0x97   : > { %12086 = vmatmul.mubr.msk.bf16.gmra.mrb[56].mxu0 %vm990_vm2, %v981_v39  ;;  %12172 = vmatmul.mubr.msk.bf16.gmra.mrb[56].mxu1 %vm990_vm2, %v917_v40  ;;  %v1907_v39 = vld [vmem:[%s14261_s4 + $0x72] sm:$0xff]  ;;  %v1908_v40 = vld [vmem:[%s14261_s4 + $0x7a] sm:$0xff] }
  0x98   : > { %12089 = vmatprep.mubr.msk.bf16.mxu0 %vm14078_vm1, %v18027_v3  ;;  %12175 = vmatprep.mubr.msk.bf16.mxu1 %vm14078_vm1, %v18027_v3  ;;  %v1942_v47 = vpack.c.bf16 %v1908_v40, %v1907_v39 }
  0x9f   : > { %12090 = vmatmul.mubr.msk.bf16.gmra.mrb[60].mxu0 %vm990_vm2, %v982_v45  ;;  %12176 = vmatmul.mubr.msk.bf16.gmra.mrb[60].mxu1 %vm990_vm2, %v918_v46 }
  0xa0   : > { %12093 = vmatprep.mubr.msk.bf16.mxu0 %vm14078_vm1, %v18027_v3  ;;  %12179 = vmatprep.mubr.msk.bf16.mxu1 %vm14078_vm1, %v18027_v3 }
  0xa7   : > { %12094 = vmatmul.mubr.msk.bf16.gmra.mrb[64].mxu0 %vm990_vm2, %v983_v51  ;;  %12180 = vmatmul.mubr.msk.bf16.gmra.mrb[64].mxu1 %vm990_vm2, %v919_v52  ;;  %v1909_v52 = vld [vmem:[%s14261_s4 + $0x82] sm:$0xff] }
  0xa8   : > { %12097 = vmatprep.mubr.msk.bf16.mxu0 %vm14078_vm1, %v18027_v3  ;;  %12183 = vmatprep.mubr.msk.bf16.mxu1 %vm14078_vm1, %v18027_v3  ;;  %v1943_v60 = vpack.c.bf16 %v1910_v53, %v1909_v52 }
  0xaf   : > { %12098 = vmatmul.mubr.msk.bf16.gmra.mrb[68].mxu0 %vm990_vm2, %v984_v57  ;;  %12184 = vmatmul.mubr.msk.bf16.gmra.mrb[68].mxu1 %vm990_vm2, %v920_v58 }
  0xb0   : > { %12101 = vmatprep.mubr.msk.bf16.mxu0 %vm14078_vm1, %v18027_v3  ;;  %12187 = vmatprep.mubr.msk.bf16.mxu1 %vm14078_vm1, %v18027_v3 }
  0xb7   : > { %12102 = vmatmul.mubr.msk.bf16.gmra.mrb[72].mxu0 %vm990_vm2, %v985_v63  ;;  %12188 = vmatmul.mubr.msk.bf16.gmra.mrb[72].mxu1 %vm990_vm2, %v921_v0 }
  0xb8   : > { %12105 = vmatprep.mubr.msk.bf16.mxu0 %vm14078_vm1, %v18027_v3  ;;  %12191 = vmatprep.mubr.msk.bf16.mxu1 %vm14078_vm1, %v18027_v3 }
  0xbf   : > { %12106 = vmatmul.mubr.msk.bf16.gmra.mrb[76].mxu0 %vm990_vm2, %v986_v6  ;;  %12192 = vmatmul.mubr.msk.bf16.gmra.mrb[76].mxu1 %vm990_vm2, %v922_v7 }
  0xc0   : > { %12109 = vmatprep.mubr.msk.bf16.mxu0 %vm14078_vm1, %v18027_v3  ;;  %12195 = vmatprep.mubr.msk.bf16.mxu1 %vm14078_vm1, %v18027_v3 }
  0xc7   : > { %12110 = vmatmul.mubr.msk.bf16.gmra.mrb[80].mxu0 %vm990_vm2, %v987_v10  ;;  %12196 = vmatmul.mubr.msk.bf16.gmra.mrb[80].mxu1 %vm990_vm2, %v923_v11  ;;  %v1944_v10 = vpack.c.bf16 %v1912_v2, %v1911_v1 }
  0xc8   : > { %12201 = vmatprep.mubr.msk.bf16.mxu0 %vm14078_vm1, %v18027_v3  ;;  %12287 = vmatprep.mubr.msk.bf16.mxu1 %vm14078_vm1, %v18027_v3 }
  0xcf   : > { %12202 = vmatmul.mubr.msk.bf16.vlgmr.msra.gmra.mrb[84].mxu0 %vm990_vm2, %v1565_v18  ;;  %12288 = vmatmul.mubr.msk.bf16.vlgmr.msra.gmra.mrb[84].mxu1 %vm990_vm2, %v1936_v19 }
  0xd0   : > { %12205 = vmatprep.mubr.msk.bf16.mxu0 %vm14078_vm1, %v18027_v3  ;;  %12291 = vmatprep.mubr.msk.bf16.mxu1 %vm14078_vm1, %v18027_v3 }
  0xd1   : > { %12372 = vmatpush3.bf16.msra.mxu0 %v2394_v20  ;;  %12458 = vmatpush3.bf16.msra.mxu1 %v2765_v38 }
  0xd2   : > { %12543 = vmatprep.subr.bf16.mxu0 %v18027_v3  ;;  %12629 = vmatprep.subr.bf16.mxu1 %v18027_v3 }
  0xd7   : > { %12206 = vmatmul.mubr.msk.bf16.gmra.mrb[88].mxu0 %vm990_vm2, %v1936_v19  ;;  %12292 = vmatmul.mubr.msk.bf16.gmra.mrb[88].mxu1 %vm990_vm2, %v1937_v23 }
  0xd8   : > { %12209 = vmatprep.mubr.msk.bf16.mxu0 %vm14078_vm1, %v18027_v3  ;;  %12295 = vmatprep.mubr.msk.bf16.mxu1 %vm14078_vm1, %v18027_v3 }
  0xdf   : > { %12210 = vmatmul.mubr.msk.bf16.gmra.mrb[92].mxu0 %vm990_vm2, %v1937_v23  ;;  %12296 = vmatmul.mubr.msk.bf16.gmra.mrb[92].mxu1 %vm990_vm2, %v1938_v26  ;;  %v1945_v23 = vpack.c.bf16 %v1914_v16, %v1913_v15 }
  0xe0   : > { %12213 = vmatprep.mubr.msk.bf16.mxu0 %vm14078_vm1, %v18027_v3  ;;  %12299 = vmatprep.mubr.msk.bf16.mxu1 %vm14078_vm1, %v18027_v3 }
  0xe7   : > { %12214 = vmatmul.mubr.msk.bf16.gmra.mrb[96].mxu0 %vm990_vm2, %v1938_v26  ;;  %12300 = vmatmul.mubr.msk.bf16.gmra.mrb[96].mxu1 %vm990_vm2, %v1939_v29 }
  0xe8   : > { %12217 = vmatprep.mubr.msk.bf16.mxu0 %vm14078_vm1, %v18027_v3  ;;  %12303 = vmatprep.mubr.msk.bf16.mxu1 %vm14078_vm1, %v18027_v3 }
  0xef   : > { %12218 = vmatmul.mubr.msk.bf16.gmra.mrb[100].mxu0 %vm990_vm2, %v1939_v29  ;;  %12304 = vmatmul.mubr.msk.bf16.gmra.mrb[100].mxu1 %vm990_vm2, %v1940_v32  ;;  %v1916_v29 = vld [vmem:[%s14261_s4 + $0xba] sm:$0xff] }
  0xf0   : > { %12221 = vmatprep.mubr.msk.bf16.mxu0 %vm14078_vm1, %v18027_v3  ;;  %12307 = vmatprep.mubr.msk.bf16.mxu1 %vm14078_vm1, %v18027_v3 }
  0xf7   : > { %12222 = vmatmul.mubr.msk.bf16.gmra.mrb[104].mxu0 %vm990_vm2, %v1940_v32  ;;  %12308 = vmatmul.mubr.msk.bf16.gmra.mrb[104].mxu1 %vm990_vm2, %v1941_v36 }
  0xf8   : > { %12225 = vmatprep.mubr.msk.bf16.mxu0 %vm14078_vm1, %v18027_v3  ;;  %12311 = vmatprep.mubr.msk.bf16.mxu1 %vm14078_vm1, %v18027_v3 }
  0xfa   : > { %v1092_v41 = vpop.f32.mrb[0].mxu0  ;;  %v1358_v42 = vpop.f32.mrb[0].mxu1 }
  0xfb   : > { %v12031_v43 = vpop.f32.mrb[1].mxu0  ;;  %v14540_v44 = vadd.f32 %v1358_v42, %v1092_v41  ;;  %v12117_v45 = vpop.f32.mrb[1].mxu1  ;;  %v1917_v41 = vld [vmem:[%s14261_s4 + $0xc2] sm:$0xff]  ;;  %v1918_v42 = vld [vmem:[%s14261_s4 + $0xca] sm:$0xff] }
  0xfc   : > { %v1095_v46 = vpop.f32.mrb[2].mxu0  ;;  %v1361_v48 = vpop.f32.mrb[2].mxu1 }
  0xfd   : > { %v12032_v49 = vpop.f32.mrb[3].mxu0  ;;  %v14542_v50 = vadd.f32 %v1361_v48, %v1095_v46  ;;  %v12118_v51 = vpop.f32.mrb[3].mxu1 }
  0xfe   : > { %v1947_v51 = vpack.c.bf16 %v1918_v42, %v1917_v41  ;;  %v1926_v41 = vld [vmem:[%s14261_s4 + $0x10a] sm:$0xff] }
  0xff   : > { %12226 = vmatmul.mubr.msk.bf16.gmra.mrb[108].mxu0 %vm990_vm2, %v1941_v36  ;;  %12312 = vmatmul.mubr.msk.bf16.gmra.mrb[108].mxu1 %vm990_vm2, %v1942_v47  ;;  %v1946_v36 = vpack.c.bf16 %v1916_v29, %v1915_v28 }
 0x100   : > { %12229 = vmatprep.mubr.msk.bf16.mxu0 %vm14078_vm1, %v18027_v3  ;;  %12315 = vmatprep.mubr.msk.bf16.mxu1 %vm14078_vm1, %v18027_v3 }
 0x102   : > { %v1100_v54 = vpop.f32.mrb[4].mxu0  ;;  %v1366_v55 = vpop.f32.mrb[4].mxu1 }
 0x103   : > { %v12035_v56 = vpop.f32.mrb[5].mxu0  ;;  %v14552_v57 = vadd.f32 %v1366_v55, %v1100_v54  ;;  %v12121_v58 = vpop.f32.mrb[5].mxu1 }
 0x104   : > { %v1103_v59 = vpop.f32.mrb[6].mxu0  ;;  %v1369_v61 = vpop.f32.mrb[6].mxu1  ;;  %v1919_v56 = vld [vmem:[%s14261_s4 + $0xd2] sm:$0xff]  ;;  %v1920_v58 = vld [vmem:[%s14261_s4 + $0xda] sm:$0xff] }
 0x105   : > { %v12036_v62 = vpop.f32.mrb[7].mxu0  ;;  %v14554_v63 = vadd.f32 %v1369_v61, %v1103_v59  ;;  %v12122_v0 = vpop.f32.mrb[7].mxu1  ;;  %v1948_v2 = vpack.c.bf16 %v1920_v58, %v1919_v56  ;;  %v1927_v58 = vld [vmem:[%s14261_s4 + $0x112] sm:$0xff] }
 0x107   : > { %12230 = vmatmul.mubr.msk.bf16.gmra.mrb[112].mxu0 %vm990_vm2, %v1942_v47  ;;  %12316 = vmatmul.mubr.msk.bf16.gmra.mrb[112].mxu1 %vm990_vm2, %v1943_v60 }
 0x108   : > { %12233 = vmatprep.mubr.msk.bf16.mxu0 %vm14078_vm1, %v18027_v3  ;;  %12319 = vmatprep.mubr.msk.bf16.mxu1 %vm14078_vm1, %v18027_v3 }
 0x10a   : > { %v1108_v4 = vpop.f32.mrb[8].mxu0  ;;  %v1374_v5 = vpop.f32.mrb[8].mxu1 }
 0x10b   : > { %v12039_v6 = vpop.f32.mrb[9].mxu0  ;;  %v14564_v7 = vadd.f32 %v1374_v5, %v1108_v4  ;;  %v12125_v8 = vpop.f32.mrb[9].mxu1 }
 0x10c   : > { %v1111_v9 = vpop.f32.mrb[10].mxu0  ;;  %v1377_v11 = vpop.f32.mrb[10].mxu1 }
 0x10d   : > { %v12040_v12 = vpop.f32.mrb[11].mxu0  ;;  %v14566_v13 = vadd.f32 %v1377_v11, %v1111_v9  ;;  %v12126_v14 = vpop.f32.mrb[11].mxu1  ;;  %v1921_v9 = vld [vmem:[%s14261_s4 + $0xe2] sm:$0xff] }
 0x10f   : > { %12234 = vmatmul.mubr.msk.bf16.gmra.mrb[116].mxu0 %vm990_vm2, %v1943_v60  ;;  %12320 = vmatmul.mubr.msk.bf16.gmra.mrb[116].mxu1 %vm990_vm2, %v1944_v10 }
 0x110   : > { %12237 = vmatprep.mubr.msk.bf16.mxu0 %vm14078_vm1, %v18027_v3  ;;  %12323 = vmatprep.mubr.msk.bf16.mxu1 %vm14078_vm1, %v18027_v3 }
 0x112   : > { %v1116_v17 = vpop.f32.mrb[12].mxu0  ;;  %v1382_v18 = vpop.f32.mrb[12].mxu1 }
 0x113   : > { %v12043_v19 = vpop.f32.mrb[13].mxu0  ;;  %v14576_v20 = vadd.f32 %v1382_v18, %v1116_v17  ;;  %v12129_v21 = vpop.f32.mrb[13].mxu1 }
 0x114   : > { %v1119_v22 = vpop.f32.mrb[14].mxu0  ;;  %v1385_v24 = vpop.f32.mrb[14].mxu1 }
 0x115   : > { %v12044_v25 = vpop.f32.mrb[15].mxu0  ;;  %v14578_v26 = vadd.f32 %v1385_v24, %v1119_v22  ;;  %v12130_v27 = vpop.f32.mrb[15].mxu1  ;;  %v1923_v24 = vld [vmem:[%s14261_s4 + $0xf2] sm:$0xff] }
 0x116   : > { %v1924_v25 = vld [vmem:[%s14261_s4 + $0xfa] sm:$0xff] }
 0x117   : > { %12238 = vmatmul.mubr.msk.bf16.gmra.mrb[120].mxu0 %vm990_vm2, %v1944_v10  ;;  %12324 = vmatmul.mubr.msk.bf16.gmra.mrb[120].mxu1 %vm990_vm2, %v1945_v23  ;;  %v1922_v10 = vld [vmem:[%s14261_s4 + $0xea] sm:$0xff] }
 0x118   : > { %12241 = vmatprep.mubr.msk.bf16.mxu0 %vm14078_vm1, %v18027_v3  ;;  %12327 = vmatprep.mubr.msk.bf16.mxu1 %vm14078_vm1, %v18027_v3  ;;  %v1949_v18 = vpack.c.bf16 %v1922_v10, %v1921_v9 }
 0x11a   : > { %v1124_v30 = vpop.f32.mrb[16].mxu0  ;;  %v1390_v31 = vpop.f32.mrb[16].mxu1 }
 0x11b   : > { %v12047_v32 = vpop.f32.mrb[17].mxu0  ;;  %v14588_v33 = vadd.f32 %v1390_v31, %v1124_v30  ;;  %v12133_v34 = vpop.f32.mrb[17].mxu1 }
 0x11c   : > { %v1127_v35 = vpop.f32.mrb[18].mxu0  ;;  %v1393_v37 = vpop.f32.mrb[18].mxu1  ;;  %v1950_v34 = vpack.c.bf16 %v1924_v25, %v1923_v24 }
 0x11d   : > { %v12048_v38 = vpop.f32.mrb[19].mxu0  ;;  %v14590_v39 = vadd.f32 %v1393_v37, %v1127_v35  ;;  %v12134_v40 = vpop.f32.mrb[19].mxu1 }
 0x11e   : > { %v1925_v40 = vld [vmem:[%s14261_s4 + $0x102] sm:$0xff] }
 0x11f   : > { %12242 = vmatmul.mubr.msk.bf16.gmra.mrb[124].mxu0 %vm990_vm2, %v1945_v23  ;;  %12328 = vmatmul.mubr.msk.bf16.gmra.mrb[124].mxu1 %vm990_vm2, %v1946_v36 }
 0x120   : > { %12245 = vmatprep.mubr.msk.bf16.mxu0 %vm14078_vm1, %v18027_v3  ;;  %12331 = vmatprep.mubr.msk.bf16.mxu1 %vm14078_vm1, %v18027_v3 }
 0x122   : > { %v1132_v43 = vpop.f32.mrb[20].mxu0  ;;  %v1398_v45 = vpop.f32.mrb[20].mxu1 }
 0x123   : > { %v12051_v46 = vpop.f32.mrb[21].mxu0  ;;  %v14600_v47 = vadd.f32 %v1398_v45, %v1132_v43  ;;  %v12137_v48 = vpop.f32.mrb[21].mxu1 }
 0x124   : > { %v1135_v49 = vpop.f32.mrb[22].mxu0  ;;  %v1401_v52 = vpop.f32.mrb[22].mxu1 }
 0x125   : > { %v12052_v53 = vpop.f32.mrb[23].mxu0  ;;  %v14602_v54 = vadd.f32 %v1401_v52, %v1135_v49  ;;  %v12138_v55 = vpop.f32.mrb[23].mxu1 }
 0x127   : > { %12246 = vmatmul.mubr.msk.bf16.gmra.mrb[128].mxu0 %vm990_vm2, %v1946_v36  ;;  %12332 = vmatmul.mubr.msk.bf16.gmra.mrb[128].mxu1 %vm990_vm2, %v1947_v51 }
 0x128   : > { %12249 = vmatprep.mubr.msk.bf16.mxu0 %vm14078_vm1, %v18027_v3  ;;  %12335 = vmatprep.mubr.msk.bf16.mxu1 %vm14078_vm1, %v18027_v3 }
 0x12a   : > { %v1140_v59 = vpop.f32.mrb[24].mxu0  ;;  %v1406_v60 = vpop.f32.mrb[24].mxu1 }
 0x12b   : > { %v12055_v61 = vpop.f32.mrb[25].mxu0  ;;  %v14612_v62 = vadd.f32 %v1406_v60, %v1140_v59  ;;  %v12141_v0 = vpop.f32.mrb[25].mxu1  ;;  %v1928_v59 = vld [vmem:[%s14261_s4 + $0x11a] sm:$0xff] }
 0x12c   : > { %v1143_v1 = vpop.f32.mrb[26].mxu0  ;;  %v1409_v4 = vpop.f32.mrb[26].mxu1 }
 0x12d   : > { %v12056_v5 = vpop.f32.mrb[27].mxu0  ;;  %v14614_v6 = vadd.f32 %v1409_v4, %v1143_v1  ;;  %v12142_v8 = vpop.f32.mrb[27].mxu1 }
 0x12e   : > { %v1952_v5 = vpack.c.bf16 %v1928_v59, %v1927_v58 }
 0x12f   : > { %12250 = vmatmul.mubr.msk.bf16.gmra.mrb[132].mxu0 %vm990_vm2, %v1947_v51  ;;  %12336 = vmatmul.mubr.msk.bf16.gmra.mrb[132].mxu1 %vm990_vm2, %v1948_v2  ;;  %v1951_v51 = vpack.c.bf16 %v1926_v41, %v1925_v40 }
 0x130   : > { %12253 = vmatprep.mubr.msk.bf16.mxu0 %vm14078_vm1, %v18027_v3  ;;  %12339 = vmatprep.mubr.msk.bf16.mxu1 %vm14078_vm1, %v18027_v3 }
 0x132   : > { %v1148_v11 = vpop.f32.mrb[28].mxu0  ;;  %v1414_v12 = vpop.f32.mrb[28].mxu1 }
 0x133   : > { %v12059_v14 = vpop.f32.mrb[29].mxu0  ;;  %v14624_v15 = vadd.f32 %v1414_v12, %v1148_v11  ;;  %v12145_v16 = vpop.f32.mrb[29].mxu1  ;;  %v1929_v12 = vld [vmem:[%s14261_s4 + $0x122] sm:$0xff] }
 0x134   : > { %v1151_v17 = vpop.f32.mrb[30].mxu0  ;;  %v1417_v19 = vpop.f32.mrb[30].mxu1  ;;  %v1930_v14 = vld [vmem:[%s14261_s4 + $0x12a] sm:$0xff] }
 0x135   : > { %v12060_v21 = vpop.f32.mrb[31].mxu0  ;;  %v14626_v22 = vadd.f32 %v1417_v19, %v1151_v17  ;;  %v12146_v23 = vpop.f32.mrb[31].mxu1  ;;  %v1953_v24 = vpack.c.bf16 %v1930_v14, %v1929_v12 }
 0x137   : > { %12254 = vmatmul.mubr.msk.bf16.gmra.mrb[136].mxu0 %vm990_vm2, %v1948_v2  ;;  %12340 = vmatmul.mubr.msk.bf16.gmra.mrb[136].mxu1 %vm990_vm2, %v1949_v18 }
 0x138   : > { %12257 = vmatprep.mubr.msk.bf16.mxu0 %vm14078_vm1, %v18027_v3  ;;  %12343 = vmatprep.mubr.msk.bf16.mxu1 %vm14078_vm1, %v18027_v3 }
 0x13a   : > { %v1156_v27 = vpop.f32.mrb[32].mxu0  ;;  %v1422_v28 = vpop.f32.mrb[32].mxu1 }
 0x13b   : > { %v12063_v29 = vpop.f32.mrb[33].mxu0  ;;  %v14636_v30 = vadd.f32 %v1422_v28, %v1156_v27  ;;  %v12149_v31 = vpop.f32.mrb[33].mxu1 }
 0x13c   : > { %v1159_v32 = vpop.f32.mrb[34].mxu0  ;;  %v1425_v35 = vpop.f32.mrb[34].mxu1  ;;  %v1931_v31 = vld [vmem:[%s14261_s4 + $0x132] sm:$0xff] }
 0x13d   : > { %v12064_v36 = vpop.f32.mrb[35].mxu0  ;;  %v14638_v37 = vadd.f32 %v1425_v35, %v1159_v32  ;;  %v12150_v38 = vpop.f32.mrb[35].mxu1  ;;  %v1932_v32 = vld [vmem:[%s14261_s4 + $0x13a] sm:$0xff] }
 0x13f   : > { %12258 = vmatmul.mubr.msk.bf16.gmra.mrb[140].mxu0 %vm990_vm2, %v1949_v18  ;;  %12344 = vmatmul.mubr.msk.bf16.gmra.mrb[140].mxu1 %vm990_vm2, %v1950_v34 }
 0x140   : > { %12261 = vmatprep.mubr.msk.bf16.mxu0 %vm14078_vm1, %v18027_v3  ;;  %12347 = vmatprep.mubr.msk.bf16.mxu1 %vm14078_vm1, %v18027_v3 }
 0x142   : > { %v1164_v42 = vpop.f32.mrb[36].mxu0  ;;  %v1430_v43 = vpop.f32.mrb[36].mxu1 }
 0x143   : > { %v12067_v45 = vpop.f32.mrb[37].mxu0  ;;  %v14648_v46 = vadd.f32 %v1430_v43, %v1164_v42  ;;  %v12153_v48 = vpop.f32.mrb[37].mxu1  ;;  %v1954_v42 = vpack.c.bf16 %v1932_v32, %v1931_v31  ;;  %v3070_v32 = vld [vmem:[%s18045_s10 + $0x18] sm:$0xf] }
 0x144   : > { %v1167_v49 = vpop.f32.mrb[38].mxu0  ;;  %v1433_v52 = vpop.f32.mrb[38].mxu1 }
 0x145   : > { %v12068_v53 = vpop.f32.mrb[39].mxu0  ;;  %v14650_v55 = vadd.f32 %v1433_v52, %v1167_v49  ;;  %v12154_v56 = vpop.f32.mrb[39].mxu1  ;;  %v1934_v52 = vld [vmem:[%s14261_s4 + $0x14a] sm:$0xff] }
 0x147   : > { %12262 = vmatmul.mubr.msk.bf16.gmra.mrb[144].mxu0 %vm990_vm2, %v1950_v34  ;;  %12348 = vmatmul.mubr.msk.bf16.gmra.mrb[144].mxu1 %vm990_vm2, %v1951_v51 }
 0x148   : > { %12265 = vmatprep.mubr.msk.bf16.mxu0 %vm14078_vm1, %v18027_v3  ;;  %12351 = vmatprep.mubr.msk.bf16.mxu1 %vm14078_vm1, %v18027_v3 }
 0x14a   : > { %v1172_v60 = vpop.f32.mrb[40].mxu0  ;;  %v1438_v61 = vpop.f32.mrb[40].mxu1 }
 0x14b   : > { %v12071_v0 = vpop.f32.mrb[41].mxu0  ;;  %v14660_v1 = vadd.f32 %v1438_v61, %v1172_v60  ;;  %v12157_v2 = vpop.f32.mrb[41].mxu1 }
 0x14c   : > { %v1175_v4 = vpop.f32.mrb[42].mxu0  ;;  %v1441_v8 = vpop.f32.mrb[42].mxu1 }
 0x14d   : > { %v12072_v9 = vpop.f32.mrb[43].mxu0  ;;  %v14662_v10 = vadd.f32 %v1441_v8, %v1175_v4  ;;  %v12158_v11 = vpop.f32.mrb[43].mxu1 }
 0x14e   : > { %v1564_v9 = vld [vmem:[%s14261_s4 + $0x142] sm:$0xf]  ;;  %v1935_v11 = vld [vmem:[%s14261_s4 + $0x152] sm:$0xf] }
 0x14f   : > { %12266 = vmatmul.mubr.msk.bf16.gmra.mrb[148].mxu0 %vm990_vm2, %v1951_v51  ;;  %12352 = vmatmul.mubr.msk.bf16.gmra.mrb[148].mxu1 %vm990_vm2, %v1952_v5  ;;  %v1933_v51 = vld [vmem:[%s14261_s4 + $0x142] sm:$0xff] }
 0x150   : > { %12269 = vmatprep.mubr.msk.bf16.mxu0 %vm14078_vm1, %v18027_v3  ;;  %12355 = vmatprep.mubr.msk.bf16.mxu1 %vm14078_vm1, %v18027_v3  ;;  %v1955_v0 = vpack.c.bf16 %v1934_v52, %v1933_v51 }
 0x152   : > { %v1180_v16 = vpop.f32.mrb[44].mxu0  ;;  %v1446_v17 = vpop.f32.mrb[44].mxu1 }
 0x153   : > { %v12075_v18 = vpop.f32.mrb[45].mxu0  ;;  %v14672_v19 = vadd.f32 %v1446_v17, %v1180_v16  ;;  %v12161_v21 = vpop.f32.mrb[45].mxu1  ;;  %v1585_v17 = vpack.c.bf16 %v1564_v9, %v1564_v9  ;;  %v2639_v9 = vld [vmem:[%s14261_s4 + $0x24] sm:$0xff] }
 0x154   : > { %v1183_v23 = vpop.f32.mrb[46].mxu0  ;;  %v1449_v25 = vpop.f32.mrb[46].mxu1 }
 0x155   : > { %v12076_v27 = vpop.f32.mrb[47].mxu0  ;;  %v14674_v28 = vadd.f32 %v1449_v25, %v1183_v23  ;;  %v12162_v29 = vpop.f32.mrb[47].mxu1 }
 0x157   : > { %12270 = vmatmul.mubr.msk.bf16.gmra.mrb[152].mxu0 %vm990_vm2, %v1952_v5  ;;  %12356 = vmatmul.mubr.msk.bf16.gmra.mrb[152].mxu1 %vm990_vm2, %v1953_v24 }
 0x158   : > { %12273 = vmatprep.mubr.msk.bf16.mxu0 %vm14078_vm1, %v18027_v3  ;;  %12359 = vmatprep.mubr.msk.bf16.mxu1 %vm14078_vm1, %v18027_v3 }
 0x15a   : > { %v1188_v34 = vpop.f32.mrb[48].mxu0  ;;  %v1454_v35 = vpop.f32.mrb[48].mxu1 }
 0x15b   : > { %v12079_v36 = vpop.f32.mrb[49].mxu0  ;;  %v14684_v38 = vadd.f32 %v1454_v35, %v1188_v34  ;;  %v12165_v40 = vpop.f32.mrb[49].mxu1  ;;  %v2266_v34 = vld [vmem:[%s14261_s4 + $0x13] sm:$0xff]  ;;  %v2267_v35 = vld [vmem:[%s14261_s4 + $0x1b] sm:$0xff] }
 0x15c   : > { %v1191_v41 = vpop.f32.mrb[50].mxu0  ;;  %v1457_v43 = vpop.f32.mrb[50].mxu1  ;;  %v2637_v36 = vld [vmem:[%s14261_s4 + $0x14] sm:$0xff]  ;;  %v2638_v40 = vld [vmem:[%s14261_s4 + $0x1c] sm:$0xff] }
 0x15d   : > { %v12080_v45 = vpop.f32.mrb[51].mxu0  ;;  %v14686_v48 = vadd.f32 %v1457_v43, %v1191_v41  ;;  %v12166_v49 = vpop.f32.mrb[51].mxu1 }
 0x15e   : > { %v2307_v49 = vpack.c.bf16 %v2267_v35, %v2266_v34  ;;  %v2270_v35 = vld [vmem:[%s14261_s4 + $0x33] sm:$0xff] }
 0x15f   : > { %12274 = vmatmul.mubr.msk.bf16.gmra.mrb[156].mxu0 %vm990_vm2, %v1953_v24  ;;  %12360 = vmatmul.mubr.msk.bf16.gmra.mrb[156].mxu1 %vm990_vm2, %v1954_v42  ;;  %v1956_v24 = vpack.c.bf16 %v1935_v11, %v1935_v11  ;;  %v2640_v11 = vld [vmem:[%s14261_s4 + $0x2c] sm:$0xff] }
 0x160   : > { %12277 = vmatprep.mubr.msk.bf16.mxu0 %vm14078_vm1, %v18027_v3  ;;  %12363 = vmatprep.mubr.msk.bf16.mxu1 %vm14078_vm1, %v18027_v3 }
 0x162   : > { %v1196_v53 = vpop.f32.mrb[52].mxu0  ;;  %v1462_v56 = vpop.f32.mrb[52].mxu1 }
 0x163   : > { %v12083_v58 = vpop.f32.mrb[53].mxu0  ;;  %v14696_v59 = vadd.f32 %v1462_v56, %v1196_v53  ;;  %v12169_v60 = vpop.f32.mrb[53].mxu1  ;;  %v2678_v56 = vpack.c.bf16 %v2638_v40, %v2637_v36  ;;  %v2271_v36 = vld [vmem:[%s14261_s4 + $0x3b] sm:$0xff] }
 0x164   : > { %v1199_v61 = vpop.f32.mrb[54].mxu0  ;;  %v1465_v2 = vpop.f32.mrb[54].mxu1  ;;  %v2641_v40 = vld [vmem:[%s14261_s4 + $0x34] sm:$0xff] }
 0x165   : > { %v12084_v4 = vpop.f32.mrb[55].mxu0  ;;  %v14698_v5 = vadd.f32 %v1465_v2, %v1199_v61  ;;  %v12170_v8 = vpop.f32.mrb[55].mxu1 }
 0x166   : > { %v2268_v4 = vld [vmem:[%s14261_s4 + $0x23] sm:$0xff]  ;;  %v2269_v8 = vld [vmem:[%s14261_s4 + $0x2b] sm:$0xff] }
 0x167   : > { %12278 = vmatmul.mubr.msk.bf16.gmra.mrb[160].mxu0 %vm990_vm2, %v1954_v42  ;;  %12364 = vmatmul.mubr.msk.bf16.gmra.mrb[160].mxu1 %vm990_vm2, %v1955_v0  ;;  %v3071_v42 = vpack.c.bf16 %v3070_v32, %v3070_v32 }
 0x168   : > { %12281 = vmatprep.mubr.msk.bf16.mxu0 %vm14078_vm1, %v18027_v3  ;;  %12367 = vmatprep.mubr.msk.bf16.mxu1 %vm14078_vm1, %v18027_v3 }
 0x169   : > { %v3136_v2 = vsel %vm1054_vm0, %v3071_v42, 0 }
 0x16a   : > { %v1204_v12 = vpop.f32.mrb[56].mxu0  ;;  %v1470_v14 = vpop.f32.mrb[56].mxu1 }
 0x16b   : > { %v12087_v16 = vpop.f32.mrb[57].mxu0  ;;  %v14708_v18 = vadd.f32 %v1470_v14, %v1204_v12  ;;  %v12173_v21 = vpop.f32.mrb[57].mxu1 }
 0x16c   : > { %v1207_v23 = vpop.f32.mrb[58].mxu0  ;;  %v1473_v25 = vpop.f32.mrb[58].mxu1 }
 0x16d   : > { %v12088_v27 = vpop.f32.mrb[59].mxu0  ;;  %v14710_v29 = vadd.f32 %v1473_v25, %v1207_v23  ;;  %v12174_v31 = vpop.f32.mrb[59].mxu1  ;;  %v14743_v25 = vpack.c.bf16 %v2640_v11, %v2639_v9  ;;  %v2273_v9 = vld [vmem:[%s14261_s4 + $0x4b] sm:$0xff] }
 0x16e   : > { %v2643_v11 = vld [vmem:[%s14261_s4 + $0x44] sm:$0xff] }
 0x16f   : > { %12282 = vmatmul.mubr.msk.bf16.gmra.mrb[164].mxu0 %vm990_vm2, %v1585_v17  ;;  %12368 = vmatmul.mubr.msk.bf16.gmra.mrb[164].mxu1 %vm990_vm2, %v1956_v24  ;;  %v2308_v17 = vpack.c.bf16 %v2269_v8, %v2268_v4  ;;  %v2272_v8 = vld [vmem:[%s14261_s4 + $0x43] sm:$0xff] }
 0x170   : > { %12373 = vmatprep.mubr.msk.bf16.mxu0 %vm14078_vm1, %v18027_v3  ;;  %12459 = vmatprep.mubr.msk.bf16.mxu1 %vm14078_vm1, %v18027_v3 }
 0x172   : > { %v1212_v41 = vpop.f32.mrb[60].mxu0  ;;  %v1478_v43 = vpop.f32.mrb[60].mxu1 }
 0x173   : > { %v12091_v45 = vpop.f32.mrb[61].mxu0  ;;  %v14725_v51 = vadd.f32 %v1478_v43, %v1212_v41  ;;  %v12177_v52 = vpop.f32.mrb[61].mxu1  ;;  %v2642_v41 = vld [vmem:[%s14261_s4 + $0x3c] sm:$0xff] }
 0x174   : > { %v1215_v53 = vpop.f32.mrb[62].mxu0  ;;  %v1481_v58 = vpop.f32.mrb[62].mxu1 }
 0x175   : > { %v12092_v60 = vpop.f32.mrb[63].mxu0  ;;  %v14727_v61 = vadd.f32 %v1481_v58, %v1215_v53  ;;  %v12178_v0 = vpop.f32.mrb[63].mxu1  ;;  %v14760_v58 = vpack.c.bf16 %v2642_v41, %v2641_v40 }
 0x177   : > { %12374 = vmatmul.mubr.msk.bf16.vlgmr.msra.gmra.mrb[168].mxu0 %vm990_vm2, %v2307_v49  ;;  %12460 = vmatmul.mubr.msk.bf16.vlgmr.msra.gmra.mrb[168].mxu1 %vm990_vm2, %v2678_v56  ;;  %v2309_v49 = vpack.c.bf16 %v2271_v36, %v2270_v35 }
 0x178   : > { %12377 = vmatprep.mubr.msk.bf16.mxu0 %vm14078_vm1, %v18027_v3  ;;  %12463 = vmatprep.mubr.msk.bf16.mxu1 %vm14078_vm1, %v18027_v3 }
 0x179   : > { %12544 = vmatpush3.bf16.msra.mxu0 %v3136_v2 }
 0x17a   : > { %v1220_v12 = vpop.f32.mrb[64].mxu0  ;;  %12715 = vmatprep.subr.bf16.mxu0 %v18027_v3  ;;  %v1486_v14 = vpop.f32.mrb[64].mxu1 }
 0x17b   : > { %v12095_v16 = vpop.f32.mrb[65].mxu0  ;;  %v14741_v21 = vadd.f32 %v1486_v14, %v1220_v12  ;;  %v12181_v23 = vpop.f32.mrb[65].mxu1  ;;  %v2644_v12 = vld [vmem:[%s14261_s4 + $0x4c] sm:$0xff] }
 0x17c   : > { %v1223_v24 = vpop.f32.mrb[66].mxu0  ;;  %v1489_v27 = vpop.f32.mrb[66].mxu1  ;;  %v2310_v23 = vpack.c.bf16 %v2273_v9, %v2272_v8 }
 0x17d   : > { %v12096_v31 = vpop.f32.mrb[67].mxu0  ;;  %v14745_v32 = vadd.f32 %v1489_v27, %v1223_v24  ;;  %v12182_v34 = vpop.f32.mrb[67].mxu1 }
 0x17e   : > { %v14777_v34 = vpack.c.bf16 %v2644_v12, %v2643_v11 }
 0x17f   : > { %12378 = vmatmul.mubr.msk.bf16.gmra.mrb[172].mxu0 %vm990_vm2, %v2308_v17  ;;  %12464 = vmatmul.mubr.msk.bf16.gmra.mrb[172].mxu1 %vm990_vm2, %v14743_v25 }
 0x180   : > { %12381 = vmatprep.mubr.msk.bf16.mxu0 %vm14078_vm1, %v18027_v3  ;;  %12467 = vmatprep.mubr.msk.bf16.mxu1 %vm14078_vm1, %v18027_v3 }
 0x182   : > { %v1228_v42 = vpop.f32.mrb[68].mxu0  ;;  %v1494_v43 = vpop.f32.mrb[68].mxu1 }
 0x183   : > { %v12099_v45 = vpop.f32.mrb[69].mxu0  ;;  %v14758_v52 = vadd.f32 %v1494_v43, %v1228_v42  ;;  %v12185_v53 = vpop.f32.mrb[69].mxu1  ;;  %v2274_v42 = vld [vmem:[%s14261_s4 + $0x53] sm:$0xff]  ;;  %v2275_v43 = vld [vmem:[%s14261_s4 + $0x5b] sm:$0xff] }
 0x184   : > { %v1231_v56 = vpop.f32.mrb[70].mxu0  ;;  %v1497_v60 = vpop.f32.mrb[70].mxu1  ;;  %v2645_v45 = vld [vmem:[%s14261_s4 + $0x54] sm:$0xff] }
 0x185   : > { %v12100_v0 = vpop.f32.mrb[71].mxu0  ;;  %v14762_v2 = vadd.f32 %v1497_v60, %v1231_v56  ;;  %v12186_v4 = vpop.f32.mrb[71].mxu1 }
 0x186   : > { %v2311_v0 = vpack.c.bf16 %v2275_v43, %v2274_v42 }
 0x187   : > { %12382 = vmatmul.mubr.msk.bf16.gmra.mrb[176].mxu0 %vm990_vm2, %v2309_v49  ;;  %12468 = vmatmul.mubr.msk.bf16.gmra.mrb[176].mxu1 %vm990_vm2, %v14760_v58  ;;  %v2646_v49 = vld [vmem:[%s14261_s4 + $0x5c] sm:$0xff] }
 0x188   : > { %12385 = vmatprep.mubr.msk.bf16.mxu0 %vm14078_vm1, %v18027_v3  ;;  %12471 = vmatprep.mubr.msk.bf16.mxu1 %vm14078_vm1, %v18027_v3  ;;  %v14794_v11 = vpack.c.bf16 %v2646_v49, %v2645_v45  ;;  %v3441_v45 = vld [vmem:[%s18045_s10 + $0x1c] sm:$0xf] }
 0x18a   : > { %v1236_v14 = vpop.f32.mrb[72].mxu0  ;;  %v1502_v16 = vpop.f32.mrb[72].mxu1 }
 0x18b   : > { %v12103_v17 = vpop.f32.mrb[73].mxu0  ;;  %v14775_v24 = vadd.f32 %v1502_v16, %v1236_v14  ;;  %v12189_v27 = vpop.f32.mrb[73].mxu1 }
 0x18c   : > { %v1239_v31 = vpop.f32.mrb[74].mxu0  ;;  %v1505_v35 = vpop.f32.mrb[74].mxu1  ;;  %v2277_v27 = vld [vmem:[%s14261_s4 + $0x6b] sm:$0xff] }
 0x18d   : > { %v12104_v36 = vpop.f32.mrb[75].mxu0  ;;  %v14779_v40 = vadd.f32 %v1505_v35, %v1239_v31  ;;  %v12190_v41 = vpop.f32.mrb[75].mxu1  ;;  %v2647_v31 = vld [vmem:[%s14261_s4 + $0x64] sm:$0xff]  ;;  %v2648_v35 = vld [vmem:[%s14261_s4 + $0x6c] sm:$0xff] }
 0x18f   : > { %12386 = vmatmul.mubr.msk.bf16.gmra.mrb[180].mxu0 %vm990_vm2, %v2310_v23  ;;  %12472 = vmatmul.mubr.msk.bf16.gmra.mrb[180].mxu1 %vm990_vm2, %v14777_v34  ;;  %v2276_v23 = vld [vmem:[%s14261_s4 + $0x63] sm:$0xff] }
 0x190   : > { %12389 = vmatprep.mubr.msk.bf16.mxu0 %vm14078_vm1, %v18027_v3  ;;  %12475 = vmatprep.mubr.msk.bf16.mxu1 %vm14078_vm1, %v18027_v3  ;;  %v2312_v43 = vpack.c.bf16 %v2277_v27, %v2276_v23  ;;  %v2279_v23 = vld [vmem:[%s14261_s4 + $0x7b] sm:$0xff] }
 0x191   : > { %v2649_v27 = vld [vmem:[%s14261_s4 + $0x74] sm:$0xff] }
 0x192   : > { %v1244_v53 = vpop.f32.mrb[76].mxu0  ;;  %v1510_v56 = vpop.f32.mrb[76].mxu1 }
 0x193   : > { %v12107_v60 = vpop.f32.mrb[77].mxu0  ;;  %v14792_v4 = vadd.f32 %v1510_v56, %v1244_v53  ;;  %v12193_v8 = vpop.f32.mrb[77].mxu1 }
 0x194   : > { %v1247_v9 = vpop.f32.mrb[78].mxu0  ;;  %v1513_v12 = vpop.f32.mrb[78].mxu1  ;;  %v14814_v60 = vpack.c.bf16 %v2648_v35, %v2647_v31  ;;  %v2650_v31 = vld [vmem:[%s14261_s4 + $0x7c] sm:$0xff] }
 0x195   : > { %v12108_v14 = vpop.f32.mrb[79].mxu0  ;;  %v14796_v16 = vadd.f32 %v1513_v12, %v1247_v9  ;;  %v12194_v17 = vpop.f32.mrb[79].mxu1 }
 0x196   : > { %v2278_v17 = vld [vmem:[%s14261_s4 + $0x73] sm:$0xff] }
 0x197   : > { %12390 = vmatmul.mubr.msk.bf16.gmra.mrb[184].mxu0 %vm990_vm2, %v2311_v0  ;;  %12476 = vmatmul.mubr.msk.bf16.gmra.mrb[184].mxu1 %vm990_vm2, %v14794_v11  ;;  %v3442_v0 = vpack.c.bf16 %v3441_v45, %v3441_v45 }
 0x198   : > { %12393 = vmatprep.mubr.msk.bf16.mxu0 %vm14078_vm1, %v18027_v3  ;;  %12479 = vmatprep.mubr.msk.bf16.mxu1 %vm14078_vm1, %v18027_v3 }
 0x199   : > { %v3507_v14 = vsel %vm1054_vm0, %v3442_v0, 0 }
 0x19a   : > { %v1252_v36 = vpop.f32.mrb[80].mxu0  ;;  %v1518_v41 = vpop.f32.mrb[80].mxu1  ;;  %12630 = vmatpush3.bf16.msra.mxu1 %v3507_v14 }
 0x19b   : > { %v12111_v42 = vpop.f32.mrb[81].mxu0  ;;  %v14812_v49 = vadd.f32 %v1518_v41, %v1252_v36  ;;  %v12197_v56 = vpop.f32.mrb[81].mxu1 }
 0x19c   : > { %v1255_v53 = vpop.f32.mrb[82].mxu0  ;;  %v1521_v9 = vpop.f32.mrb[82].mxu1  ;;  %v14829_v56 = vpack.c.bf16 %v2650_v31, %v2649_v27  ;;  %v2652_v27 = vld [vmem:[%s14261_s4 + $0x8c] sm:$0xff] }
 0x19d   : > { %v12112_v8 = vpop.f32.mrb[83].mxu0  ;;  %v12198_v12 = vpop.f32.mrb[83].mxu1 }
 0x19f   : > { %12394 = vmatmul.mubr.msk.bf16.gmra.mrb[188].mxu0 %vm990_vm2, %v2312_v43  ;;  %12480 = vmatmul.mubr.msk.bf16.gmra.mrb[188].mxu1 %vm990_vm2, %v14814_v60  ;;  %v2313_v43 = vpack.c.bf16 %v2279_v23, %v2278_v17  ;;  %v2280_v17 = vld [vmem:[%s14261_s4 + $0x83] sm:$0xff]  ;;  %v2281_v23 = vld [vmem:[%s14261_s4 + $0x8b] sm:$0xff] }
 0x1a0   : > { %12397 = vmatprep.mubr.msk.bf16.mxu0 %vm14078_vm1, %v18027_v3  ;;  %12483 = vmatprep.mubr.msk.bf16.mxu1 %vm14078_vm1, %v18027_v3 }
 0x1a2   : > { %v1688_v35 = vpop.f32.mrb[84].mxu0  ;;  %v2059_v42 = vpop.f32.mrb[84].mxu1 }
 0x1a3   : > { %v1854_v36 = vadd.f32 %v1688_v35, %v14540_v44  ;;  %v12203_v41 = vpop.f32.mrb[85].mxu0  ;;  %v12289_v53 = vpop.f32.mrb[85].mxu1  ;;  %v18049_v44 = vmov 0.0  }
 0x1a4   : > { %v1691_v45 = vpop.f32.mrb[86].mxu0  ;;  %v2062_v12 = vpop.f32.mrb[86].mxu1 }
 0x1a5   : > { %v1855_v0 = vadd.f32 %v1691_v45, %v14542_v50  ;;  %v14832_v8 = vadd.f32 %v2059_v42, %v1854_v36  ;;  %v12204_v9 = vpop.f32.mrb[87].mxu0  ;;  %v12290_v14 = vpop.f32.mrb[87].mxu1  ;;  %v2651_v50 = vld [vmem:[%s14261_s4 + $0x84] sm:$0xff]  ;;  %v2314_v42 = vpack.c.bf16 %v2281_v23, %v2280_v17  ;;  %v2283_v17 = vld [vmem:[%s14261_s4 + $0x9b] sm:$0xff] }
 0x1a6   : > { %v14848_v53 = vpack.c.bf16 %v2652_v27, %v2651_v50  ;;  %v2654_v23 = vld [vmem:[%s14261_s4 + $0x9c] sm:$0xff] }
 0x1a7   : > { %18047 = vst [vmem:[#allocation6_spill] sm:$0xff] %v14832_v8  ;;  %v14834_v3 = vadd.f32 %v2062_v12, %v1855_v0  ;;  %12398 = vmatmul.mubr.msk.bf16.gmra.mrb[192].mxu0 %vm990_vm2, %v2313_v43  ;;  %12484 = vmatmul.mubr.msk.bf16.gmra.mrb[192].mxu1 %vm990_vm2, %v14829_v56 }
 0x1a8   : > { %12401 = vmatprep.mubr.msk.bf16.mxu0 %vm14078_vm1, %v18049_v44  ;;  %12487 = vmatprep.mubr.msk.bf16.mxu1 %vm14078_vm1, %v18049_v44 }
 0x1a9   : > { %18048 = vst [vmem:[#allocation7_spill] sm:$0xff] %v14834_v3 }
 0x1aa   : > { %v1696_v31 = vpop.f32.mrb[88].mxu0  ;;  %v2067_v41 = vpop.f32.mrb[88].mxu1 }
 0x1ab   : > { %v1856_v35 = vadd.f32 %v1696_v31, %v14552_v57  ;;  %v12207_v36 = vpop.f32.mrb[89].mxu0  ;;  %v12293_v45 = vpop.f32.mrb[89].mxu1  ;;  %v2282_v57 = vld [vmem:[%s14261_s4 + $0x93] sm:$0xff] }
 0x1ac   : > { %v1699_v43 = vpop.f32.mrb[90].mxu0  ;;  %v2070_v14 = vpop.f32.mrb[90].mxu1 }
 0x1ad   : > { %v1857_v0 = vadd.f32 %v1699_v43, %v14554_v63  ;;  %v14851_v9 = vadd.f32 %v2067_v41, %v1856_v35  ;;  %v12208_v12 = vpop.f32.mrb[91].mxu0  ;;  %v12294_v3 = vpop.f32.mrb[91].mxu1  ;;  %v2653_v63 = vld [vmem:[%s14261_s4 + $0x94] sm:$0xff]  ;;  %v2315_v35 = vpack.c.bf16 %v2283_v17, %v2282_v57  ;;  %v2285_v57 = vld [vmem:[%s14261_s4 + $0xab] sm:$0xff] }
 0x1ae   : > { %v2656_v17 = vld [vmem:[%s14261_s4 + $0xac] sm:$0xff] }
 0x1af   : > { %v14853_v8 = vadd.f32 %v2070_v14, %v1857_v0  ;;  %12402 = vmatmul.mubr.msk.bf16.gmra.mrb[196].mxu0 %vm990_vm2, %v2314_v42  ;;  %12488 = vmatmul.mubr.msk.bf16.gmra.mrb[196].mxu1 %vm990_vm2, %v14848_v53  ;;  %v14867_v42 = vpack.c.bf16 %v2654_v23, %v2653_v63 }
 0x1b0   : > { %12405 = vmatprep.mubr.msk.bf16.mxu0 %vm14078_vm1, %v18049_v44  ;;  %12491 = vmatprep.mubr.msk.bf16.mxu1 %vm14078_vm1, %v18049_v44 }
 0x1b1   : > { %18050 = vst [vmem:[#allocation8_spill] sm:$0xff] %v14853_v8 }
 0x1b2   : > { %v1704_v50 = vpop.f32.mrb[92].mxu0  ;;  %v2075_v31 = vpop.f32.mrb[92].mxu1 }
 0x1b3   : > { %v1858_v3 = vadd.f32 %v1704_v50, %v14564_v7  ;;  %v12211_v27 = vpop.f32.mrb[93].mxu0  ;;  %v12297_v41 = vpop.f32.mrb[93].mxu1  ;;  %v2284_v7 = vld [vmem:[%s14261_s4 + $0xa3] sm:$0xff] }
 0x1b4   : > { %v1707_v36 = vpop.f32.mrb[94].mxu0  ;;  %v2078_v12 = vpop.f32.mrb[94].mxu1  ;;  %v2316_v27 = vpack.c.bf16 %v2285_v57, %v2284_v7  ;;  %v2287_v7 = vld [vmem:[%s14261_s4 + $0xbb] sm:$0xff] }
 0x1b5   : > { %v1859_v43 = vadd.f32 %v1707_v36, %v14566_v13  ;;  %v14870_v45 = vadd.f32 %v2075_v31, %v1858_v3  ;;  %v12212_v0 = vpop.f32.mrb[95].mxu0  ;;  %v12298_v14 = vpop.f32.mrb[95].mxu1  ;;  %v2655_v13 = vld [vmem:[%s14261_s4 + $0xa4] sm:$0xff]  ;;  %v2658_v57 = vld [vmem:[%s14261_s4 + $0xbc] sm:$0xff] }
 0x1b6   : > { %v14886_v36 = vpack.c.bf16 %v2656_v17, %v2655_v13 }
 0x1b7   : > { %v14872_v8 = vadd.f32 %v2078_v12, %v1859_v43  ;;  %12406 = vmatmul.mubr.msk.bf16.gmra.mrb[200].mxu0 %vm990_vm2, %v2315_v35  ;;  %12492 = vmatmul.mubr.msk.bf16.gmra.mrb[200].mxu1 %vm990_vm2, %v14867_v42 }
 0x1b8   : > { %12409 = vmatprep.mubr.msk.bf16.mxu0 %vm14078_vm1, %v18049_v44  ;;  %12495 = vmatprep.mubr.msk.bf16.mxu1 %vm14078_vm1, %v18049_v44 }
 0x1b9   : > { %18051 = vst [vmem:[#allocation9_spill] sm:$0xff] %v14872_v8 }
 0x1ba   : > { %v1712_v63 = vpop.f32.mrb[96].mxu0  ;;  %v2083_v3 = vpop.f32.mrb[96].mxu1 }
 0x1bb   : > { %v1860_v23 = vadd.f32 %v1712_v63, %v14576_v20  ;;  %v12215_v50 = vpop.f32.mrb[97].mxu0  ;;  %v12301_v35 = vpop.f32.mrb[97].mxu1  ;;  %v2286_v20 = vld [vmem:[%s14261_s4 + $0xb3] sm:$0xff] }
 0x1bc   : > { %v1715_v31 = vpop.f32.mrb[98].mxu0  ;;  %v2086_v12 = vpop.f32.mrb[98].mxu1  ;;  %v2317_v50 = vpack.c.bf16 %v2287_v7, %v2286_v20  ;;  %v2289_v20 = vld [vmem:[%s14261_s4 + $0xcb] sm:$0xff] }
 0x1bd   : > { %v1861_v41 = vadd.f32 %v1715_v31, %v14578_v26  ;;  %v14889_v43 = vadd.f32 %v2083_v3, %v1860_v23  ;;  %v12216_v0 = vpop.f32.mrb[99].mxu0  ;;  %v12302_v14 = vpop.f32.mrb[99].mxu1  ;;  %v2657_v26 = vld [vmem:[%s14261_s4 + $0xb4] sm:$0xff]  ;;  %v2660_v7 = vld [vmem:[%s14261_s4 + $0xcc] sm:$0xff] }
 0x1be   : > { %v14905_v31 = vpack.c.bf16 %v2658_v57, %v2657_v26 }
 0x1bf   : > { %v14891_v8 = vadd.f32 %v2086_v12, %v1861_v41  ;;  %12410 = vmatmul.mubr.msk.bf16.gmra.mrb[204].mxu0 %vm990_vm2, %v2316_v27  ;;  %12496 = vmatmul.mubr.msk.bf16.gmra.mrb[204].mxu1 %vm990_vm2, %v14886_v36 }
 0x1c0   : > { %12413 = vmatprep.mubr.msk.bf16.mxu0 %vm14078_vm1, %v18049_v44  ;;  %12499 = vmatprep.mubr.msk.bf16.mxu1 %vm14078_vm1, %v18049_v44 }
 0x1c1   : > { %18052 = vst [vmem:[#allocation10_spill] sm:$0xff] %v14891_v8 }
 0x1c2   : > { %v1720_v13 = vpop.f32.mrb[100].mxu0  ;;  %v2091_v23 = vpop.f32.mrb[100].mxu1 }
 0x1c3   : > { %v1862_v17 = vadd.f32 %v1720_v13, %v14588_v33  ;;  %v12219_v63 = vpop.f32.mrb[101].mxu0  ;;  %v12305_v27 = vpop.f32.mrb[101].mxu1  ;;  %v2288_v33 = vld [vmem:[%s14261_s4 + $0xc3] sm:$0xff] }
 0x1c4   : > { %v1723_v3 = vpop.f32.mrb[102].mxu0  ;;  %v2094_v12 = vpop.f32.mrb[102].mxu1  ;;  %v2318_v63 = vpack.c.bf16 %v2289_v20, %v2288_v33  ;;  %v2291_v33 = vld [vmem:[%s14261_s4 + $0xdb] sm:$0xff] }
 0x1c5   : > { %v1863_v35 = vadd.f32 %v1723_v3, %v14590_v39  ;;  %v14908_v41 = vadd.f32 %v2091_v23, %v1862_v17  ;;  %v12220_v0 = vpop.f32.mrb[103].mxu0  ;;  %v12306_v14 = vpop.f32.mrb[103].mxu1  ;;  %v2659_v39 = vld [vmem:[%s14261_s4 + $0xc4] sm:$0xff]  ;;  %v2662_v20 = vld [vmem:[%s14261_s4 + $0xdc] sm:$0xff] }
 0x1c6   : > { %v14924_v3 = vpack.c.bf16 %v2660_v7, %v2659_v39 }
 0x1c7   : > { %v14910_v8 = vadd.f32 %v2094_v12, %v1863_v35  ;;  %12414 = vmatmul.mubr.msk.bf16.gmra.mrb[208].mxu0 %vm990_vm2, %v2317_v50  ;;  %12500 = vmatmul.mubr.msk.bf16.gmra.mrb[208].mxu1 %vm990_vm2, %v14905_v31 }
 0x1c8   : > { %12417 = vmatprep.mubr.msk.bf16.mxu0 %vm14078_vm1, %v18049_v44  ;;  %12503 = vmatprep.mubr.msk.bf16.mxu1 %vm14078_vm1, %v18049_v44 }
 0x1c9   : > { %18053 = vst [vmem:[#allocation11_spill] sm:$0xff] %v14910_v8 }
 0x1ca   : > { %v1728_v26 = vpop.f32.mrb[104].mxu0  ;;  %v2099_v17 = vpop.f32.mrb[104].mxu1 }
 0x1cb   : > { %v1864_v57 = vadd.f32 %v1728_v26, %v14600_v47  ;;  %v12223_v13 = vpop.f32.mrb[105].mxu0  ;;  %v12309_v50 = vpop.f32.mrb[105].mxu1  ;;  %v2290_v47 = vld [vmem:[%s14261_s4 + $0xd3] sm:$0xff] }
 0x1cc   : > { %v1731_v23 = vpop.f32.mrb[106].mxu0  ;;  %v2102_v12 = vpop.f32.mrb[106].mxu1  ;;  %v2319_v13 = vpack.c.bf16 %v2291_v33, %v2290_v47  ;;  %v2293_v47 = vld [vmem:[%s14261_s4 + $0xeb] sm:$0xff] }
 0x1cd   : > { %v1865_v27 = vadd.f32 %v1731_v23, %v14602_v54  ;;  %v14927_v35 = vadd.f32 %v2099_v17, %v1864_v57  ;;  %v12224_v0 = vpop.f32.mrb[107].mxu0  ;;  %v12310_v14 = vpop.f32.mrb[107].mxu1  ;;  %v2661_v54 = vld [vmem:[%s14261_s4 + $0xd4] sm:$0xff]  ;;  %v2664_v33 = vld [vmem:[%s14261_s4 + $0xec] sm:$0xff] }
 0x1ce   : > { %v14943_v23 = vpack.c.bf16 %v2662_v20, %v2661_v54 }
 0x1cf   : > { %v14929_v8 = vadd.f32 %v2102_v12, %v1865_v27  ;;  %12418 = vmatmul.mubr.msk.bf16.gmra.mrb[212].mxu0 %vm990_vm2, %v2318_v63  ;;  %12504 = vmatmul.mubr.msk.bf16.gmra.mrb[212].mxu1 %vm990_vm2, %v14924_v3 }
 0x1d0   : > { %12421 = vmatprep.mubr.msk.bf16.mxu0 %vm14078_vm1, %v18049_v44  ;;  %12507 = vmatprep.mubr.msk.bf16.mxu1 %vm14078_vm1, %v18049_v44 }
 0x1d1   : > { %18054 = vst [vmem:[#allocation12_spill] sm:$0xff] %v14929_v8 }
 0x1d2   : > { %v1736_v39 = vpop.f32.mrb[108].mxu0  ;;  %v2107_v57 = vpop.f32.mrb[108].mxu1 }
 0x1d3   : > { %v1866_v7 = vadd.f32 %v1736_v39, %v14612_v62  ;;  %v12227_v26 = vpop.f32.mrb[109].mxu0  ;;  %v12313_v63 = vpop.f32.mrb[109].mxu1  ;;  %v2292_v62 = vld [vmem:[%s14261_s4 + $0xe3] sm:$0xff] }
 0x1d4   : > { %v1739_v17 = vpop.f32.mrb[110].mxu0  ;;  %v2110_v12 = vpop.f32.mrb[110].mxu1  ;;  %v2320_v26 = vpack.c.bf16 %v2293_v47, %v2292_v62  ;;  %v2295_v62 = vld [vmem:[%s14261_s4 + $0xfb] sm:$0xff] }
 0x1d5   : > { %v1867_v50 = vadd.f32 %v1739_v17, %v14614_v6  ;;  %v14946_v27 = vadd.f32 %v2107_v57, %v1866_v7  ;;  %v12228_v0 = vpop.f32.mrb[111].mxu0  ;;  %v12314_v14 = vpop.f32.mrb[111].mxu1  ;;  %v2663_v6 = vld [vmem:[%s14261_s4 + $0xe4] sm:$0xff]  ;;  %v2666_v47 = vld [vmem:[%s14261_s4 + $0xfc] sm:$0xff] }
 0x1d6   : > { %v14962_v17 = vpack.c.bf16 %v2664_v33, %v2663_v6 }
 0x1d7   : > { %v14948_v8 = vadd.f32 %v2110_v12, %v1867_v50  ;;  %12422 = vmatmul.mubr.msk.bf16.gmra.mrb[216].mxu0 %vm990_vm2, %v2319_v13  ;;  %12508 = vmatmul.mubr.msk.bf16.gmra.mrb[216].mxu1 %vm990_vm2, %v14943_v23 }
 0x1d8   : > { %12425 = vmatprep.mubr.msk.bf16.mxu0 %vm14078_vm1, %v18049_v44  ;;  %12511 = vmatprep.mubr.msk.bf16.mxu1 %vm14078_vm1, %v18049_v44 }
 0x1d9   : > { %18055 = vst [vmem:[#allocation13_spill] sm:$0xff] %v14948_v8 }
 0x1da   : > { %v1744_v54 = vpop.f32.mrb[112].mxu0  ;;  %v2115_v7 = vpop.f32.mrb[112].mxu1 }
 0x1db   : > { %v1868_v20 = vadd.f32 %v1744_v54, %v14624_v15  ;;  %v12231_v39 = vpop.f32.mrb[113].mxu0  ;;  %v12317_v13 = vpop.f32.mrb[113].mxu1  ;;  %v2294_v15 = vld [vmem:[%s14261_s4 + $0xf3] sm:$0xff] }
 0x1dc   : > { %v1747_v57 = vpop.f32.mrb[114].mxu0  ;;  %v2118_v12 = vpop.f32.mrb[114].mxu1  ;;  %v2321_v39 = vpack.c.bf16 %v2295_v62, %v2294_v15  ;;  %v2297_v15 = vld [vmem:[%s14261_s4 + $0x10b] sm:$0xff] }
 0x1dd   : > { %v1869_v63 = vadd.f32 %v1747_v57, %v14626_v22  ;;  %v14965_v50 = vadd.f32 %v2115_v7, %v1868_v20  ;;  %v12232_v0 = vpop.f32.mrb[115].mxu0  ;;  %v12318_v14 = vpop.f32.mrb[115].mxu1  ;;  %v2665_v22 = vld [vmem:[%s14261_s4 + $0xf4] sm:$0xff]  ;;  %v2668_v62 = vld [vmem:[%s14261_s4 + $0x10c] sm:$0xff] }
 0x1de   : > { %v14981_v57 = vpack.c.bf16 %v2666_v47, %v2665_v22 }
 0x1df   : > { %v14967_v8 = vadd.f32 %v2118_v12, %v1869_v63  ;;  %12426 = vmatmul.mubr.msk.bf16.gmra.mrb[220].mxu0 %vm990_vm2, %v2320_v26  ;;  %12512 = vmatmul.mubr.msk.bf16.gmra.mrb[220].mxu1 %vm990_vm2, %v14962_v17 }
 0x1e0   : > { %12429 = vmatprep.mubr.msk.bf16.mxu0 %vm14078_vm1, %v18049_v44  ;;  %12515 = vmatprep.mubr.msk.bf16.mxu1 %vm14078_vm1, %v18049_v44 }
 0x1e1   : > { %18056 = vst [vmem:[#allocation14_spill] sm:$0xff] %v14967_v8 }
 0x1e2   : > { %v1752_v6 = vpop.f32.mrb[116].mxu0  ;;  %v2123_v20 = vpop.f32.mrb[116].mxu1 }
 0x1e3   : > { %v1870_v33 = vadd.f32 %v1752_v6, %v14636_v30  ;;  %v12235_v54 = vpop.f32.mrb[117].mxu0  ;;  %v12321_v26 = vpop.f32.mrb[117].mxu1  ;;  %v2296_v30 = vld [vmem:[%s14261_s4 + $0x103] sm:$0xff] }
 0x1e4   : > { %v1755_v7 = vpop.f32.mrb[118].mxu0  ;;  %v2126_v12 = vpop.f32.mrb[118].mxu1  ;;  %v2322_v54 = vpack.c.bf16 %v2297_v15, %v2296_v30  ;;  %v2299_v30 = vld [vmem:[%s14261_s4 + $0x11b] sm:$0xff] }
 0x1e5   : > { %v1871_v13 = vadd.f32 %v1755_v7, %v14638_v37  ;;  %v14984_v63 = vadd.f32 %v2123_v20, %v1870_v33  ;;  %v12236_v0 = vpop.f32.mrb[119].mxu0  ;;  %v12322_v14 = vpop.f32.mrb[119].mxu1  ;;  %v2667_v37 = vld [vmem:[%s14261_s4 + $0x104] sm:$0xff]  ;;  %v2670_v15 = vld [vmem:[%s14261_s4 + $0x11c] sm:$0xff] }
 0x1e6   : > { %v15000_v7 = vpack.c.bf16 %v2668_v62, %v2667_v37 }
 0x1e7   : > { %v14986_v8 = vadd.f32 %v2126_v12, %v1871_v13  ;;  %12430 = vmatmul.mubr.msk.bf16.gmra.mrb[224].mxu0 %vm990_vm2, %v2321_v39  ;;  %12516 = vmatmul.mubr.msk.bf16.gmra.mrb[224].mxu1 %vm990_vm2, %v14981_v57 }
 0x1e8   : > { %12433 = vmatprep.mubr.msk.bf16.mxu0 %vm14078_vm1, %v18049_v44  ;;  %12519 = vmatprep.mubr.msk.bf16.mxu1 %vm14078_vm1, %v18049_v44 }
 0x1e9   : > { %18057 = vst [vmem:[#allocation15_spill] sm:$0xff] %v14986_v8 }
 0x1ea   : > { %v1760_v22 = vpop.f32.mrb[120].mxu0  ;;  %v2131_v33 = vpop.f32.mrb[120].mxu1 }
 0x1eb   : > { %v1872_v47 = vadd.f32 %v1760_v22, %v14648_v46  ;;  %v12239_v6 = vpop.f32.mrb[121].mxu0  ;;  %v12325_v39 = vpop.f32.mrb[121].mxu1  ;;  %v2298_v46 = vld [vmem:[%s14261_s4 + $0x113] sm:$0xff] }
 0x1ec   : > { %v1763_v20 = vpop.f32.mrb[122].mxu0  ;;  %v2134_v12 = vpop.f32.mrb[122].mxu1  ;;  %v2323_v6 = vpack.c.bf16 %v2299_v30, %v2298_v46  ;;  %v2301_v46 = vld [vmem:[%s14261_s4 + $0x12b] sm:$0xff] }
 0x1ed   : > { %v1873_v26 = vadd.f32 %v1763_v20, %v14650_v55  ;;  %v15003_v13 = vadd.f32 %v2131_v33, %v1872_v47  ;;  %v12240_v0 = vpop.f32.mrb[123].mxu0  ;;  %v12326_v14 = vpop.f32.mrb[123].mxu1  ;;  %v2669_v55 = vld [vmem:[%s14261_s4 + $0x114] sm:$0xff]  ;;  %v2672_v30 = vld [vmem:[%s14261_s4 + $0x12c] sm:$0xff] }
 0x1ee   : > { %v15019_v20 = vpack.c.bf16 %v2670_v15, %v2669_v55 }
 0x1ef   : > { %v15005_v8 = vadd.f32 %v2134_v12, %v1873_v26  ;;  %12434 = vmatmul.mubr.msk.bf16.gmra.mrb[228].mxu0 %vm990_vm2, %v2322_v54  ;;  %12520 = vmatmul.mubr.msk.bf16.gmra.mrb[228].mxu1 %vm990_vm2, %v15000_v7 }
 0x1f0   : > { %12437 = vmatprep.mubr.msk.bf16.mxu0 %vm14078_vm1, %v18049_v44  ;;  %12523 = vmatprep.mubr.msk.bf16.mxu1 %vm14078_vm1, %v18049_v44 }
 0x1f1   : > { %18058 = vst [vmem:[#allocation16_spill] sm:$0xff] %v15005_v8 }
 0x1f2   : > { %v1768_v37 = vpop.f32.mrb[124].mxu0  ;;  %v2139_v47 = vpop.f32.mrb[124].mxu1 }
 0x1f3   : > { %v1874_v62 = vadd.f32 %v1768_v37, %v14660_v1  ;;  %v12243_v22 = vpop.f32.mrb[125].mxu0  ;;  %v12329_v54 = vpop.f32.mrb[125].mxu1  ;;  %v2300_v1 = vld [vmem:[%s14261_s4 + $0x123] sm:$0xff] }
 0x1f4   : > { %v1771_v33 = vpop.f32.mrb[126].mxu0  ;;  %v2142_v12 = vpop.f32.mrb[126].mxu1  ;;  %v2324_v22 = vpack.c.bf16 %v2301_v46, %v2300_v1  ;;  %v2303_v1 = vld [vmem:[%s14261_s4 + $0x13b] sm:$0xff] }
 0x1f5   : > { %v1875_v39 = vadd.f32 %v1771_v33, %v14662_v10  ;;  %v15022_v26 = vadd.f32 %v2139_v47, %v1874_v62  ;;  %v12244_v0 = vpop.f32.mrb[127].mxu0  ;;  %v12330_v14 = vpop.f32.mrb[127].mxu1  ;;  %v2671_v10 = vld [vmem:[%s14261_s4 + $0x124] sm:$0xff]  ;;  %v2674_v46 = vld [vmem:[%s14261_s4 + $0x13c] sm:$0xff] }
 0x1f6   : > { %v15038_v33 = vpack.c.bf16 %v2672_v30, %v2671_v10 }
 0x1f7   : > { %v15024_v8 = vadd.f32 %v2142_v12, %v1875_v39  ;;  %12438 = vmatmul.mubr.msk.bf16.gmra.mrb[232].mxu0 %vm990_vm2, %v2323_v6  ;;  %12524 = vmatmul.mubr.msk.bf16.gmra.mrb[232].mxu1 %vm990_vm2, %v15019_v20 }
 0x1f8   : > { %12441 = vmatprep.mubr.msk.bf16.mxu0 %vm14078_vm1, %v18049_v44  ;;  %12527 = vmatprep.mubr.msk.bf16.mxu1 %vm14078_vm1, %v18049_v44 }
 0x1f9   : > { %18059 = vst [vmem:[#allocation17_spill] sm:$0xff] %v15024_v8 }
 0x1fa   : > { %v1776_v55 = vpop.f32.mrb[128].mxu0  ;;  %v2147_v62 = vpop.f32.mrb[128].mxu1 }
 0x1fb   : > { %v1876_v15 = vadd.f32 %v1776_v55, %v14672_v19  ;;  %v12247_v37 = vpop.f32.mrb[129].mxu0  ;;  %v12333_v6 = vpop.f32.mrb[129].mxu1  ;;  %v2302_v19 = vld [vmem:[%s14261_s4 + $0x133] sm:$0xff] }
 0x1fc   : > { %v1779_v47 = vpop.f32.mrb[130].mxu0  ;;  %v2150_v12 = vpop.f32.mrb[130].mxu1  ;;  %v2325_v37 = vpack.c.bf16 %v2303_v1, %v2302_v19  ;;  %v2305_v19 = vld [vmem:[%s14261_s4 + $0x14b] sm:$0xff] }
 0x1fd   : > { %v1877_v54 = vadd.f32 %v1779_v47, %v14674_v28  ;;  %v15041_v39 = vadd.f32 %v2147_v62, %v1876_v15  ;;  %v12248_v0 = vpop.f32.mrb[131].mxu0  ;;  %v12334_v14 = vpop.f32.mrb[131].mxu1  ;;  %v2673_v28 = vld [vmem:[%s14261_s4 + $0x134] sm:$0xff]  ;;  %v2676_v1 = vld [vmem:[%s14261_s4 + $0x14c] sm:$0xff] }
 0x1fe   : > { %v15057_v47 = vpack.c.bf16 %v2674_v46, %v2673_v28 }
 0x1ff   : > { %v15043_v8 = vadd.f32 %v2150_v12, %v1877_v54  ;;  %12442 = vmatmul.mubr.msk.bf16.gmra.mrb[236].mxu0 %vm990_vm2, %v2324_v22  ;;  %12528 = vmatmul.mubr.msk.bf16.gmra.mrb[236].mxu1 %vm990_vm2, %v15038_v33 }
 0x200   : > { %12445 = vmatprep.mubr.msk.bf16.mxu0 %vm14078_vm1, %v18049_v44  ;;  %12531 = vmatprep.mubr.msk.bf16.mxu1 %vm14078_vm1, %v18049_v44 }
 0x201   : > { %18060 = vst [vmem:[#allocation18_spill] sm:$0xff] %v15043_v8 }
 0x202   : > { %v1784_v10 = vpop.f32.mrb[132].mxu0  ;;  %v2155_v15 = vpop.f32.mrb[132].mxu1 }
 0x203   : > { %v1878_v30 = vadd.f32 %v1784_v10, %v14684_v38  ;;  %v12251_v55 = vpop.f32.mrb[133].mxu0  ;;  %v12337_v22 = vpop.f32.mrb[133].mxu1  ;;  %v2304_v38 = vld [vmem:[%s14261_s4 + $0x143] sm:$0xff] }
 0x204   : > { %v1787_v62 = vpop.f32.mrb[134].mxu0  ;;  %v2158_v12 = vpop.f32.mrb[134].mxu1  ;;  %v2326_v55 = vpack.c.bf16 %v2305_v19, %v2304_v38 }
 0x205   : > { %v1879_v6 = vadd.f32 %v1787_v62, %v14686_v48  ;;  %v15060_v54 = vadd.f32 %v2155_v15, %v1878_v30  ;;  %v12252_v0 = vpop.f32.mrb[135].mxu0  ;;  %v12338_v14 = vpop.f32.mrb[135].mxu1  ;;  %v2675_v48 = vld [vmem:[%s14261_s4 + $0x144] sm:$0xff] }
 0x206   : > { %v15076_v62 = vpack.c.bf16 %v2676_v1, %v2675_v48 }
 0x207   : > { %v15062_v8 = vadd.f32 %v2158_v12, %v1879_v6  ;;  %12446 = vmatmul.mubr.msk.bf16.gmra.mrb[240].mxu0 %vm990_vm2, %v2325_v37  ;;  %12532 = vmatmul.mubr.msk.bf16.gmra.mrb[240].mxu1 %vm990_vm2, %v15057_v47 }
 0x208   : > { %12449 = vmatprep.mubr.msk.bf16.mxu0 %vm14078_vm1, %v18049_v44  ;;  %12535 = vmatprep.mubr.msk.bf16.mxu1 %vm14078_vm1, %v18049_v44 }
 0x209   : > { %18061 = vst [vmem:[#allocation19_spill] sm:$0xff] %v15062_v8 }
 0x20a   : > { %v1792_v28 = vpop.f32.mrb[136].mxu0  ;;  %v2163_v30 = vpop.f32.mrb[136].mxu1 }
 0x20b   : > { %v1880_v46 = vadd.f32 %v1792_v28, %v14696_v59  ;;  %v12255_v10 = vpop.f32.mrb[137].mxu0  ;;  %v12341_v37 = vpop.f32.mrb[137].mxu1  ;;  %v2306_v59 = vld [vmem:[%s14261_s4 + $0x153] sm:$0xf] }
 0x20c   : > { %v1795_v15 = vpop.f32.mrb[138].mxu0  ;;  %v2166_v12 = vpop.f32.mrb[138].mxu1  ;;  %v2327_v28 = vpack.c.bf16 %v2306_v59, %v2306_v59 }
 0x20d   : > { %v1881_v22 = vadd.f32 %v1795_v15, %v14698_v5  ;;  %v15079_v6 = vadd.f32 %v2163_v30, %v1880_v46  ;;  %v12256_v0 = vpop.f32.mrb[139].mxu0  ;;  %v12342_v14 = vpop.f32.mrb[139].mxu1  ;;  %v2677_v5 = vld [vmem:[%s14261_s4 + $0x154] sm:$0xf] }
 0x20e   : > { %v2698_v30 = vpack.c.bf16 %v2677_v5, %v2677_v5  ;;  %v3380_v14 = vld [vmem:[%s14261_s4 + $0x2d] sm:$0xff] }
 0x20f   : > { %v15081_v8 = vadd.f32 %v2166_v12, %v1881_v22  ;;  %12450 = vmatmul.mubr.msk.bf16.gmra.mrb[244].mxu0 %vm990_vm2, %v2326_v55  ;;  %12536 = vmatmul.mubr.msk.bf16.gmra.mrb[244].mxu1 %vm990_vm2, %v15076_v62 }
 0x210   : > { %12453 = vmatprep.mubr.msk.bf16.mxu0 %vm14078_vm1, %v18049_v44  ;;  %12539 = vmatprep.mubr.msk.bf16.mxu1 %vm14078_vm1, %v18049_v44 }
 0x212   : > { %v1800_v38 = vpop.f32.mrb[140].mxu0  ;;  %v2171_v1 = vpop.f32.mrb[140].mxu1 }
 0x213   : > { %v1882_v19 = vadd.f32 %v1800_v38, %v14708_v18  ;;  %v12259_v48 = vpop.f32.mrb[141].mxu0  ;;  %v12345_v10 = vpop.f32.mrb[141].mxu1  ;;  %v3812_v18 = vld [vmem:[%s18045_s10 + $0x20] sm:$0xf] }
 0x214   : > { %v1803_v46 = vpop.f32.mrb[142].mxu0  ;;  %v2174_v22 = vpop.f32.mrb[142].mxu1  ;;  %v3813_v5 = vpack.c.bf16 %v3812_v18, %v3812_v18 }
 0x215   : > { %v1883_v55 = vadd.f32 %v1803_v46, %v14710_v29  ;;  %v15094_v15 = vadd.f32 %v2171_v1, %v1882_v19  ;;  %v12260_v37 = vpop.f32.mrb[143].mxu0  ;;  %v12346_v0 = vpop.f32.mrb[143].mxu1  ;;  %v3379_v29 = vld [vmem:[%s14261_s4 + $0x25] sm:$0xff] }
 0x216   : > { %v3420_v46 = vpack.c.bf16 %v3380_v14, %v3379_v29  ;;  %v3878_v0 = vsel %vm1054_vm0, %v3813_v5, 0 }
 0x217   : > { %v15096_v12 = vadd.f32 %v2174_v22, %v1883_v55  ;;  %12454 = vmatmul.mubr.msk.bf16.gmra.mrb[248].mxu0 %vm990_vm2, %v2327_v28  ;;  %12540 = vmatmul.mubr.msk.bf16.gmra.mrb[248].mxu1 %vm990_vm2, %v2698_v30 }
 0x218   : > { %12545 = vmatprep.mubr.msk.bf16.mxu0 %vm14078_vm1, %v18049_v44  ;;  %12631 = vmatprep.mubr.msk.bf16.mxu1 %vm14078_vm1, %v18049_v44 }
 0x219   : > { %18062 = vst [vmem:[#allocation20_spill] sm:$0xff] %v15096_v12 }
 0x21a   : > { %v1808_v59 = vpop.f32.mrb[144].mxu0  ;;  %v2179_v48 = vpop.f32.mrb[144].mxu1 }
 0x21b   : > { %v1884_v38 = vadd.f32 %v1808_v59, %v14725_v51  ;;  %v12263_v19 = vpop.f32.mrb[145].mxu0  ;;  %v12349_v28 = vpop.f32.mrb[145].mxu1  ;;  %v3381_v51 = vld [vmem:[%s14261_s4 + $0x35] sm:$0xff] }
 0x21c   : > { %v1811_v1 = vpop.f32.mrb[146].mxu0  ;;  %v2182_v37 = vpop.f32.mrb[146].mxu1 }
 0x21d   : > { %v1885_v10 = vadd.f32 %v1811_v1, %v14727_v61  ;;  %v15111_v30 = vadd.f32 %v2179_v48, %v1884_v38  ;;  %v12264_v55 = vpop.f32.mrb[147].mxu0  ;;  %v12350_v22 = vpop.f32.mrb[147].mxu1  ;;  %v3382_v61 = vld [vmem:[%s14261_s4 + $0x3d] sm:$0xff] }
 0x21e   : > { %v3421_v38 = vpack.c.bf16 %v3382_v61, %v3381_v51 }
 0x21f   : > { %v15114_v12 = vadd.f32 %v2182_v37, %v1885_v10  ;;  %12546 = vmatmul.mubr.msk.bf16.vlgmr.msra.gmra.mrb[252].mxu0 %vm990_vm2, %v14743_v25  ;;  %12632 = vmatmul.mubr.msk.bf16.vlgmr.msra.gmra.mrb[252].mxu1 %vm990_vm2, %v3420_v46 }
 0x220   : > { %12549 = vmatprep.mubr.msk.bf16.mxu0 %vm14078_vm1, %v18049_v44  ;;  %12635 = vmatprep.mubr.msk.bf16.mxu1 %vm14078_vm1, %v18049_v44 }
 0x221   : > { %12716 = vmatpush3.bf16.msra.mxu0 %v3878_v0 }
 0x222   : > { %v1816_v18 = vpop.f32.mrb[148].mxu0  ;;  %12891 = vmatprep.subr.bf16.mxu0 %v18049_v44  ;;  %v2187_v25 = vpop.f32.mrb[148].mxu1 }
 0x223   : > { %v1886_v29 = vadd.f32 %v1816_v18, %v14741_v21  ;;  %v12267_v14 = vpop.f32.mrb[149].mxu0  ;;  %v12353_v5 = vpop.f32.mrb[149].mxu1  ;;  %v3383_v21 = vld [vmem:[%s14261_s4 + $0x45] sm:$0xff] }
 0x224   : > { %v1819_v59 = vpop.f32.mrb[150].mxu0  ;;  %v2190_v28 = vpop.f32.mrb[150].mxu1 }
 0x225   : > { %v1887_v19 = vadd.f32 %v1819_v59, %v14745_v32  ;;  %v15128_v48 = vadd.f32 %v2187_v25, %v1886_v29  ;;  %v12268_v1 = vpop.f32.mrb[151].mxu0  ;;  %v12354_v46 = vpop.f32.mrb[151].mxu1  ;;  %v3384_v32 = vld [vmem:[%s14261_s4 + $0x4d] sm:$0xff] }
 0x227   : > { %v15130_v10 = vadd.f32 %v2190_v28, %v1887_v19  ;;  %12550 = vmatmul.mubr.msk.bf16.gmra.mrb[0].mxu0 %vm990_vm2, %v14760_v58  ;;  %12636 = vmatmul.mubr.msk.bf16.gmra.mrb[0].mxu1 %vm990_vm2, %v3421_v38  ;;  %v3422_v58 = vpack.c.bf16 %v3384_v32, %v3383_v21 }
 0x228   : > { %12553 = vmatprep.mubr.msk.bf16.mxu0 %vm14078_vm1, %v18049_v44  ;;  %12639 = vmatprep.mubr.msk.bf16.mxu1 %vm14078_vm1, %v18049_v44 }
 0x22a   : > { %v1824_v55 = vpop.f32.mrb[152].mxu0  ;;  %v2195_v0 = vpop.f32.mrb[152].mxu1 }
 0x22b   : > { %v1888_v37 = vadd.f32 %v1824_v55, %v14758_v52  ;;  %v12271_v22 = vpop.f32.mrb[153].mxu0  ;;  %v12357_v61 = vpop.f32.mrb[153].mxu1  ;;  %v3385_v52 = vld [vmem:[%s14261_s4 + $0x55] sm:$0xff] }
 0x22c   : > { %v1827_v51 = vpop.f32.mrb[154].mxu0  ;;  %v2198_v25 = vpop.f32.mrb[154].mxu1 }
 0x22d   : > { %v1889_v18 = vadd.f32 %v1827_v51, %v14762_v2  ;;  %v15143_v29 = vadd.f32 %v2195_v0, %v1888_v37  ;;  %v12272_v14 = vpop.f32.mrb[155].mxu0  ;;  %v12358_v59 = vpop.f32.mrb[155].mxu1  ;;  %v3386_v2 = vld [vmem:[%s14261_s4 + $0x5d] sm:$0xff] }
 0x22f   : > { %v15145_v5 = vadd.f32 %v2198_v25, %v1889_v18  ;;  %12554 = vmatmul.mubr.msk.bf16.gmra.mrb[4].mxu0 %vm990_vm2, %v14777_v34  ;;  %12640 = vmatmul.mubr.msk.bf16.gmra.mrb[4].mxu1 %vm990_vm2, %v3422_v58  ;;  %v3423_v34 = vpack.c.bf16 %v3386_v2, %v3385_v52 }
 0x230   : > { %12557 = vmatprep.mubr.msk.bf16.mxu0 %vm14078_vm1, %v18049_v44  ;;  %12643 = vmatprep.mubr.msk.bf16.mxu1 %vm14078_vm1, %v18049_v44 }
 0x232   : > { %v1832_v38 = vpop.f32.mrb[156].mxu0  ;;  %v2203_v28 = vpop.f32.mrb[156].mxu1 }
 0x233   : > { %v1890_v19 = vadd.f32 %v1832_v38, %v14775_v24  ;;  %v12275_v1 = vpop.f32.mrb[157].mxu0  ;;  %v12361_v21 = vpop.f32.mrb[157].mxu1  ;;  %v3387_v24 = vld [vmem:[%s14261_s4 + $0x65] sm:$0xff] }
 0x234   : > { %v1835_v46 = vpop.f32.mrb[158].mxu0  ;;  %v2206_v22 = vpop.f32.mrb[158].mxu1 }
 0x235   : > { %v1891_v32 = vadd.f32 %v1835_v46, %v14779_v40  ;;  %v15158_v55 = vadd.f32 %v2203_v28, %v1890_v19  ;;  %v12276_v37 = vpop.f32.mrb[159].mxu0  ;;  %v12362_v0 = vpop.f32.mrb[159].mxu1  ;;  %v3388_v40 = vld [vmem:[%s14261_s4 + $0x6d] sm:$0xff] }
 0x237   : > { %v15160_v51 = vadd.f32 %v2206_v22, %v1891_v32  ;;  %12558 = vmatmul.mubr.msk.bf16.gmra.mrb[8].mxu0 %vm990_vm2, %v14794_v11  ;;  %12644 = vmatmul.mubr.msk.bf16.gmra.mrb[8].mxu1 %vm990_vm2, %v3423_v34  ;;  %v3424_v11 = vpack.c.bf16 %v3388_v40, %v3387_v24 }
 0x238   : > { %12561 = vmatprep.mubr.msk.bf16.mxu0 %vm14078_vm1, %v18049_v44  ;;  %12647 = vmatprep.mubr.msk.bf16.mxu1 %vm14078_vm1, %v18049_v44 }
 0x23a   : > { %v1840_v61 = vpop.f32.mrb[160].mxu0  ;;  %v2211_v14 = vpop.f32.mrb[160].mxu1 }
 0x23b   : > { %v1892_v58 = vadd.f32 %v1840_v61, %v14792_v4  ;;  %v12279_v18 = vpop.f32.mrb[161].mxu0  ;;  %v12365_v59 = vpop.f32.mrb[161].mxu1  ;;  %v3389_v4 = vld [vmem:[%s14261_s4 + $0x75] sm:$0xff] }
 0x23c   : > { %v1843_v25 = vpop.f32.mrb[162].mxu0  ;;  %v2214_v19 = vpop.f32.mrb[162].mxu1 }
 0x23d   : > { %v1893_v52 = vadd.f32 %v1843_v25, %v14796_v16  ;;  %v15173_v2 = vadd.f32 %v2211_v14, %v1892_v58  ;;  %v12280_v38 = vpop.f32.mrb[163].mxu0  ;;  %v12366_v1 = vpop.f32.mrb[163].mxu1  ;;  %v3390_v16 = vld [vmem:[%s14261_s4 + $0x7d] sm:$0xff]  ;;  %v3392_v58 = vld [vmem:[%s14261_s4 + $0x8d] sm:$0xff] }
 0x23e   : > { %v18063_v14 = vld [vmem:[#allocation6_spill] sm:$0xff] }
 0x23f   : > { %v15175_v28 = vadd.f32 %v2214_v19, %v1893_v52  ;;  %12562 = vmatmul.mubr.msk.bf16.gmra.mrb[12].mxu0 %vm990_vm2, %v14814_v60  ;;  %12648 = vmatmul.mubr.msk.bf16.gmra.mrb[12].mxu1 %vm990_vm2, %v3424_v11  ;;  %v3425_v60 = vpack.c.bf16 %v3390_v16, %v3389_v4  ;;  %v18064_v19 = vld [vmem:[#allocation7_spill] sm:$0xff] }
 0x240   : > { %12565 = vmatprep.mubr.msk.bf16.mxu0 %vm14078_vm1, %v18049_v44  ;;  %12651 = vmatprep.mubr.msk.bf16.mxu1 %vm14078_vm1, %v18049_v44 }
 0x242   : > { %v1848_v46 = vpop.f32.mrb[164].mxu0  ;;  %v2219_v32 = vpop.f32.mrb[164].mxu1 }
 0x243   : > { %v1894_v21 = vadd.f32 %v1848_v46, %v14812_v49  ;;  %v12283_v34 = vpop.f32.mrb[165].mxu0  ;;  %v12369_v22 = vpop.f32.mrb[165].mxu1  ;;  %v3391_v49 = vld [vmem:[%s14261_s4 + $0x85] sm:$0xff] }
 0x244   : > { %v1851_v37 = vpop.f32.mrb[166].mxu0  ;;  %v2222_v40 = vpop.f32.mrb[166].mxu1 }
 0x245   : > { %v15187_v0 = vadd.f32 %v2219_v32, %v1894_v21  ;;  %v12284_v24 = vpop.f32.mrb[167].mxu0  ;;  %v12370_v61 = vpop.f32.mrb[167].mxu1  ;;  %v3393_v32 = vld [vmem:[%s14261_s4 + $0x95] sm:$0xff]  ;;  %v3394_v37 = vld [vmem:[%s14261_s4 + $0x9d] sm:$0xff] }
 0x247   : > { %12566 = vmatmul.mubr.msk.bf16.gmra.mrb[16].mxu0 %vm990_vm2, %v14829_v56  ;;  %12652 = vmatmul.mubr.msk.bf16.gmra.mrb[16].mxu1 %vm990_vm2, %v3425_v60  ;;  %v3426_v56 = vpack.c.bf16 %v3392_v58, %v3391_v49  ;;  %v18065_v58 = vld [vmem:[#allocation8_spill] sm:$0xff] }
 0x248   : > { %12569 = vmatprep.mubr.msk.bf16.mxu0 %vm14078_vm1, %v18049_v44  ;;  %12655 = vmatprep.mubr.msk.bf16.mxu1 %vm14078_vm1, %v18049_v44 }
 0x24a   : > { %v2430_v18 = vpop.f32.mrb[168].mxu0  ;;  %v2801_v11 = vpop.f32.mrb[168].mxu1 }
 0x24b   : > { %v2596_v25 = vadd.f32 %v2430_v18, %v18063_v14  ;;  %v12375_v59 = vpop.f32.mrb[169].mxu0  ;;  %v12461_v38 = vpop.f32.mrb[169].mxu1 }
 0x24c   : > { %v2433_v52 = vpop.f32.mrb[170].mxu0  ;;  %v2804_v46 = vpop.f32.mrb[170].mxu1  ;;  %v3396_v38 = vld [vmem:[%s14261_s4 + $0xad] sm:$0xff] }
 0x24d   : > { %v2597_v1 = vadd.f32 %v2433_v52, %v18064_v19  ;;  %v15200_v4 = vadd.f32 %v2801_v11, %v2596_v25  ;;  %v12376_v16 = vpop.f32.mrb[171].mxu0  ;;  %v12462_v21 = vpop.f32.mrb[171].mxu1 }
 0x24f   : > { %v15202_v34 = vadd.f32 %v2804_v46, %v2597_v1  ;;  %12570 = vmatmul.mubr.msk.bf16.gmra.mrb[20].mxu0 %vm990_vm2, %v14848_v53  ;;  %12656 = vmatmul.mubr.msk.bf16.gmra.mrb[20].mxu1 %vm990_vm2, %v3426_v56  ;;  %v3427_v53 = vpack.c.bf16 %v3394_v37, %v3393_v32  ;;  %v18066_v32 = vld [vmem:[#allocation9_spill] sm:$0xff] }
 0x250   : > { %12573 = vmatprep.mubr.msk.bf16.mxu0 %vm14078_vm1, %v18049_v44  ;;  %12659 = vmatprep.mubr.msk.bf16.mxu1 %vm14078_vm1, %v18049_v44 }
 0x252   : > { %v2438_v22 = vpop.f32.mrb[172].mxu0  ;;  %v2809_v40 = vpop.f32.mrb[172].mxu1 }
 0x253   : > { %v2598_v60 = vadd.f32 %v2438_v22, %v14851_v9  ;;  %v12379_v24 = vpop.f32.mrb[173].mxu0  ;;  %v12465_v49 = vpop.f32.mrb[173].mxu1  ;;  %v3395_v9 = vld [vmem:[%s14261_s4 + $0xa5] sm:$0xff] }
 0x254   : > { %v2441_v61 = vpop.f32.mrb[174].mxu0  ;;  %v2812_v59 = vpop.f32.mrb[174].mxu1  ;;  %v3398_v49 = vld [vmem:[%s14261_s4 + $0xbd] sm:$0xff] }
 0x255   : > { %v2599_v18 = vadd.f32 %v2441_v61, %v18065_v58  ;;  %v15215_v14 = vadd.f32 %v2809_v40, %v2598_v60  ;;  %v12380_v25 = vpop.f32.mrb[175].mxu0  ;;  %v12466_v11 = vpop.f32.mrb[175].mxu1 }
 0x257   : > { %v15217_v52 = vadd.f32 %v2812_v59, %v2599_v18  ;;  %12574 = vmatmul.mubr.msk.bf16.gmra.mrb[24].mxu0 %vm990_vm2, %v14867_v42  ;;  %12660 = vmatmul.mubr.msk.bf16.gmra.mrb[24].mxu1 %vm990_vm2, %v3427_v53  ;;  %v3428_v42 = vpack.c.bf16 %v3396_v38, %v3395_v9  ;;  %v18067_v9 = vld [vmem:[#allocation10_spill] sm:$0xff] }
 0x258   : > { %12577 = vmatprep.mubr.msk.bf16.mxu0 %vm14078_vm1, %v18049_v44  ;;  %12663 = vmatprep.mubr.msk.bf16.mxu1 %vm14078_vm1, %v18049_v44 }
 0x25a   : > { %v2446_v56 = vpop.f32.mrb[176].mxu0  ;;  %v2817_v16 = vpop.f32.mrb[176].mxu1 }
 0x25b   : > { %v2600_v19 = vadd.f32 %v2446_v56, %v14870_v45  ;;  %v12383_v1 = vpop.f32.mrb[177].mxu0  ;;  %v12469_v21 = vpop.f32.mrb[177].mxu1  ;;  %v3397_v45 = vld [vmem:[%s14261_s4 + $0xb5] sm:$0xff] }
 0x25c   : > { %v2449_v46 = vpop.f32.mrb[178].mxu0  ;;  %v2820_v24 = vpop.f32.mrb[178].mxu1  ;;  %v3400_v21 = vld [vmem:[%s14261_s4 + $0xcd] sm:$0xff] }
 0x25d   : > { %v2601_v37 = vadd.f32 %v2449_v46, %v18066_v32  ;;  %v15230_v22 = vadd.f32 %v2817_v16, %v2600_v19  ;;  %v12384_v60 = vpop.f32.mrb[179].mxu0  ;;  %v12470_v40 = vpop.f32.mrb[179].mxu1 }
 0x25f   : > { %v15232_v61 = vadd.f32 %v2820_v24, %v2601_v37  ;;  %12578 = vmatmul.mubr.msk.bf16.gmra.mrb[28].mxu0 %vm990_vm2, %v14886_v36  ;;  %12664 = vmatmul.mubr.msk.bf16.gmra.mrb[28].mxu1 %vm990_vm2, %v3428_v42  ;;  %v3429_v36 = vpack.c.bf16 %v3398_v49, %v3397_v45  ;;  %v18068_v45 = vld [vmem:[#allocation11_spill] sm:$0xff] }
 0x260   : > { %12581 = vmatprep.mubr.msk.bf16.mxu0 %vm14078_vm1, %v18049_v44  ;;  %12667 = vmatprep.mubr.msk.bf16.mxu1 %vm14078_vm1, %v18049_v44 }
 0x262   : > { %v2454_v53 = vpop.f32.mrb[180].mxu0  ;;  %v2825_v25 = vpop.f32.mrb[180].mxu1 }
 0x263   : > { %v2602_v58 = vadd.f32 %v2454_v53, %v14889_v43  ;;  %v12387_v18 = vpop.f32.mrb[181].mxu0  ;;  %v12473_v11 = vpop.f32.mrb[181].mxu1  ;;  %v3399_v43 = vld [vmem:[%s14261_s4 + $0xc5] sm:$0xff] }
 0x264   : > { %v2457_v59 = vpop.f32.mrb[182].mxu0  ;;  %v2828_v1 = vpop.f32.mrb[182].mxu1  ;;  %v3402_v11 = vld [vmem:[%s14261_s4 + $0xdd] sm:$0xff] }
 0x265   : > { %v2603_v38 = vadd.f32 %v2457_v59, %v18067_v9  ;;  %v15245_v56 = vadd.f32 %v2825_v25, %v2602_v58  ;;  %v12388_v19 = vpop.f32.mrb[183].mxu0  ;;  %v12474_v16 = vpop.f32.mrb[183].mxu1 }
 0x267   : > { %v15247_v46 = vadd.f32 %v2828_v1, %v2603_v38  ;;  %12582 = vmatmul.mubr.msk.bf16.gmra.mrb[32].mxu0 %vm990_vm2, %v14905_v31  ;;  %12668 = vmatmul.mubr.msk.bf16.gmra.mrb[32].mxu1 %vm990_vm2, %v3429_v36  ;;  %v3430_v31 = vpack.c.bf16 %v3400_v21, %v3399_v43  ;;  %v18069_v43 = vld [vmem:[#allocation12_spill] sm:$0xff] }
 0x268   : > { %12585 = vmatprep.mubr.msk.bf16.mxu0 %vm14078_vm1, %v18049_v44  ;;  %12671 = vmatprep.mubr.msk.bf16.mxu1 %vm14078_vm1, %v18049_v44 }
 0x26a   : > { %v2462_v42 = vpop.f32.mrb[184].mxu0  ;;  %v2833_v60 = vpop.f32.mrb[184].mxu1 }
 0x26b   : > { %v2604_v32 = vadd.f32 %v2462_v42, %v14908_v41  ;;  %v12391_v37 = vpop.f32.mrb[185].mxu0  ;;  %v12477_v40 = vpop.f32.mrb[185].mxu1  ;;  %v3401_v41 = vld [vmem:[%s14261_s4 + $0xd5] sm:$0xff] }
 0x26c   : > { %v2465_v24 = vpop.f32.mrb[186].mxu0  ;;  %v2836_v18 = vpop.f32.mrb[186].mxu1  ;;  %v3404_v40 = vld [vmem:[%s14261_s4 + $0xed] sm:$0xff] }
 0x26d   : > { %v2605_v49 = vadd.f32 %v2465_v24, %v18068_v45  ;;  %v15260_v53 = vadd.f32 %v2833_v60, %v2604_v32  ;;  %v12392_v58 = vpop.f32.mrb[187].mxu0  ;;  %v12478_v25 = vpop.f32.mrb[187].mxu1 }
 0x26f   : > { %v15262_v59 = vadd.f32 %v2836_v18, %v2605_v49  ;;  %12586 = vmatmul.mubr.msk.bf16.gmra.mrb[36].mxu0 %vm990_vm2, %v14924_v3  ;;  %12672 = vmatmul.mubr.msk.bf16.gmra.mrb[36].mxu1 %vm990_vm2, %v3430_v31  ;;  %v3431_v3 = vpack.c.bf16 %v3402_v11, %v3401_v41  ;;  %v18070_v41 = vld [vmem:[#allocation13_spill] sm:$0xff] }
 0x270   : > { %12589 = vmatprep.mubr.msk.bf16.mxu0 %vm14078_vm1, %v18049_v44  ;;  %12675 = vmatprep.mubr.msk.bf16.mxu1 %vm14078_vm1, %v18049_v44 }
 0x272   : > { %v2470_v36 = vpop.f32.mrb[188].mxu0  ;;  %v2841_v19 = vpop.f32.mrb[188].mxu1 }
 0x273   : > { %v2606_v9 = vadd.f32 %v2470_v36, %v14927_v35  ;;  %v12395_v38 = vpop.f32.mrb[189].mxu0  ;;  %v12481_v16 = vpop.f32.mrb[189].mxu1  ;;  %v3403_v35 = vld [vmem:[%s14261_s4 + $0xe5] sm:$0xff] }
 0x274   : > { %v2473_v1 = vpop.f32.mrb[190].mxu0  ;;  %v2844_v37 = vpop.f32.mrb[190].mxu1  ;;  %v3406_v16 = vld [vmem:[%s14261_s4 + $0xfd] sm:$0xff] }
 0x275   : > { %v2607_v21 = vadd.f32 %v2473_v1, %v18069_v43  ;;  %v15275_v42 = vadd.f32 %v2841_v19, %v2606_v9  ;;  %v12396_v32 = vpop.f32.mrb[191].mxu0  ;;  %v12482_v60 = vpop.f32.mrb[191].mxu1 }
 0x277   : > { %v15277_v24 = vadd.f32 %v2844_v37, %v2607_v21  ;;  %12590 = vmatmul.mubr.msk.bf16.gmra.mrb[40].mxu0 %vm990_vm2, %v14943_v23  ;;  %12676 = vmatmul.mubr.msk.bf16.gmra.mrb[40].mxu1 %vm990_vm2, %v3431_v3  ;;  %v3432_v23 = vpack.c.bf16 %v3404_v40, %v3403_v35  ;;  %v18071_v35 = vld [vmem:[#allocation14_spill] sm:$0xff] }
 0x278   : > { %12593 = vmatprep.mubr.msk.bf16.mxu0 %vm14078_vm1, %v18049_v44  ;;  %12679 = vmatprep.mubr.msk.bf16.mxu1 %vm14078_vm1, %v18049_v44 }
 0x27a   : > { %v2478_v31 = vpop.f32.mrb[192].mxu0  ;;  %v2849_v58 = vpop.f32.mrb[192].mxu1 }
 0x27b   : > { %v2608_v45 = vadd.f32 %v2478_v31, %v14946_v27  ;;  %v12399_v49 = vpop.f32.mrb[193].mxu0  ;;  %v12485_v25 = vpop.f32.mrb[193].mxu1  ;;  %v3405_v27 = vld [vmem:[%s14261_s4 + $0xf5] sm:$0xff] }
 0x27c   : > { %v2481_v18 = vpop.f32.mrb[194].mxu0  ;;  %v2852_v38 = vpop.f32.mrb[194].mxu1  ;;  %v3408_v25 = vld [vmem:[%s14261_s4 + $0x10d] sm:$0xff] }
 0x27d   : > { %v2609_v11 = vadd.f32 %v2481_v18, %v18070_v41  ;;  %v15290_v36 = vadd.f32 %v2849_v58, %v2608_v45  ;;  %v12400_v9 = vpop.f32.mrb[195].mxu0  ;;  %v12486_v19 = vpop.f32.mrb[195].mxu1 }
 0x27f   : > { %v15292_v1 = vadd.f32 %v2852_v38, %v2609_v11  ;;  %12594 = vmatmul.mubr.msk.bf16.gmra.mrb[44].mxu0 %vm990_vm2, %v14962_v17  ;;  %12680 = vmatmul.mubr.msk.bf16.gmra.mrb[44].mxu1 %vm990_vm2, %v3432_v23  ;;  %v3433_v17 = vpack.c.bf16 %v3406_v16, %v3405_v27  ;;  %v18072_v27 = vld [vmem:[#allocation15_spill] sm:$0xff] }
 0x280   : > { %12597 = vmatprep.mubr.msk.bf16.mxu0 %vm14078_vm1, %v18049_v44  ;;  %12683 = vmatprep.mubr.msk.bf16.mxu1 %vm14078_vm1, %v18049_v44 }
 0x282   : > { %v2486_v3 = vpop.f32.mrb[196].mxu0  ;;  %v2857_v32 = vpop.f32.mrb[196].mxu1 }
 0x283   : > { %v2610_v43 = vadd.f32 %v2486_v3, %v14965_v50  ;;  %v12403_v21 = vpop.f32.mrb[197].mxu0  ;;  %v12489_v60 = vpop.f32.mrb[197].mxu1  ;;  %v3407_v50 = vld [vmem:[%s14261_s4 + $0x105] sm:$0xff] }
 0x284   : > { %v2489_v37 = vpop.f32.mrb[198].mxu0  ;;  %v2860_v49 = vpop.f32.mrb[198].mxu1  ;;  %v3410_v60 = vld [vmem:[%s14261_s4 + $0x11d] sm:$0xff] }
 0x285   : > { %v2611_v40 = vadd.f32 %v2489_v37, %v18071_v35  ;;  %v15305_v31 = vadd.f32 %v2857_v32, %v2610_v43  ;;  %v12404_v45 = vpop.f32.mrb[199].mxu0  ;;  %v12490_v58 = vpop.f32.mrb[199].mxu1 }
 0x287   : > { %v15307_v18 = vadd.f32 %v2860_v49, %v2611_v40  ;;  %12598 = vmatmul.mubr.msk.bf16.gmra.mrb[48].mxu0 %vm990_vm2, %v14981_v57  ;;  %12684 = vmatmul.mubr.msk.bf16.gmra.mrb[48].mxu1 %vm990_vm2, %v3433_v17  ;;  %v3434_v57 = vpack.c.bf16 %v3408_v25, %v3407_v50  ;;  %v18073_v50 = vld [vmem:[#allocation16_spill] sm:$0xff] }
 0x288   : > { %12601 = vmatprep.mubr.msk.bf16.mxu0 %vm14078_vm1, %v18049_v44  ;;  %12687 = vmatprep.mubr.msk.bf16.mxu1 %vm14078_vm1, %v18049_v44 }
 0x28a   : > { %v2494_v23 = vpop.f32.mrb[200].mxu0  ;;  %v2865_v9 = vpop.f32.mrb[200].mxu1 }
 0x28b   : > { %v2612_v41 = vadd.f32 %v2494_v23, %v14984_v63  ;;  %v12407_v11 = vpop.f32.mrb[201].mxu0  ;;  %v12493_v19 = vpop.f32.mrb[201].mxu1  ;;  %v3409_v63 = vld [vmem:[%s14261_s4 + $0x115] sm:$0xff] }
 0x28c   : > { %v2497_v38 = vpop.f32.mrb[202].mxu0  ;;  %v2868_v21 = vpop.f32.mrb[202].mxu1  ;;  %v3412_v19 = vld [vmem:[%s14261_s4 + $0x12d] sm:$0xff] }
 0x28d   : > { %v2613_v16 = vadd.f32 %v2497_v38, %v18072_v27  ;;  %v15320_v3 = vadd.f32 %v2865_v9, %v2612_v41  ;;  %v12408_v43 = vpop.f32.mrb[203].mxu0  ;;  %v12494_v32 = vpop.f32.mrb[203].mxu1 }
 0x28f   : > { %v15322_v37 = vadd.f32 %v2868_v21, %v2613_v16  ;;  %12602 = vmatmul.mubr.msk.bf16.gmra.mrb[52].mxu0 %vm990_vm2, %v15000_v7  ;;  %12688 = vmatmul.mubr.msk.bf16.gmra.mrb[52].mxu1 %vm990_vm2, %v3434_v57  ;;  %v3435_v7 = vpack.c.bf16 %v3410_v60, %v3409_v63  ;;  %v18074_v63 = vld [vmem:[#allocation17_spill] sm:$0xff] }
 0x290   : > { %12605 = vmatprep.mubr.msk.bf16.mxu0 %vm14078_vm1, %v18049_v44  ;;  %12691 = vmatprep.mubr.msk.bf16.mxu1 %vm14078_vm1, %v18049_v44 }
 0x292   : > { %v2502_v17 = vpop.f32.mrb[204].mxu0  ;;  %v2873_v45 = vpop.f32.mrb[204].mxu1 }
 0x293   : > { %v2614_v35 = vadd.f32 %v2502_v17, %v15003_v13  ;;  %v12411_v40 = vpop.f32.mrb[205].mxu0  ;;  %v12497_v58 = vpop.f32.mrb[205].mxu1  ;;  %v3411_v13 = vld [vmem:[%s14261_s4 + $0x125] sm:$0xff] }
 0x294   : > { %v2505_v49 = vpop.f32.mrb[206].mxu0  ;;  %v2876_v11 = vpop.f32.mrb[206].mxu1  ;;  %v3414_v58 = vld [vmem:[%s14261_s4 + $0x13d] sm:$0xff] }
 0x295   : > { %v2615_v25 = vadd.f32 %v2505_v49, %v18073_v50  ;;  %v15335_v23 = vadd.f32 %v2873_v45, %v2614_v35  ;;  %v12412_v41 = vpop.f32.mrb[207].mxu0  ;;  %v12498_v9 = vpop.f32.mrb[207].mxu1 }
 0x297   : > { %v15337_v38 = vadd.f32 %v2876_v11, %v2615_v25  ;;  %12606 = vmatmul.mubr.msk.bf16.gmra.mrb[56].mxu0 %vm990_vm2, %v15019_v20  ;;  %12692 = vmatmul.mubr.msk.bf16.gmra.mrb[56].mxu1 %vm990_vm2, %v3435_v7  ;;  %v3436_v20 = vpack.c.bf16 %v3412_v19, %v3411_v13  ;;  %v18075_v13 = vld [vmem:[#allocation18_spill] sm:$0xff] }
 0x298   : > { %12609 = vmatprep.mubr.msk.bf16.mxu0 %vm14078_vm1, %v18049_v44  ;;  %12695 = vmatprep.mubr.msk.bf16.mxu1 %vm14078_vm1, %v18049_v44 }
 0x29a   : > { %v2510_v57 = vpop.f32.mrb[208].mxu0  ;;  %v2881_v43 = vpop.f32.mrb[208].mxu1 }
 0x29b   : > { %v2616_v27 = vadd.f32 %v2510_v57, %v15022_v26  ;;  %v12415_v16 = vpop.f32.mrb[209].mxu0  ;;  %v12501_v32 = vpop.f32.mrb[209].mxu1  ;;  %v3413_v26 = vld [vmem:[%s14261_s4 + $0x135] sm:$0xff] }
 0x29c   : > { %v2513_v21 = vpop.f32.mrb[210].mxu0  ;;  %v2884_v40 = vpop.f32.mrb[210].mxu1  ;;  %v3416_v32 = vld [vmem:[%s14261_s4 + $0x14d] sm:$0xff] }
 0x29d   : > { %v2617_v60 = vadd.f32 %v2513_v21, %v18074_v63  ;;  %v15350_v17 = vadd.f32 %v2881_v43, %v2616_v27  ;;  %v12416_v35 = vpop.f32.mrb[211].mxu0  ;;  %v12502_v45 = vpop.f32.mrb[211].mxu1 }
 0x29f   : > { %v15352_v49 = vadd.f32 %v2884_v40, %v2617_v60  ;;  %12610 = vmatmul.mubr.msk.bf16.gmra.mrb[60].mxu0 %vm990_vm2, %v15038_v33  ;;  %12696 = vmatmul.mubr.msk.bf16.gmra.mrb[60].mxu1 %vm990_vm2, %v3436_v20  ;;  %v3437_v33 = vpack.c.bf16 %v3414_v58, %v3413_v26  ;;  %v18076_v26 = vld [vmem:[#allocation19_spill] sm:$0xff] }
 0x2a0   : > { %12613 = vmatprep.mubr.msk.bf16.mxu0 %vm14078_vm1, %v18049_v44  ;;  %12699 = vmatprep.mubr.msk.bf16.mxu1 %vm14078_vm1, %v18049_v44 }
 0x2a2   : > { %v2518_v7 = vpop.f32.mrb[212].mxu0  ;;  %v2889_v41 = vpop.f32.mrb[212].mxu1 }
 0x2a3   : > { %v2618_v50 = vadd.f32 %v2518_v7, %v15041_v39  ;;  %v12419_v25 = vpop.f32.mrb[213].mxu0  ;;  %v12505_v9 = vpop.f32.mrb[213].mxu1  ;;  %v3415_v39 = vld [vmem:[%s14261_s4 + $0x145] sm:$0xff] }
 0x2a4   : > { %v2521_v11 = vpop.f32.mrb[214].mxu0  ;;  %v2892_v16 = vpop.f32.mrb[214].mxu1  ;;  %v3438_v45 = vpack.c.bf16 %v3416_v32, %v3415_v39  ;;  %v3047_v9 = vld [vmem:[%s14261_s4 + $0x15c] sm:$0xff] }
 0x2a5   : > { %v2619_v19 = vadd.f32 %v2521_v11, %v18075_v13  ;;  %v15365_v57 = vadd.f32 %v2889_v41, %v2618_v50  ;;  %v12420_v27 = vpop.f32.mrb[215].mxu0  ;;  %v12506_v43 = vpop.f32.mrb[215].mxu1  ;;  %v3418_v13 = vld [vmem:[%s14261_s4 + $0x15d] sm:$0xff] }
 0x2a7   : > { %v15367_v21 = vadd.f32 %v2892_v16, %v2619_v19  ;;  %12614 = vmatmul.mubr.msk.bf16.gmra.mrb[64].mxu0 %vm990_vm2, %v15057_v47  ;;  %12700 = vmatmul.mubr.msk.bf16.gmra.mrb[64].mxu1 %vm990_vm2, %v3437_v33  ;;  %v3417_v33 = vld [vmem:[%s14261_s4 + $0x155] sm:$0xff] }
 0x2a8   : > { %12617 = vmatprep.mubr.msk.bf16.mxu0 %vm14078_vm1, %v18049_v44  ;;  %12703 = vmatprep.mubr.msk.bf16.mxu1 %vm14078_vm1, %v18049_v44 }
 0x2aa   : > { %v2526_v20 = vpop.f32.mrb[216].mxu0  ;;  %v2897_v35 = vpop.f32.mrb[216].mxu1 }
 0x2ab   : > { %v2620_v63 = vadd.f32 %v2526_v20, %v15060_v54  ;;  %v12423_v60 = vpop.f32.mrb[217].mxu0  ;;  %v12509_v47 = vpop.f32.mrb[217].mxu1  ;;  %v3046_v54 = vld [vmem:[%s14261_s4 + $0x154] sm:$0xff]  ;;  %v3439_v20 = vpack.c.bf16 %v3418_v13, %v3417_v33  ;;  %v18077_v13 = vld [vmem:[#allocation20_spill] sm:$0xff] }
 0x2ac   : > { %v2529_v40 = vpop.f32.mrb[218].mxu0  ;;  %v2900_v25 = vpop.f32.mrb[218].mxu1 }
 0x2ad   : > { %v2621_v58 = vadd.f32 %v2529_v40, %v18076_v26  ;;  %v15380_v7 = vadd.f32 %v2897_v35, %v2620_v63  ;;  %v12424_v50 = vpop.f32.mrb[219].mxu0  ;;  %v12510_v41 = vpop.f32.mrb[219].mxu1  ;;  %v3419_v26 = vld [vmem:[%s14261_s4 + $0x165] sm:$0xf] }
 0x2ae   : > { %v3440_v33 = vpack.c.bf16 %v3419_v26, %v3419_v26 }
 0x2af   : > { %v15382_v11 = vadd.f32 %v2900_v25, %v2621_v58  ;;  %12618 = vmatmul.mubr.msk.bf16.gmra.mrb[68].mxu0 %vm990_vm2, %v15076_v62  ;;  %12704 = vmatmul.mubr.msk.bf16.gmra.mrb[68].mxu1 %vm990_vm2, %v3438_v45  ;;  %v3068_v62 = vpack.c.bf16 %v3047_v9, %v3046_v54 }
 0x2b0   : > { %12621 = vmatprep.mubr.msk.bf16.mxu0 %vm14078_vm1, %v18049_v44  ;;  %12707 = vmatprep.mubr.msk.bf16.mxu1 %vm14078_vm1, %v18049_v44 }
 0x2b2   : > { %v2534_v19 = vpop.f32.mrb[220].mxu0  ;;  %v2905_v43 = vpop.f32.mrb[220].mxu1 }
 0x2b3   : > { %v2622_v27 = vadd.f32 %v2534_v19, %v15079_v6  ;;  %v12427_v16 = vpop.f32.mrb[221].mxu0  ;;  %v12513_v32 = vpop.f32.mrb[221].mxu1  ;;  %v3048_v6 = vld [vmem:[%s14261_s4 + $0x164] sm:$0xf] }
 0x2b4   : > { %v2537_v39 = vpop.f32.mrb[222].mxu0  ;;  %v2908_v40 = vpop.f32.mrb[222].mxu1  ;;  %v3069_v41 = vpack.c.bf16 %v3048_v6, %v3048_v6  ;;  %v3751_v32 = vld [vmem:[%s14261_s4 + $0x2e] sm:$0xff] }
 0x2b5   : > { %v2623_v63 = vadd.f32 %v2537_v39, %v15081_v8  ;;  %v15397_v60 = vadd.f32 %v2905_v43, %v2622_v27  ;;  %v12428_v35 = vpop.f32.mrb[223].mxu0  ;;  %v12514_v47 = vpop.f32.mrb[223].mxu1 }
 0x2b7   : > { %v15399_v45 = vadd.f32 %v2908_v40, %v2623_v63  ;;  %12622 = vmatmul.mubr.msk.bf16.gmra.mrb[72].mxu0 %vm990_vm2, %v3068_v62  ;;  %12708 = vmatmul.mubr.msk.bf16.gmra.mrb[72].mxu1 %vm990_vm2, %v3439_v20 }
 0x2b8   : > { %12625 = vmatprep.mubr.msk.bf16.mxu0 %vm14078_vm1, %v18049_v44  ;;  %12711 = vmatprep.mubr.msk.bf16.mxu1 %vm14078_vm1, %v18049_v44 }
 0x2ba   : > { %v2542_v8 = vpop.f32.mrb[224].mxu0  ;;  %v2913_v25 = vpop.f32.mrb[224].mxu1 }
 0x2bb   : > { %v2624_v58 = vadd.f32 %v2542_v8, %v15094_v15  ;;  %v12431_v50 = vpop.f32.mrb[225].mxu0  ;;  %v12517_v9 = vpop.f32.mrb[225].mxu1  ;;  %v3750_v15 = vld [vmem:[%s14261_s4 + $0x26] sm:$0xff] }
 0x2bc   : > { %v2545_v54 = vpop.f32.mrb[226].mxu0  ;;  %v2916_v43 = vpop.f32.mrb[226].mxu1  ;;  %v3791_v47 = vpack.c.bf16 %v3751_v32, %v3750_v15  ;;  %v3753_v9 = vld [vmem:[%s14261_s4 + $0x3e] sm:$0xff] }
 0x2bd   : > { %v2625_v19 = vadd.f32 %v2545_v54, %v18077_v13  ;;  %v15411_v27 = vadd.f32 %v2913_v25, %v2624_v58  ;;  %v12432_v16 = vpop.f32.mrb[227].mxu0  ;;  %v12518_v62 = vpop.f32.mrb[227].mxu1 }
 0x2bf   : > { %v15413_v39 = vadd.f32 %v2916_v43, %v2625_v19  ;;  %12626 = vmatmul.mubr.msk.bf16.gmra.mrb[76].mxu0 %vm990_vm2, %v3069_v41  ;;  %12712 = vmatmul.mubr.msk.bf16.gmra.mrb[76].mxu1 %vm990_vm2, %v3440_v33 }
 0x2c0   : > { %12717 = vmatprep.mubr.msk.bf16.mxu0 %vm14078_vm1, %v18049_v44 }
 0x2c2   : > { %v2550_v20 = vpop.f32.mrb[228].mxu0  ;;  %v2921_v40 = vpop.f32.mrb[228].mxu1 }
 0x2c3   : > { %v2626_v63 = vadd.f32 %v2550_v20, %v15111_v30  ;;  %v12435_v35 = vpop.f32.mrb[229].mxu0  ;;  %v12521_v26 = vpop.f32.mrb[229].mxu1  ;;  %v3752_v30 = vld [vmem:[%s14261_s4 + $0x36] sm:$0xff] }
 0x2c4   : > { %v2553_v6 = vpop.f32.mrb[230].mxu0  ;;  %v2924_v25 = vpop.f32.mrb[230].mxu1  ;;  %v3792_v16 = vpack.c.bf16 %v3753_v9, %v3752_v30 }
 0x2c5   : > { %v2627_v8 = vadd.f32 %v2553_v6, %v15114_v12  ;;  %v15423_v58 = vadd.f32 %v2921_v40, %v2626_v63  ;;  %v12436_v50 = vpop.f32.mrb[231].mxu0  ;;  %v12522_v41 = vpop.f32.mrb[231].mxu1 }
 0x2c7   : > { %v15425_v54 = vadd.f32 %v2924_v25, %v2627_v8  ;;  %12718 = vmatmul.mubr.msk.bf16.vlgmr.msra.gmra.mrb[80].mxu0 %vm990_vm2, %v3791_v47  ;;  %v3755_v47 = vld [vmem:[%s14261_s4 + $0x4e] sm:$0xff] }
 0x2c8   : > { %12721 = vmatprep.mubr.msk.bf16.mxu0 %vm14078_vm1, %v18049_v44 }
 0x2ca   : > { %v2558_v33 = vpop.f32.mrb[232].mxu0  ;;  %v2929_v19 = vpop.f32.mrb[232].mxu1 }
 0x2cb   : > { %v2628_v13 = vadd.f32 %v2558_v33, %v15128_v48  ;;  %v12439_v12 = vpop.f32.mrb[233].mxu0  ;;  %v12525_v62 = vpop.f32.mrb[233].mxu1  ;;  %v3754_v48 = vld [vmem:[%s14261_s4 + $0x46] sm:$0xff] }
 0x2cc   : > { %v2561_v43 = vpop.f32.mrb[234].mxu0  ;;  %v2932_v63 = vpop.f32.mrb[234].mxu1  ;;  %v3793_v50 = vpack.c.bf16 %v3755_v47, %v3754_v48 }
 0x2cd   : > { %v2629_v15 = vadd.f32 %v2561_v43, %v15130_v10  ;;  %v15434_v32 = vadd.f32 %v2929_v19, %v2628_v13  ;;  %v12440_v20 = vpop.f32.mrb[235].mxu0  ;;  %v12526_v35 = vpop.f32.mrb[235].mxu1 }
 0x2cf   : > { %v15436_v40 = vadd.f32 %v2932_v63, %v2629_v15  ;;  %12722 = vmatmul.mubr.msk.bf16.gmra.mrb[84].mxu0 %vm990_vm2, %v3792_v16  ;;  %v3757_v16 = vld [vmem:[%s14261_s4 + $0x5e] sm:$0xff] }
 0x2d0   : > { %12725 = vmatprep.mubr.msk.bf16.mxu0 %vm14078_vm1, %v18049_v44 }
 0x2d2   : > { %v2566_v6 = vpop.f32.mrb[236].mxu0  ;;  %v2937_v8 = vpop.f32.mrb[236].mxu1 }
 0x2d3   : > { %v2630_v26 = vadd.f32 %v2566_v6, %v15143_v29  ;;  %v12443_v10 = vpop.f32.mrb[237].mxu0  ;;  %v12529_v41 = vpop.f32.mrb[237].mxu1  ;;  %v3756_v29 = vld [vmem:[%s14261_s4 + $0x56] sm:$0xff] }
 0x2d4   : > { %v2569_v25 = vpop.f32.mrb[238].mxu0  ;;  %v2940_v13 = vpop.f32.mrb[238].mxu1  ;;  %v3794_v20 = vpack.c.bf16 %v3757_v16, %v3756_v29 }
 0x2d5   : > { %v2631_v30 = vadd.f32 %v2569_v25, %v15145_v5  ;;  %v15445_v9 = vadd.f32 %v2937_v8, %v2630_v26  ;;  %v12444_v33 = vpop.f32.mrb[239].mxu0  ;;  %v12530_v12 = vpop.f32.mrb[239].mxu1 }
 0x2d7   : > { %v15447_v19 = vadd.f32 %v2940_v13, %v2631_v30  ;;  %12726 = vmatmul.mubr.msk.bf16.gmra.mrb[88].mxu0 %vm990_vm2, %v3793_v50  ;;  %v3759_v50 = vld [vmem:[%s14261_s4 + $0x6e] sm:$0xff] }
 0x2d8   : > { %12729 = vmatprep.mubr.msk.bf16.mxu0 %vm14078_vm1, %v18049_v44 }
 0x2da   : > { %v2574_v43 = vpop.f32.mrb[240].mxu0  ;;  %v2945_v15 = vpop.f32.mrb[240].mxu1 }
 0x2db   : > { %v2632_v62 = vadd.f32 %v2574_v43, %v15158_v55  ;;  %v12447_v5 = vpop.f32.mrb[241].mxu0  ;;  %v12533_v35 = vpop.f32.mrb[241].mxu1  ;;  %v3758_v55 = vld [vmem:[%s14261_s4 + $0x66] sm:$0xff] }
 0x2dc   : > { %v2577_v63 = vpop.f32.mrb[242].mxu0  ;;  %v2948_v26 = vpop.f32.mrb[242].mxu1  ;;  %v3795_v33 = vpack.c.bf16 %v3759_v50, %v3758_v55 }
 0x2dd   : > { %v2633_v48 = vadd.f32 %v2577_v63, %v15160_v51  ;;  %v15456_v47 = vadd.f32 %v2945_v15, %v2632_v62  ;;  %v12448_v6 = vpop.f32.mrb[243].mxu0  ;;  %v12534_v10 = vpop.f32.mrb[243].mxu1 }
 0x2df   : > { %v15458_v8 = vadd.f32 %v2948_v26, %v2633_v48  ;;  %12730 = vmatmul.mubr.msk.bf16.gmra.mrb[92].mxu0 %vm990_vm2, %v3794_v20  ;;  %v3761_v20 = vld [vmem:[%s14261_s4 + $0x7e] sm:$0xff] }
 0x2e0   : > { %12733 = vmatprep.mubr.msk.bf16.mxu0 %vm14078_vm1, %v18049_v44 }
 0x2e2   : > { %v2582_v25 = vpop.f32.mrb[244].mxu0  ;;  %v2953_v30 = vpop.f32.mrb[244].mxu1 }
 0x2e3   : > { %v2634_v41 = vadd.f32 %v2582_v25, %v15173_v2  ;;  %v12451_v51 = vpop.f32.mrb[245].mxu0  ;;  %v12537_v12 = vpop.f32.mrb[245].mxu1  ;;  %v3760_v2 = vld [vmem:[%s14261_s4 + $0x76] sm:$0xff] }
 0x2e4   : > { %v2585_v13 = vpop.f32.mrb[246].mxu0  ;;  %v2956_v62 = vpop.f32.mrb[246].mxu1  ;;  %v3796_v6 = vpack.c.bf16 %v3761_v20, %v3760_v2  ;;  %v3762_v51 = vld [vmem:[%s14261_s4 + $0x86] sm:$0xff] }
 0x2e5   : > { %v2635_v29 = vadd.f32 %v2585_v13, %v15175_v28  ;;  %v15467_v16 = vadd.f32 %v2953_v30, %v2634_v41  ;;  %v12452_v43 = vpop.f32.mrb[247].mxu0  ;;  %v12538_v5 = vpop.f32.mrb[247].mxu1  ;;  %v3763_v30 = vld [vmem:[%s14261_s4 + $0x8e] sm:$0xff] }
 0x2e7   : > { %v15469_v15 = vadd.f32 %v2956_v62, %v2635_v29  ;;  %12734 = vmatmul.mubr.msk.bf16.gmra.mrb[96].mxu0 %vm990_vm2, %v3795_v33  ;;  %v3797_v29 = vpack.c.bf16 %v3763_v30, %v3762_v51 }
 0x2e8   : > { %12737 = vmatprep.mubr.msk.bf16.mxu0 %vm14078_vm1, %v18049_v44 }
 0x2ea   : > { %v2590_v63 = vpop.f32.mrb[248].mxu0  ;;  %v2961_v48 = vpop.f32.mrb[248].mxu1 }
 0x2eb   : > { %v2636_v35 = vadd.f32 %v2590_v63, %v15187_v0  ;;  %v12455_v28 = vpop.f32.mrb[249].mxu0  ;;  %v12541_v10 = vpop.f32.mrb[249].mxu1 }
 0x2ec   : > { %v2593_v26 = vpop.f32.mrb[250].mxu0  ;;  %v2964_v25 = vpop.f32.mrb[250].mxu1 }
 0x2ed   : > { %v15477_v55 = vadd.f32 %v2961_v48, %v2636_v35  ;;  %v12456_v50 = vpop.f32.mrb[251].mxu0  ;;  %v12542_v41 = vpop.f32.mrb[251].mxu1  ;;  %v3765_v48 = vld [vmem:[%s14261_s4 + $0x9e] sm:$0xff] }
 0x2ef   : > { %12738 = vmatmul.mubr.msk.bf16.gmra.mrb[100].mxu0 %vm990_vm2, %v3796_v6 }
 0x2f0   : > { %12741 = vmatprep.mubr.msk.bf16.mxu0 %vm14078_vm1, %v18049_v44 }
 0x2f2   : > { %v3172_v33 = vpop.f32.mrb[252].mxu0  ;;  %v3543_v12 = vpop.f32.mrb[252].mxu1 }
 0x2f3   : > { %v3338_v0 = vadd.f32 %v3172_v33, %v15200_v4  ;;  %v12547_v13 = vpop.f32.mrb[253].mxu0  ;;  %v12633_v62 = vpop.f32.mrb[253].mxu1  ;;  %v3764_v4 = vld [vmem:[%s14261_s4 + $0x96] sm:$0xff] }
 0x2f4   : > { %v3175_v43 = vpop.f32.mrb[254].mxu0  ;;  %v3546_v63 = vpop.f32.mrb[254].mxu1  ;;  %v3798_v50 = vpack.c.bf16 %v3765_v48, %v3764_v4 }
 0x2f5   : > { %v3339_v5 = vadd.f32 %v3175_v43, %v15202_v34  ;;  %v15486_v2 = vadd.f32 %v3543_v12, %v3338_v0  ;;  %v12548_v20 = vpop.f32.mrb[255].mxu0  ;;  %v12634_v35 = vpop.f32.mrb[255].mxu1 }
 0x2f7   : > { %v15488_v28 = vadd.f32 %v3546_v63, %v3339_v5  ;;  %12742 = vmatmul.mubr.msk.bf16.gmra.mrb[104].mxu0 %vm990_vm2, %v3797_v29  ;;  %v3767_v29 = vld [vmem:[%s14261_s4 + $0xae] sm:$0xff] }
 0x2f8   : > { %12745 = vmatprep.mubr.msk.bf16.mxu0 %vm14078_vm1, %v18049_v44 }
 0x2fa   : > { %v3180_v6 = vpop.f32.mrb[0].mxu0  ;;  %v3551_v10 = vpop.f32.mrb[0].mxu1 }
 0x2fb   : > { %v3340_v26 = vadd.f32 %v3180_v6, %v15215_v14  ;;  %v12551_v34 = vpop.f32.mrb[1].mxu0  ;;  %v12637_v41 = vpop.f32.mrb[1].mxu1  ;;  %v3766_v14 = vld [vmem:[%s14261_s4 + $0xa6] sm:$0xff] }
 0x2fc   : > { %v3183_v25 = vpop.f32.mrb[2].mxu0  ;;  %v3554_v0 = vpop.f32.mrb[2].mxu1  ;;  %v3799_v20 = vpack.c.bf16 %v3767_v29, %v3766_v14 }
 0x2fd   : > { %v3341_v51 = vadd.f32 %v3183_v25, %v15217_v52  ;;  %v15497_v30 = vadd.f32 %v3551_v10, %v3340_v26  ;;  %v12552_v33 = vpop.f32.mrb[3].mxu0  ;;  %v12638_v13 = vpop.f32.mrb[3].mxu1 }
 0x2ff   : > { %v15499_v12 = vadd.f32 %v3554_v0, %v3341_v51  ;;  %12746 = vmatmul.mubr.msk.bf16.gmra.mrb[108].mxu0 %vm990_vm2, %v3798_v50  ;;  %v3769_v50 = vld [vmem:[%s14261_s4 + $0xbe] sm:$0xff] }
 0x300   : > { %12749 = vmatprep.mubr.msk.bf16.mxu0 %vm14078_vm1, %v18049_v44 }
 0x302   : > { %v3188_v43 = vpop.f32.mrb[4].mxu0  ;;  %v3559_v5 = vpop.f32.mrb[4].mxu1 }
 0x303   : > { %v3342_v62 = vadd.f32 %v3188_v43, %v15230_v22  ;;  %v12555_v52 = vpop.f32.mrb[5].mxu0  ;;  %v12641_v35 = vpop.f32.mrb[5].mxu1  ;;  %v3768_v22 = vld [vmem:[%s14261_s4 + $0xb6] sm:$0xff] }
 0x304   : > { %v3191_v63 = vpop.f32.mrb[6].mxu0  ;;  %v3562_v26 = vpop.f32.mrb[6].mxu1  ;;  %v3800_v33 = vpack.c.bf16 %v3769_v50, %v3768_v22 }
 0x305   : > { %v3343_v4 = vadd.f32 %v3191_v63, %v15232_v61  ;;  %v15508_v48 = vadd.f32 %v3559_v5, %v3342_v62  ;;  %v12556_v6 = vpop.f32.mrb[7].mxu0  ;;  %v12642_v34 = vpop.f32.mrb[7].mxu1 }
 0x307   : > { %v15510_v10 = vadd.f32 %v3562_v26, %v3343_v4  ;;  %12750 = vmatmul.mubr.msk.bf16.gmra.mrb[112].mxu0 %vm990_vm2, %v3799_v20  ;;  %v3771_v20 = vld [vmem:[%s14261_s4 + $0xce] sm:$0xff] }
 0x308   : > { %12753 = vmatprep.mubr.msk.bf16.mxu0 %vm14078_vm1, %v18049_v44 }
 0x30a   : > { %v3196_v25 = vpop.f32.mrb[8].mxu0  ;;  %v3567_v51 = vpop.f32.mrb[8].mxu1 }
 0x30b   : > { %v3344_v41 = vadd.f32 %v3196_v25, %v15245_v56  ;;  %v12559_v61 = vpop.f32.mrb[9].mxu0  ;;  %v12645_v13 = vpop.f32.mrb[9].mxu1  ;;  %v3770_v56 = vld [vmem:[%s14261_s4 + $0xc6] sm:$0xff] }
 0x30c   : > { %v3199_v0 = vpop.f32.mrb[10].mxu0  ;;  %v3570_v62 = vpop.f32.mrb[10].mxu1  ;;  %v3801_v6 = vpack.c.bf16 %v3771_v20, %v3770_v56 }
 0x30d   : > { %v3345_v14 = vadd.f32 %v3199_v0, %v15247_v46  ;;  %v15519_v29 = vadd.f32 %v3567_v51, %v3344_v41  ;;  %v12560_v43 = vpop.f32.mrb[11].mxu0  ;;  %v12646_v52 = vpop.f32.mrb[11].mxu1 }
 0x30f   : > { %v15521_v5 = vadd.f32 %v3570_v62, %v3345_v14  ;;  %12754 = vmatmul.mubr.msk.bf16.gmra.mrb[116].mxu0 %vm990_vm2, %v3800_v33  ;;  %v3773_v33 = vld [vmem:[%s14261_s4 + $0xde] sm:$0xff] }
 0x310   : > { %12757 = vmatprep.mubr.msk.bf16.mxu0 %vm14078_vm1, %v18049_v44 }
 0x312   : > { %v3204_v63 = vpop.f32.mrb[12].mxu0  ;;  %v3575_v4 = vpop.f32.mrb[12].mxu1 }
 0x313   : > { %v3346_v35 = vadd.f32 %v3204_v63, %v15260_v53  ;;  %v12563_v46 = vpop.f32.mrb[13].mxu0  ;;  %v12649_v34 = vpop.f32.mrb[13].mxu1  ;;  %v3772_v53 = vld [vmem:[%s14261_s4 + $0xd6] sm:$0xff] }
 0x314   : > { %v3207_v26 = vpop.f32.mrb[14].mxu0  ;;  %v3578_v41 = vpop.f32.mrb[14].mxu1  ;;  %v3802_v43 = vpack.c.bf16 %v3773_v33, %v3772_v53 }
 0x315   : > { %v3347_v22 = vadd.f32 %v3207_v26, %v15262_v59  ;;  %v15530_v50 = vadd.f32 %v3575_v4, %v3346_v35  ;;  %v12564_v25 = vpop.f32.mrb[15].mxu0  ;;  %v12650_v61 = vpop.f32.mrb[15].mxu1 }
 0x317   : > { %v15532_v51 = vadd.f32 %v3578_v41, %v3347_v22  ;;  %12758 = vmatmul.mubr.msk.bf16.gmra.mrb[120].mxu0 %vm990_vm2, %v3801_v6  ;;  %v3775_v6 = vld [vmem:[%s14261_s4 + $0xee] sm:$0xff] }
 0x318   : > { %12761 = vmatprep.mubr.msk.bf16.mxu0 %vm14078_vm1, %v18049_v44 }
 0x31a   : > { %v3212_v0 = vpop.f32.mrb[16].mxu0  ;;  %v3583_v14 = vpop.f32.mrb[16].mxu1 }
 0x31b   : > { %v3348_v13 = vadd.f32 %v3212_v0, %v15275_v42  ;;  %v12567_v59 = vpop.f32.mrb[17].mxu0  ;;  %v12653_v52 = vpop.f32.mrb[17].mxu1  ;;  %v3774_v42 = vld [vmem:[%s14261_s4 + $0xe6] sm:$0xff] }
 0x31c   : > { %v3215_v62 = vpop.f32.mrb[18].mxu0  ;;  %v3586_v63 = vpop.f32.mrb[18].mxu1  ;;  %v3803_v25 = vpack.c.bf16 %v3775_v6, %v3774_v42 }
 0x31d   : > { %v3349_v56 = vadd.f32 %v3215_v62, %v15277_v24  ;;  %v12568_v20 = vpop.f32.mrb[19].mxu0  ;;  %v15541_v35 = vadd.f32 %v3583_v14, %v3348_v13  ;;  %v12654_v46 = vpop.f32.mrb[19].mxu1 }
 0x31f   : > { %12762 = vmatmul.mubr.msk.bf16.gmra.mrb[124].mxu0 %vm990_vm2, %v3802_v43  ;;  %v15544_v4 = vadd.f32 %v3586_v63, %v3349_v56  ;;  %v3777_v43 = vld [vmem:[%s14261_s4 + $0xfe] sm:$0xff] }
 0x320   : > { %12765 = vmatprep.mubr.msk.bf16.mxu0 %vm14078_vm1, %v18049_v44 }
 0x322   : > { %v3220_v26 = vpop.f32.mrb[20].mxu0  ;;  %v3591_v22 = vpop.f32.mrb[20].mxu1 }
 0x323   : > { %v3350_v34 = vadd.f32 %v3220_v26, %v15290_v36  ;;  %v12571_v24 = vpop.f32.mrb[21].mxu0  ;;  %v12657_v61 = vpop.f32.mrb[21].mxu1  ;;  %v3776_v36 = vld [vmem:[%s14261_s4 + $0xf6] sm:$0xff] }
 0x324   : > { %v3223_v41 = vpop.f32.mrb[22].mxu0  ;;  %v3594_v0 = vpop.f32.mrb[22].mxu1  ;;  %v3804_v20 = vpack.c.bf16 %v3777_v43, %v3776_v36 }
 0x325   : > { %v3351_v53 = vadd.f32 %v3223_v41, %v15292_v1  ;;  %v12572_v33 = vpop.f32.mrb[23].mxu0  ;;  %v15552_v13 = vadd.f32 %v3591_v22, %v3350_v34  ;;  %v12658_v59 = vpop.f32.mrb[23].mxu1 }
 0x327   : > { %12766 = vmatmul.mubr.msk.bf16.gmra.mrb[128].mxu0 %vm990_vm2, %v3803_v25  ;;  %v15555_v14 = vadd.f32 %v3594_v0, %v3351_v53  ;;  %v3779_v25 = vld [vmem:[%s14261_s4 + $0x10e] sm:$0xff] }
 0x328   : > { %12769 = vmatprep.mubr.msk.bf16.mxu0 %vm14078_vm1, %v18049_v44 }
 0x32a   : > { %v3228_v62 = vpop.f32.mrb[24].mxu0  ;;  %v3599_v56 = vpop.f32.mrb[24].mxu1 }
 0x32b   : > { %v3352_v52 = vadd.f32 %v3228_v62, %v15305_v31  ;;  %v12575_v1 = vpop.f32.mrb[25].mxu0  ;;  %v12661_v46 = vpop.f32.mrb[25].mxu1  ;;  %v3778_v31 = vld [vmem:[%s14261_s4 + $0x106] sm:$0xff] }
 0x32c   : > { %v3231_v63 = vpop.f32.mrb[26].mxu0  ;;  %v3602_v26 = vpop.f32.mrb[26].mxu1  ;;  %v3805_v33 = vpack.c.bf16 %v3779_v25, %v3778_v31 }
 0x32d   : > { %v3353_v42 = vadd.f32 %v3231_v63, %v15307_v18  ;;  %v12576_v6 = vpop.f32.mrb[27].mxu0  ;;  %v15563_v34 = vadd.f32 %v3599_v56, %v3352_v52  ;;  %v12662_v24 = vpop.f32.mrb[27].mxu1 }
 0x32f   : > { %12770 = vmatmul.mubr.msk.bf16.gmra.mrb[132].mxu0 %vm990_vm2, %v3804_v20  ;;  %v15566_v22 = vadd.f32 %v3602_v26, %v3353_v42  ;;  %v3781_v20 = vld [vmem:[%s14261_s4 + $0x11e] sm:$0xff] }
 0x330   : > { %12773 = vmatprep.mubr.msk.bf16.mxu0 %vm14078_vm1, %v18049_v44 }
 0x332   : > { %v3236_v41 = vpop.f32.mrb[28].mxu0  ;;  %v3607_v53 = vpop.f32.mrb[28].mxu1 }
 0x333   : > { %v3354_v61 = vadd.f32 %v3236_v41, %v15320_v3  ;;  %v12579_v18 = vpop.f32.mrb[29].mxu0  ;;  %v12665_v59 = vpop.f32.mrb[29].mxu1  ;;  %v3780_v3 = vld [vmem:[%s14261_s4 + $0x116] sm:$0xff] }
 0x334   : > { %v3239_v0 = vpop.f32.mrb[30].mxu0  ;;  %v3610_v62 = vpop.f32.mrb[30].mxu1  ;;  %v3806_v6 = vpack.c.bf16 %v3781_v20, %v3780_v3 }
 0x335   : > { %v3355_v36 = vadd.f32 %v3239_v0, %v15322_v37  ;;  %v12580_v43 = vpop.f32.mrb[31].mxu0  ;;  %v15574_v52 = vadd.f32 %v3607_v53, %v3354_v61  ;;  %v12666_v1 = vpop.f32.mrb[31].mxu1 }
 0x337   : > { %12774 = vmatmul.mubr.msk.bf16.gmra.mrb[136].mxu0 %vm990_vm2, %v3805_v33  ;;  %v15577_v56 = vadd.f32 %v3610_v62, %v3355_v36  ;;  %v3783_v33 = vld [vmem:[%s14261_s4 + $0x12e] sm:$0xff] }
 0x338   : > { %12777 = vmatprep.mubr.msk.bf16.mxu0 %vm14078_vm1, %v18049_v44 }
 0x33a   : > { %v3244_v63 = vpop.f32.mrb[32].mxu0  ;;  %v3615_v42 = vpop.f32.mrb[32].mxu1 }
 0x33b   : > { %v3356_v46 = vadd.f32 %v3244_v63, %v15335_v23  ;;  %v12583_v37 = vpop.f32.mrb[33].mxu0  ;;  %v12669_v24 = vpop.f32.mrb[33].mxu1  ;;  %v3782_v23 = vld [vmem:[%s14261_s4 + $0x126] sm:$0xff] }
 0x33c   : > { %v3247_v26 = vpop.f32.mrb[34].mxu0  ;;  %v3618_v41 = vpop.f32.mrb[34].mxu1  ;;  %v3807_v43 = vpack.c.bf16 %v3783_v33, %v3782_v23 }
 0x33d   : > { %v3357_v31 = vadd.f32 %v3247_v26, %v15337_v38  ;;  %v12584_v25 = vpop.f32.mrb[35].mxu0  ;;  %v15585_v61 = vadd.f32 %v3615_v42, %v3356_v46  ;;  %v12670_v18 = vpop.f32.mrb[35].mxu1 }
 0x33f   : > { %12778 = vmatmul.mubr.msk.bf16.gmra.mrb[140].mxu0 %vm990_vm2, %v3806_v6  ;;  %v15588_v53 = vadd.f32 %v3618_v41, %v3357_v31  ;;  %v3785_v6 = vld [vmem:[%s14261_s4 + $0x13e] sm:$0xff] }
 0x340   : > { %12781 = vmatprep.mubr.msk.bf16.mxu0 %vm14078_vm1, %v18049_v44 }
 0x342   : > { %v3252_v0 = vpop.f32.mrb[36].mxu0  ;;  %v3623_v36 = vpop.f32.mrb[36].mxu1 }
 0x343   : > { %v3358_v59 = vadd.f32 %v3252_v0, %v15350_v17  ;;  %v12587_v38 = vpop.f32.mrb[37].mxu0  ;;  %v12673_v1 = vpop.f32.mrb[37].mxu1  ;;  %v3784_v17 = vld [vmem:[%s14261_s4 + $0x136] sm:$0xff] }
 0x344   : > { %v3255_v62 = vpop.f32.mrb[38].mxu0  ;;  %v3626_v63 = vpop.f32.mrb[38].mxu1  ;;  %v3808_v25 = vpack.c.bf16 %v3785_v6, %v3784_v17 }
 0x345   : > { %v3359_v3 = vadd.f32 %v3255_v62, %v15352_v49  ;;  %v12588_v20 = vpop.f32.mrb[39].mxu0  ;;  %v15596_v46 = vadd.f32 %v3623_v36, %v3358_v59  ;;  %v12674_v37 = vpop.f32.mrb[39].mxu1 }
 0x347   : > { %12782 = vmatmul.mubr.msk.bf16.gmra.mrb[144].mxu0 %vm990_vm2, %v3807_v43  ;;  %v15599_v42 = vadd.f32 %v3626_v63, %v3359_v3  ;;  %v3787_v43 = vld [vmem:[%s14261_s4 + $0x14e] sm:$0xff] }
 0x348   : > { %12785 = vmatprep.mubr.msk.bf16.mxu0 %vm14078_vm1, %v18049_v44 }
 0x34a   : > { %v3260_v26 = vpop.f32.mrb[40].mxu0  ;;  %v3631_v31 = vpop.f32.mrb[40].mxu1 }
 0x34b   : > { %v3360_v24 = vadd.f32 %v3260_v26, %v15365_v57  ;;  %v12591_v49 = vpop.f32.mrb[41].mxu0  ;;  %v12677_v18 = vpop.f32.mrb[41].mxu1  ;;  %v3786_v57 = vld [vmem:[%s14261_s4 + $0x146] sm:$0xff] }
 0x34c   : > { %v3263_v41 = vpop.f32.mrb[42].mxu0  ;;  %v3634_v0 = vpop.f32.mrb[42].mxu1  ;;  %v3809_v20 = vpack.c.bf16 %v3787_v43, %v3786_v57 }
 0x34d   : > { %v3361_v23 = vadd.f32 %v3263_v41, %v15367_v21  ;;  %v12592_v33 = vpop.f32.mrb[43].mxu0  ;;  %v15607_v59 = vadd.f32 %v3631_v31, %v3360_v24  ;;  %v12678_v38 = vpop.f32.mrb[43].mxu1 }
 0x34f   : > { %12786 = vmatmul.mubr.msk.bf16.gmra.mrb[148].mxu0 %vm990_vm2, %v3808_v25  ;;  %v15610_v36 = vadd.f32 %v3634_v0, %v3361_v23  ;;  %v3789_v25 = vld [vmem:[%s14261_s4 + $0x15e] sm:$0xff] }
 0x350   : > { %12789 = vmatprep.mubr.msk.bf16.mxu0 %vm14078_vm1, %v18049_v44 }
 0x352   : > { %v3268_v62 = vpop.f32.mrb[44].mxu0  ;;  %v3639_v3 = vpop.f32.mrb[44].mxu1 }
 0x353   : > { %v3362_v1 = vadd.f32 %v3268_v62, %v15380_v7  ;;  %v12595_v21 = vpop.f32.mrb[45].mxu0  ;;  %v12681_v37 = vpop.f32.mrb[45].mxu1  ;;  %v3788_v7 = vld [vmem:[%s14261_s4 + $0x156] sm:$0xff] }
 0x354   : > { %v3271_v63 = vpop.f32.mrb[46].mxu0  ;;  %v3642_v26 = vpop.f32.mrb[46].mxu1  ;;  %v3810_v33 = vpack.c.bf16 %v3789_v25, %v3788_v7 }
 0x355   : > { %v3363_v17 = vadd.f32 %v3271_v63, %v15382_v11  ;;  %v12596_v6 = vpop.f32.mrb[47].mxu0  ;;  %v15618_v24 = vadd.f32 %v3639_v3, %v3362_v1  ;;  %v12682_v49 = vpop.f32.mrb[47].mxu1 }
 0x357   : > { %12790 = vmatmul.mubr.msk.bf16.gmra.mrb[152].mxu0 %vm990_vm2, %v3809_v20  ;;  %v15621_v31 = vadd.f32 %v3642_v26, %v3363_v17 }
 0x358   : > { %12793 = vmatprep.mubr.msk.bf16.mxu0 %vm14078_vm1, %v18049_v44 }
 0x35a   : > { %v3276_v41 = vpop.f32.mrb[48].mxu0  ;;  %v3647_v11 = vpop.f32.mrb[48].mxu1 }
 0x35b   : > { %v3364_v18 = vadd.f32 %v3276_v41, %v15397_v60  ;;  %v12599_v23 = vpop.f32.mrb[49].mxu0  ;;  %v12685_v38 = vpop.f32.mrb[49].mxu1  ;;  %v3790_v60 = vld [vmem:[%s14261_s4 + $0x166] sm:$0xf]  ;;  %s18082_s4 = sld [smem:[#allocation28_spill]] }
 0x35c   : > { %v3279_v0 = vpop.f32.mrb[50].mxu0  ;;  %v3650_v62 = vpop.f32.mrb[50].mxu1  ;;  %v3811_v6 = vpack.c.bf16 %v3790_v60, %v3790_v60 }
 0x35d   : > { %v3365_v57 = vadd.f32 %v3279_v0, %v15399_v45  ;;  %v12600_v43 = vpop.f32.mrb[51].mxu0  ;;  %v15629_v1 = vadd.f32 %v3647_v11, %v3364_v18  ;;  %v12686_v21 = vpop.f32.mrb[51].mxu1 }
 0x35f   : > { %12794 = vmatmul.mubr.msk.bf16.gmra.mrb[156].mxu0 %vm990_vm2, %v3810_v33  ;;  %v15632_v3 = vadd.f32 %v3650_v62, %v3365_v57 }
 0x360   : > { %12797 = vmatprep.mubr.msk.bf16.mxu0 %vm14078_vm1, %v18049_v44 }
 0x362   : > { %v3284_v20 = vpop.f32.mrb[52].mxu0  ;;  %v3655_v17 = vpop.f32.mrb[52].mxu1 }
 0x363   : > { %v3366_v63 = vadd.f32 %v3284_v20, %v15411_v27  ;;  %v12603_v37 = vpop.f32.mrb[53].mxu0  ;;  %v12689_v26 = vpop.f32.mrb[53].mxu1 }
 0x364   : > { %v3287_v45 = vpop.f32.mrb[54].mxu0  ;;  %v3658_v25 = vpop.f32.mrb[54].mxu1 }
 0x365   : > { %v3367_v49 = vadd.f32 %v3287_v45, %v15413_v39  ;;  %v12604_v7 = vpop.f32.mrb[55].mxu0  ;;  %v15639_v41 = vadd.f32 %v3655_v17, %v3366_v63  ;;  %v12690_v18 = vpop.f32.mrb[55].mxu1 }
 0x367   : > { %12798 = vmatmul.mubr.msk.bf16.gmra.mrb[160].mxu0 %vm990_vm2, %v3811_v6  ;;  %v15642_v23 = vadd.f32 %v3658_v25, %v3367_v49 }
 0x368   : > { %12895 = vmatprep.mubr.msk.bf16.mxu0 %vm14078_vm1, %v18049_v44 }
 0x36a   : > { %v3292_v27 = vpop.f32.mrb[56].mxu0  ;;  %v3663_v0 = vpop.f32.mrb[56].mxu1 }
 0x36b   : > { %v3368_v11 = vadd.f32 %v3292_v27, %v15423_v58  ;;  %v12607_v33 = vpop.f32.mrb[57].mxu0  ;;  %v12693_v57 = vpop.f32.mrb[57].mxu1 }
 0x36c   : > { %v3295_v38 = vpop.f32.mrb[58].mxu0  ;;  %v3666_v62 = vpop.f32.mrb[58].mxu1 }
 0x36d   : > { %v3369_v39 = vadd.f32 %v3295_v38, %v15425_v54  ;;  %v12608_v43 = vpop.f32.mrb[59].mxu0  ;;  %v15648_v21 = vadd.f32 %v3663_v0, %v3368_v11  ;;  %v12694_v60 = vpop.f32.mrb[59].mxu1 }
 0x36f   : > { %v15650_v20 = vadd.f32 %v3666_v62, %v3369_v39 }
 0x372   : > { %v3300_v63 = vpop.f32.mrb[60].mxu0  ;;  %v3671_v6 = vpop.f32.mrb[60].mxu1 }
 0x373   : > { %v3370_v37 = vadd.f32 %v3300_v63, %v15434_v32  ;;  %v12611_v17 = vpop.f32.mrb[61].mxu0  ;;  %v12697_v58 = vpop.f32.mrb[61].mxu1 }
 0x374   : > { %v3303_v45 = vpop.f32.mrb[62].mxu0  ;;  %v3674_v7 = vpop.f32.mrb[62].mxu1 }
 0x375   : > { %v3371_v26 = vadd.f32 %v3303_v45, %v15436_v40  ;;  %v12612_v49 = vpop.f32.mrb[63].mxu0  ;;  %v15654_v25 = vadd.f32 %v3671_v6, %v3370_v37  ;;  %v12698_v54 = vpop.f32.mrb[63].mxu1 }
 0x377   : > { %v15656_v18 = vadd.f32 %v3674_v7, %v3371_v26 }
 0x37a   : > { %v3308_v27 = vpop.f32.mrb[64].mxu0  ;;  %v3679_v0 = vpop.f32.mrb[64].mxu1 }
 0x37b   : > { %v3372_v11 = vadd.f32 %v3308_v27, %v15445_v9  ;;  %v12615_v33 = vpop.f32.mrb[65].mxu0  ;;  %v12701_v32 = vpop.f32.mrb[65].mxu1 }
 0x37c   : > { %v3311_v38 = vpop.f32.mrb[66].mxu0  ;;  %v3682_v43 = vpop.f32.mrb[66].mxu1 }
 0x37d   : > { %v3373_v57 = vadd.f32 %v3311_v38, %v15447_v19  ;;  %v12616_v39 = vpop.f32.mrb[67].mxu0  ;;  %v15660_v62 = vadd.f32 %v3679_v0, %v3372_v11  ;;  %v12702_v40 = vpop.f32.mrb[67].mxu1 }
 0x37f   : > { %v15662_v60 = vadd.f32 %v3682_v43, %v3373_v57 }
 0x382   : > { %v3316_v63 = vpop.f32.mrb[68].mxu0  ;;  %v3687_v6 = vpop.f32.mrb[68].mxu1 }
 0x383   : > { %v3374_v37 = vadd.f32 %v3316_v63, %v15456_v47  ;;  %v12619_v17 = vpop.f32.mrb[69].mxu0  ;;  %v12705_v9 = vpop.f32.mrb[69].mxu1 }
 0x384   : > { %v3319_v45 = vpop.f32.mrb[70].mxu0  ;;  %v3690_v49 = vpop.f32.mrb[70].mxu1 }
 0x385   : > { %v3375_v58 = vadd.f32 %v3319_v45, %v15458_v8  ;;  %v12620_v26 = vpop.f32.mrb[71].mxu0  ;;  %v15666_v7 = vadd.f32 %v3687_v6, %v3374_v37  ;;  %v12706_v19 = vpop.f32.mrb[71].mxu1 }
 0x386   : > { %v15682_v19 = vld [vmem:[%s18078_s5] ss:$0 sm:$0xff] }
 0x387   : > { %v15668_v54 = vadd.f32 %v3690_v49, %v3375_v58 }
 0x38a   : > { %v3324_v27 = vpop.f32.mrb[72].mxu0  ;;  %v3695_v0 = vpop.f32.mrb[72].mxu1 }
 0x38b   : > { %v3376_v11 = vadd.f32 %v3324_v27, %v15467_v16  ;;  %v12623_v33 = vpop.f32.mrb[73].mxu0  ;;  %v12709_v47 = vpop.f32.mrb[73].mxu1 }
 0x38c   : > { %v3327_v38 = vpop.f32.mrb[74].mxu0  ;;  %v3698_v39 = vpop.f32.mrb[74].mxu1 }
 0x38d   : > { %v3377_v32 = vadd.f32 %v3327_v38, %v15469_v15  ;;  %v12624_v57 = vpop.f32.mrb[75].mxu0  ;;  %v15672_v43 = vadd.f32 %v3695_v0, %v3376_v11  ;;  %v12710_v8 = vpop.f32.mrb[75].mxu1 }
 0x38f   : > { %v15674_v40 = vadd.f32 %v3698_v39, %v3377_v32  ;;  %v13563_v32 = vld [vmem:[%s18079_s20 + $0x4] ss:$12 sps:$4 sm:$0xff]  }
 0x390   : > { %4443 = vmatprep.mubr.bf16.mxu1 %v13563_v32 }
 0x392   : > { %v3332_v63 = vpop.f32.mrb[76].mxu0  ;;  %v3703_v6 = vpop.f32.mrb[76].mxu1 }
 0x393   : > { %v3378_v37 = vadd.f32 %v3332_v63, %v15477_v55  ;;  %v12627_v17 = vpop.f32.mrb[77].mxu0  ;;  %v12713_v16 = vpop.f32.mrb[77].mxu1 }
 0x394   : > { %v3335_v45 = vpop.f32.mrb[78].mxu0  ;;  %v3706_v26 = vpop.f32.mrb[78].mxu1 }
 0x395   : > { %v12628_v9 = vpop.f32.mrb[79].mxu0  ;;  %v15677_v58 = vadd.f32 %v3703_v6, %v3378_v37  ;;  %v12714_v49 = vpop.f32.mrb[79].mxu1 }
 0x39a   : > { %v3914_v15 = vpop.f32.mrb[80].mxu0 }
 0x39b   : > { %v12719_v27 = vpop.f32.mrb[81].mxu0  ;;  %v4080_v11 = vadd.f32 %v3914_v15, %v15486_v2 }
 0x39c   : > { %v3917_v33 = vpop.f32.mrb[82].mxu0 }
 0x39d   : > { %v12720_v55 = vpop.f32.mrb[83].mxu0  ;;  %v4081_v0 = vadd.f32 %v3917_v33, %v15488_v28  ;;  %v4128_v38 = vadd.f32 %v15682_v19, %v4080_v11 }
 0x39f   : > { %v4129_v47 = vadd.f32 %v15682_v19, %v4081_v0  ;;  %v4169_v57 = vmax.f32 %v4128_v38, 0.0 }
 0x3a1   : > { %v4170_v39 = vmax.f32 %v4129_v47, 0.0 }
 0x3a2   : > { %v3922_v8 = vpop.f32.mrb[84].mxu0 }
 0x3a3   : > { %v4082_v63 = vadd.f32 %v3922_v8, %v15497_v30  ;;  %v12723_v37 = vpop.f32.mrb[85].mxu0  ;;  %v15692_v2 = vpack.c.bf16 %v4170_v39, %v4169_v57 }
 0x3a4   : > { %v3925_v17 = vpop.f32.mrb[86].mxu0 }
 0x3a5   : > { %v4130_v28 = vadd.f32 %v15682_v19, %v4082_v63  ;;  %v4083_v6 = vadd.f32 %v3925_v17, %v15499_v12  ;;  %v12724_v45 = vpop.f32.mrb[87].mxu0 }
 0x3a7   : > { %v4131_v16 = vadd.f32 %v15682_v19, %v4083_v6  ;;  %v4171_v9 = vmax.f32 %v4130_v28, 0.0 }
 0x3a9   : > { %v4172_v26 = vmax.f32 %v4131_v16, 0.0 }
 0x3aa   : > { %v3930_v49 = vpop.f32.mrb[88].mxu0 }
 0x3ab   : > { %v4084_v15 = vadd.f32 %v3930_v49, %v15508_v48  ;;  %v12727_v27 = vpop.f32.mrb[89].mxu0  ;;  %v15698_v11 = vpack.c.bf16 %v4172_v26, %v4171_v9 }
 0x3ac   : > { %v3933_v30 = vpop.f32.mrb[90].mxu0 }
 0x3ad   : > { %v4132_v33 = vadd.f32 %v15682_v19, %v4084_v15  ;;  %v4085_v55 = vadd.f32 %v3933_v30, %v15510_v10  ;;  %v12728_v0 = vpop.f32.mrb[91].mxu0 }
 0x3af   : > { %v4133_v38 = vadd.f32 %v15682_v19, %v4085_v55  ;;  %v4173_v12 = vmax.f32 %v4132_v33, 0.0 }
 0x3b1   : > { %v4174_v47 = vmax.f32 %v4133_v38, 0.0 }
 0x3b2   : > { %v3938_v32 = vpop.f32.mrb[92].mxu0 }
 0x3b3   : > { %v4086_v57 = vadd.f32 %v3938_v32, %v15519_v29  ;;  %v12731_v39 = vpop.f32.mrb[93].mxu0  ;;  %v15704_v8 = vpack.c.bf16 %v4174_v47, %v4173_v12 }
 0x3b4   : > { %v3941_v48 = vpop.f32.mrb[94].mxu0 }
 0x3b5   : > { %v4134_v63 = vadd.f32 %v15682_v19, %v4086_v57  ;;  %v4087_v37 = vadd.f32 %v3941_v48, %v15521_v5  ;;  %v12732_v17 = vpop.f32.mrb[95].mxu0 }
 0x3b7   : > { %v4135_v28 = vadd.f32 %v15682_v19, %v4087_v37  ;;  %v4175_v10 = vmax.f32 %v4134_v63, 0.0 }
 0x3b9   : > { %v4176_v6 = vmax.f32 %v4135_v28, 0.0 }
 0x3ba   : > { %v3946_v45 = vpop.f32.mrb[96].mxu0 }
 0x3bb   : > { %v4088_v16 = vadd.f32 %v3946_v45, %v15530_v50  ;;  %v12735_v9 = vpop.f32.mrb[97].mxu0  ;;  %v15710_v26 = vpack.c.bf16 %v4176_v6, %v4175_v10 }
 0x3bc   : > { %v3949_v29 = vpop.f32.mrb[98].mxu0 }
 0x3bd   : > { %v4136_v49 = vadd.f32 %v15682_v19, %v4088_v16  ;;  %v4089_v15 = vadd.f32 %v3949_v29, %v15532_v51  ;;  %v12736_v27 = vpop.f32.mrb[99].mxu0 }
 0x3bf   : > { %v4137_v30 = vadd.f32 %v15682_v19, %v4089_v15  ;;  %v4177_v5 = vmax.f32 %v4136_v49, 0.0 }
 0x3c1   : > { %v4178_v33 = vmax.f32 %v4137_v30, 0.0 }
 0x3c2   : > { %v3954_v55 = vpop.f32.mrb[100].mxu0 }
 0x3c3   : > { %v4090_v0 = vadd.f32 %v3954_v55, %v15541_v35  ;;  %v12739_v38 = vpop.f32.mrb[101].mxu0  ;;  %v15716_v12 = vpack.c.bf16 %v4178_v33, %v4177_v5 }
 0x3c4   : > { %v3957_v50 = vpop.f32.mrb[102].mxu0 }
 0x3c5   : > { %v4138_v47 = vadd.f32 %v15682_v19, %v4090_v0  ;;  %v4091_v32 = vadd.f32 %v3957_v50, %v15544_v4  ;;  %v12740_v57 = vpop.f32.mrb[103].mxu0 }
 0x3c7   : > { %v4139_v39 = vadd.f32 %v15682_v19, %v4091_v32  ;;  %v4179_v51 = vmax.f32 %v4138_v47, 0.0 }
 0x3c9   : > { %v4180_v48 = vmax.f32 %v4139_v39, 0.0 }
 0x3ca   : > { %v3962_v63 = vpop.f32.mrb[104].mxu0 }
 0x3cb   : > { %v15721_v37 = vpack.c.bf16 %v4180_v48, %v4179_v51  ;;  %v4092_v17 = vadd.f32 %v3962_v63, %v15552_v13  ;;  %v12743_v28 = vpop.f32.mrb[105].mxu0 }
 0x3cc   : > { %v3965_v35 = vpop.f32.mrb[106].mxu0 }
 0x3cd   : > { %v4140_v10 = vadd.f32 %v15682_v19, %v4092_v17  ;;  %v4093_v6 = vadd.f32 %v3965_v35, %v15555_v14  ;;  %v12744_v45 = vpop.f32.mrb[107].mxu0 }
 0x3cf   : > { %v4141_v16 = vadd.f32 %v15682_v19, %v4093_v6  ;;  %v4181_v4 = vmax.f32 %v4140_v10, 0.0 }
 0x3d1   : > { %v4182_v9 = vmax.f32 %v4141_v16, 0.0 }
 0x3d2   : > { %v3970_v29 = vpop.f32.mrb[108].mxu0 }
 0x3d3   : > { %v15727_v49 = vpack.c.bf16 %v4182_v9, %v4181_v4  ;;  %v4094_v15 = vadd.f32 %v3970_v29, %v15563_v34  ;;  %v12747_v27 = vpop.f32.mrb[109].mxu0 }
 0x3d4   : > { %v3973_v30 = vpop.f32.mrb[110].mxu0 }
 0x3d5   : > { %v4142_v13 = vadd.f32 %v15682_v19, %v4094_v15  ;;  %v4095_v5 = vadd.f32 %v3973_v30, %v15566_v22  ;;  %v12748_v33 = vpop.f32.mrb[111].mxu0 }
 0x3d7   : > { %v4143_v55 = vadd.f32 %v15682_v19, %v4095_v5  ;;  %v4183_v14 = vmax.f32 %v4142_v13, 0.0 }
 0x3d9   : > { %v4184_v0 = vmax.f32 %v4143_v55, 0.0 }
 0x3da   : > { %v3978_v38 = vpop.f32.mrb[112].mxu0 }
 0x3db   : > { %v15733_v50 = vpack.c.bf16 %v4184_v0, %v4183_v14  ;;  %v4096_v47 = vadd.f32 %v3978_v38, %v15574_v52  ;;  %v12751_v32 = vpop.f32.mrb[113].mxu0 }
 0x3dc   : > { %v3981_v57 = vpop.f32.mrb[114].mxu0 }
 0x3dd   : > { %v4144_v34 = vadd.f32 %v15682_v19, %v4096_v47  ;;  %v4097_v39 = vadd.f32 %v3981_v57, %v15577_v56  ;;  %v12752_v51 = vpop.f32.mrb[115].mxu0 }
 0x3df   : > { %v4145_v48 = vadd.f32 %v15682_v19, %v4097_v39  ;;  %v4185_v22 = vmax.f32 %v4144_v34, 0.0 }
 0x3e1   : > { %v4186_v63 = vmax.f32 %v4145_v48, 0.0 }
 0x3e2   : > { %v3986_v17 = vpop.f32.mrb[116].mxu0 }
 0x3e3   : > { %v4098_v28 = vadd.f32 %v3986_v17, %v15585_v61  ;;  %v12755_v35 = vpop.f32.mrb[117].mxu0  ;;  %v4250_v10 = vpack.c.bf16 %v4186_v63, %v4185_v22 }
 0x3e4   : > { %v3989_v6 = vpop.f32.mrb[118].mxu0 }
 0x3e5   : > { %v4146_v45 = vadd.f32 %v15682_v19, %v4098_v28  ;;  %v4099_v52 = vadd.f32 %v3989_v6, %v15588_v53  ;;  %11641 = vmatprep.subr.bf16.mxu1 %v4250_v10  ;;  %v12756_v16 = vpop.f32.mrb[119].mxu0 }
 0x3e6   : > { %11642 = vmatpush3.bf16.msra.mxu1 %v15692_v2 }
 0x3e7   : > { %v4147_v56 = vadd.f32 %v15682_v19, %v4099_v52  ;;  %v4187_v4 = vmax.f32 %v4146_v45, 0.0 }
 0x3e9   : > { %v4188_v9 = vmax.f32 %v4147_v56, 0.0 }
 0x3ea   : > { %v3994_v29 = vpop.f32.mrb[120].mxu0 }
 0x3eb   : > { %v4100_v15 = vadd.f32 %v3994_v29, %v15596_v46  ;;  %v12759_v27 = vpop.f32.mrb[121].mxu0  ;;  %v4251_v61 = vpack.c.bf16 %v4188_v9, %v4187_v4 }
 0x3ec   : > { %v3997_v30 = vpop.f32.mrb[122].mxu0 }
 0x3ed   : > { %v4148_v13 = vadd.f32 %v15682_v19, %v4100_v15  ;;  %v4101_v5 = vadd.f32 %v3997_v30, %v15599_v42  ;;  %11643 = vmatprep.subr.bf16.mxu1 %v4251_v61  ;;  %v12760_v53 = vpop.f32.mrb[123].mxu0 }
 0x3ee   : > { %11644 = vmatpush3.bf16.msra.mxu1 %v15698_v11 }
 0x3ef   : > { %v4149_v2 = vadd.f32 %v15682_v19, %v4101_v5  ;;  %v4189_v33 = vmax.f32 %v4148_v13, 0.0 }
 0x3f1   : > { %v4190_v55 = vmax.f32 %v4149_v2, 0.0 }
 0x3f2   : > { %v4002_v14 = vpop.f32.mrb[124].mxu0 }
 0x3f3   : > { %v4102_v0 = vadd.f32 %v4002_v14, %v15607_v59  ;;  %v12763_v38 = vpop.f32.mrb[125].mxu0  ;;  %v4252_v46 = vpack.c.bf16 %v4190_v55, %v4189_v33 }
 0x3f4   : > { %v4005_v47 = vpop.f32.mrb[126].mxu0 }
 0x3f5   : > { %v4150_v32 = vadd.f32 %v15682_v19, %v4102_v0  ;;  %v4103_v57 = vadd.f32 %v4005_v47, %v15610_v36  ;;  %11645 = vmatprep.subr.bf16.mxu1 %v4252_v46  ;;  %v12764_v42 = vpop.f32.mrb[127].mxu0 }
 0x3f6   : > { %11646 = vmatpush3.bf16.msra.mxu1 %v15704_v8 }
 0x3f7   : > { %v4151_v11 = vadd.f32 %v15682_v19, %v4103_v57  ;;  %v4191_v34 = vmax.f32 %v4150_v32, 0.0 }
 0x3f9   : > { %v4192_v39 = vmax.f32 %v4151_v11, 0.0 }
 0x3fa   : > { %v4010_v51 = vpop.f32.mrb[128].mxu0 }
 0x3fb   : > { %v4104_v48 = vadd.f32 %v4010_v51, %v15618_v24  ;;  %v12767_v22 = vpop.f32.mrb[129].mxu0  ;;  %v4253_v59 = vpack.c.bf16 %v4192_v39, %v4191_v34 }
 0x3fc   : > { %v4013_v63 = vpop.f32.mrb[130].mxu0 }
 0x3fd   : > { %v4152_v17 = vadd.f32 %v15682_v19, %v4104_v48  ;;  %v4105_v28 = vadd.f32 %v4013_v63, %v15621_v31  ;;  %11647 = vmatprep.subr.bf16.mxu1 %v4253_v59  ;;  %v12768_v36 = vpop.f32.mrb[131].mxu0  ;;  %v13566_v48 = vld [vmem:[%s18079_s20 + $0x1c] ss:$12 sps:$4 sm:$0xff]  }
 0x3fe   : > { %11648 = vmatpush3.bf16.msra.mxu1 %v15710_v26 }
 0x3ff   : > { %v4153_v8 = vadd.f32 %v15682_v19, %v4105_v28  ;;  %v4193_v35 = vmax.f32 %v4152_v17, 0.0 }
 0x401   : > { %v4194_v10 = vmax.f32 %v4153_v8, 0.0 }
 0x402   : > { %v4018_v6 = vpop.f32.mrb[132].mxu0 }
 0x403   : > { %v4106_v45 = vadd.f32 %v4018_v6, %v15629_v1  ;;  %v12771_v52 = vpop.f32.mrb[133].mxu0  ;;  %v4254_v24 = vpack.c.bf16 %v4194_v10, %v4193_v35  ;;  %v13564_v35 = vld [vmem:[%s18079_s20 + $0x18] ss:$12 sps:$4 sm:$0xff]   ;;  %v13569_v6 = vld [vmem:[%s18079_s20 + $0x34] ss:$12 sps:$4 sm:$0xff]  }
 0x404   : > { %v4021_v16 = vpop.f32.mrb[134].mxu0 }
 0x405   : > { %v4154_v56 = vadd.f32 %v15682_v19, %v4106_v45  ;;  %v4107_v4 = vadd.f32 %v4021_v16, %v15632_v3  ;;  %11649 = vmatprep.subr.bf16.mxu1 %v4254_v24  ;;  %v12772_v31 = vpop.f32.mrb[135].mxu0 }
 0x406   : > { %11650 = vmatpush3.bf16.msra.mxu1 %v15716_v12 }
 0x407   : > { %v4155_v26 = vadd.f32 %v15682_v19, %v4107_v4  ;;  %v4195_v9 = vmax.f32 %v4154_v56, 0.0 }
 0x409   : > { %v4196_v29 = vmax.f32 %v4155_v26, 0.0 }
 0x40a   : > { %v4026_v15 = vpop.f32.mrb[136].mxu0 }
 0x40b   : > { %v4108_v27 = vadd.f32 %v4026_v15, %v15639_v41  ;;  %v12775_v61 = vpop.f32.mrb[137].mxu0  ;;  %v4255_v1 = vpack.c.bf16 %v4196_v29, %v4195_v9  ;;  %v13567_v9 = vld [vmem:[%s18079_s20 + $0x30] ss:$12 sps:$4 sm:$0xff]   ;;  %v13572_v15 = vld [vmem:[%s18079_s20 + $0x4c] ss:$12 sps:$4 sm:$0xff]  }
 0x40c   : > { %v4029_v30 = vpop.f32.mrb[138].mxu0 }
 0x40d   : > { %v4156_v13 = vadd.f32 %v15682_v19, %v4108_v27  ;;  %v4109_v5 = vadd.f32 %v4029_v30, %v15642_v23  ;;  %11651 = vmatprep.subr.bf16.mxu1 %v4255_v1  ;;  %v12776_v3 = vpop.f32.mrb[139].mxu0 }
 0x40e   : > { %11652 = vmatpush3.bf16.msra.mxu1 %v15721_v37 }
 0x40f   : > { %v4157_v12 = vadd.f32 %v15682_v19, %v4109_v5  ;;  %v4197_v53 = vmax.f32 %v4156_v13, 0.0 }
 0x411   : > { %v4198_v2 = vmax.f32 %v4157_v12, 0.0 }
 0x412   : > { %v4034_v33 = vpop.f32.mrb[140].mxu0 }
 0x413   : > { %v4110_v55 = vadd.f32 %v4034_v33, %v15648_v21  ;;  %v12779_v14 = vpop.f32.mrb[141].mxu0  ;;  %v4256_v41 = vpack.c.bf16 %v4198_v2, %v4197_v53  ;;  %v13570_v53 = vld [vmem:[%s18079_s20 + $0x48] ss:$12 sps:$4 sm:$0xff]   ;;  %v13575_v33 = vld [vmem:[%s18079_s20 + $0x64] ss:$12 sps:$4 sm:$0xff]  }
 0x414   : > { %v4037_v0 = vpop.f32.mrb[142].mxu0 }
 0x415   : > { %v4158_v38 = vadd.f32 %v15682_v19, %v4110_v55  ;;  %v4111_v46 = vadd.f32 %v4037_v0, %v15650_v20  ;;  %11653 = vmatprep.subr.bf16.mxu1 %v4256_v41  ;;  %v12780_v23 = vpop.f32.mrb[143].mxu0  ;;  %v13561_v20 = vld [vmem:[%s18079_s20] ss:$12 sps:$4 sm:$0xff]  }
 0x416   : > { %11654 = vmatpush3.bf16.msra.mxu1 %v15727_v49 }
 0x417   : > { %v4159_v37 = vadd.f32 %v15682_v19, %v4111_v46  ;;  %v4199_v47 = vmax.f32 %v4158_v38, 0.0 }
 0x419   : > { %v4200_v32 = vmax.f32 %v4159_v37, 0.0  ;;  %v13573_v37 = vld [vmem:[%s18079_s20 + $0x60] ss:$12 sps:$4 sm:$0xff]  }
 0x41a   : > { %v4042_v57 = vpop.f32.mrb[144].mxu0 }
 0x41b   : > { %v4112_v42 = vadd.f32 %v4042_v57, %v15654_v25  ;;  %v12783_v11 = vpop.f32.mrb[145].mxu0  ;;  %v4257_v21 = vpack.c.bf16 %v4200_v32, %v4199_v47  ;;  %v13578_v32 = vld [vmem:[%s18079_s20 + $0x7c] ss:$12 sps:$4 sm:$0xff]  }
 0x41c   : > { %v4045_v34 = vpop.f32.mrb[146].mxu0  ;;  %v13581_v11 = vld [vmem:[%s18079_s20 + $0x94] ss:$12 sps:$4 sm:$0xff]  }
 0x41d   : > { %v4160_v39 = vadd.f32 %v15682_v19, %v4112_v42  ;;  %v4113_v51 = vadd.f32 %v4045_v34, %v15656_v18  ;;  %11655 = vmatprep.subr.bf16.mxu1 %v4257_v21  ;;  %v12784_v49 = vpop.f32.mrb[147].mxu0  ;;  %v13579_v21 = vld [vmem:[%s18079_s20 + $0x90] ss:$12 sps:$4 sm:$0xff]   ;;  %v13584_v34 = vld [vmem:[%s18079_s20 + $0xac] ss:$12 sps:$4 sm:$0x1f]  }
 0x41e   : > { %11656 = vmatpush3.bf16.msra.mxu1 %v15733_v50  ;;  %v13587_v49 = vld [vmem:[%s18079_s20 + $0x38] ss:$12 sps:$4 sm:$0xff]  }
 0x41f   : > { %v4161_v25 = vadd.f32 %v15682_v19, %v4113_v51  ;;  %v4201_v22 = vmax.f32 %v4160_v39, 0.0  ;;  %v13582_v39 = vld [vmem:[%s18079_s20 + $0xa8] ss:$12 sps:$4 sm:$0x1f]  }
 0x420   : > { %v13585_v51 = vld [vmem:[%s18079_s20 + $0x8] ss:$12 sps:$4 sm:$0xff]  }
 0x421   : > { %v4202_v59 = vmax.f32 %v4161_v25, 0.0  ;;  %4444 = vmatmul.mubr.bf16.vlgmr.msra.gmra.mrb[80].mxu1 %v13561_v20  ;;  %v13586_v20 = vld [vmem:[%s18079_s20 + $0x20] ss:$12 sps:$4 sm:$0xff]   ;;  %v13589_v25 = vld [vmem:[%s18079_s20 + $0x68] ss:$12 sps:$4 sm:$0xff]  }
 0x422   : > { %v4050_v63 = vpop.f32.mrb[148].mxu0  ;;  %4451 = vmatprep.mubr.bf16.mxu1 %v13566_v48  ;;  %v13588_v48 = vld [vmem:[%s18079_s20 + $0x50] ss:$12 sps:$4 sm:$0xff]  }
 0x423   : > { %v4114_v18 = vadd.f32 %v4050_v63, %v15660_v62  ;;  %v12787_v17 = vpop.f32.mrb[149].mxu0  ;;  %v4258_v28 = vpack.c.bf16 %v4202_v59, %v4201_v22  ;;  %v13590_v22 = vld [vmem:[%s18079_s20 + $0x80] ss:$12 sps:$4 sm:$0xff]   ;;  %v13591_v59 = vld [vmem:[%s18079_s20 + $0x98] ss:$12 sps:$4 sm:$0xff]  }
 0x424   : > { %v4053_v36 = vpop.f32.mrb[150].mxu0  ;;  %v13592_v63 = vld [vmem:[%s18079_s20 + $0xb0] ss:$12 sps:$4 sm:$0x1f]   ;;  %v13594_v17 = vld [vmem:[%s18080_s0 + $0x20] sm:$0xff]  }
 0x425   : > { %v4162_v8 = vadd.f32 %v15682_v19, %v4114_v18  ;;  %v4115_v50 = vadd.f32 %v4053_v36, %v15662_v60  ;;  %12801 = vmatprep.subr.bf16.mxu1 %v4258_v28  ;;  %v12788_v10 = vpop.f32.mrb[151].mxu0  ;;  %v13593_v18 = vld [vmem:[%s18080_s0 + $0x10] sm:$0xff]   ;;  %12892 = vmatpush3.bf16.msra.mxu0 %v13594_v17  ;;  %v13596_v36 = vld [vmem:[%s18080_s0 + $0x28] sm:$0xff]  }
 0x426   : > { %12802 = vmatpush3.bf16.msra.mxu1 %v4258_v28  ;;  %12893 = vmatprep.subr.bf16.mxu0 %v18049_v44  ;;  %v13595_v28 = vld [vmem:[%s18080_s0 + $0x18] sm:$0xff]  }
 0x427   : > { %v4163_v62 = vadd.f32 %v15682_v19, %v4115_v50  ;;  %v4203_v45 = vmax.f32 %v4162_v8, 0.0 }
 0x429   : > { %v4204_v52 = vmax.f32 %v4163_v62, 0.0  ;;  %4452 = vmatmul.mubr.bf16.gmra.mrb[84].mxu1 %v13564_v35  ;;  %12894 = vmatpush3.bf16.msra.mxu0 %v13596_v36 }
 0x42a   : > { %v4058_v24 = vpop.f32.mrb[152].mxu0  ;;  %4459 = vmatprep.mubr.bf16.mxu1 %v13569_v6  ;;  %12955 = vmatprep.subr.bf16.mxu0 %v18049_v44 }
 0x42b   : > { %v4116_v60 = vadd.f32 %v4058_v24, %v15666_v7  ;;  %v12791_v16 = vpop.f32.mrb[153].mxu0  ;;  %v4259_v56 = vpack.c.bf16 %v4204_v52, %v4203_v45 }
 0x42c   : > { %v4061_v4 = vpop.f32.mrb[154].mxu0 }
 0x42d   : > { %v4164_v31 = vadd.f32 %v15682_v19, %v4116_v60  ;;  %v4117_v26 = vadd.f32 %v4061_v4, %v15668_v54  ;;  %12803 = vmatprep.subr.bf16.mxu1 %v4259_v56  ;;  %v12792_v29 = vpop.f32.mrb[155].mxu0 }
 0x42e   : > { %12804 = vmatpush3.bf16.msra.mxu1 %v4259_v56 }
 0x42f   : > { %v4165_v7 = vadd.f32 %v15682_v19, %v4117_v26  ;;  %v4205_v27 = vmax.f32 %v4164_v31, 0.0 }
 0x431   : > { %v4206_v61 = vmax.f32 %v4165_v7, 0.0  ;;  %4460 = vmatmul.mubr.bf16.gmra.mrb[88].mxu1 %v13567_v9 }
 0x432   : > { %v4066_v1 = vpop.f32.mrb[156].mxu0  ;;  %4467 = vmatprep.mubr.bf16.mxu1 %v13572_v15 }
 0x433   : > { %v4118_v54 = vadd.f32 %v4066_v1, %v15672_v43  ;;  %v12795_v30 = vpop.f32.mrb[157].mxu0  ;;  %v4260_v13 = vpack.c.bf16 %v4206_v61, %v4205_v27 }
 0x434   : > { %v4069_v5 = vpop.f32.mrb[158].mxu0 }
 0x435   : > { %v4166_v3 = vadd.f32 %v15682_v19, %v4118_v54  ;;  %v4119_v12 = vadd.f32 %v4069_v5, %v15674_v40  ;;  %12805 = vmatprep.subr.bf16.mxu1 %v4260_v13  ;;  %v12796_v2 = vpop.f32.mrb[159].mxu0 }
 0x436   : > { %12806 = vmatpush3.bf16.msra.mxu1 %v4260_v13 }
 0x437   : > { %v4167_v43 = vadd.f32 %v15682_v19, %v4119_v12  ;;  %v4207_v55 = vmax.f32 %v4166_v3, 0.0 }
 0x439   : > { %v4208_v14 = vmax.f32 %v4167_v43, 0.0  ;;  %4468 = vmatmul.mubr.bf16.gmra.mrb[92].mxu1 %v13570_v53 }
 0x43a   : > { %v4074_v41 = vpop.f32.mrb[160].mxu0  ;;  %4475 = vmatprep.mubr.bf16.mxu1 %v13575_v33 }
 0x43b   : > { %v4120_v40 = vadd.f32 %v4074_v41, %v15677_v58  ;;  %v4261_v0 = vpack.c.bf16 %v4208_v14, %v4207_v55  ;;  %v12799_v38 = vpop.f32.mrb[161].mxu0 }
 0x43c   : > { %v4077_v46 = vpop.f32.mrb[162].mxu0 }
 0x43d   : > { %v4168_v23 = vadd.f32 %v15682_v19, %v4120_v40  ;;  %12807 = vmatprep.subr.bf16.mxu1 %v4261_v0  ;;  %v12800_v47 = vpop.f32.mrb[163].mxu0  ;;  %v13576_v19 = vld [vmem:[%s18079_s20 + $0x78] ss:$12 sps:$4 sm:$0xff]  }
 0x43e   : > { %12808 = vmatpush3.bf16.msra.mxu1 %v4261_v0 }
 0x43f   : > { %v4209_v57 = vmax.f32 %v4168_v23, 0.0 }
 0x441   : > { %v4262_v42 = vpack.c.bf16 %v4209_v57, %v4209_v57  ;;  %4476 = vmatmul.mubr.bf16.gmra.mrb[96].mxu1 %v13573_v37 }
 0x442   : > { %4483 = vmatprep.mubr.bf16.mxu1 %v13578_v32 }
 0x443   : > { %13545 = vmatprep.subr.msk.bf16.mxu1 %vm1054_vm0, %v4262_v42  ;;  %v4409_v58 = vsel %vm1054_vm0, %v4262_v42, 0 }
 0x444   : > { %12810 = vmatpush3.bf16.msra.mxu1 %v4409_v58 }
 0x445   : > { %12827 = vmatprep.subr.bf16.mxu1 %v18049_v44 }
 0x449   : > { %4484 = vmatmul.mubr.bf16.gmra.mrb[100].mxu1 %v13576_v19 }
 0x44a   : > { %4491 = vmatprep.mubr.bf16.mxu1 %v13581_v11 }
 0x451   : > { %4492 = vmatmul.mubr.bf16.gmra.mrb[104].mxu1 %v13579_v21 }
 0x452   : > { %4499 = vmatprep.mubr.bf16.mxu1 %v13584_v34 }
 0x459   : > { %4500 = vmatmul.mubr.bf16.gmra.mrb[108].mxu1 %v13582_v39 }
 0x45a   : > { %12811 = vmatprep.mubr.msk.bf16.mxu1 %vm4383_vm3, %v13585_v51 }
 0x461   : > { %12812 = vmatmul.mubr.msk.bf16.vlgmr.msra.gmra.mrb[112].mxu1 %vm4383_vm3, %v13586_v20 }
 0x462   : > { %12815 = vmatprep.mubr.msk.bf16.mxu1 %vm4383_vm3, %v13587_v49  ;;  %12828 = vmatpush3.bf16.msra.mxu1 %v13593_v18 }
 0x463   : > { %12829 = vmatprep.subr.bf16.mxu1 %v18049_v44 }
 0x466   : > { %12830 = vmatpush3.bf16.msra.mxu1 %v13595_v28 }
 0x467   : > { %12859 = vmatprep.subr.bf16.mxu1 %v18049_v44 }
 0x469   : > { %12816 = vmatmul.mubr.msk.bf16.gmra.mrb[116].mxu1 %vm4383_vm3, %v13588_v48 }
 0x46a   : > { %12819 = vmatprep.mubr.msk.bf16.mxu1 %vm4383_vm3, %v13589_v25 }
 0x471   : > { %12820 = vmatmul.mubr.msk.bf16.gmra.mrb[120].mxu1 %vm4383_vm3, %v13590_v22 }
 0x472   : > { %12823 = vmatprep.mubr.msk.bf16.mxu1 %vm4383_vm3, %v13591_v59 }
 0x479   : > { %12824 = vmatmul.mubr.msk.bf16.gmra.mrb[124].mxu1 %vm4383_vm3, %v13592_v63 }
 0x47a   : > { %12831 = vmatprep.mubr.msk.bf16.mxu1 %vm14078_vm1, %v18049_v44 }
 0x4f4   : > { %v11657_v8 = vpop.f32.mrb[80].mxu1 }
 0x4f5   : > { %v11658_v50 = vpop.f32.mrb[81].mxu1 }
 0x4f6   : > { %v11659_v35 = vadd.f32 %v11658_v50, %v11657_v8  ;;  %v11660_v10 = vpop.f32.mrb[82].mxu1 }
 0x4f7   : > { %v11661_v6 = vpop.f32.mrb[83].mxu1 }
 0x4f8   : > { %v11662_v62 = vadd.f32 %v11661_v6, %v11660_v10 }
 0x4fc   : > { %v11663_v45 = vpop.f32.mrb[84].mxu1 }
 0x4fd   : > { %v11664_v52 = vpop.f32.mrb[85].mxu1 }
 0x4fe   : > { %v11665_v24 = vadd.f32 %v11664_v52, %v11663_v45  ;;  %v11666_v60 = vpop.f32.mrb[86].mxu1  ;;  %v13597_v52 = vld [vmem:[%s18080_s0] sm:$0xff]  }
 0x4ff   : > { %v11667_v16 = vpop.f32.mrb[87].mxu1 }
 0x500   : > { %v11668_v56 = vadd.f32 %v11667_v16, %v11666_v60 }
 0x504   : > { %v11669_v4 = vpop.f32.mrb[88].mxu1 }
 0x505   : > { %v11670_v31 = vpop.f32.mrb[89].mxu1 }
 0x506   : > { %v11671_v26 = vadd.f32 %v11670_v31, %v11669_v4  ;;  %v11672_v9 = vpop.f32.mrb[90].mxu1 }
 0x507   : > { %v11673_v29 = vpop.f32.mrb[91].mxu1 }
 0x508   : > { %v11674_v15 = vadd.f32 %v11673_v29, %v11672_v9 }
 0x50c   : > { %v11675_v7 = vpop.f32.mrb[92].mxu1 }
 0x50d   : > { %v11676_v27 = vpop.f32.mrb[93].mxu1 }
 0x50e   : > { %v11677_v61 = vadd.f32 %v11676_v27, %v11675_v7  ;;  %v11678_v1 = vpop.f32.mrb[94].mxu1  ;;  %v13599_v7 = vld [vmem:[%s18080_s0 + $0x8] sm:$0xff]  }
 0x50f   : > { %v11679_v54 = vpop.f32.mrb[95].mxu1 }
 0x510   : > { %v11680_v30 = vadd.f32 %v11679_v54, %v11678_v1  ;;  %v13600_v1 = vld [vmem:[%s18080_s0 + $0x48] sm:$0xff]  }
 0x514   : > { %v11681_v13 = vpop.f32.mrb[96].mxu1 }
 0x515   : > { %v11682_v5 = vpop.f32.mrb[97].mxu1 }
 0x516   : > { %v15891_v3 = vadd.f32 %v11682_v5, %v11681_v13  ;;  %v11684_v12 = vpop.f32.mrb[98].mxu1 }
 0x517   : > { %v11685_v53 = vpop.f32.mrb[99].mxu1 }
 0x518   : > { %v15893_v2 = vadd.f32 %v11685_v53, %v11684_v12 }
 0x51c   : > { %v11687_v33 = vpop.f32.mrb[100].mxu1 }
 0x51d   : > { %v11688_v43 = vpop.f32.mrb[101].mxu1 }
 0x51e   : > { %v11689_v55 = vadd.f32 %v11688_v43, %v11687_v33  ;;  %v11690_v14 = vpop.f32.mrb[102].mxu1 }
 0x51f   : > { %v11691_v41 = vpop.f32.mrb[103].mxu1 }
 0x520   : > { %v11692_v40 = vadd.f32 %v11691_v41, %v11690_v14 }
 0x524   : > { %v11693_v0 = vpop.f32.mrb[104].mxu1 }
 0x525   : > { %v11694_v38 = vpop.f32.mrb[105].mxu1 }
 0x526   : > { %v11696_v46 = vpop.f32.mrb[106].mxu1  ;;  %v15895_v23 = vadd.f32 %v11694_v38, %v11693_v0 }
 0x527   : > { %v11697_v37 = vpop.f32.mrb[107].mxu1 }
 0x528   : > { %v15897_v47 = vadd.f32 %v11697_v37, %v11696_v46 }
 0x52c   : > { %v11699_v32 = vpop.f32.mrb[108].mxu1 }
 0x52d   : > { %v11700_v57 = vpop.f32.mrb[109].mxu1 }
 0x52e   : > { %v11702_v42 = vpop.f32.mrb[110].mxu1  ;;  %v15899_v58 = vadd.f32 %v11700_v57, %v11699_v32 }
 0x52f   : > { %v11703_v19 = vpop.f32.mrb[111].mxu1 }
 0x530   : > { %v15901_v11 = vadd.f32 %v11703_v19, %v11702_v42 }
 0x534   : > { %v12813_v21 = vpop.f32.mrb[112].mxu1 }
 0x535   : > { %v4551_v34 = vadd.f32 %v12813_v21, %v11665_v24  ;;  %v4542_v39 = vpop.f32.mrb[113].mxu1 }
 0x536   : > { %v4543_v51 = vadd.f32 %v11659_v35, %v4542_v39  ;;  %v12814_v20 = vpop.f32.mrb[114].mxu1 }
 0x537   : > { %4608 = vst.msk [vmem:[#allocation2 + $0x10] sm:$0xff] %vm4605_vm4, %v4551_v34  ;;  %v4554_v49 = vadd.f32 %v12814_v20, %v11668_v56  ;;  %v4545_v48 = vpop.f32.mrb[115].mxu1  ;;  %v13598_v56 = vld [vmem:[%s18080_s0 + $0x40] sm:$0xff]  }
 0x538   : > { %4606 = vst.msk [vmem:[#allocation2] sm:$0xff] %vm4605_vm4, %v4543_v51  ;;  %v4546_v25 = vadd.f32 %v11662_v62, %v4545_v48 }
 0x539   : > { %4609 = vst.msk [vmem:[#allocation2 + $0x18] sm:$0xff] %vm4605_vm4, %v4554_v49 }
 0x53a   : > { %4607 = vst.msk [vmem:[#allocation2 + $0x8] sm:$0xff] %vm4605_vm4, %v4546_v25 }
 0x53c   : > { %v12817_v22 = vpop.f32.mrb[116].mxu1 }
 0x53d   : > { %v4567_v59 = vadd.f32 %v12817_v22, %v11677_v61  ;;  %v4558_v63 = vpop.f32.mrb[117].mxu1 }
 0x53e   : > { %v4559_v18 = vadd.f32 %v11671_v26, %v4558_v63  ;;  %v12818_v17 = vpop.f32.mrb[118].mxu1 }
 0x53f   : > { %4612 = vst.msk [vmem:[#allocation2 + $0x30] sm:$0xff] %vm4605_vm4, %v4567_v59  ;;  %v4570_v28 = vadd.f32 %v12818_v17, %v11680_v30  ;;  %v4561_v36 = vpop.f32.mrb[119].mxu1 }
 0x540   : > { %4610 = vst.msk [vmem:[#allocation2 + $0x20] sm:$0xff] %vm4605_vm4, %v4559_v18  ;;  %v4562_v8 = vadd.f32 %v11674_v15, %v4561_v36  ;;  %v15909_v50 = vld [vmem:[#allocation2 + $0x12] sm:$0xff] }
 0x541   : > { %4613 = vst.msk [vmem:[#allocation2 + $0x38] sm:$0xff] %vm4605_vm4, %v4570_v28  ;;  %v4647_v35 = vld [vmem:[#allocation2 + $0x1] sm:$0xff]  ;;  %v4648_v10 = vld [vmem:[#allocation2 + $0x9] sm:$0xff]  ;;  %v4649_v13 = vld [vmem:[#allocation2 + $0x11] sm:$0xff] }
 0x542   : > { %v4913_v6 = vld [vmem:[#allocation2 + $0x2] sm:$0xff]  ;;  %4611 = vst.msk [vmem:[#allocation2 + $0x28] sm:$0xff] %vm4605_vm4, %v4562_v8  ;;  %v4660_v62 = vpack.c.bf16 %v4648_v10, %v4647_v35  ;;  %v15913_v45 = vld [vmem:[#allocation2 + $0xa] sm:$0xff] }
 0x543   : > { %v4926_v24 = vpack.c.bf16 %v15913_v45, %v4913_v6  ;;  %v5084_v60 = vpack.c.bf16 %v15909_v50, %v15913_v45  ;;  %v4624_v6 = vld [vmem:[#allocation2 + $0x8] sm:$0xff] }
 0x544   : > { %v12821_v16 = vpop.f32.mrb[120].mxu1  ;;  %12832 = vmatmul.mubr.msk.bf16.vlgmr.msra.gmra.mrb[128].mxu1 %vm4605_vm4, %v4660_v62  ;;  %v5230_v62 = vld [vmem:[#allocation2 + $0x13] sm:$0xff] }
 0x545   : > { %v4583_v4 = vadd.f32 %v12821_v16, %v11689_v55  ;;  %v4574_v31 = vpop.f32.mrb[121].mxu1  ;;  %12896 = vmatmul.mubr.msk.bf16.vlgmr.msra.gmra.mrb[164].mxu0 %vm4605_vm4, %v4926_v24  ;;  %12835 = vmatprep.mubr.msk.bf16.mxu1 %vm14078_vm1, %v18049_v44  ;;  %v4623_v24 = vld [vmem:[#allocation2] sm:$0xff] }
 0x546   : > { %v4575_v26 = vadd.f32 %v15891_v3, %v4574_v31  ;;  %v12822_v9 = vpop.f32.mrb[122].mxu1  ;;  %12899 = vmatprep.mubr.msk.bf16.mxu0 %vm14078_vm1, %v18049_v44  ;;  %12860 = vmatpush3.bf16.msra.mxu1 %v13597_v52  ;;  %v5229_v52 = vld [vmem:[#allocation2 + $0xb] sm:$0xff]  ;;  %v4636_v16 = vpack.c.bf16 %v4624_v6, %v4623_v24  ;;  %v13602_v31 = vld [vmem:[%s18080_s0 + $0x60] sm:$0xff]  }
 0x547   : > { %4616 = vst.msk [vmem:[#allocation2 + $0x50] sm:$0xff] %vm4605_vm4, %v4583_v4  ;;  %v4586_v29 = vadd.f32 %v12822_v9, %v11692_v40  ;;  %v4577_v15 = vpop.f32.mrb[123].mxu1  ;;  %v4650_v27 = vld [vmem:[#allocation2 + $0x19] sm:$0xff]  ;;  %12956 = vmatpush3.bf16.msra.mxu0 %v13598_v56  ;;  %12861 = vmatprep.subr.bf16.mxu1 %v18049_v44  ;;  %v13601_v56 = vld [vmem:[%s18080_s0 + $0x30] sm:$0xff]   ;;  %v5242_v4 = vpack.c.bf16 %v5230_v62, %v5229_v52 }
 0x548   : > { %4614 = vst.msk [vmem:[#allocation2 + $0x40] sm:$0xff] %vm4605_vm4, %v4575_v26  ;;  %v4578_v61 = vadd.f32 %v15893_v2, %v4577_v15  ;;  %v15940_v54 = vld [vmem:[#allocation2 + $0x1a] sm:$0xff]  ;;  %12957 = vmatprep.subr.bf16.mxu0 %v18049_v44  ;;  %v15950_v3 = vld [vmem:[#allocation2 + $0x32] sm:$0xff]  ;;  %v4661_v53 = vpack.c.bf16 %v4650_v27, %v4649_v13 }
 0x549   : > { %v15942_v30 = vld [vmem:[#allocation2 + $0x22] sm:$0xff]  ;;  %4617 = vst.msk [vmem:[#allocation2 + $0x58] sm:$0xff] %vm4605_vm4, %v4586_v29  ;;  %v15947_v5 = vld [vmem:[#allocation2 + $0x2a] sm:$0xff]  ;;  %v4927_v33 = vpack.c.bf16 %v15940_v54, %v15909_v50  ;;  %v13603_v26 = vld [vmem:[%s18080_s0 + $0x38] sm:$0xff]  }
 0x54a   : > { %4615 = vst.msk [vmem:[#allocation2 + $0x48] sm:$0xff] %vm4605_vm4, %v4578_v61  ;;  %v5085_v12 = vpack.c.bf16 %v15942_v30, %v15940_v54  ;;  %12862 = vmatpush3.bf16.msra.mxu1 %v13599_v7  ;;  %v5086_v2 = vpack.c.bf16 %v15950_v3, %v15947_v5  ;;  %v4651_v46 = vld [vmem:[#allocation2 + $0x21] sm:$0xff]  ;;  %v4652_v37 = vld [vmem:[#allocation2 + $0x29] sm:$0xff]  ;;  %v4928_v34 = vpack.c.bf16 %v15947_v5, %v15942_v30  ;;  %v4653_v39 = vld [vmem:[#allocation2 + $0x31] sm:$0xff] }
 0x54b   : > { %12958 = vmatpush3.bf16.msra.mxu0 %v13600_v1  ;;  %12923 = vmatprep.subr.bf16.mxu1 %v18049_v44  ;;  %v4626_v9 = vld [vmem:[#allocation2 + $0x18] sm:$0xff]  ;;  %v13604_v29 = vld [vmem:[%s18080_s0 + $0x68] sm:$0xff]   ;;  %v4625_v7 = vld [vmem:[#allocation2 + $0x10] sm:$0xff] }
 0x54c   : > { %v12825_v43 = vpop.f32.mrb[124].mxu1  ;;  %12836 = vmatmul.mubr.msk.bf16.gmra.mrb[132].mxu1 %vm4605_vm4, %v4661_v53  ;;  %13019 = vmatprep.subr.bf16.mxu0 %v18049_v44  ;;  %v5232_v15 = vld [vmem:[#allocation2 + $0x23] sm:$0xff]  ;;  %v4637_v27 = vpack.c.bf16 %v4626_v9, %v4625_v7  ;;  %v5231_v61 = vld [vmem:[#allocation2 + $0x1b] sm:$0xff]  ;;  %v5233_v53 = vld [vmem:[#allocation2 + $0x2b] sm:$0xff] }
 0x54d   : > { %v4599_v55 = vadd.f32 %v12825_v43, %v15899_v58  ;;  %v4590_v14 = vpop.f32.mrb[125].mxu1  ;;  %12900 = vmatmul.mubr.msk.bf16.gmra.mrb[168].mxu0 %vm4605_vm4, %v4927_v33  ;;  %12839 = vmatprep.mubr.msk.bf16.mxu1 %vm14078_vm1, %v18049_v44  ;;  %v5243_v1 = vpack.c.bf16 %v5232_v15, %v5231_v61  ;;  %v4628_v13 = vld [vmem:[#allocation2 + $0x28] sm:$0xff]  ;;  %v5234_v33 = vld [vmem:[#allocation2 + $0x33] sm:$0xff]  ;;  %v4627_v43 = vld [vmem:[#allocation2 + $0x20] sm:$0xff] }
 0x54e   : > { %v4591_v41 = vadd.f32 %v15895_v23, %v4590_v14  ;;  %v12826_v40 = vpop.f32.mrb[126].mxu1  ;;  %12903 = vmatprep.mubr.msk.bf16.mxu0 %vm14078_vm1, %v18049_v44  ;;  %v5244_v14 = vpack.c.bf16 %v5234_v33, %v5233_v53  ;;  %v13606_v62 = vld [vmem:[%s18080_s0 + $0x80] sm:$0xff]   ;;  %v13607_v52 = vld [vmem:[%s18080_s0 + $0x58] sm:$0xff]   ;;  %v13608_v50 = vld [vmem:[%s18080_s0 + $0x88] sm:$0xff]  }
 0x54f   : > { %4620 = vst.msk [vmem:[#allocation2 + $0x70] sm:$0xff] %vm4605_vm4, %v4599_v55  ;;  %v4602_v0 = vadd.f32 %v12826_v40, %v15901_v11  ;;  %v4593_v38 = vpop.f32.mrb[127].mxu1  ;;  %v15974_v42 = vld [vmem:[#allocation2 + $0x3a] sm:$0xff]  ;;  %v4662_v11 = vpack.c.bf16 %v4652_v37, %v4651_v46  ;;  %v4638_v55 = vpack.c.bf16 %v4628_v13, %v4627_v43  ;;  %v16111_v45 = vld [vmem:[#allocation2 + $0x24] sm:$0xff]  ;;  %v5864_v53 = vld [vmem:[#allocation2 + $0x2e] sm:$0xff] }
 0x550   : > { %4618 = vst.msk [vmem:[#allocation2 + $0x60] sm:$0xff] %vm4605_vm4, %v4591_v41  ;;  %v15971_v32 = vld [vmem:[#allocation2 + $0x52] sm:$0xff]  ;;  %v4594_v57 = vadd.f32 %v15897_v47, %v4593_v38  ;;  %v4929_v20 = vpack.c.bf16 %v15974_v42, %v15950_v3  ;;  %v5235_v46 = vld [vmem:[#allocation2 + $0x3b] sm:$0xff]  ;;  %v5863_v13 = vld [vmem:[#allocation2 + $0x26] sm:$0xff] }
 0x551   : > { %v15976_v23 = vld [vmem:[#allocation2 + $0x42] sm:$0xff]  ;;  %4622 = vst.msk [vmem:[#allocation2 + $0x78] sm:$0x3] %vm4621_vm5, %v4602_v0  ;;  %v15978_v58 = vld [vmem:[#allocation2 + $0x4a] sm:$0xff]  ;;  %v4654_v47 = vld [vmem:[#allocation2 + $0x39] sm:$0xff]  ;;  %v5875_v43 = vpack.c.bf16 %v5864_v53, %v5863_v13 }
 0x552   : > { %4619 = vst.msk [vmem:[#allocation2 + $0x68] sm:$0xff] %vm4605_vm4, %v4594_v57  ;;  %v5087_v19 = vpack.c.bf16 %v15976_v23, %v15974_v42  ;;  %v5088_v21 = vpack.c.bf16 %v15971_v32, %v15978_v58  ;;  %v4663_v51 = vpack.c.bf16 %v4654_v47, %v4653_v39  ;;  %v4655_v49 = vld [vmem:[#allocation2 + $0x41] sm:$0xff]  ;;  %v4656_v48 = vld [vmem:[#allocation2 + $0x49] sm:$0xff]  ;;  %v4930_v22 = vpack.c.bf16 %v15978_v58, %v15976_v23  ;;  %v4657_v18 = vld [vmem:[#allocation2 + $0x51] sm:$0xff] }
 0x553   : > { %v4664_v25 = vpack.c.bf16 %v4656_v48, %v4655_v49  ;;  %v4630_v41 = vld [vmem:[#allocation2 + $0x38] sm:$0xff]  ;;  %v5236_v40 = vld [vmem:[#allocation2 + $0x43] sm:$0xff]  ;;  %v4629_v0 = vld [vmem:[#allocation2 + $0x30] sm:$0xff] }
 0x554   : > { %12840 = vmatmul.mubr.msk.bf16.gmra.mrb[136].mxu1 %vm4605_vm4, %v4662_v11  ;;  %v4639_v38 = vpack.c.bf16 %v4630_v41, %v4629_v0  ;;  %v5245_v37 = vpack.c.bf16 %v5236_v40, %v5235_v46  ;;  %v4632_v57 = vld [vmem:[#allocation2 + $0x48] sm:$0xff]  ;;  %v4631_v47 = vld [vmem:[#allocation2 + $0x40] sm:$0xff]  ;;  %v4633_v48 = vld [vmem:[#allocation2 + $0x50] sm:$0xff] }
 0x555   : > { %12904 = vmatmul.mubr.msk.bf16.gmra.mrb[172].mxu0 %vm4605_vm4, %v4928_v34  ;;  %12843 = vmatprep.mubr.msk.bf16.mxu1 %vm14078_vm1, %v18049_v44  ;;  %v5237_v11 = vld [vmem:[#allocation2 + $0x4b] sm:$0xff]  ;;  %v5238_v34 = vld [vmem:[#allocation2 + $0x53] sm:$0xff]  ;;  %v4640_v39 = vpack.c.bf16 %v4632_v57, %v4631_v47 }
 0x556   : > { %12907 = vmatprep.mubr.msk.bf16.mxu0 %vm14078_vm1, %v18049_v44  ;;  %v16144_v54 = vld [vmem:[#allocation2 + $0x44] sm:$0xff]  ;;  %v16146_v30 = vld [vmem:[#allocation2 + $0x4c] sm:$0xff]  ;;  %v16161_v3 = vld [vmem:[#allocation2 + $0x54] sm:$0xff] }
 0x557   : > { %v4658_v59 = vld [vmem:[#allocation2 + $0x59] sm:$0xff]  ;;  %v4659_v36 = vld [vmem:[#allocation2 + $0x61] sm:$0xf]  ;;  %v5557_v58 = vld [vmem:[#allocation2 + $0x74] sm:$0xf] }
 0x558   : > { %v16009_v63 = vld [vmem:[#allocation2 + $0x5a] sm:$0xff]  ;;  %v4665_v17 = vpack.c.bf16 %v4658_v59, %v4657_v18  ;;  %v4925_v8 = vld [vmem:[#allocation2 + $0x62] sm:$0xf]  ;;  %v4666_v35 = vpack.c.bf16 %v4659_v36, %v4659_v36  ;;  %v5564_v9 = vpack.c.bf16 %v5557_v58, %v5557_v58  ;;  %v5867_v0 = vld [vmem:[#allocation2 + $0x46] sm:$0xff] }
 0x559   : > { %v4931_v28 = vpack.c.bf16 %v16009_v63, %v15971_v32  ;;  %v4932_v10 = vpack.c.bf16 %v4925_v8, %v4925_v8  ;;  %v5240_v49 = vld [vmem:[#allocation2 + $0x63] sm:$0xff]  ;;  %v5861_v15 = vld [vmem:[#allocation2 + $0x16] sm:$0xff] }
 0x55a   : > { %v4635_v18 = vld [vmem:[#allocation2 + $0x60] sm:$0xf]  ;;  %v16174_v23 = vld [vmem:[#allocation2 + $0x64] sm:$0xff]  ;;  %v5865_v41 = vld [vmem:[#allocation2 + $0x36] sm:$0xff] }
 0x55b   : > { %v16083_v8 = vld [vmem:[#allocation2 + $0x1c] sm:$0xff]  ;;  %v5083_v32 = vld [vmem:[#allocation2 + $0x6a] sm:$0xf] }
 0x55c   : > { %12844 = vmatmul.mubr.msk.bf16.gmra.mrb[140].mxu1 %vm4605_vm4, %v4663_v51  ;;  %v5246_v51 = vpack.c.bf16 %v5238_v34, %v5237_v11  ;;  %v16159_v5 = vld [vmem:[#allocation2 + $0x5c] sm:$0xff]  ;;  %v5401_v33 = vpack.c.bf16 %v16111_v45, %v16083_v8  ;;  %v5404_v11 = vpack.c.bf16 %v16161_v3, %v16146_v30 }
 0x55d   : > { %12908 = vmatmul.mubr.msk.bf16.gmra.mrb[176].mxu0 %vm4605_vm4, %v4929_v20  ;;  %12847 = vmatprep.mubr.msk.bf16.mxu1 %vm14078_vm1, %v18049_v44  ;;  %v4634_v20 = vld [vmem:[#allocation2 + $0x58] sm:$0xff]  ;;  %v5082_v42 = vld [vmem:[#allocation2 + $0x62] sm:$0xff] }
 0x55e   : > { %12911 = vmatprep.mubr.msk.bf16.mxu0 %vm14078_vm1, %v18049_v44  ;;  %v5870_v57 = vld [vmem:[#allocation2 + $0x5e] sm:$0xff]  ;;  %v5869_v34 = vld [vmem:[#allocation2 + $0x56] sm:$0xff] }
 0x55f   : > { %v5878_v47 = vpack.c.bf16 %v5870_v57, %v5869_v34 }
 0x564   : > { %12848 = vmatmul.mubr.msk.bf16.gmra.mrb[144].mxu1 %vm4605_vm4, %v4664_v25  ;;  %v4641_v25 = vpack.c.bf16 %v4634_v20, %v4633_v48  ;;  %v5405_v20 = vpack.c.bf16 %v16174_v23, %v16159_v5  ;;  %v5399_v48 = vld [vmem:[#allocation2 + $0x6c] sm:$0xf] }
 0x565   : > { %12912 = vmatmul.mubr.msk.bf16.gmra.mrb[180].mxu0 %vm4605_vm4, %v4930_v22  ;;  %12851 = vmatprep.mubr.msk.bf16.mxu1 %vm14078_vm1, %v18049_v44  ;;  %v5239_v22 = vld [vmem:[#allocation2 + $0x5b] sm:$0xff] }
 0x566   : > { %12915 = vmatprep.mubr.msk.bf16.mxu0 %vm14078_vm1, %v18049_v44  ;;  %v5247_v59 = vpack.c.bf16 %v5240_v49, %v5239_v22  ;;  %v5873_v22 = vld [vmem:[#allocation2 + $0x76] sm:$0xf] }
 0x56c   : > { %12852 = vmatmul.mubr.msk.bf16.gmra.mrb[148].mxu1 %vm4605_vm4, %v4665_v17  ;;  %v5241_v17 = vld [vmem:[#allocation2 + $0x6b] sm:$0xf] }
 0x56d   : > { %12916 = vmatmul.mubr.msk.bf16.gmra.mrb[184].mxu0 %vm4605_vm4, %v4931_v28  ;;  %12855 = vmatprep.mubr.msk.bf16.mxu1 %vm14078_vm1, %v18049_v44  ;;  %v4642_v28 = vpack.c.bf16 %v4635_v18, %v4635_v18  ;;  %v5248_v36 = vpack.c.bf16 %v5241_v17, %v5241_v17 }
 0x56e   : > { %12919 = vmatprep.mubr.msk.bf16.mxu0 %vm14078_vm1, %v18049_v44 }
 0x574   : > { %12856 = vmatmul.mubr.msk.bf16.gmra.mrb[152].mxu1 %vm4605_vm4, %v4666_v35  ;;  %v16085_v35 = vld [vmem:[#allocation2 + $0x14] sm:$0xff] }
 0x575   : > { %12920 = vmatmul.mubr.msk.bf16.gmra.mrb[188].mxu0 %vm4605_vm4, %v4932_v10  ;;  %12863 = vmatprep.mubr.msk.bf16.mxu1 %vm14078_vm1, %v18049_v44  ;;  %v13605_v10 = vld [vmem:[%s18080_s0 + $0x50] sm:$0xff]   ;;  %v5558_v6 = vpack.c.bf16 %v16083_v8, %v16085_v35 }
 0x576   : > { %12959 = vmatprep.mubr.msk.bf16.mxu0 %vm14078_vm1, %v18049_v44 }
 0x57c   : > { %12864 = vmatmul.mubr.msk.bf16.vlgmr.msra.gmra.mrb[156].mxu1 %vm4605_vm4, %v4636_v16  ;;  %v16129_v16 = vld [vmem:[#allocation2 + $0x3c] sm:$0xff] }
 0x57d   : > { %12960 = vmatmul.mubr.msk.bf16.vlgmr.msra.gmra.mrb[192].mxu0 %vm4605_vm4, %v5242_v4  ;;  %12867 = vmatprep.mubr.msk.bf16.mxu1 %vm14078_vm1, %v18049_v44  ;;  %v5403_v46 = vpack.c.bf16 %v16144_v54, %v16129_v16 }
 0x57e   : > { %12963 = vmatprep.mubr.msk.bf16.mxu0 %vm14078_vm1, %v18049_v44  ;;  %12924 = vmatpush3.bf16.msra.mxu1 %v13601_v56  ;;  %v16131_v56 = vld [vmem:[#allocation2 + $0x34] sm:$0xff] }
 0x57f   : > { %13020 = vmatpush3.bf16.msra.mxu0 %v13602_v31  ;;  %12925 = vmatprep.subr.bf16.mxu1 %v18049_v44  ;;  %v5560_v4 = vpack.c.bf16 %v16129_v16, %v16131_v56  ;;  %v5089_v31 = vpack.c.bf16 %v5082_v42, %v16009_v63  ;;  %v5387_v63 = vld [vmem:[#allocation2 + $0xc] sm:$0xff] }
 0x580   : > { %13021 = vmatprep.subr.bf16.mxu0 %v18049_v44  ;;  %v5400_v7 = vpack.c.bf16 %v16085_v35, %v5387_v63 }
 0x582   : > { %12926 = vmatpush3.bf16.msra.mxu1 %v13603_v26 }
 0x583   : > { %13022 = vmatpush3.bf16.msra.mxu0 %v13604_v29  ;;  %12987 = vmatprep.subr.bf16.mxu1 %v18049_v44  ;;  %v5862_v29 = vld [vmem:[#allocation2 + $0x1e] sm:$0xff] }
 0x584   : > { %12868 = vmatmul.mubr.msk.bf16.gmra.mrb[160].mxu1 %vm4605_vm4, %v4637_v27  ;;  %13083 = vmatprep.subr.bf16.mxu0 %v18049_v44  ;;  %v13609_v27 = vld [vmem:[%s18080_s0 + $0x70] sm:$0xff]   ;;  %v5874_v61 = vpack.c.bf16 %v5862_v29, %v5861_v15 }
 0x585   : > { %12964 = vmatmul.mubr.msk.bf16.gmra.mrb[196].mxu0 %vm4605_vm4, %v5243_v1  ;;  %12871 = vmatprep.mubr.msk.bf16.mxu1 %vm14078_vm1, %v18049_v44  ;;  %v13610_v1 = vld [vmem:[%s18080_s0 + $0x78] sm:$0xff]  }
 0x586   : > { %12967 = vmatprep.mubr.msk.bf16.mxu0 %vm14078_vm1, %v18049_v44  ;;  %v5707_v15 = vld [vmem:[#allocation2 + $0x35] sm:$0xff] }
 0x58c   : > { %12872 = vmatmul.mubr.msk.bf16.gmra.mrb[164].mxu1 %vm4605_vm4, %v4638_v55  ;;  %v5866_v55 = vld [vmem:[#allocation2 + $0x3e] sm:$0xff] }
 0x58d   : > { %12968 = vmatmul.mubr.msk.bf16.gmra.mrb[200].mxu0 %vm4605_vm4, %v5244_v14  ;;  %12875 = vmatprep.mubr.msk.bf16.mxu1 %vm14078_vm1, %v18049_v44  ;;  %v5876_v40 = vpack.c.bf16 %v5866_v55, %v5865_v41 }
 0x58e   : > { %12971 = vmatprep.mubr.msk.bf16.mxu0 %vm14078_vm1, %v18049_v44 }
 0x594   : > { %12876 = vmatmul.mubr.msk.bf16.gmra.mrb[168].mxu1 %vm4605_vm4, %v4639_v38  ;;  %v5868_v38 = vld [vmem:[#allocation2 + $0x4e] sm:$0xff] }
 0x595   : > { %12972 = vmatmul.mubr.msk.bf16.gmra.mrb[204].mxu0 %vm4605_vm4, %v5245_v37  ;;  %12879 = vmatprep.mubr.msk.bf16.mxu1 %vm14078_vm1, %v18049_v44  ;;  %v5877_v37 = vpack.c.bf16 %v5868_v38, %v5867_v0 }
 0x596   : > { %12975 = vmatprep.mubr.msk.bf16.mxu0 %vm14078_vm1, %v18049_v44 }
 0x59c   : > { %12880 = vmatmul.mubr.msk.bf16.gmra.mrb[172].mxu1 %vm4605_vm4, %v4640_v39  ;;  %v5871_v39 = vld [vmem:[#allocation2 + $0x66] sm:$0xff] }
 0x59d   : > { %12976 = vmatmul.mubr.msk.bf16.gmra.mrb[208].mxu0 %vm4605_vm4, %v5246_v51  ;;  %12883 = vmatprep.mubr.msk.bf16.mxu1 %vm14078_vm1, %v18049_v44  ;;  %v5872_v51 = vld [vmem:[#allocation2 + $0x6e] sm:$0xff] }
 0x59e   : > { %12979 = vmatprep.mubr.msk.bf16.mxu0 %vm14078_vm1, %v18049_v44  ;;  %v5879_v49 = vpack.c.bf16 %v5872_v51, %v5871_v39  ;;  %v5711_v51 = vld [vmem:[#allocation2 + $0x55] sm:$0xff] }
 0x5a4   : > { %12884 = vmatmul.mubr.msk.bf16.gmra.mrb[176].mxu1 %vm4605_vm4, %v4641_v25 }
 0x5a5   : > { %12980 = vmatmul.mubr.msk.bf16.gmra.mrb[212].mxu0 %vm4605_vm4, %v5247_v59  ;;  %12887 = vmatprep.mubr.msk.bf16.mxu1 %vm14078_vm1, %v18049_v44 }
 0x5a6   : > { %12983 = vmatprep.mubr.msk.bf16.mxu0 %vm14078_vm1, %v18049_v44 }
 0x5ac   : > { %12888 = vmatmul.mubr.msk.bf16.gmra.mrb[180].mxu1 %vm4605_vm4, %v4642_v28 }
 0x5ad   : > { %12984 = vmatmul.mubr.msk.bf16.gmra.mrb[216].mxu0 %vm4605_vm4, %v5248_v36  ;;  %12927 = vmatprep.mubr.msk.bf16.mxu1 %vm14078_vm1, %v18049_v44  ;;  %v5406_v36 = vpack.c.bf16 %v5399_v48, %v5399_v48 }
 0x5ae   : > { %13023 = vmatprep.mubr.msk.bf16.mxu0 %vm14078_vm1, %v18049_v44 }
 0x5b4   : > { %12928 = vmatmul.mubr.msk.bf16.vlgmr.msra.gmra.mrb[184].mxu1 %vm4605_vm4, %v5084_v60  ;;  %v16113_v60 = vld [vmem:[#allocation2 + $0x2c] sm:$0xff] }
 0x5b5   : > { %13024 = vmatmul.mubr.msk.bf16.vlgmr.msra.gmra.mrb[220].mxu0 %vm4605_vm4, %v5558_v6  ;;  %12931 = vmatprep.mubr.msk.bf16.mxu1 %vm14078_vm1, %v18049_v44  ;;  %v5559_v24 = vpack.c.bf16 %v16113_v60, %v16111_v45  ;;  %v5402_v14 = vpack.c.bf16 %v16131_v56, %v16113_v60  ;;  %v5703_v60 = vld [vmem:[#allocation2 + $0x15] sm:$0xff] }
 0x5b6   : > { %13027 = vmatprep.mubr.msk.bf16.mxu0 %vm14078_vm1, %v18049_v44  ;;  %12988 = vmatpush3.bf16.msra.mxu1 %v13605_v10  ;;  %v5880_v10 = vpack.c.bf16 %v5873_v22, %v5873_v22 }
 0x5b7   : > { %13084 = vmatpush3.bf16.msra.mxu0 %v13606_v62  ;;  %12989 = vmatprep.subr.bf16.mxu1 %v18049_v44  ;;  %v5704_v62 = vld [vmem:[#allocation2 + $0x1d] sm:$0xff] }
 0x5b8   : > { %13085 = vmatprep.subr.bf16.mxu0 %v18049_v44  ;;  %v5716_v56 = vpack.c.bf16 %v5704_v62, %v5703_v60 }
 0x5ba   : > { %12990 = vmatpush3.bf16.msra.mxu1 %v13607_v52 }
 0x5bb   : > { %13086 = vmatpush3.bf16.msra.mxu0 %v13608_v50  ;;  %13051 = vmatprep.subr.bf16.mxu1 %v18049_v44 }
 0x5bc   : > { %12932 = vmatmul.mubr.msk.bf16.gmra.mrb[188].mxu1 %vm4605_vm4, %v5085_v12  ;;  %13137 = vmatprep.subr.bf16.mxu0 %v18049_v44  ;;  %v5561_v12 = vpack.c.bf16 %v16146_v30, %v16144_v54 }
 0x5bd   : > { %13028 = vmatmul.mubr.msk.bf16.gmra.mrb[224].mxu0 %vm4605_vm4, %v5559_v24  ;;  %12935 = vmatprep.mubr.msk.bf16.mxu1 %vm14078_vm1, %v18049_v44 }
 0x5be   : > { %13031 = vmatprep.mubr.msk.bf16.mxu0 %vm14078_vm1, %v18049_v44 }
 0x5c4   : > { %12936 = vmatmul.mubr.msk.bf16.gmra.mrb[192].mxu1 %vm4605_vm4, %v5086_v2  ;;  %v5562_v2 = vpack.c.bf16 %v16159_v5, %v16161_v3  ;;  %v5706_v5 = vld [vmem:[#allocation2 + $0x2d] sm:$0xff] }
 0x5c5   : > { %13032 = vmatmul.mubr.msk.bf16.gmra.mrb[228].mxu0 %vm4605_vm4, %v5560_v4  ;;  %12939 = vmatprep.mubr.msk.bf16.mxu1 %vm14078_vm1, %v18049_v44 }
 0x5c6   : > { %13035 = vmatprep.mubr.msk.bf16.mxu0 %vm14078_vm1, %v18049_v44 }
 0x5cc   : > { %12940 = vmatmul.mubr.msk.bf16.gmra.mrb[196].mxu1 %vm4605_vm4, %v5087_v19  ;;  %v5556_v19 = vld [vmem:[#allocation2 + $0x6c] sm:$0xff] }
 0x5cd   : > { %13036 = vmatmul.mubr.msk.bf16.gmra.mrb[232].mxu0 %vm4605_vm4, %v5561_v12  ;;  %12943 = vmatprep.mubr.msk.bf16.mxu1 %vm14078_vm1, %v18049_v44  ;;  %v5563_v26 = vpack.c.bf16 %v5556_v19, %v16174_v23  ;;  %v5705_v12 = vld [vmem:[#allocation2 + $0x25] sm:$0xff] }
 0x5ce   : > { %13039 = vmatprep.mubr.msk.bf16.mxu0 %vm14078_vm1, %v18049_v44 }
 0x5d4   : > { %12944 = vmatmul.mubr.msk.bf16.gmra.mrb[200].mxu1 %vm4605_vm4, %v5088_v21  ;;  %v5090_v21 = vpack.c.bf16 %v5083_v32, %v5083_v32 }
 0x5d5   : > { %13040 = vmatmul.mubr.msk.bf16.gmra.mrb[236].mxu0 %vm4605_vm4, %v5562_v2  ;;  %12947 = vmatprep.mubr.msk.bf16.mxu1 %vm14078_vm1, %v18049_v44 }
 0x5d6   : > { %13043 = vmatprep.mubr.msk.bf16.mxu0 %vm14078_vm1, %v18049_v44 }
 0x5dc   : > { %12948 = vmatmul.mubr.msk.bf16.gmra.mrb[204].mxu1 %vm4605_vm4, %v5089_v31  ;;  %v5717_v31 = vpack.c.bf16 %v5706_v5, %v5705_v12  ;;  %v5715_v5 = vld [vmem:[#allocation2 + $0x75] sm:$0xf] }
 0x5dd   : > { %13044 = vmatmul.mubr.msk.bf16.gmra.mrb[240].mxu0 %vm4605_vm4, %v5563_v26  ;;  %12951 = vmatprep.mubr.msk.bf16.mxu1 %vm14078_vm1, %v18049_v44 }
 0x5de   : > { %13047 = vmatprep.mubr.msk.bf16.mxu0 %vm14078_vm1, %v18049_v44 }
 0x5e4   : > { %12952 = vmatmul.mubr.msk.bf16.gmra.mrb[208].mxu1 %vm4605_vm4, %v5090_v21  ;;  %v5708_v21 = vld [vmem:[#allocation2 + $0x3d] sm:$0xff] }
 0x5e5   : > { %13048 = vmatmul.mubr.msk.bf16.gmra.mrb[244].mxu0 %vm4605_vm4, %v5564_v9  ;;  %12991 = vmatprep.mubr.msk.bf16.mxu1 %vm14078_vm1, %v18049_v44 }
 0x5e6   : > { %13087 = vmatprep.mubr.msk.bf16.mxu0 %vm14078_vm1, %v18049_v44 }
 0x5ec   : > { %12992 = vmatmul.mubr.msk.bf16.vlgmr.msra.gmra.mrb[212].mxu1 %vm4605_vm4, %v5400_v7 }
 0x5ed   : > { %13088 = vmatmul.mubr.msk.bf16.vlgmr.msra.gmra.mrb[248].mxu0 %vm4605_vm4, %v5874_v61  ;;  %12995 = vmatprep.mubr.msk.bf16.mxu1 %vm14078_vm1, %v18049_v44  ;;  %v5718_v61 = vpack.c.bf16 %v5708_v21, %v5707_v15 }
 0x5ee   : > { %13091 = vmatprep.mubr.msk.bf16.mxu0 %vm14078_vm1, %v18049_v44  ;;  %13052 = vmatpush3.bf16.msra.mxu1 %v13609_v27 }
 0x5ef   : > { %13053 = vmatprep.subr.bf16.mxu1 %v18049_v44 }
 0x5f2   : > { %13054 = vmatpush3.bf16.msra.mxu1 %v13610_v1 }
 0x5f4   : > { %12996 = vmatmul.mubr.msk.bf16.gmra.mrb[216].mxu1 %vm4605_vm4, %v5401_v33  ;;  %v5709_v33 = vld [vmem:[#allocation2 + $0x45] sm:$0xff] }
 0x5f5   : > { %13092 = vmatmul.mubr.msk.bf16.gmra.mrb[252].mxu0 %vm4605_vm4, %v5875_v43  ;;  %12999 = vmatprep.mubr.msk.bf16.mxu1 %vm14078_vm1, %v18049_v44  ;;  %v5710_v43 = vld [vmem:[#allocation2 + $0x4d] sm:$0xff] }
 0x5f6   : > { %13095 = vmatprep.mubr.msk.bf16.mxu0 %vm14078_vm1, %v18049_v44  ;;  %v5719_v38 = vpack.c.bf16 %v5710_v43, %v5709_v33 }
 0x5fc   : > { %13000 = vmatmul.mubr.msk.bf16.gmra.mrb[220].mxu1 %vm4605_vm4, %v5402_v14 }
 0x5fd   : > { %13096 = vmatmul.mubr.msk.bf16.gmra.mrb[0].mxu0 %vm4605_vm4, %v5876_v40  ;;  %13003 = vmatprep.mubr.msk.bf16.mxu1 %vm14078_vm1, %v18049_v44 }
 0x5fe   : > { %13099 = vmatprep.mubr.msk.bf16.mxu0 %vm14078_vm1, %v18049_v44 }
 0x604   : > { %13004 = vmatmul.mubr.msk.bf16.gmra.mrb[224].mxu1 %vm4605_vm4, %v5403_v46 }
 0x605   : > { %13100 = vmatmul.mubr.msk.bf16.gmra.mrb[4].mxu0 %vm4605_vm4, %v5877_v37  ;;  %13007 = vmatprep.mubr.msk.bf16.mxu1 %vm14078_vm1, %v18049_v44 }
 0x606   : > { %13103 = vmatprep.mubr.msk.bf16.mxu0 %vm14078_vm1, %v18049_v44 }
 0x60c   : > { %13008 = vmatmul.mubr.msk.bf16.gmra.mrb[228].mxu1 %vm4605_vm4, %v5404_v11  ;;  %v5712_v11 = vld [vmem:[#allocation2 + $0x5d] sm:$0xff] }
 0x60d   : > { %13104 = vmatmul.mubr.msk.bf16.gmra.mrb[8].mxu0 %vm4605_vm4, %v5878_v47  ;;  %13011 = vmatprep.mubr.msk.bf16.mxu1 %vm14078_vm1, %v18049_v44  ;;  %v5720_v48 = vpack.c.bf16 %v5712_v11, %v5711_v51 }
 0x60e   : > { %13107 = vmatprep.mubr.msk.bf16.mxu0 %vm14078_vm1, %v18049_v44 }
 0x614   : > { %13012 = vmatmul.mubr.msk.bf16.gmra.mrb[232].mxu1 %vm4605_vm4, %v5405_v20 }
 0x615   : > { %13108 = vmatmul.mubr.msk.bf16.gmra.mrb[12].mxu0 %vm4605_vm4, %v5879_v49  ;;  %13015 = vmatprep.mubr.msk.bf16.mxu1 %vm14078_vm1, %v18049_v44 }
 0x616   : > { %13111 = vmatprep.mubr.msk.bf16.mxu0 %vm14078_vm1, %v18049_v44 }
 0x617   : > { %v16244_v25 = vpop.f32.mrb[128].mxu1 }
 0x618   : > { %v16246_v59 = vpop.f32.mrb[164].mxu0  ;;  %v12833_v18 = vpop.f32.mrb[129].mxu1 }
 0x619   : > { %v12897_v17 = vpop.f32.mrb[165].mxu0  ;;  %v16248_v28 = vpop.f32.mrb[130].mxu1 }
 0x61a   : > { %v16250_v8 = vpop.f32.mrb[166].mxu0  ;;  %v12834_v35 = vpop.f32.mrb[131].mxu1 }
 0x61b   : > { %v12898_v6 = vpop.f32.mrb[167].mxu0  ;;  %v5713_v35 = vld [vmem:[#allocation2 + $0x65] sm:$0xff] }
 0x61c   : > { %13016 = vmatmul.mubr.msk.bf16.gmra.mrb[236].mxu1 %vm4605_vm4, %v5406_v36 }
 0x61d   : > { %13112 = vmatmul.mubr.msk.bf16.gmra.mrb[16].mxu0 %vm4605_vm4, %v5880_v10  ;;  %13055 = vmatprep.mubr.msk.bf16.mxu1 %vm14078_vm1, %v18049_v44  ;;  %v5714_v10 = vld [vmem:[#allocation2 + $0x6d] sm:$0xff] }
 0x61e   : > { %13145 = vmatprep.mubr.msk.bf16.mxu0 %vm14078_vm1, %v18049_v44 }
 0x61f   : > { %v16258_v52 = vpop.f32.mrb[132].mxu1 }
 0x620   : > { %v16260_v50 = vpop.f32.mrb[168].mxu0  ;;  %v12837_v45 = vpop.f32.mrb[133].mxu1 }
 0x621   : > { %v12901_v24 = vpop.f32.mrb[169].mxu0  ;;  %v16262_v16 = vpop.f32.mrb[134].mxu1 }
 0x622   : > { %v16264_v4 = vpop.f32.mrb[170].mxu0  ;;  %v12838_v54 = vpop.f32.mrb[135].mxu1  ;;  %v5721_v24 = vpack.c.bf16 %v5714_v10, %v5713_v35 }
 0x623   : > { %v12902_v30 = vpop.f32.mrb[171].mxu0 }
 0x624   : > { %13056 = vmatmul.mubr.msk.bf16.vlgmr.msra.gmra.mrb[240].mxu1 %vm4605_vm4, %v5716_v56 }
 0x625   : > { %13059 = vmatprep.mubr.msk.bf16.mxu1 %vm14078_vm1, %v18049_v44 }
 0x627   : > { %v16269_v3 = vpop.f32.mrb[136].mxu1 }
 0x628   : > { %v16271_v2 = vpop.f32.mrb[172].mxu0  ;;  %v12841_v42 = vpop.f32.mrb[137].mxu1 }
 0x629   : > { %v12905_v23 = vpop.f32.mrb[173].mxu0  ;;  %v16273_v19 = vpop.f32.mrb[138].mxu1 }
 0x62a   : > { %v16275_v26 = vpop.f32.mrb[174].mxu0  ;;  %v12842_v32 = vpop.f32.mrb[139].mxu1 }
 0x62b   : > { %v12906_v58 = vpop.f32.mrb[175].mxu0 }
 0x62c   : > { %13060 = vmatmul.mubr.msk.bf16.gmra.mrb[244].mxu1 %vm4605_vm4, %v5717_v31 }
 0x62d   : > { %13063 = vmatprep.mubr.msk.bf16.mxu1 %vm14078_vm1, %v18049_v44 }
 0x62f   : > { %v16280_v9 = vpop.f32.mrb[140].mxu1 }
 0x630   : > { %v16282_v63 = vpop.f32.mrb[176].mxu0  ;;  %v12845_v29 = vpop.f32.mrb[141].mxu1 }
 0x631   : > { %v12909_v7 = vpop.f32.mrb[177].mxu0  ;;  %v16284_v27 = vpop.f32.mrb[142].mxu1 }
 0x632   : > { %v16286_v1 = vpop.f32.mrb[178].mxu0  ;;  %v12846_v13 = vpop.f32.mrb[143].mxu1  ;;  %v5722_v7 = vpack.c.bf16 %v5715_v5, %v5715_v5 }
 0x633   : > { %v12910_v53 = vpop.f32.mrb[179].mxu0 }
 0x634   : > { %13064 = vmatmul.mubr.msk.bf16.gmra.mrb[248].mxu1 %vm4605_vm4, %v5718_v61 }
 0x635   : > { %13067 = vmatprep.mubr.msk.bf16.mxu1 %vm14078_vm1, %v18049_v44 }
 0x637   : > { %v16291_v55 = vpop.f32.mrb[144].mxu1 }
 0x638   : > { %v16293_v14 = vpop.f32.mrb[180].mxu0  ;;  %v12849_v41 = vpop.f32.mrb[145].mxu1 }
 0x639   : > { %v12913_v40 = vpop.f32.mrb[181].mxu0  ;;  %v16295_v0 = vpop.f32.mrb[146].mxu1 }
 0x63a   : > { %v16297_v46 = vpop.f32.mrb[182].mxu0  ;;  %v12850_v37 = vpop.f32.mrb[147].mxu1 }
 0x63b   : > { %v12914_v57 = vpop.f32.mrb[183].mxu0 }
 0x63c   : > { %13068 = vmatmul.mubr.msk.bf16.gmra.mrb[252].mxu1 %vm4605_vm4, %v5719_v38 }
 0x63d   : > { %13071 = vmatprep.mubr.msk.bf16.mxu1 %vm14078_vm1, %v18049_v44 }
 0x63f   : > { %v16302_v34 = vpop.f32.mrb[148].mxu1 }
 0x640   : > { %v16304_v47 = vpop.f32.mrb[184].mxu0  ;;  %v12853_v39 = vpop.f32.mrb[149].mxu1 }
 0x641   : > { %v12917_v20 = vpop.f32.mrb[185].mxu0  ;;  %v16306_v49 = vpop.f32.mrb[150].mxu1 }
 0x642   : > { %v16308_v22 = vpop.f32.mrb[186].mxu0  ;;  %v12854_v18 = vpop.f32.mrb[151].mxu1 }
 0x643   : > { %v12918_v17 = vpop.f32.mrb[187].mxu0 }
 0x644   : > { %13072 = vmatmul.mubr.msk.bf16.gmra.mrb[0].mxu1 %vm4605_vm4, %v5720_v48 }
 0x645   : > { %13075 = vmatprep.mubr.msk.bf16.mxu1 %vm14078_vm1, %v18049_v44 }
 0x647   : > { %v16313_v36 = vpop.f32.mrb[152].mxu1 }
 0x648   : > { %v16315_v6 = vpop.f32.mrb[188].mxu0  ;;  %v12857_v62 = vpop.f32.mrb[153].mxu1 }
 0x649   : > { %v12921_v45 = vpop.f32.mrb[189].mxu0  ;;  %v4789_v60 = vpop.f32.mrb[154].mxu1 }
 0x64a   : > { %v5055_v56 = vpop.f32.mrb[190].mxu0  ;;  %v12858_v54 = vpop.f32.mrb[155].mxu1 }
 0x64b   : > { %v12922_v30 = vpop.f32.mrb[191].mxu0 }
 0x64c   : > { %13076 = vmatmul.mubr.msk.bf16.gmra.mrb[4].mxu1 %vm4605_vm4, %v5721_v24 }
 0x64d   : > { %13079 = vmatprep.mubr.msk.bf16.mxu1 %vm14078_vm1, %v18049_v44 }
 0x64f   : > { %v4859_v12 = vpop.f32.mrb[156].mxu1 }
 0x650   : > { %v4860_v42 = vadd.f32 %v4859_v12, %v16244_v25  ;;  %v16321_v23 = vpop.f32.mrb[192].mxu0  ;;  %v12865_v31 = vpop.f32.mrb[157].mxu1 }
 0x651   : > { %v12961_v32 = vpop.f32.mrb[193].mxu0  ;;  %v4862_v58 = vpop.f32.mrb[158].mxu1 }
 0x652   : > { %v4863_v21 = vadd.f32 %v4862_v58, %v16248_v28  ;;  %v16324_v29 = vpop.f32.mrb[194].mxu0  ;;  %v12866_v15 = vpop.f32.mrb[159].mxu1  ;;  %v16327_v61 = vadd.f32 %v16246_v59, %v4860_v42 }
 0x653   : > { %v12962_v13 = vpop.f32.mrb[195].mxu0 }
 0x654   : > { %13080 = vmatmul.mubr.msk.bf16.gmra.mrb[8].mxu1 %vm4605_vm4, %v5722_v7  ;;  %v16331_v53 = vadd.f32 %v16250_v8, %v4863_v21 }
 0x657   : > { %v4867_v25 = vpop.f32.mrb[160].mxu1 }
 0x658   : > { %v4868_v33 = vadd.f32 %v4867_v25, %v16258_v52  ;;  %v16334_v43 = vpop.f32.mrb[196].mxu0  ;;  %v12869_v41 = vpop.f32.mrb[161].mxu1 }
 0x659   : > { %v12965_v28 = vpop.f32.mrb[197].mxu0  ;;  %v4870_v40 = vpop.f32.mrb[162].mxu1 }
 0x65a   : > { %v4871_v38 = vadd.f32 %v4870_v40, %v16262_v16  ;;  %v16337_v37 = vpop.f32.mrb[198].mxu0  ;;  %v12870_v59 = vpop.f32.mrb[163].mxu1  ;;  %v16340_v57 = vadd.f32 %v16260_v50, %v4868_v33 }
 0x65b   : > { %v12966_v11 = vpop.f32.mrb[199].mxu0 }
 0x65c   : > { %v16343_v8 = vadd.f32 %v16264_v4, %v4871_v38 }
 0x65f   : > { %v4875_v39 = vpop.f32.mrb[164].mxu1 }
 0x660   : > { %v4876_v52 = vadd.f32 %v4875_v39, %v16269_v3  ;;  %v16346_v51 = vpop.f32.mrb[200].mxu0  ;;  %v12873_v20 = vpop.f32.mrb[165].mxu1 }
 0x661   : > { %v12969_v48 = vpop.f32.mrb[201].mxu0  ;;  %v4878_v18 = vpop.f32.mrb[166].mxu1 }
 0x662   : > { %v4879_v16 = vadd.f32 %v4878_v18, %v16273_v19  ;;  %v16349_v17 = vpop.f32.mrb[202].mxu0  ;;  %v12874_v35 = vpop.f32.mrb[167].mxu1  ;;  %v16352_v50 = vadd.f32 %v16271_v2, %v4876_v52 }
 0x663   : > { %v12970_v10 = vpop.f32.mrb[203].mxu0 }
 0x664   : > { %v16355_v4 = vadd.f32 %v16275_v26, %v4879_v16 }
 0x667   : > { %v4883_v62 = vpop.f32.mrb[168].mxu1 }
 0x668   : > { %v4884_v3 = vadd.f32 %v4883_v62, %v16280_v9  ;;  %v16358_v45 = vpop.f32.mrb[204].mxu0  ;;  %v12877_v60 = vpop.f32.mrb[169].mxu1 }
 0x669   : > { %v12973_v24 = vpop.f32.mrb[205].mxu0  ;;  %v4886_v56 = vpop.f32.mrb[170].mxu1 }
 0x66a   : > { %v4887_v19 = vadd.f32 %v4886_v56, %v16284_v27  ;;  %v16361_v54 = vpop.f32.mrb[206].mxu0  ;;  %v12878_v30 = vpop.f32.mrb[171].mxu1  ;;  %v16364_v2 = vadd.f32 %v16282_v63, %v4884_v3 }
 0x66b   : > { %v12974_v12 = vpop.f32.mrb[207].mxu0 }
 0x66c   : > { %v16367_v26 = vadd.f32 %v16286_v1, %v4887_v19 }
 0x66f   : > { %v4891_v5 = vpop.f32.mrb[172].mxu1 }
 0x670   : > { %v4892_v9 = vadd.f32 %v4891_v5, %v16291_v55  ;;  %v16370_v42 = vpop.f32.mrb[208].mxu0  ;;  %v12881_v31 = vpop.f32.mrb[173].mxu1 }
 0x671   : > { %v12977_v32 = vpop.f32.mrb[209].mxu0  ;;  %v4894_v58 = vpop.f32.mrb[174].mxu1 }
 0x672   : > { %v4895_v27 = vadd.f32 %v4894_v58, %v16295_v0  ;;  %v16373_v21 = vpop.f32.mrb[210].mxu0  ;;  %v12882_v15 = vpop.f32.mrb[175].mxu1  ;;  %v16376_v63 = vadd.f32 %v16293_v14, %v4892_v9 }
 0x673   : > { %v12978_v7 = vpop.f32.mrb[211].mxu0 }
 0x674   : > { %v16379_v1 = vadd.f32 %v16297_v46, %v4895_v27 }
 0x677   : > { %v4899_v13 = vpop.f32.mrb[176].mxu1 }
 0x678   : > { %v4900_v55 = vadd.f32 %v4899_v13, %v16302_v34  ;;  %v16382_v25 = vpop.f32.mrb[212].mxu0  ;;  %v12885_v33 = vpop.f32.mrb[177].mxu1 }
 0x679   : > { %v12981_v41 = vpop.f32.mrb[213].mxu0  ;;  %v4902_v28 = vpop.f32.mrb[178].mxu1 }
 0x67a   : > { %v4903_v0 = vadd.f32 %v4902_v28, %v16306_v49  ;;  %v16385_v40 = vpop.f32.mrb[214].mxu0  ;;  %v12886_v38 = vpop.f32.mrb[179].mxu1  ;;  %v16388_v14 = vadd.f32 %v16304_v47, %v4900_v55 }
 0x67b   : > { %v12982_v59 = vpop.f32.mrb[215].mxu0 }
 0x67c   : > { %v16391_v46 = vadd.f32 %v16308_v22, %v4903_v0 }
 0x67f   : > { %v4907_v11 = vpop.f32.mrb[180].mxu1 }
 0x680   : > { %v4908_v34 = vadd.f32 %v4907_v11, %v16313_v36  ;;  %v16394_v39 = vpop.f32.mrb[216].mxu0  ;;  %v12889_v52 = vpop.f32.mrb[181].mxu1 }
 0x681   : > { %v12985_v20 = vpop.f32.mrb[217].mxu0  ;;  %v4910_v48 = vpop.f32.mrb[182].mxu1 }
 0x682   : > { %v5371_v18 = vpop.f32.mrb[218].mxu0  ;;  %v12890_v49 = vpop.f32.mrb[183].mxu1  ;;  %v16397_v16 = vadd.f32 %v16315_v6, %v4908_v34 }
 0x683   : > { %v12986_v35 = vpop.f32.mrb[219].mxu0 }
 0x687   : > { %v5162_v47 = vpop.f32.mrb[184].mxu1 }
 0x688   : > { %v5216_v10 = vadd.f32 %v5162_v47, %v16327_v61  ;;  %v16400_v62 = vpop.f32.mrb[220].mxu0  ;;  %v12929_v22 = vpop.f32.mrb[185].mxu1 }
 0x689   : > { %v13025_v3 = vpop.f32.mrb[221].mxu0  ;;  %v5165_v60 = vpop.f32.mrb[186].mxu1 }
 0x68a   : > { %v5217_v36 = vadd.f32 %v5165_v60, %v16331_v53  ;;  %v16403_v24 = vpop.f32.mrb[222].mxu0  ;;  %v12930_v56 = vpop.f32.mrb[187].mxu1  ;;  %v16406_v19 = vadd.f32 %v16321_v23, %v5216_v10 }
 0x68b   : > { %v13026_v30 = vpop.f32.mrb[223].mxu0 }
 0x68c   : > { %v16409_v6 = vadd.f32 %v16324_v29, %v5217_v36 }
 0x68f   : > { %v5170_v12 = vpop.f32.mrb[188].mxu1 }
 0x690   : > { %v5218_v61 = vadd.f32 %v5170_v12, %v16340_v57  ;;  %v16412_v5 = vpop.f32.mrb[224].mxu0  ;;  %v12933_v9 = vpop.f32.mrb[189].mxu1 }
 0x691   : > { %v13029_v31 = vpop.f32.mrb[225].mxu0  ;;  %v5173_v32 = vpop.f32.mrb[190].mxu1 }
 0x692   : > { %v5219_v53 = vadd.f32 %v5173_v32, %v16343_v8  ;;  %v16415_v58 = vpop.f32.mrb[226].mxu0  ;;  %v12934_v27 = vpop.f32.mrb[191].mxu1  ;;  %v16418_v23 = vadd.f32 %v16334_v43, %v5218_v61 }
 0x693   : > { %v13030_v15 = vpop.f32.mrb[227].mxu0 }
 0x694   : > { %v16421_v29 = vadd.f32 %v16337_v37, %v5219_v53 }
 0x697   : > { %v5178_v7 = vpop.f32.mrb[192].mxu1 }
 0x698   : > { %v5220_v57 = vadd.f32 %v5178_v7, %v16352_v50  ;;  %v16424_v13 = vpop.f32.mrb[228].mxu0  ;;  %v12937_v55 = vpop.f32.mrb[193].mxu1 }
 0x699   : > { %v13033_v33 = vpop.f32.mrb[229].mxu0  ;;  %v5181_v41 = vpop.f32.mrb[194].mxu1 }
 0x69a   : > { %v5221_v8 = vadd.f32 %v5181_v41, %v16355_v4  ;;  %v16427_v28 = vpop.f32.mrb[230].mxu0  ;;  %v12938_v0 = vpop.f32.mrb[195].mxu1  ;;  %v16430_v43 = vadd.f32 %v16346_v51, %v5220_v57 }
 0x69b   : > { %v13034_v38 = vpop.f32.mrb[231].mxu0 }
 0x69c   : > { %v16433_v37 = vadd.f32 %v16349_v17, %v5221_v8 }
 0x69f   : > { %v5186_v59 = vpop.f32.mrb[196].mxu1 }
 0x6a0   : > { %v5222_v50 = vadd.f32 %v5186_v59, %v16364_v2  ;;  %v16436_v11 = vpop.f32.mrb[232].mxu0  ;;  %v12941_v34 = vpop.f32.mrb[197].mxu1 }
 0x6a1   : > { %v13037_v52 = vpop.f32.mrb[233].mxu0  ;;  %v5189_v20 = vpop.f32.mrb[198].mxu1 }
 0x6a2   : > { %v5223_v4 = vadd.f32 %v5189_v20, %v16367_v26  ;;  %v16439_v48 = vpop.f32.mrb[234].mxu0  ;;  %v12942_v18 = vpop.f32.mrb[199].mxu1  ;;  %v16442_v51 = vadd.f32 %v16358_v45, %v5222_v50 }
 0x6a3   : > { %v13038_v49 = vpop.f32.mrb[235].mxu0 }
 0x6a4   : > { %v16445_v17 = vadd.f32 %v16361_v54, %v5223_v4 }
 0x6a7   : > { %v5194_v35 = vpop.f32.mrb[200].mxu1 }
 0x6a8   : > { %v5224_v2 = vadd.f32 %v5194_v35, %v16376_v63  ;;  %v16448_v47 = vpop.f32.mrb[236].mxu0  ;;  %v12945_v10 = vpop.f32.mrb[201].mxu1 }
 0x6a9   : > { %v13041_v22 = vpop.f32.mrb[237].mxu0  ;;  %v5197_v3 = vpop.f32.mrb[202].mxu1 }
 0x6aa   : > { %v5225_v26 = vadd.f32 %v5197_v3, %v16379_v1  ;;  %v16451_v60 = vpop.f32.mrb[238].mxu0  ;;  %v12946_v36 = vpop.f32.mrb[203].mxu1  ;;  %v16454_v45 = vadd.f32 %v16370_v42, %v5224_v2 }
 0x6ab   : > { %v13042_v56 = vpop.f32.mrb[239].mxu0 }
 0x6ac   : > { %v16457_v54 = vadd.f32 %v16373_v21, %v5225_v26  ;;  %v13611_v21 = vld [vmem:[%s18081_s7] sm:$0xff]  }
 0x6ad   : > { %13129 = vmatprep.mubr.msk.bf16.mxu1 %vm6084_vm6, %v13611_v21 }
 0x6af   : > { %v5202_v30 = vpop.f32.mrb[204].mxu1 }
 0x6b0   : > { %v5226_v63 = vadd.f32 %v5202_v30, %v16388_v14  ;;  %v16460_v12 = vpop.f32.mrb[240].mxu0  ;;  %v12949_v61 = vpop.f32.mrb[205].mxu1 }
 0x6b1   : > { %v13045_v9 = vpop.f32.mrb[241].mxu0  ;;  %v5205_v31 = vpop.f32.mrb[206].mxu1 }
 0x6b2   : > { %v5227_v1 = vadd.f32 %v5205_v31, %v16391_v46  ;;  %v16463_v32 = vpop.f32.mrb[242].mxu0  ;;  %v12950_v53 = vpop.f32.mrb[207].mxu1  ;;  %v16466_v42 = vadd.f32 %v16382_v25, %v5226_v63 }
 0x6b3   : > { %v13046_v27 = vpop.f32.mrb[243].mxu0 }
 0x6b4   : > { %v16472_v14 = vadd.f32 %v16385_v40, %v5227_v1  ;;  %v13615_v40 = vld [vmem:[%s18082_s4 + $0x20] sm:$0xff]  }
 0x6b5   : > { %13138 = vmatpush3.bf16.msra.mxu0 %v13615_v40 }
 0x6b6   : > { %13139 = vmatprep.subr.bf16.mxu0 %v18049_v44 }
 0x6b7   : > { %v5210_v15 = vpop.f32.mrb[208].mxu1 }
 0x6b8   : > { %v5228_v46 = vadd.f32 %v5210_v15, %v16397_v16  ;;  %v16476_v7 = vpop.f32.mrb[244].mxu0  ;;  %v12953_v57 = vpop.f32.mrb[209].mxu1 }
 0x6b9   : > { %v13049_v55 = vpop.f32.mrb[245].mxu0  ;;  %v5213_v25 = vpop.f32.mrb[210].mxu1 }
 0x6ba   : > { %v5687_v33 = vpop.f32.mrb[246].mxu0  ;;  %v12954_v41 = vpop.f32.mrb[211].mxu1  ;;  %v16479_v8 = vadd.f32 %v16394_v39, %v5228_v46 }
 0x6bb   : > { %v13050_v0 = vpop.f32.mrb[247].mxu0 }
 0x6bf   : > { %v5478_v38 = vpop.f32.mrb[212].mxu1 }
 0x6c0   : > { %v5532_v59 = vadd.f32 %v5478_v38, %v16406_v19  ;;  %v16485_v50 = vpop.f32.mrb[248].mxu0  ;;  %v12993_v16 = vpop.f32.mrb[213].mxu1 }
 0x6c1   : > { %v13089_v34 = vpop.f32.mrb[249].mxu0  ;;  %v5481_v52 = vpop.f32.mrb[214].mxu1 }
 0x6c2   : > { %v5533_v20 = vadd.f32 %v5481_v52, %v16409_v6  ;;  %v16489_v39 = vpop.f32.mrb[250].mxu0  ;;  %v12994_v4 = vpop.f32.mrb[215].mxu1  ;;  %v16492_v18 = vadd.f32 %v16400_v62, %v5532_v59 }
 0x6c3   : > { %v13090_v49 = vpop.f32.mrb[251].mxu0 }
 0x6c4   : > { %v16495_v35 = vadd.f32 %v16403_v24, %v5533_v20 }
 0x6c7   : > { %v5486_v19 = vpop.f32.mrb[216].mxu1 }
 0x6c8   : > { %v5534_v2 = vadd.f32 %v5486_v19, %v16418_v23  ;;  %v16498_v10 = vpop.f32.mrb[252].mxu0  ;;  %v12997_v22 = vpop.f32.mrb[217].mxu1 }
 0x6c9   : > { %v13093_v3 = vpop.f32.mrb[253].mxu0  ;;  %v5489_v26 = vpop.f32.mrb[218].mxu1 }
 0x6ca   : > { %v5535_v6 = vadd.f32 %v5489_v26, %v16421_v29  ;;  %v16501_v36 = vpop.f32.mrb[254].mxu0  ;;  %v12998_v56 = vpop.f32.mrb[219].mxu1  ;;  %v16504_v62 = vadd.f32 %v16412_v5, %v5534_v2 }
 0x6cb   : > { %v13094_v30 = vpop.f32.mrb[255].mxu0 }
 0x6cc   : > { %v16507_v24 = vadd.f32 %v16415_v58, %v5535_v6 }
 0x6cf   : > { %v5494_v63 = vpop.f32.mrb[220].mxu1 }
 0x6d0   : > { %v5536_v23 = vadd.f32 %v5494_v63, %v16430_v43  ;;  %v16510_v61 = vpop.f32.mrb[0].mxu0  ;;  %v13001_v9 = vpop.f32.mrb[221].mxu1 }
 0x6d1   : > { %v13097_v31 = vpop.f32.mrb[1].mxu0  ;;  %v5497_v1 = vpop.f32.mrb[222].mxu1 }
 0x6d2   : > { %v5537_v29 = vadd.f32 %v5497_v1, %v16433_v37  ;;  %v16513_v53 = vpop.f32.mrb[2].mxu0  ;;  %v13002_v27 = vpop.f32.mrb[223].mxu1  ;;  %v16516_v5 = vadd.f32 %v16424_v13, %v5536_v23 }
 0x6d3   : > { %v13098_v21 = vpop.f32.mrb[3].mxu0 }
 0x6d4   : > { %v16519_v58 = vadd.f32 %v16427_v28, %v5537_v29 }
 0x6d7   : > { %v5502_v15 = vpop.f32.mrb[224].mxu1 }
 0x6d8   : > { %v5538_v43 = vadd.f32 %v5502_v15, %v16442_v51  ;;  %v16522_v46 = vpop.f32.mrb[4].mxu0  ;;  %v13005_v57 = vpop.f32.mrb[225].mxu1 }
 0x6d9   : > { %v13101_v55 = vpop.f32.mrb[5].mxu0  ;;  %v5505_v25 = vpop.f32.mrb[226].mxu1 }
 0x6da   : > { %v5539_v37 = vadd.f32 %v5505_v25, %v16445_v17  ;;  %v16525_v33 = vpop.f32.mrb[6].mxu0  ;;  %v13006_v41 = vpop.f32.mrb[227].mxu1  ;;  %v16528_v13 = vadd.f32 %v16436_v11, %v5538_v43 }
 0x6db   : > { %v13102_v0 = vpop.f32.mrb[7].mxu0 }
 0x6dc   : > { %v16531_v28 = vadd.f32 %v16439_v48, %v5539_v37 }
 0x6df   : > { %v5510_v40 = vpop.f32.mrb[228].mxu1 }
 0x6e0   : > { %v5540_v51 = vadd.f32 %v5510_v40, %v16454_v45  ;;  %v16534_v38 = vpop.f32.mrb[8].mxu0  ;;  %v13009_v59 = vpop.f32.mrb[229].mxu1 }
 0x6e1   : > { %v13105_v16 = vpop.f32.mrb[9].mxu0  ;;  %v5513_v34 = vpop.f32.mrb[230].mxu1 }
 0x6e2   : > { %v5541_v17 = vadd.f32 %v5513_v34, %v16457_v54  ;;  %v16537_v52 = vpop.f32.mrb[10].mxu0  ;;  %v13010_v20 = vpop.f32.mrb[231].mxu1  ;;  %v16540_v11 = vadd.f32 %v16448_v47, %v5540_v51 }
 0x6e3   : > { %v13106_v4 = vpop.f32.mrb[11].mxu0 }
 0x6e4   : > { %v16543_v48 = vadd.f32 %v16451_v60, %v5541_v17 }
 0x6e7   : > { %v5518_v49 = vpop.f32.mrb[232].mxu1 }
 0x6e8   : > { %v5542_v45 = vadd.f32 %v5518_v49, %v16466_v42  ;;  %v16546_v19 = vpop.f32.mrb[12].mxu0  ;;  %v13013_v2 = vpop.f32.mrb[233].mxu1 }
 0x6e9   : > { %v13109_v22 = vpop.f32.mrb[13].mxu0  ;;  %v5521_v3 = vpop.f32.mrb[234].mxu1 }
 0x6ea   : > { %v5543_v54 = vadd.f32 %v5521_v3, %v16472_v14  ;;  %v16549_v26 = vpop.f32.mrb[14].mxu0  ;;  %v13014_v6 = vpop.f32.mrb[235].mxu1  ;;  %v16552_v47 = vadd.f32 %v16460_v12, %v5542_v45 }
 0x6eb   : > { %v13110_v56 = vpop.f32.mrb[15].mxu0 }
 0x6ec   : > { %v16555_v60 = vadd.f32 %v16463_v32, %v5543_v54  ;;  %v16567_v32 = vld [vmem:[%s18083_s3] ss:$0 sm:$0xff] }
 0x6ef   : > { %v5526_v30 = vpop.f32.mrb[236].mxu1 }
 0x6f0   : > { %v5544_v42 = vadd.f32 %v5526_v30, %v16479_v8  ;;  %v16558_v63 = vpop.f32.mrb[16].mxu0  ;;  %v13017_v23 = vpop.f32.mrb[237].mxu1 }
 0x6f1   : > { %v13113_v9 = vpop.f32.mrb[17].mxu0  ;;  %v5529_v31 = vpop.f32.mrb[238].mxu1 }
 0x6f2   : > { %v6003_v1 = vpop.f32.mrb[18].mxu0  ;;  %v13018_v14 = vpop.f32.mrb[239].mxu1  ;;  %v16561_v29 = vadd.f32 %v16476_v7, %v5544_v42 }
 0x6f3   : > { %v13114_v27 = vpop.f32.mrb[19].mxu0 }
 0x6f7   : > { %v5794_v12 = vpop.f32.mrb[240].mxu1 }
 0x6f8   : > { %v5848_v21 = vadd.f32 %v5794_v12, %v16492_v18  ;;  %v13057_v15 = vpop.f32.mrb[241].mxu1 }
 0x6f9   : > { %v5797_v8 = vpop.f32.mrb[242].mxu1 }
 0x6fa   : > { %v6006_v43 = vadd.f32 %v16485_v50, %v5848_v21  ;;  %v5849_v57 = vadd.f32 %v5797_v8, %v16495_v35  ;;  %v13058_v55 = vpop.f32.mrb[243].mxu1 }
 0x6fc   : > { %v6026_v25 = vadd.f32 %v16567_v32, %v6006_v43  ;;  %v6007_v7 = vadd.f32 %v16489_v39, %v5849_v57 }
 0x6fe   : > { %v6027_v37 = vadd.f32 %v16567_v32, %v6007_v7  ;;  %v6039_v18 = vmax.f32 %v6026_v25, 0.0 }
 0x6ff   : > { %v5802_v41 = vpop.f32.mrb[244].mxu1 }
 0x700   : > { %v6040_v0 = vmax.f32 %v6027_v37, 0.0  ;;  %v5850_v40 = vadd.f32 %v5802_v41, %v16504_v62  ;;  %v13061_v51 = vpop.f32.mrb[245].mxu1 }
 0x701   : > { %v5805_v59 = vpop.f32.mrb[246].mxu1 }
 0x702   : > { %v6008_v16 = vadd.f32 %v16498_v10, %v5850_v40  ;;  %v5851_v50 = vadd.f32 %v5805_v59, %v16507_v24  ;;  %v13062_v34 = vpop.f32.mrb[247].mxu1  ;;  %v6059_v35 = vpack.c.bf16 %v6040_v0, %v6039_v18 }
 0x704   : > { %v6028_v17 = vadd.f32 %v16567_v32, %v6008_v16  ;;  %v6009_v20 = vadd.f32 %v16501_v36, %v5851_v50  ;;  %13115 = vmatprep.subr.bf16.mxu1 %v6059_v35 }
 0x705   : > { %13116 = vmatpush3.bf16.msra.mxu1 %v6059_v35 }
 0x706   : > { %v6029_v39 = vadd.f32 %v16567_v32, %v6009_v20  ;;  %v6041_v49 = vmax.f32 %v6028_v17, 0.0 }
 0x707   : > { %v5810_v4 = vpop.f32.mrb[248].mxu1 }
 0x708   : > { %v6042_v45 = vmax.f32 %v6029_v39, 0.0  ;;  %v5852_v62 = vadd.f32 %v5810_v4, %v16516_v5  ;;  %v13065_v2 = vpop.f32.mrb[249].mxu1 }
 0x709   : > { %v5813_v22 = vpop.f32.mrb[250].mxu1 }
 0x70a   : > { %v6010_v10 = vadd.f32 %v16510_v61, %v5852_v62  ;;  %v5853_v24 = vadd.f32 %v5813_v22, %v16519_v58  ;;  %v13066_v3 = vpop.f32.mrb[251].mxu1  ;;  %v6060_v54 = vpack.c.bf16 %v6042_v45, %v6041_v49  ;;  %v13616_v22 = vld [vmem:[%s18082_s4 + $0x28] sm:$0xff]  }
 0x70b   : > { %13140 = vmatpush3.bf16.msra.mxu0 %v13616_v22  ;;  %v13620_v3 = vld [vmem:[%s18082_s4 + $0x8] sm:$0xff]  }
 0x70c   : > { %v6030_v6 = vadd.f32 %v16567_v32, %v6010_v10  ;;  %v6011_v36 = vadd.f32 %v16513_v53, %v5853_v24  ;;  %13117 = vmatprep.subr.bf16.mxu1 %v6060_v54  ;;  %v13619_v10 = vld [vmem:[%s18082_s4] sm:$0xff]   ;;  %v13617_v24 = vld [vmem:[%s18082_s4 + $0x30] sm:$0xff]   ;;  %13141 = vmatprep.subr.bf16.mxu0 %v18049_v44 }
 0x70d   : > { %13118 = vmatpush3.bf16.msra.mxu1 %v6060_v54  ;;  %v13618_v54 = vld [vmem:[%s18082_s4 + $0x38] sm:$0xff]  }
 0x70e   : > { %v6031_v56 = vadd.f32 %v16567_v32, %v6011_v36  ;;  %v6043_v42 = vmax.f32 %v6030_v6, 0.0  ;;  %v13621_v6 = vld [vmem:[%s18082_s4 + $0x10] sm:$0xff]   ;;  %v13623_v36 = vld [vmem:[%s18082_s4 + $0x18] sm:$0xff]  }
 0x70f   : > { %v5818_v30 = vpop.f32.mrb[252].mxu1  ;;  %13142 = vmatpush3.bf16.msra.mxu0 %v13617_v24 }
 0x710   : > { %v6044_v23 = vmax.f32 %v6031_v56, 0.0  ;;  %v5854_v5 = vadd.f32 %v5818_v30, %v16528_v13  ;;  %v13069_v9 = vpop.f32.mrb[253].mxu1  ;;  %13143 = vmatprep.subr.bf16.mxu0 %v18049_v44 }
 0x711   : > { %v5821_v31 = vpop.f32.mrb[254].mxu1 }
 0x712   : > { %v6012_v61 = vadd.f32 %v16522_v46, %v5854_v5  ;;  %v5855_v58 = vadd.f32 %v5821_v31, %v16531_v28  ;;  %v13070_v1 = vpop.f32.mrb[255].mxu1  ;;  %v6061_v14 = vpack.c.bf16 %v6044_v23, %v6043_v42 }
 0x713   : > { %13144 = vmatpush3.bf16.msra.mxu0 %v13618_v54 }
 0x714   : > { %v6032_v27 = vadd.f32 %v16567_v32, %v6012_v61  ;;  %v6013_v53 = vadd.f32 %v16525_v33, %v5855_v58  ;;  %13119 = vmatprep.subr.bf16.mxu1 %v6061_v14  ;;  %13177 = vmatprep.subr.bf16.mxu0 %v18049_v44  ;;  %v13622_v58 = vld [vmem:[%s18082_s4 + $0x40] sm:$0xff]  }
 0x715   : > { %13120 = vmatpush3.bf16.msra.mxu1 %v6061_v14 }
 0x716   : > { %v6033_v12 = vadd.f32 %v16567_v32, %v6013_v53  ;;  %v6045_v15 = vmax.f32 %v6032_v27, 0.0 }
 0x717   : > { %v5826_v21 = vpop.f32.mrb[0].mxu1 }
 0x718   : > { %v6046_v8 = vmax.f32 %v6033_v12, 0.0  ;;  %v5856_v13 = vadd.f32 %v5826_v21, %v16540_v11  ;;  %v13073_v43 = vpop.f32.mrb[1].mxu1 }
 0x719   : > { %v5829_v57 = vpop.f32.mrb[2].mxu1 }
 0x71a   : > { %v6014_v46 = vadd.f32 %v16534_v38, %v5856_v13  ;;  %v5857_v28 = vadd.f32 %v5829_v57, %v16543_v48  ;;  %v13074_v55 = vpop.f32.mrb[3].mxu1  ;;  %v6062_v25 = vpack.c.bf16 %v6046_v8, %v6045_v15  ;;  %v13627_v13 = vld [vmem:[%s18082_s4 + $0x60] sm:$0xff]   ;;  %v13624_v57 = vld [vmem:[%s18082_s4 + $0x48] sm:$0xff]  }
 0x71b   : > { %v13628_v55 = vld [vmem:[%s18082_s4 + $0x68] sm:$0xff]  }
 0x71c   : > { %v6034_v7 = vadd.f32 %v16567_v32, %v6014_v46  ;;  %v6015_v33 = vadd.f32 %v16537_v52, %v5857_v28  ;;  %13121 = vmatprep.subr.bf16.mxu1 %v6062_v25 }
 0x71d   : > { %13122 = vmatpush3.bf16.msra.mxu1 %v6062_v25 }
 0x71e   : > { %v6035_v37 = vadd.f32 %v16567_v32, %v6015_v33  ;;  %v6047_v18 = vmax.f32 %v6034_v7, 0.0  ;;  %v13625_v33 = vld [vmem:[%s18082_s4 + $0x50] sm:$0xff]  }
 0x71f   : > { %v5834_v41 = vpop.f32.mrb[4].mxu1 }
 0x720   : > { %v6048_v0 = vmax.f32 %v6035_v37, 0.0  ;;  %v5858_v11 = vadd.f32 %v5834_v41, %v16552_v47  ;;  %v13077_v40 = vpop.f32.mrb[5].mxu1 }
 0x721   : > { %v5837_v51 = vpop.f32.mrb[6].mxu1 }
 0x722   : > { %v6016_v38 = vadd.f32 %v16546_v19, %v5858_v11  ;;  %v5859_v48 = vadd.f32 %v5837_v51, %v16555_v60  ;;  %v13078_v59 = vpop.f32.mrb[7].mxu1  ;;  %v6063_v16 = vpack.c.bf16 %v6048_v0, %v6047_v18  ;;  %v13629_v18 = vld [vmem:[%s18082_s4 + $0x70] sm:$0xff]   ;;  %v13626_v0 = vld [vmem:[%s18082_s4 + $0x58] sm:$0xff]  }
 0x723   : > { %v13631_v51 = vld [vmem:[%s18082_s4 + $0x78] sm:$0xff]  }
 0x724   : > { %v6036_v50 = vadd.f32 %v16567_v32, %v6016_v38  ;;  %v6017_v52 = vadd.f32 %v16549_v26, %v5859_v48  ;;  %13123 = vmatprep.subr.bf16.mxu1 %v6063_v16 }
 0x725   : > { %13124 = vmatpush3.bf16.msra.mxu1 %v6063_v16 }
 0x726   : > { %v6037_v34 = vadd.f32 %v16567_v32, %v6017_v52  ;;  %v6049_v17 = vmax.f32 %v6036_v50, 0.0  ;;  %v13630_v52 = vld [vmem:[%s18082_s4 + $0x80] sm:$0xff]  }
 0x727   : > { %v5842_v35 = vpop.f32.mrb[8].mxu1 }
 0x728   : > { %v6050_v20 = vmax.f32 %v6037_v34, 0.0  ;;  %v5860_v47 = vadd.f32 %v5842_v35, %v16561_v29  ;;  %v13081_v39 = vpop.f32.mrb[9].mxu1  ;;  %v13612_v29 = vld [vmem:[%s18081_s7 + $0x8] sm:$0xff]  }
 0x729   : > { %v5845_v4 = vpop.f32.mrb[10].mxu1 }
 0x72a   : > { %v6018_v19 = vadd.f32 %v16558_v63, %v5860_v47  ;;  %v13082_v60 = vpop.f32.mrb[11].mxu1  ;;  %v6064_v49 = vpack.c.bf16 %v6050_v20, %v6049_v17  ;;  %v13613_v63 = vld [vmem:[%s18081_s7 + $0x10] sm:$0xff]   ;;  %v13635_v17 = vld [vmem:[%s18082_s4 + $0xa0] sm:$0xff]   ;;  %v13632_v20 = vld [vmem:[%s18082_s4 + $0x88] sm:$0xff]  }
 0x72b   : > { %v13636_v4 = vld [vmem:[%s18082_s4 + $0xa8] sm:$0xff]   ;;  %v13633_v60 = vld [vmem:[%s18082_s4 + $0x90] sm:$0xff]  }
 0x72c   : > { %v6038_v45 = vadd.f32 %v16567_v32, %v6018_v19  ;;  %13125 = vmatprep.subr.bf16.mxu1 %v6064_v49  ;;  %v13614_v32 = vld [vmem:[%s18081_s7 + $0x18] ss:$0 sps:$4 sm:$0x11]   ;;  %s857_s7 = scalar_lea.vmem %s18018_s27, %s18090_s30 }
 0x72d   : > { %13126 = vmatpush3.bf16.msra.mxu1 %v6064_v49 }
 0x72e   : > { %v6051_v26 = vmax.f32 %v6038_v45, 0.0 }
 0x730   : > { %v6065_v62 = vpack.c.bf16 %v6051_v26, %v6051_v26  ;;  %v13637_v26 = vld [vmem:[%s18082_s4 + $0xb0] sm:$0xff]  }
 0x732   : > { %13546 = vmatprep.subr.msk.bf16.mxu1 %vm1054_vm0, %v6065_v62  ;;  %v6098_v2 = vsel %vm1054_vm0, %v6065_v62, 0  ;;  %v13634_v62 = vld [vmem:[%s18082_s4 + $0x98] sm:$0xff]  }
 0x733   : > { %13128 = vmatpush3.bf16.msra.mxu1 %v6098_v2 }
 0x734   : > { %13157 = vmatprep.subr.bf16.mxu1 %v18049_v44 }
 0x736   : > { %13130 = vmatmul.mubr.msk.bf16.vlgmr.msra.gmra.mrb[12].mxu1 %vm6084_vm6, %v13612_v29 }
 0x737   : > { %13133 = vmatprep.mubr.msk.bf16.mxu1 %vm6084_vm6, %v13613_v63  ;;  %13158 = vmatpush3.bf16.msra.mxu1 %v13619_v10  ;;  %v13639_v63 = vld [vmem:[%s18082_s4 + $0xb8] sm:$0xff]  }
 0x738   : > { %13159 = vmatprep.subr.bf16.mxu1 %v18049_v44 }
 0x73b   : > { %13160 = vmatpush3.bf16.msra.mxu1 %v13620_v3  ;;  %v13638_v3 = vld [vmem:[%s18082_s4 + $0xc0] sm:$0xff]  }
 0x73c   : > { %13161 = vmatprep.subr.bf16.mxu1 %v18049_v44 }
 0x73e   : > { %13134 = vmatmul.mubr.msk.bf16.gmra.mrb[16].mxu1 %vm6084_vm6, %v13614_v32 }
 0x73f   : > { %13165 = vmatprep.mubr.msk.bf16.mxu1 %vm14078_vm1, %v18049_v44  ;;  %13162 = vmatpush3.bf16.msra.mxu1 %v13621_v6 }
 0x740   : > { %13163 = vmatprep.subr.bf16.mxu1 %v18049_v44 }
 0x743   : > { %13164 = vmatpush3.bf16.msra.mxu1 %v13623_v36  ;;  %v13643_v36 = vld [vmem:[%s18082_s4 + $0xe0] sm:$0xff]  }
 0x744   : > { %13197 = vmatprep.subr.bf16.mxu1 %v18049_v44 }
 0x809   : > { %v13131_v56 = vpop.f32.mrb[12].mxu1 }
 0x80a   : > { %6167 = vst.msk [vmem:[#allocation3 + $0x10] sm:$0xff] %vm6164_vm7, %v13131_v56  ;;  %v6134_v30 = vpop.f32.mrb[13].mxu1  ;;  %v13640_v56 = vld [vmem:[%s18082_s4 + $0xc8] sm:$0xff]  }
 0x80b   : > { %6165 = vst.msk [vmem:[#allocation3] sm:$0xff] %vm6164_vm7, %v6134_v30  ;;  %v13132_v42 = vpop.f32.mrb[14].mxu1 }
 0x80c   : > { %6168 = vst.msk [vmem:[#allocation3 + $0x18] sm:$0xff] %vm6164_vm7, %v13132_v42  ;;  %v6137_v23 = vpop.f32.mrb[15].mxu1 }
 0x80d   : > { %6166 = vst.msk [vmem:[#allocation3 + $0x8] sm:$0xff] %vm6164_vm7, %v6137_v23  ;;  %v13644_v23 = vld [vmem:[%s18082_s4 + $0xe8] sm:$0xff]  }
 0x811   : > { %v13135_v5 = vpop.f32.mrb[16].mxu1  ;;  %v16689_v25 = vld [vmem:[#allocation3 + $0x10] sm:$0xff] }
 0x812   : > { %6172 = vst.msk [vmem:[#allocation3 + $0x30] sm:$0x3] %vm6171_vm8, %v13135_v5  ;;  %v6150_v9 = vpop.f32.mrb[17].mxu1  ;;  %v6173_v31 = vld [vmem:[#allocation3] sm:$0xff] }
 0x813   : > { %v16656_v61 = vld [vmem:[#allocation3 + $0x16] sm:$0xff]  ;;  %6169 = vst.msk [vmem:[#allocation3 + $0x20] sm:$0xff] %vm6164_vm7, %v6150_v9  ;;  %v13136_v1 = vpop.f32.mrb[18].mxu1 }
 0x814   : > { %v16662_v14 = vld [vmem:[#allocation3 + $0x8] sm:$0xff]  ;;  %v6153_v12 = vpop.f32.mrb[19].mxu1  ;;  %v16683_v28 = vld [vmem:[#allocation3 + $0x18] sm:$0xff]  ;;  %v13641_v9 = vld [vmem:[%s18082_s4 + $0xd0] sm:$0xff]  }
 0x815   : > { %v6189_v27 = vld [vmem:[#allocation3 + $0x1] sm:$0xff]  ;;  %v6190_v53 = vld [vmem:[#allocation3 + $0x9] sm:$0xff]  ;;  %v6178_v21 = vpack.c.bf16 %v16662_v14, %v6173_v31  ;;  %6170 = vst.msk [vmem:[#allocation3 + $0x28] sm:$0xff] %vm6164_vm7, %v6153_v12  ;;  %v6191_v7 = vld [vmem:[#allocation3 + $0x11] sm:$0xff]  ;;  %v6179_v41 = vpack.c.bf16 %v16683_v28, %v16689_v25  ;;  %v6718_v6 = vpack.c.bf16 %v16689_v25, %v16662_v14 }
 0x816   : > { %v6194_v15 = vpack.c.bf16 %v6190_v53, %v6189_v27  ;;  %v16666_v8 = vld [vmem:[#allocation3 + $0xe] sm:$0xff]  ;;  %v6383_v59 = vld [vmem:[#allocation3 + $0x2] sm:$0xff]  ;;  %v6605_v5 = vld [vmem:[#allocation3 + $0x17] sm:$0xff] }
 0x817   : > { %v7048_v43 = vpack.c.bf16 %v16656_v61, %v16666_v8  ;;  %13166 = vmatmul.mubr.msk.bf16.vlgmr.msra.gmra.mrb[20].mxu1 %vm6164_vm7, %v6178_v21  ;;  %v6384_v16 = vld [vmem:[#allocation3 + $0xa] sm:$0xff]  ;;  %v6385_v19 = vld [vmem:[#allocation3 + $0x12] sm:$0xff] }
 0x818   : > { %13146 = vmatmul.mubr.msk.bf16.vlgmr.msra.gmra.mrb[20].mxu0 %vm6164_vm7, %v6194_v15  ;;  %13169 = vmatprep.mubr.msk.bf16.mxu1 %vm14078_vm1, %v18049_v44  ;;  %v6493_v50 = vld [vmem:[#allocation3 + $0x6] sm:$0xff]  ;;  %v6388_v34 = vpack.c.bf16 %v6384_v16, %v6383_v59  ;;  %v6604_v24 = vld [vmem:[#allocation3 + $0xf] sm:$0xff]  ;;  %v13642_v14 = vld [vmem:[%s18082_s4 + $0xd8] sm:$0xff]  }
 0x819   : > { %13149 = vmatprep.mubr.msk.bf16.mxu0 %vm14078_vm1, %v18049_v44  ;;  %13178 = vmatpush3.bf16.msra.mxu0 %v13622_v58  ;;  %v6498_v35 = vpack.c.bf16 %v16666_v8, %v6493_v50  ;;  %v6603_v10 = vld [vmem:[#allocation3 + $0x7] sm:$0xff]  ;;  %v13645_v1 = vld [vmem:[%s18082_s4 + $0xf0] sm:$0xff]   ;;  %v13647_v12 = vld [vmem:[%s18082_s4 + $0xf8] sm:$0xff]  }
 0x81a   : > { %13179 = vmatprep.subr.bf16.mxu0 %v18049_v44  ;;  %v6192_v46 = vld [vmem:[#allocation3 + $0x19] sm:$0xff]  ;;  %13198 = vmatpush3.bf16.msra.mxu1 %v13627_v13  ;;  %v6193_v11 = vld [vmem:[#allocation3 + $0x21] sm:$0xf]  ;;  %v6608_v54 = vpack.c.bf16 %v6604_v24, %v6603_v10 }
 0x81b   : > { %13199 = vmatprep.subr.bf16.mxu1 %v18049_v44  ;;  %v6195_v37 = vpack.c.bf16 %v6192_v46, %v6191_v7  ;;  %v6177_v40 = vld [vmem:[#allocation3 + $0x20] sm:$0xf]  ;;  %v6196_v38 = vpack.c.bf16 %v6193_v11, %v6193_v11  ;;  %v6824_v13 = vld [vmem:[#allocation3 + $0x14] sm:$0xff]  ;;  %v6823_v46 = vld [vmem:[#allocation3 + $0xc] sm:$0xff] }
 0x81c   : > { %v6180_v48 = vpack.c.bf16 %v6177_v40, %v6177_v40  ;;  %v6386_v47 = vld [vmem:[#allocation3 + $0x1a] sm:$0xff]  ;;  %v6387_v2 = vld [vmem:[#allocation3 + $0x22] sm:$0xf]  ;;  %v6497_v29 = vld [vmem:[#allocation3 + $0x26] sm:$0xf]  ;;  %v6828_v25 = vpack.c.bf16 %v6824_v13, %v6823_v46 }
 0x81d   : > { %13180 = vmatpush3.bf16.msra.mxu0 %v13624_v57  ;;  %v16740_v39 = vld [vmem:[#allocation3 + $0x1e] sm:$0xff]  ;;  %v6389_v49 = vpack.c.bf16 %v6386_v47, %v6385_v19  ;;  %v6390_v32 = vpack.c.bf16 %v6387_v2, %v6387_v2  ;;  %v6500_v22 = vpack.c.bf16 %v6497_v29, %v6497_v29  ;;  %v6607_v27 = vld [vmem:[#allocation3 + $0x27] sm:$0xf]  ;;  %v6934_v57 = vld [vmem:[#allocation3 + $0x15] sm:$0xff] }
 0x81e   : > { %13181 = vmatprep.subr.bf16.mxu0 %v18049_v44  ;;  %13200 = vmatpush3.bf16.msra.mxu1 %v13628_v55  ;;  %v6499_v45 = vpack.c.bf16 %v16740_v39, %v16656_v61  ;;  %v6606_v30 = vld [vmem:[#allocation3 + $0x1f] sm:$0xff]  ;;  %v6717_v53 = vld [vmem:[#allocation3 + $0x28] sm:$0xf]  ;;  %v6610_v21 = vpack.c.bf16 %v6607_v27, %v6607_v27  ;;  %v6937_v59 = vld [vmem:[#allocation3 + $0x2d] sm:$0xf] }
 0x81f   : > { %13170 = vmatmul.mubr.msk.bf16.gmra.mrb[24].mxu1 %vm6164_vm7, %v6179_v41  ;;  %13201 = vmatprep.subr.bf16.mxu1 %v18049_v44  ;;  %v6716_v42 = vld [vmem:[#allocation3 + $0x20] sm:$0xff]  ;;  %v6609_v31 = vpack.c.bf16 %v6606_v30, %v6605_v5  ;;  %v6720_v15 = vpack.c.bf16 %v6717_v53, %v6717_v53  ;;  %v6940_v50 = vpack.c.bf16 %v6937_v59, %v6937_v59 }
 0x820   : > { %13150 = vmatmul.mubr.msk.bf16.gmra.mrb[24].mxu0 %vm6164_vm7, %v6195_v37  ;;  %13173 = vmatprep.mubr.msk.bf16.mxu1 %vm14078_vm1, %v18049_v44  ;;  %v6719_v58 = vpack.c.bf16 %v6716_v42, %v16683_v28  ;;  %v6933_v28 = vld [vmem:[#allocation3 + $0xd] sm:$0xff]  ;;  %v13646_v55 = vld [vmem:[%s18082_s4 + $0x100] sm:$0xff]  }
 0x821   : > { %13153 = vmatprep.mubr.msk.bf16.mxu0 %vm14078_vm1, %v18049_v44  ;;  %13182 = vmatpush3.bf16.msra.mxu0 %v13625_v33  ;;  %v6938_v7 = vpack.c.bf16 %v6934_v57, %v6933_v28  ;;  %v13648_v33 = vld [vmem:[%s18082_s4 + $0x108] sm:$0xff]   ;;  %v6935_v11 = vld [vmem:[#allocation3 + $0x1d] sm:$0xff] }
 0x822   : > { %13183 = vmatprep.subr.bf16.mxu0 %v18049_v44  ;;  %13202 = vmatpush3.bf16.msra.mxu1 %v13629_v18  ;;  %v6826_v37 = vld [vmem:[#allocation3 + $0x24] sm:$0xff]  ;;  %v6825_v18 = vld [vmem:[#allocation3 + $0x1c] sm:$0xff] }
 0x823   : > { %13203 = vmatprep.subr.bf16.mxu1 %v18049_v44  ;;  %v6936_v41 = vld [vmem:[#allocation3 + $0x25] sm:$0xff]  ;;  %v6829_v40 = vpack.c.bf16 %v6826_v37, %v6825_v18 }
 0x824   : > { %v13651_v61 = vld [vmem:[%s18084_s8] sm:$0xff]  }
 0x825   : > { %13184 = vmatpush3.bf16.msra.mxu0 %v13626_v0  ;;  %v13649_v0 = vld [vmem:[%s18082_s4 + $0x110] sm:$0xff]   ;;  %v13653_v8 = vld [vmem:[%s18085_s6 + $0xc0] ss:$12 sps:$4 sm:$0xff]  }
 0x826   : > { %13217 = vmatprep.subr.bf16.mxu0 %v18049_v44  ;;  %13204 = vmatpush3.bf16.msra.mxu1 %v13631_v51  ;;  %v6939_v51 = vpack.c.bf16 %v6936_v41, %v6935_v11  ;;  %v13671_v42 = vld [vmem:[%s18085_s6 + $0x124] ss:$12 sps:$4 sm:$0xff]  }
 0x827   : > { %13174 = vmatmul.mubr.msk.bf16.gmra.mrb[28].mxu1 %vm6164_vm7, %v6180_v48  ;;  %13237 = vmatprep.subr.bf16.mxu1 %v18049_v44  ;;  %v6827_v48 = vld [vmem:[#allocation3 + $0x2c] sm:$0xf] }
 0x828   : > { %13154 = vmatmul.mubr.msk.bf16.gmra.mrb[28].mxu0 %vm6164_vm7, %v6196_v38  ;;  %13205 = vmatprep.mubr.msk.bf16.mxu1 %vm14078_vm1, %v18049_v44  ;;  %v13650_v38 = vld [vmem:[%s18082_s4 + $0x118] sm:$0xff]   ;;  %v6830_v16 = vpack.c.bf16 %v6827_v48, %v6827_v48  ;;  %s854_s4 = scalar_lea.vmem %s18017_s26, %s18090_s30 }
 0x829   : > { %13185 = vmatprep.mubr.msk.bf16.mxu0 %vm14078_vm1, %v18049_v44 }
 0x82f   : > { %13206 = vmatmul.mubr.msk.bf16.vlgmr.msra.gmra.mrb[32].mxu1 %vm6164_vm7, %v6498_v35  ;;  %v7047_v35 = vld [vmem:[#allocation3 + $0x2e] sm:$0xf] }
 0x830   : > { %13186 = vmatmul.mubr.msk.bf16.vlgmr.msra.gmra.mrb[32].mxu0 %vm6164_vm7, %v6388_v34  ;;  %13209 = vmatprep.mubr.msk.bf16.mxu1 %vm14078_vm1, %v18049_v44 }
 0x831   : > { %13189 = vmatprep.mubr.msk.bf16.mxu0 %vm14078_vm1, %v18049_v44  ;;  %13218 = vmatpush3.bf16.msra.mxu0 %v13630_v52  ;;  %v7046_v52 = vld [vmem:[#allocation3 + $0x26] sm:$0xff] }
 0x832   : > { %13219 = vmatprep.subr.bf16.mxu0 %v18049_v44  ;;  %13238 = vmatpush3.bf16.msra.mxu1 %v13635_v17  ;;  %v7049_v34 = vpack.c.bf16 %v7046_v52, %v16740_v39  ;;  %v7050_v17 = vpack.c.bf16 %v7047_v35, %v7047_v35 }
 0x833   : > { %13239 = vmatprep.subr.bf16.mxu1 %v18049_v44 }
 0x835   : > { %13220 = vmatpush3.bf16.msra.mxu0 %v13632_v20  ;;  %v13659_v20 = vld [vmem:[%s18085_s6 + $0xdc] ss:$12 sps:$4 sm:$0xff]  }
 0x836   : > { %13221 = vmatprep.subr.bf16.mxu0 %v18049_v44  ;;  %13240 = vmatpush3.bf16.msra.mxu1 %v13636_v4  ;;  %v13657_v4 = vld [vmem:[%s18085_s6 + $0xd8] ss:$12 sps:$4 sm:$0xff]  }
 0x837   : > { %13210 = vmatmul.mubr.msk.bf16.gmra.mrb[36].mxu1 %vm6164_vm7, %v6499_v45  ;;  %13241 = vmatprep.subr.bf16.mxu1 %v18049_v44 }
 0x838   : > { %13190 = vmatmul.mubr.msk.bf16.gmra.mrb[36].mxu0 %vm6164_vm7, %v6389_v49  ;;  %13213 = vmatprep.mubr.msk.bf16.mxu1 %vm14078_vm1, %v18049_v44 }
 0x839   : > { %13193 = vmatprep.mubr.msk.bf16.mxu0 %vm14078_vm1, %v18049_v44  ;;  %13222 = vmatpush3.bf16.msra.mxu0 %v13633_v60 }
 0x83a   : > { %13223 = vmatprep.subr.bf16.mxu0 %v18049_v44  ;;  %13242 = vmatpush3.bf16.msra.mxu1 %v13637_v26 }
 0x83b   : > { %13243 = vmatprep.subr.bf16.mxu1 %v18049_v44 }
 0x83d   : > { %13224 = vmatpush3.bf16.msra.mxu0 %v13634_v62  ;;  %v13663_v62 = vld [vmem:[%s18085_s6 + $0xf4] ss:$12 sps:$4 sm:$0xff]  }
 0x83e   : > { %13257 = vmatprep.subr.bf16.mxu0 %v18049_v44  ;;  %13244 = vmatpush3.bf16.msra.mxu1 %v13639_v63 }
 0x83f   : > { %13214 = vmatmul.mubr.msk.bf16.gmra.mrb[40].mxu1 %vm6164_vm7, %v6500_v22  ;;  %13277 = vmatprep.subr.bf16.mxu1 %v18049_v44  ;;  %v13667_v22 = vld [vmem:[%s18085_s6 + $0x10c] ss:$12 sps:$4 sm:$0xff]  }
 0x840   : > { %13194 = vmatmul.mubr.msk.bf16.gmra.mrb[40].mxu0 %vm6164_vm7, %v6390_v32  ;;  %13245 = vmatprep.mubr.msk.bf16.mxu1 %vm14078_vm1, %v18049_v44  ;;  %v13661_v32 = vld [vmem:[%s18085_s6 + $0xf0] ss:$12 sps:$4 sm:$0xff]  }
 0x841   : > { %13225 = vmatprep.mubr.msk.bf16.mxu0 %vm14078_vm1, %v18049_v44 }
 0x847   : > { %13246 = vmatmul.mubr.msk.bf16.vlgmr.msra.gmra.mrb[44].mxu1 %vm6164_vm7, %v6718_v6 }
 0x848   : > { %13226 = vmatmul.mubr.msk.bf16.vlgmr.msra.gmra.mrb[44].mxu0 %vm6164_vm7, %v6608_v54  ;;  %13249 = vmatprep.mubr.msk.bf16.mxu1 %vm14078_vm1, %v18049_v44 }
 0x849   : > { %13229 = vmatprep.mubr.msk.bf16.mxu0 %vm14078_vm1, %v18049_v44  ;;  %13258 = vmatpush3.bf16.msra.mxu0 %v13638_v3  ;;  %v13665_v3 = vld [vmem:[%s18085_s6 + $0x108] ss:$12 sps:$4 sm:$0xff]  }
 0x84a   : > { %13259 = vmatprep.subr.bf16.mxu0 %v18049_v44  ;;  %13278 = vmatpush3.bf16.msra.mxu1 %v13643_v36 }
 0x84b   : > { %13279 = vmatprep.subr.bf16.mxu1 %v18049_v44 }
 0x84d   : > { %13260 = vmatpush3.bf16.msra.mxu0 %v13640_v56 }
 0x84e   : > { %13261 = vmatprep.subr.bf16.mxu0 %v18049_v44  ;;  %13280 = vmatpush3.bf16.msra.mxu1 %v13644_v23 }
 0x84f   : > { %13250 = vmatmul.mubr.msk.bf16.gmra.mrb[48].mxu1 %vm6164_vm7, %v6719_v58  ;;  %13281 = vmatprep.subr.bf16.mxu1 %v18049_v44 }
 0x850   : > { %13230 = vmatmul.mubr.msk.bf16.gmra.mrb[48].mxu0 %vm6164_vm7, %v6609_v31  ;;  %13253 = vmatprep.mubr.msk.bf16.mxu1 %vm14078_vm1, %v18049_v44  ;;  %v13669_v31 = vld [vmem:[%s18085_s6 + $0x120] ss:$12 sps:$4 sm:$0xff]  }
 0x851   : > { %13233 = vmatprep.mubr.msk.bf16.mxu0 %vm14078_vm1, %v18049_v44  ;;  %13262 = vmatpush3.bf16.msra.mxu0 %v13641_v9 }
 0x852   : > { %13263 = vmatprep.subr.bf16.mxu0 %v18049_v44  ;;  %13282 = vmatpush3.bf16.msra.mxu1 %v13645_v1 }
 0x853   : > { %13283 = vmatprep.subr.bf16.mxu1 %v18049_v44 }
 0x855   : > { %13264 = vmatpush3.bf16.msra.mxu0 %v13642_v14 }
 0x856   : > { %13297 = vmatprep.subr.bf16.mxu0 %v18049_v44  ;;  %13284 = vmatpush3.bf16.msra.mxu1 %v13647_v12 }
 0x857   : > { %13254 = vmatmul.mubr.msk.bf16.gmra.mrb[52].mxu1 %vm6164_vm7, %v6720_v15 }
 0x858   : > { %13234 = vmatmul.mubr.msk.bf16.gmra.mrb[52].mxu0 %vm6164_vm7, %v6610_v21  ;;  %13285 = vmatprep.mubr.msk.bf16.mxu1 %vm14078_vm1, %v18049_v44 }
 0x859   : > { %13265 = vmatprep.mubr.msk.bf16.mxu0 %vm14078_vm1, %v18049_v44 }
 0x85f   : > { %13286 = vmatmul.mubr.msk.bf16.vlgmr.msra.gmra.mrb[56].mxu1 %vm6164_vm7, %v6938_v7 }
 0x860   : > { %13266 = vmatmul.mubr.msk.bf16.vlgmr.msra.gmra.mrb[56].mxu0 %vm6164_vm7, %v6828_v25  ;;  %13289 = vmatprep.mubr.msk.bf16.mxu1 %vm14078_vm1, %v18049_v44 }
 0x861   : > { %13269 = vmatprep.mubr.msk.bf16.mxu0 %vm14078_vm1, %v18049_v44  ;;  %13298 = vmatpush3.bf16.msra.mxu0 %v13646_v55 }
 0x862   : > { %13299 = vmatprep.subr.bf16.mxu0 %v18049_v44 }
 0x865   : > { %13300 = vmatpush3.bf16.msra.mxu0 %v13648_v33 }
 0x866   : > { %13301 = vmatprep.subr.bf16.mxu0 %v18049_v44 }
 0x867   : > { %13290 = vmatmul.mubr.msk.bf16.gmra.mrb[60].mxu1 %vm6164_vm7, %v6939_v51 }
 0x868   : > { %13270 = vmatmul.mubr.msk.bf16.gmra.mrb[60].mxu0 %vm6164_vm7, %v6829_v40  ;;  %13293 = vmatprep.mubr.msk.bf16.mxu1 %vm14078_vm1, %v18049_v44 }
 0x869   : > { %13273 = vmatprep.mubr.msk.bf16.mxu0 %vm14078_vm1, %v18049_v44  ;;  %13302 = vmatpush3.bf16.msra.mxu0 %v13649_v0 }
 0x86a   : > { %13303 = vmatprep.subr.bf16.mxu0 %v18049_v44 }
 0x86d   : > { %13304 = vmatpush3.bf16.msra.mxu0 %v13650_v38 }
 0x86f   : > { %13294 = vmatmul.mubr.msk.bf16.gmra.mrb[64].mxu1 %vm6164_vm7, %v6940_v50 }
 0x870   : > { %13274 = vmatmul.mubr.msk.bf16.gmra.mrb[64].mxu0 %vm6164_vm7, %v6830_v16  ;;  %13323 = vmatprep.mubr.msk.bf16.mxu1 %vm7187_vm9, %v13651_v61 }
 0x871   : > { %13305 = vmatprep.mubr.msk.bf16.mxu0 %vm14078_vm1, %v18049_v44 }
 0x878   : > { %13306 = vmatmul.mubr.msk.bf16.vlgmr.msra.gmra.mrb[68].mxu0 %vm6164_vm7, %v7048_v43  ;;  %v13655_v43 = vld [vmem:[%s18085_s6 + $0xc4] ss:$12 sps:$4 sm:$0xff]  }
 0x879   : > { %13309 = vmatprep.mubr.msk.bf16.mxu0 %vm14078_vm1, %v18049_v44  ;;  %7448 = vmatprep.subr.bf16.mxu0 %v13655_v43 }
 0x87a   : > { %7449 = vmatpush1.bf16.msra.mxu0 %v13653_v8 }
 0x87b   : > { %7450 = vmatprep.subr.bf16.mxu0 %v13659_v20 }
 0x87e   : > { %7451 = vmatpush1.bf16.msra.mxu0 %v13657_v4 }
 0x87f   : > { %7452 = vmatprep.subr.bf16.mxu0 %v13663_v62 }
 0x880   : > { %13310 = vmatmul.mubr.msk.bf16.gmra.mrb[72].mxu0 %vm6164_vm7, %v7049_v34 }
 0x881   : > { %13313 = vmatprep.mubr.msk.bf16.mxu0 %vm14078_vm1, %v18049_v44 }
 0x882   : > { %7453 = vmatpush1.bf16.msra.mxu0 %v13661_v32 }
 0x883   : > { %7454 = vmatprep.subr.bf16.mxu0 %v13667_v22 }
 0x886   : > { %7455 = vmatpush1.bf16.msra.mxu0 %v13665_v3 }
 0x887   : > { %7456 = vmatprep.subr.bf16.mxu0 %v13671_v42 }
 0x888   : > { %13314 = vmatmul.mubr.msk.bf16.gmra.mrb[76].mxu0 %vm6164_vm7, %v7050_v17 }
 0x88a   : > { %7457 = vmatpush1.bf16.msra.mxu0 %v13669_v31 }
 0x8ea   : > { %v6361_v39 = vpop.f32.mrb[20].mxu1 }
 0x8eb   : > { %v6272_v47 = vpop.f32.mrb[20].mxu0  ;;  %v13167_v49 = vpop.f32.mrb[21].mxu1 }
 0x8ec   : > { %v13147_v19 = vpop.f32.mrb[21].mxu0  ;;  %v6362_v60 = vadd.f32 %v6361_v39, %v6272_v47  ;;  %v6364_v26 = vpop.f32.mrb[22].mxu1 }
 0x8ed   : > { %v6275_v45 = vpop.f32.mrb[22].mxu0  ;;  %v13168_v63 = vpop.f32.mrb[23].mxu1 }
 0x8ee   : > { %v13148_v2 = vpop.f32.mrb[23].mxu0  ;;  %v6365_v29 = vadd.f32 %v6364_v26, %v6275_v45 }
 0x8f2   : > { %v6369_v24 = vpop.f32.mrb[24].mxu1 }
 0x8f3   : > { %v6280_v10 = vpop.f32.mrb[24].mxu0  ;;  %v13171_v36 = vpop.f32.mrb[25].mxu1 }
 0x8f4   : > { %v13151_v54 = vpop.f32.mrb[25].mxu0  ;;  %v6370_v6 = vadd.f32 %v6369_v24, %v6280_v10  ;;  %v6372_v30 = vpop.f32.mrb[26].mxu1 }
 0x8f5   : > { %v6283_v56 = vpop.f32.mrb[26].mxu0  ;;  %v13172_v9 = vpop.f32.mrb[27].mxu1 }
 0x8f6   : > { %v13152_v23 = vpop.f32.mrb[27].mxu0  ;;  %v6373_v5 = vadd.f32 %v6372_v30, %v6283_v56 }
 0x8fa   : > { %v6377_v1 = vpop.f32.mrb[28].mxu1 }
 0x8fb   : > { %v6288_v58 = vpop.f32.mrb[28].mxu0  ;;  %v13175_v53 = vpop.f32.mrb[29].mxu1 }
 0x8fc   : > { %v13155_v14 = vpop.f32.mrb[29].mxu0  ;;  %v6378_v27 = vadd.f32 %v6377_v1, %v6288_v58  ;;  %v6380_v21 = vpop.f32.mrb[30].mxu1 }
 0x8fd   : > { %v6291_v12 = vpop.f32.mrb[30].mxu0  ;;  %v13176_v13 = vpop.f32.mrb[31].mxu1 }
 0x8fe   : > { %v13156_v15 = vpop.f32.mrb[31].mxu0 }
 0x902   : > { %v6576_v46 = vpop.f32.mrb[32].mxu1 }
 0x903   : > { %v6466_v57 = vpop.f32.mrb[32].mxu0  ;;  %v13207_v25 = vpop.f32.mrb[33].mxu1 }
 0x904   : > { %v6488_v28 = vadd.f32 %v6466_v57, %v6362_v60  ;;  %v13187_v55 = vpop.f32.mrb[33].mxu0  ;;  %v6579_v33 = vpop.f32.mrb[34].mxu1 }
 0x905   : > { %v6469_v7 = vpop.f32.mrb[34].mxu0  ;;  %v13208_v0 = vpop.f32.mrb[35].mxu1 }
 0x906   : > { %v6489_v37 = vadd.f32 %v6469_v7, %v6365_v29  ;;  %v13188_v41 = vpop.f32.mrb[35].mxu0  ;;  %v6598_v18 = vadd.f32 %v6576_v46, %v6488_v28 }
 0x908   : > { %v6599_v11 = vadd.f32 %v6579_v33, %v6489_v37 }
 0x90a   : > { %v6584_v51 = vpop.f32.mrb[36].mxu1 }
 0x90b   : > { %v6474_v40 = vpop.f32.mrb[36].mxu0  ;;  %v13211_v59 = vpop.f32.mrb[37].mxu1 }
 0x90c   : > { %v6490_v38 = vadd.f32 %v6474_v40, %v6370_v6  ;;  %v13191_v48 = vpop.f32.mrb[37].mxu0  ;;  %v6587_v50 = vpop.f32.mrb[38].mxu1 }
 0x90d   : > { %v6477_v16 = vpop.f32.mrb[38].mxu0  ;;  %v13212_v17 = vpop.f32.mrb[39].mxu1 }
 0x90e   : > { %v6491_v52 = vadd.f32 %v6477_v16, %v6373_v5  ;;  %v13192_v34 = vpop.f32.mrb[39].mxu0  ;;  %v6600_v35 = vadd.f32 %v6584_v51, %v6490_v38 }
 0x910   : > { %v6601_v61 = vadd.f32 %v6587_v50, %v6491_v52 }
 0x912   : > { %v6592_v43 = vpop.f32.mrb[40].mxu1 }
 0x913   : > { %v6482_v8 = vpop.f32.mrb[40].mxu0  ;;  %v13215_v39 = vpop.f32.mrb[41].mxu1 }
 0x914   : > { %v6492_v20 = vadd.f32 %v6482_v8, %v6378_v27  ;;  %v13195_v47 = vpop.f32.mrb[41].mxu0  ;;  %v6595_v19 = vpop.f32.mrb[42].mxu1 }
 0x915   : > { %v6485_v4 = vpop.f32.mrb[42].mxu0  ;;  %v13216_v45 = vpop.f32.mrb[43].mxu1 }
 0x916   : > { %v13196_v60 = vpop.f32.mrb[43].mxu0  ;;  %v6602_v49 = vadd.f32 %v6592_v43, %v6492_v20 }
 0x91a   : > { %v6796_v62 = vpop.f32.mrb[44].mxu1 }
 0x91b   : > { %v6686_v26 = vpop.f32.mrb[44].mxu0  ;;  %v13247_v63 = vpop.f32.mrb[45].mxu1 }
 0x91c   : > { %v6708_v2 = vadd.f32 %v6686_v26, %v6598_v18  ;;  %v13227_v29 = vpop.f32.mrb[45].mxu0  ;;  %v6799_v22 = vpop.f32.mrb[46].mxu1 }
 0x91d   : > { %v6689_v32 = vpop.f32.mrb[46].mxu0  ;;  %v13248_v54 = vpop.f32.mrb[47].mxu1 }
 0x91e   : > { %v6709_v10 = vadd.f32 %v6689_v32, %v6599_v11  ;;  %v13228_v24 = vpop.f32.mrb[47].mxu0  ;;  %v6818_v3 = vadd.f32 %v6796_v62, %v6708_v2 }
 0x920   : > { %v6819_v6 = vadd.f32 %v6799_v22, %v6709_v10  ;;  %v11120_v22 = vld [vmem:[%s18086_s12] ss:$0 sm:$0xff] }
 0x922   : > { %v6804_v56 = vpop.f32.mrb[48].mxu1 }
 0x923   : > { %v6694_v36 = vpop.f32.mrb[48].mxu0  ;;  %v13251_v23 = vpop.f32.mrb[49].mxu1 }
 0x924   : > { %v6710_v30 = vadd.f32 %v6694_v36, %v6600_v35  ;;  %v13231_v42 = vpop.f32.mrb[49].mxu0  ;;  %v6807_v9 = vpop.f32.mrb[50].mxu1 }
 0x925   : > { %v6697_v5 = vpop.f32.mrb[50].mxu0  ;;  %v13252_v14 = vpop.f32.mrb[51].mxu1 }
 0x926   : > { %v6711_v31 = vadd.f32 %v6697_v5, %v6601_v61  ;;  %v13232_v58 = vpop.f32.mrb[51].mxu0  ;;  %v6820_v1 = vadd.f32 %v6804_v56, %v6710_v30 }
 0x928   : > { %v6821_v27 = vadd.f32 %v6807_v9, %v6711_v31 }
 0x92a   : > { %v6812_v12 = vpop.f32.mrb[52].mxu1 }
 0x92b   : > { %v6702_v53 = vpop.f32.mrb[52].mxu0  ;;  %v13255_v13 = vpop.f32.mrb[53].mxu1 }
 0x92c   : > { %v6712_v21 = vadd.f32 %v6702_v53, %v6602_v49  ;;  %v13235_v15 = vpop.f32.mrb[53].mxu0  ;;  %v6815_v46 = vpop.f32.mrb[54].mxu1 }
 0x92d   : > { %v6705_v57 = vpop.f32.mrb[54].mxu0  ;;  %v13256_v25 = vpop.f32.mrb[55].mxu1 }
 0x92e   : > { %v13236_v28 = vpop.f32.mrb[55].mxu0  ;;  %v6822_v55 = vadd.f32 %v6812_v12, %v6712_v21 }
 0x932   : > { %v7016_v33 = vpop.f32.mrb[56].mxu1 }
 0x933   : > { %v6906_v7 = vpop.f32.mrb[56].mxu0  ;;  %v13287_v18 = vpop.f32.mrb[57].mxu1 }
 0x934   : > { %v6928_v37 = vadd.f32 %v6906_v7, %v6818_v3  ;;  %v13267_v41 = vpop.f32.mrb[57].mxu0  ;;  %v7019_v11 = vpop.f32.mrb[58].mxu1  ;;  %v13656_v18 = vld [vmem:[%s18085_s6 + $0xc8] ss:$12 sps:$4 sm:$0xff]  }
 0x935   : > { %v6909_v0 = vpop.f32.mrb[58].mxu0  ;;  %v13288_v48 = vpop.f32.mrb[59].mxu1  ;;  %v13652_v41 = vld [vmem:[%s18084_s8 + $0x8] sm:$0x1f]  }
 0x936   : > { %v6929_v40 = vadd.f32 %v6909_v0, %v6819_v6  ;;  %v13268_v51 = vpop.f32.mrb[59].mxu0  ;;  %v7038_v38 = vadd.f32 %v7016_v33, %v6928_v37  ;;  %v13660_v0 = vld [vmem:[%s18085_s6 + $0xe0] ss:$12 sps:$4 sm:$0xff]   ;;  %v13675_v48 = vld [vmem:[%s18085_s6 + $0x13c] ss:$12 sps:$4 sm:$0xff]  }
 0x937   : > { %v13672_v51 = vld [vmem:[%s18085_s6 + $0x128] ss:$12 sps:$4 sm:$0xff]   ;;  %7458 = vmatprep.subr.bf16.mxu0 %v13675_v48 }
 0x938   : > { %v7039_v59 = vadd.f32 %v7019_v11, %v6929_v40  ;;  %v13664_v11 = vld [vmem:[%s18085_s6 + $0xf8] ss:$12 sps:$4 sm:$0xff]   ;;  %v13668_v40 = vld [vmem:[%s18085_s6 + $0x110] ss:$12 sps:$4 sm:$0xff]   ;;  %v13745_v48 = vld [vmem:[%s18085_s6 + $0x228] ss:$12 sps:$4 sm:$0xff]  }
 0x93a   : > { %v7024_v50 = vpop.f32.mrb[60].mxu1 }
 0x93b   : > { %v6914_v16 = vpop.f32.mrb[60].mxu0  ;;  %v13291_v35 = vpop.f32.mrb[61].mxu1 }
 0x93c   : > { %v6930_v52 = vadd.f32 %v6914_v16, %v6820_v1  ;;  %v13271_v34 = vpop.f32.mrb[61].mxu0  ;;  %v7027_v61 = vpop.f32.mrb[62].mxu1  ;;  %v13677_v16 = vld [vmem:[%s18085_s6 + $0x150] ss:$12 sps:$4 sm:$0xff]  }
 0x93d   : > { %v6917_v17 = vpop.f32.mrb[62].mxu0  ;;  %v13292_v47 = vpop.f32.mrb[63].mxu1  ;;  %v13683_v34 = vld [vmem:[%s18085_s6 + $0x16c] ss:$12 sps:$4 sm:$0xff]   ;;  %v13684_v35 = vld [vmem:[%s18085_s6 + $0x170] ss:$12 sps:$4 sm:$0xff]  }
 0x93e   : > { %v6931_v8 = vadd.f32 %v6917_v17, %v6821_v27  ;;  %v13272_v43 = vpop.f32.mrb[63].mxu0  ;;  %v7040_v20 = vadd.f32 %v7024_v50, %v6930_v52  ;;  %v13679_v50 = vld [vmem:[%s18085_s6 + $0x154] ss:$12 sps:$4 sm:$0xff]   ;;  %v13680_v52 = vld [vmem:[%s18085_s6 + $0x158] ss:$12 sps:$4 sm:$0xff]  }
 0x93f   : > { %v13681_v17 = vld [vmem:[%s18085_s6 + $0x168] ss:$12 sps:$4 sm:$0xff]  }
 0x940   : > { %v7041_v39 = vadd.f32 %v7027_v61, %v6931_v8  ;;  %v14079_v61 = vmov 0   ;;  %v13687_v8 = vld [vmem:[%s18085_s6 + $0x4] ss:$12 sps:$4 sm:$0xff]  }
 0x941   : > { %7480 = vmatprep.mubr.bf16.mxu0 %v14079_v61  ;;  %13560 = vset.pattern.permute.xlu0 %v14079_v61 }
 0x942   : > { %v7032_v19 = vpop.f32.mrb[64].mxu1 }
 0x943   : > { %v6922_v4 = vpop.f32.mrb[64].mxu0  ;;  %v13295_v45 = vpop.f32.mrb[65].mxu1 }
 0x944   : > { %v6932_v60 = vadd.f32 %v6922_v4, %v6822_v55  ;;  %v13275_v49 = vpop.f32.mrb[65].mxu0  ;;  %v7035_v62 = vpop.f32.mrb[66].mxu1  ;;  %v13688_v45 = vld [vmem:[%s18085_s6 + $0x8] ss:$12 sps:$4 sm:$0xff]  }
 0x945   : > { %v6925_v26 = vpop.f32.mrb[66].mxu0  ;;  %v13296_v63 = vpop.f32.mrb[67].mxu1  ;;  %v13691_v62 = vld [vmem:[%s18085_s6 + $0x1c] ss:$12 sps:$4 sm:$0xff]  }
 0x946   : > { %v13276_v2 = vpop.f32.mrb[67].mxu0  ;;  %v7042_v29 = vadd.f32 %v7032_v19, %v6932_v60  ;;  %v13685_v19 = vld [vmem:[%s18085_s6] ss:$12 sps:$4 sm:$0xff]  }
 0x947   : > { %v13689_v2 = vld [vmem:[%s18085_s6 + $0x18] ss:$12 sps:$4 sm:$0xff]   ;;  %v13695_v63 = vld [vmem:[%s18085_s6 + $0x34] ss:$12 sps:$4 sm:$0xff]  }
 0x94b   : > { %v7126_v32 = vpop.f32.mrb[68].mxu0 }
 0x94c   : > { %v7148_v10 = vadd.f32 %v7126_v32, %v7038_v38  ;;  %v13307_v24 = vpop.f32.mrb[69].mxu0  ;;  %v13673_v38 = vld [vmem:[%s18085_s6 + $0x138] ss:$12 sps:$4 sm:$0xff]   ;;  %v13693_v32 = vld [vmem:[%s18085_s6 + $0x30] ss:$12 sps:$4 sm:$0xff]  }
 0x94d   : > { %v7129_v3 = vpop.f32.mrb[70].mxu0  ;;  %7459 = vmatpush1.bf16.msra.mxu0 %v13673_v38  ;;  %v13697_v24 = vld [vmem:[%s18085_s6 + $0x48] ss:$12 sps:$4 sm:$0xff]   ;;  %v13747_v38 = vld [vmem:[%s18085_s6 + $0x22c] ss:$12 sps:$4 sm:$0xff]  }
 0x94e   : > { %v7160_v54 = vadd.f32 %v11120_v22, %v7148_v10  ;;  %v7149_v6 = vadd.f32 %v7129_v3, %v7039_v59  ;;  %v13308_v36 = vpop.f32.mrb[71].mxu0  ;;  %v13676_v59 = vld [vmem:[%s18085_s6 + $0x140] ss:$12 sps:$4 sm:$0xff]   ;;  %7460 = vmatprep.subr.bf16.mxu0 %v13679_v50  ;;  %v13700_v3 = vld [vmem:[%s18085_s6 + $0x50] ss:$12 sps:$4 sm:$0xff]  }
 0x94f   : > { %v13699_v10 = vld [vmem:[%s18085_s6 + $0x4c] ss:$12 sps:$4 sm:$0xff]   ;;  %v13704_v36 = vld [vmem:[%s18085_s6 + $0x68] ss:$12 sps:$4 sm:$0xff]  }
 0x950   : > { %v7161_v56 = vadd.f32 %v11120_v22, %v7149_v6  ;;  %v7165_v30 = vmax.f32 %v7160_v54, 0.0  ;;  %v13703_v54 = vld [vmem:[%s18085_s6 + $0x64] ss:$12 sps:$4 sm:$0xff]   ;;  %v13701_v6 = vld [vmem:[%s18085_s6 + $0x60] ss:$12 sps:$4 sm:$0xff]  }
 0x951   : > { %7461 = vmatpush1.bf16.msra.mxu0 %v13677_v16  ;;  %v13751_v16 = vld [vmem:[%s18085_s6 + $0x244] ss:$12 sps:$4 sm:$0xff]  }
 0x952   : > { %v7166_v42 = vmax.f32 %v7161_v56, 0.0  ;;  %7462 = vmatprep.subr.bf16.mxu0 %v13683_v34  ;;  %v13707_v56 = vld [vmem:[%s18085_s6 + $0x7c] ss:$12 sps:$4 sm:$0xff]   ;;  %v13749_v34 = vld [vmem:[%s18085_s6 + $0x240] ss:$12 sps:$4 sm:$0xff]  }
 0x953   : > { %v7134_v23 = vpop.f32.mrb[72].mxu0 }
 0x954   : > { %v7150_v5 = vadd.f32 %v7134_v23, %v7040_v20  ;;  %v13311_v9 = vpop.f32.mrb[73].mxu0  ;;  %v7174_v31 = vpack.c.bf16 %v7166_v42, %v7165_v30  ;;  %v13705_v30 = vld [vmem:[%s18085_s6 + $0x78] ss:$12 sps:$4 sm:$0xff]   ;;  %v13708_v42 = vld [vmem:[%s18085_s6 + $0x80] ss:$12 sps:$4 sm:$0xff]  }
 0x955   : > { %v7137_v58 = vpop.f32.mrb[74].mxu0  ;;  %7463 = vmatpush1.bf16.msra.mxu0 %v13681_v17  ;;  %v13711_v23 = vld [vmem:[%s18085_s6 + $0x94] ss:$12 sps:$4 sm:$0xff]   ;;  %v13712_v9 = vld [vmem:[%s18085_s6 + $0x98] ss:$12 sps:$4 sm:$0xff]  }
 0x956   : > { %v7162_v1 = vadd.f32 %v11120_v22, %v7150_v5  ;;  %v7151_v14 = vadd.f32 %v7137_v58, %v7041_v39  ;;  %v13312_v27 = vpop.f32.mrb[75].mxu0  ;;  %13317 = vmatprep.subr.bf16.mxu1 %v7174_v31  ;;  %7660 = vmatprep.subr.bf16.mxu0 %v13687_v8  ;;  %v13709_v5 = vld [vmem:[%s18085_s6 + $0x90] ss:$12 sps:$4 sm:$0xff]   ;;  %v13713_v58 = vld [vmem:[%s18085_s6 + $0xa8] ss:$12 sps:$4 sm:$0xff]  }
 0x957   : > { %13318 = vmatpush3.bf16.msra.mxu1 %v7174_v31  ;;  %v13715_v31 = vld [vmem:[%s18085_s6 + $0xac] ss:$12 sps:$4 sm:$0xff]   ;;  %v13755_v8 = vld [vmem:[%s18085_s6 + $0x25c] ss:$12 sps:$4 sm:$0xff]  }
 0x958   : > { %v7163_v53 = vadd.f32 %v11120_v22, %v7151_v14  ;;  %v7167_v12 = vmax.f32 %v7162_v1, 0.0  ;;  %v13716_v1 = vld [vmem:[%s18085_s6 + $0xb0] ss:$12 sps:$4 sm:$0xff]   ;;  %v13717_v27 = vld [vmem:[%s18085_s6 + $0x180] ss:$12 sps:$4 sm:$0xff]  }
 0x959   : > { %v13719_v14 = vld [vmem:[%s18085_s6 + $0x184] ss:$12 sps:$4 sm:$0xff]  }
 0x95a   : > { %v7168_v21 = vmax.f32 %v7163_v53, 0.0  ;;  %v13720_v53 = vld [vmem:[%s18085_s6 + $0x188] ss:$12 sps:$4 sm:$0xff]  }
 0x95b   : > { %v7142_v15 = vpop.f32.mrb[76].mxu0 }
 0x95c   : > { %v7152_v13 = vadd.f32 %v7142_v15, %v7042_v29  ;;  %v13315_v57 = vpop.f32.mrb[77].mxu0  ;;  %v7175_v46 = vpack.c.bf16 %v7168_v21, %v7167_v12  ;;  %v13692_v29 = vld [vmem:[%s18085_s6 + $0x20] ss:$12 sps:$4 sm:$0xff]   ;;  %v13723_v12 = vld [vmem:[%s18085_s6 + $0x19c] ss:$12 sps:$4 sm:$0xff]  }
 0x95d   : > { %v7145_v28 = vpop.f32.mrb[78].mxu0  ;;  %v13721_v21 = vld [vmem:[%s18085_s6 + $0x198] ss:$12 sps:$4 sm:$0xff]   ;;  %v13724_v15 = vld [vmem:[%s18085_s6 + $0x1a0] ss:$12 sps:$4 sm:$0xff]  }
 0x95e   : > { %v7164_v55 = vadd.f32 %v11120_v22, %v7152_v13  ;;  %v13316_v25 = vpop.f32.mrb[79].mxu0  ;;  %13319 = vmatprep.subr.bf16.mxu1 %v7175_v46  ;;  %v13696_v22 = vld [vmem:[%s18085_s6 + $0x38] ss:$12 sps:$4 sm:$0xff]   ;;  %v13727_v13 = vld [vmem:[%s18085_s6 + $0x1b4] ss:$12 sps:$4 sm:$0xff]  }
 0x95f   : > { %13320 = vmatpush3.bf16.msra.mxu1 %v7175_v46  ;;  %v13725_v57 = vld [vmem:[%s18085_s6 + $0x1b0] ss:$12 sps:$4 sm:$0xff]   ;;  %v13728_v46 = vld [vmem:[%s18085_s6 + $0x1b8] ss:$12 sps:$4 sm:$0xff]  }
 0x960   : > { %v7169_v7 = vmax.f32 %v7164_v55, 0.0  ;;  %v13731_v28 = vld [vmem:[%s18085_s6 + $0x1cc] ss:$12 sps:$4 sm:$0xff]   ;;  %v13729_v55 = vld [vmem:[%s18085_s6 + $0x1c8] ss:$12 sps:$4 sm:$0xff]  }
 0x961   : > { %v13732_v25 = vld [vmem:[%s18085_s6 + $0x1d0] ss:$12 sps:$4 sm:$0xff]  }
 0x962   : > { %v7176_v33 = vpack.c.bf16 %v7169_v7, %v7169_v7  ;;  %v13735_v7 = vld [vmem:[%s18085_s6 + $0x1e4] ss:$12 sps:$4 sm:$0xff]  }
 0x964   : > { %13547 = vmatprep.subr.msk.bf16.mxu1 %vm1054_vm0, %v7176_v33  ;;  %v7195_v37 = vsel %vm1054_vm0, %v7176_v33, 0  ;;  %v13733_v33 = vld [vmem:[%s18085_s6 + $0x1e0] ss:$12 sps:$4 sm:$0xff]  }
 0x965   : > { %13322 = vmatpush3.bf16.msra.mxu1 %v7195_v37  ;;  %v13736_v37 = vld [vmem:[%s18085_s6 + $0x1e8] ss:$12 sps:$4 sm:$0xff]  }
 0x966   : > { %13327 = vmatprep.subr.bf16.mxu1 %v18049_v44 }
 0x968   : > { %13324 = vmatmul.mubr.msk.bf16.vlgmr.msra.gmra.mrb[68].mxu1 %vm7187_vm9, %v13652_v41  ;;  %v13739_v41 = vld [vmem:[%s18085_s6 + $0x1fc] ss:$12 sps:$4 sm:$0xff]  }
 0x969   : > { %13328 = vmatpush3.bf16.msra.mxu1 %v13656_v18  ;;  %13343 = vmatprep.mubr.msk.bf16.mxu1 %vm14078_vm1, %v18049_v44  ;;  %v13737_v18 = vld [vmem:[%s18085_s6 + $0x1f8] ss:$12 sps:$4 sm:$0xff]  }
 0x96a   : > { %13329 = vmatprep.subr.bf16.mxu1 %v18049_v44 }
 0x96d   : > { %13330 = vmatpush3.bf16.msra.mxu1 %v13660_v0  ;;  %v13740_v0 = vld [vmem:[%s18085_s6 + $0x200] ss:$12 sps:$4 sm:$0xff]  }
 0x96e   : > { %13331 = vmatprep.subr.bf16.mxu1 %v18049_v44 }
 0x971   : > { %13332 = vmatpush3.bf16.msra.mxu1 %v13664_v11  ;;  %v13743_v11 = vld [vmem:[%s18085_s6 + $0x214] ss:$12 sps:$4 sm:$0xff]  }
 0x972   : > { %13333 = vmatprep.subr.bf16.mxu1 %v18049_v44 }
 0x975   : > { %13334 = vmatpush3.bf16.msra.mxu1 %v13668_v40  ;;  %v13741_v40 = vld [vmem:[%s18085_s6 + $0x210] ss:$12 sps:$4 sm:$0xff]  }
 0x976   : > { %13335 = vmatprep.subr.bf16.mxu1 %v18049_v44 }
 0x979   : > { %13336 = vmatpush3.bf16.msra.mxu1 %v13672_v51  ;;  %v13744_v51 = vld [vmem:[%s18085_s6 + $0x218] ss:$12 sps:$4 sm:$0xff]  }
 0x97a   : > { %13337 = vmatprep.subr.bf16.mxu1 %v18049_v44 }
 0x97d   : > { %13338 = vmatpush3.bf16.msra.mxu1 %v13676_v59  ;;  %v13748_v59 = vld [vmem:[%s18085_s6 + $0x230] ss:$12 sps:$4 sm:$0xff]  }
 0x97e   : > { %13339 = vmatprep.subr.bf16.mxu1 %v18049_v44 }
 0x981   : > { %13340 = vmatpush3.bf16.msra.mxu1 %v13680_v52 }
 0x982   : > { %13341 = vmatprep.subr.bf16.mxu1 %v18049_v44 }
 0x985   : > { %13342 = vmatpush3.bf16.msra.mxu1 %v13684_v35  ;;  %v13752_v35 = vld [vmem:[%s18085_s6 + $0x248] ss:$12 sps:$4 sm:$0xff]  }
 0x986   : > { %13347 = vmatprep.subr.bf16.mxu1 %v18049_v44 }
 0xa3b   : > { %v13325_v43 = vpop.f32.mrb[68].mxu1 }
 0xa3c   : > { %7248 = vst [vmem:[#allocation4 + $0x10] sm:$0xff] %v13325_v43  ;;  %v7231_v20 = vpop.f32.mrb[69].mxu1  ;;  %v13753_v43 = vld [vmem:[%s18085_s6 + $0x258] ss:$12 sps:$4 sm:$0xff]  }
 0xa3d   : > { %7246 = vst [vmem:[#allocation4] sm:$0xff] %v7231_v20  ;;  %v13326_v47 = vpop.f32.mrb[70].mxu1 }
 0xa3e   : > { %7249 = vst [vmem:[#allocation4 + $0x18] sm:$0x3] %v13326_v47  ;;  %v7234_v39 = vpop.f32.mrb[71].mxu1  ;;  %v13759_v47 = vld [vmem:[%s18085_s6 + $0x274] ss:$12 sps:$4 sm:$0xff]  }
 0xa3f   : > { %7247 = vst [vmem:[#allocation4 + $0x8] sm:$0xff] %v7234_v39  ;;  %v16973_v4 = vpack.c.bf16 %v7234_v39, %v7231_v20  ;;  %v13756_v20 = vld [vmem:[%s18085_s6 + $0x260] ss:$12 sps:$4 sm:$0xff]   ;;  %v13757_v39 = vld [vmem:[%s18085_s6 + $0x270] ss:$12 sps:$4 sm:$0xff]  }
 0xa46   : > { %v7285_v60 = vld [vmem:[#allocation4 + $0x1] sm:$0xff]  ;;  %v7286_v49 = vld [vmem:[#allocation4 + $0x9] sm:$0xff] }
 0xa47   : > { %v7287_v26 = vpack.c.bf16 %v7286_v49, %v7285_v60  ;;  %v7744_v50 = vld [vmem:[#allocation4 + $0x2] sm:$0xff]  ;;  %v7745_v52 = vld [vmem:[#allocation4 + $0xa] sm:$0xff] }
 0xa48   : > { %v7746_v17 = vpack.c.bf16 %v7745_v52, %v7744_v50  ;;  %v13761_v60 = vld [vmem:[%s18085_s6 + $0x288] ss:$12 sps:$4 sm:$0xff]   ;;  %v13764_v49 = vld [vmem:[%s18085_s6 + $0x290] ss:$12 sps:$4 sm:$0xff]  }
 0xa49   : > { %7481 = vmatmul.mubr.bf16.vlgmr.msra.gmra.mrb[80].mxu0 %v7287_v26  ;;  %13344 = vmatmul.mubr.bf16.vlgmr.msra.gmra.mrb[72].mxu1 %v7287_v26  ;;  %v13765_v26 = vld [vmem:[%s18085_s6 + $0x2a0] ss:$12 sps:$4 sm:$0xff]   ;;  %v13821_v52 = vld [vmem:[%s18085_s6 + $0x3f0] ss:$12 sps:$4 sm:$0xff]  }
 0xa4a   : > { %7661 = vmatpush1.bf16.msra.mxu0 %v13685_v19  ;;  %13348 = vmatpush3.bf16.msra.mxu1 %v13688_v45  ;;  %v13763_v19 = vld [vmem:[%s18085_s6 + $0x28c] ss:$12 sps:$4 sm:$0xff]   ;;  %v13767_v45 = vld [vmem:[%s18085_s6 + $0x2a4] ss:$12 sps:$4 sm:$0xff]   ;;  %v13823_v50 = vld [vmem:[%s18085_s6 + $0x3f4] ss:$12 sps:$4 sm:$0xff]  }
 0xa4b   : > { %7662 = vmatprep.subr.bf16.mxu0 %v13691_v62  ;;  %13349 = vmatprep.subr.bf16.mxu1 %v18049_v44  ;;  %v13768_v62 = vld [vmem:[%s18085_s6 + $0x2a8] ss:$12 sps:$4 sm:$0xff]  }
 0xa4c   : > { %7692 = vmatprep.mubr.bf16.mxu0 %v14079_v61  ;;  %13363 = vmatprep.mubr.msk.bf16.mxu1 %vm14078_vm1, %v18049_v44 }
 0xa4e   : > { %7663 = vmatpush1.bf16.msra.mxu0 %v13689_v2  ;;  %13350 = vmatpush3.bf16.msra.mxu1 %v13692_v29  ;;  %v13771_v2 = vld [vmem:[%s18085_s6 + $0x2bc] ss:$12 sps:$4 sm:$0xff]   ;;  %v13769_v29 = vld [vmem:[%s18085_s6 + $0x2b8] ss:$12 sps:$4 sm:$0xff]  }
 0xa4f   : > { %7664 = vmatprep.subr.bf16.mxu0 %v13695_v63  ;;  %13351 = vmatprep.subr.bf16.mxu1 %v18049_v44  ;;  %v13772_v63 = vld [vmem:[%s18085_s6 + $0x2c0] ss:$12 sps:$4 sm:$0xff]  }
 0xa52   : > { %7665 = vmatpush1.bf16.msra.mxu0 %v13693_v32  ;;  %13352 = vmatpush3.bf16.msra.mxu1 %v13696_v22  ;;  %v13775_v32 = vld [vmem:[%s18085_s6 + $0x2d4] ss:$12 sps:$4 sm:$0xff]   ;;  %v13773_v22 = vld [vmem:[%s18085_s6 + $0x2d0] ss:$12 sps:$4 sm:$0xff]  }
 0xa53   : > { %7666 = vmatprep.subr.bf16.mxu0 %v13699_v10  ;;  %13353 = vmatprep.subr.bf16.mxu1 %v18049_v44  ;;  %v13776_v10 = vld [vmem:[%s18085_s6 + $0x2d8] ss:$12 sps:$4 sm:$0xff]  }
 0xa56   : > { %7667 = vmatpush1.bf16.msra.mxu0 %v13697_v24  ;;  %13354 = vmatpush3.bf16.msra.mxu1 %v13700_v3  ;;  %v13779_v24 = vld [vmem:[%s18085_s6 + $0x2ec] ss:$12 sps:$4 sm:$0xff]   ;;  %v13777_v3 = vld [vmem:[%s18085_s6 + $0x2e8] ss:$12 sps:$4 sm:$0xff]  }
 0xa57   : > { %7668 = vmatprep.subr.bf16.mxu0 %v13703_v54  ;;  %13355 = vmatprep.subr.bf16.mxu1 %v18049_v44  ;;  %v13780_v54 = vld [vmem:[%s18085_s6 + $0x2f0] ss:$12 sps:$4 sm:$0xff]  }
 0xa5a   : > { %7669 = vmatpush1.bf16.msra.mxu0 %v13701_v6  ;;  %13356 = vmatpush3.bf16.msra.mxu1 %v13704_v36  ;;  %v13783_v6 = vld [vmem:[%s18085_s6 + $0x304] ss:$12 sps:$4 sm:$0xff]   ;;  %v7997_v36 = vld [vmem:[#allocation4 + $0x4] sm:$0xff] }
 0xa5b   : > { %7670 = vmatprep.subr.bf16.mxu0 %v13707_v56  ;;  %13357 = vmatprep.subr.bf16.mxu1 %v18049_v44  ;;  %v7998_v56 = vld [vmem:[#allocation4 + $0xc] sm:$0xff] }
 0xa5e   : > { %7671 = vmatpush1.bf16.msra.mxu0 %v13705_v30  ;;  %13358 = vmatpush3.bf16.msra.mxu1 %v13708_v42  ;;  %v13781_v30 = vld [vmem:[%s18085_s6 + $0x300] ss:$12 sps:$4 sm:$0xff]   ;;  %v13784_v42 = vld [vmem:[%s18085_s6 + $0x308] ss:$12 sps:$4 sm:$0xff]  }
 0xa5f   : > { %7672 = vmatprep.subr.bf16.mxu0 %v13711_v23  ;;  %13359 = vmatprep.subr.bf16.mxu1 %v18049_v44  ;;  %v7999_v23 = vpack.c.bf16 %v7998_v56, %v7997_v36  ;;  %v13855_v36 = vld [vmem:[%s18085_s6 + $0x4b4] ss:$12 sps:$4 sm:$0xff]   ;;  %v13853_v56 = vld [vmem:[%s18085_s6 + $0x4b0] ss:$12 sps:$4 sm:$0xff]  }
 0xa62   : > { %7673 = vmatpush1.bf16.msra.mxu0 %v13709_v5  ;;  %13360 = vmatpush3.bf16.msra.mxu1 %v13712_v9  ;;  %v13787_v5 = vld [vmem:[%s18085_s6 + $0x31c] ss:$12 sps:$4 sm:$0xff]   ;;  %v13785_v9 = vld [vmem:[%s18085_s6 + $0x318] ss:$12 sps:$4 sm:$0xff]  }
 0xa63   : > { %7674 = vmatprep.subr.bf16.mxu0 %v13715_v31  ;;  %13361 = vmatprep.subr.bf16.mxu1 %v18049_v44  ;;  %v13788_v31 = vld [vmem:[%s18085_s6 + $0x320] ss:$12 sps:$4 sm:$0xff]  }
 0xa66   : > { %7675 = vmatpush1.bf16.msra.mxu0 %v13713_v58  ;;  %13362 = vmatpush3.bf16.msra.mxu1 %v13716_v1  ;;  %v13791_v58 = vld [vmem:[%s18085_s6 + $0x334] ss:$12 sps:$4 sm:$0xff]   ;;  %v13789_v1 = vld [vmem:[%s18085_s6 + $0x330] ss:$12 sps:$4 sm:$0xff]  }
 0xa67   : > { %7907 = vmatprep.subr.bf16.mxu0 %v13719_v14  ;;  %13367 = vmatprep.subr.bf16.mxu1 %v18049_v44  ;;  %v13792_v14 = vld [vmem:[%s18085_s6 + $0x338] ss:$12 sps:$4 sm:$0xff]  }
 0xa69   : > { %7693 = vmatmul.mubr.bf16.vlgmr.msra.gmra.mrb[80].mxu0 %v16973_v4  ;;  %13364 = vmatmul.mubr.bf16.vlgmr.msra.gmra.mrb[76].mxu1 %v16973_v4  ;;  %v13760_v4 = vld [vmem:[%s18085_s6 + $0x278] ss:$12 sps:$4 sm:$0xff]  }
 0xa6a   : > { %7908 = vmatpush1.bf16.msra.mxu0 %v13717_v27  ;;  %13368 = vmatpush3.bf16.msra.mxu1 %v13720_v53  ;;  %v13795_v27 = vld [vmem:[%s18085_s6 + $0x34c] ss:$12 sps:$4 sm:$0xff]   ;;  %v13793_v53 = vld [vmem:[%s18085_s6 + $0x348] ss:$12 sps:$4 sm:$0xff]  }
 0xa6b   : > { %7909 = vmatprep.subr.bf16.mxu0 %v13723_v12  ;;  %13369 = vmatprep.subr.bf16.mxu1 %v18049_v44  ;;  %v13796_v12 = vld [vmem:[%s18085_s6 + $0x350] ss:$12 sps:$4 sm:$0xff]  }
 0xa6c   : > { %7939 = vmatprep.mubr.bf16.mxu0 %v14079_v61  ;;  %13383 = vmatprep.mubr.msk.bf16.mxu1 %vm14078_vm1, %v18049_v44 }
 0xa6e   : > { %7910 = vmatpush1.bf16.msra.mxu0 %v13721_v21  ;;  %13370 = vmatpush3.bf16.msra.mxu1 %v13724_v15  ;;  %v13799_v21 = vld [vmem:[%s18085_s6 + $0x364] ss:$12 sps:$4 sm:$0xff]   ;;  %v13797_v15 = vld [vmem:[%s18085_s6 + $0x360] ss:$12 sps:$4 sm:$0xff]  }
 0xa6f   : > { %7911 = vmatprep.subr.bf16.mxu0 %v13727_v13  ;;  %13371 = vmatprep.subr.bf16.mxu1 %v18049_v44  ;;  %v13800_v13 = vld [vmem:[%s18085_s6 + $0x368] ss:$12 sps:$4 sm:$0xff]  }
 0xa72   : > { %7912 = vmatpush1.bf16.msra.mxu0 %v13725_v57  ;;  %13372 = vmatpush3.bf16.msra.mxu1 %v13728_v46  ;;  %v13803_v57 = vld [vmem:[%s18085_s6 + $0x37c] ss:$12 sps:$4 sm:$0xff]   ;;  %v13801_v46 = vld [vmem:[%s18085_s6 + $0x378] ss:$12 sps:$4 sm:$0xff]  }
 0xa73   : > { %7913 = vmatprep.subr.bf16.mxu0 %v13731_v28  ;;  %13373 = vmatprep.subr.bf16.mxu1 %v18049_v44  ;;  %v13804_v28 = vld [vmem:[%s18085_s6 + $0x380] ss:$12 sps:$4 sm:$0xff]  }
 0xa76   : > { %7914 = vmatpush1.bf16.msra.mxu0 %v13729_v55  ;;  %13374 = vmatpush3.bf16.msra.mxu1 %v13732_v25  ;;  %v13807_v55 = vld [vmem:[%s18085_s6 + $0x394] ss:$12 sps:$4 sm:$0xff]   ;;  %v13805_v25 = vld [vmem:[%s18085_s6 + $0x390] ss:$12 sps:$4 sm:$0xff]  }
 0xa77   : > { %7915 = vmatprep.subr.bf16.mxu0 %v13735_v7  ;;  %13375 = vmatprep.subr.bf16.mxu1 %v18049_v44  ;;  %v13808_v7 = vld [vmem:[%s18085_s6 + $0x398] ss:$12 sps:$4 sm:$0xff]  }
 0xa7a   : > { %7916 = vmatpush1.bf16.msra.mxu0 %v13733_v33  ;;  %13376 = vmatpush3.bf16.msra.mxu1 %v13736_v37  ;;  %v13811_v33 = vld [vmem:[%s18085_s6 + $0x3ac] ss:$12 sps:$4 sm:$0xff]   ;;  %v13809_v37 = vld [vmem:[%s18085_s6 + $0x3a8] ss:$12 sps:$4 sm:$0xff]  }
 0xa7b   : > { %7917 = vmatprep.subr.bf16.mxu0 %v13739_v41  ;;  %13377 = vmatprep.subr.bf16.mxu1 %v18049_v44  ;;  %v13812_v41 = vld [vmem:[%s18085_s6 + $0x3b0] ss:$12 sps:$4 sm:$0xff]  }
 0xa7e   : > { %7918 = vmatpush1.bf16.msra.mxu0 %v13737_v18  ;;  %13378 = vmatpush3.bf16.msra.mxu1 %v13740_v0  ;;  %v13815_v18 = vld [vmem:[%s18085_s6 + $0x3c4] ss:$12 sps:$4 sm:$0xff]  }
 0xa7f   : > { %7919 = vmatprep.subr.bf16.mxu0 %v13743_v11  ;;  %13379 = vmatprep.subr.bf16.mxu1 %v18049_v44  ;;  %v8250_v0 = vld [vmem:[#allocation4 + $0x5] sm:$0xff]  ;;  %v8251_v11 = vld [vmem:[#allocation4 + $0xd] sm:$0xff] }
 0xa82   : > { %7920 = vmatpush1.bf16.msra.mxu0 %v13741_v40  ;;  %13380 = vmatpush3.bf16.msra.mxu1 %v13744_v51  ;;  %v13813_v40 = vld [vmem:[%s18085_s6 + $0x3c0] ss:$12 sps:$4 sm:$0xff]   ;;  %v13816_v51 = vld [vmem:[%s18085_s6 + $0x3c8] ss:$12 sps:$4 sm:$0xff]  }
 0xa83   : > { %7921 = vmatprep.subr.bf16.mxu0 %v13747_v38  ;;  %13381 = vmatprep.subr.bf16.mxu1 %v18049_v44  ;;  %v8252_v38 = vpack.c.bf16 %v8251_v11, %v8250_v0  ;;  %v13887_v0 = vld [vmem:[%s18085_s6 + $0x574] ss:$12 sps:$4 sm:$0xff]   ;;  %v13885_v11 = vld [vmem:[%s18085_s6 + $0x570] ss:$12 sps:$4 sm:$0xff]  }
 0xa86   : > { %7922 = vmatpush1.bf16.msra.mxu0 %v13745_v48  ;;  %13382 = vmatpush3.bf16.msra.mxu1 %v13748_v59  ;;  %v13819_v48 = vld [vmem:[%s18085_s6 + $0x3dc] ss:$12 sps:$4 sm:$0xff]   ;;  %v13817_v59 = vld [vmem:[%s18085_s6 + $0x3d8] ss:$12 sps:$4 sm:$0xff]  }
 0xa87   : > { %8160 = vmatprep.subr.bf16.mxu0 %v13751_v16  ;;  %13387 = vmatprep.subr.bf16.mxu1 %v18049_v44  ;;  %v13820_v16 = vld [vmem:[%s18085_s6 + $0x3e0] ss:$12 sps:$4 sm:$0xff]  }
 0xa89   : > { %7940 = vmatmul.mubr.bf16.vlgmr.msra.gmra.mrb[80].mxu0 %v7746_v17  ;;  %13384 = vmatmul.mubr.bf16.vlgmr.msra.gmra.mrb[80].mxu1 %v7746_v17  ;;  %v13825_v17 = vld [vmem:[%s18085_s6 + $0x408] ss:$12 sps:$4 sm:$0xff]  }
 0xa8a   : > { %8161 = vmatpush1.bf16.msra.mxu0 %v13749_v34  ;;  %13388 = vmatpush3.bf16.msra.mxu1 %v13752_v35  ;;  %v13824_v34 = vld [vmem:[%s18085_s6 + $0x3f8] ss:$12 sps:$4 sm:$0xff]  }
 0xa8b   : > { %8162 = vmatprep.subr.bf16.mxu0 %v13755_v8  ;;  %13389 = vmatprep.subr.bf16.mxu1 %v18049_v44  ;;  %v13827_v35 = vld [vmem:[%s18085_s6 + $0x40c] ss:$12 sps:$4 sm:$0xff]   ;;  %v13828_v8 = vld [vmem:[%s18085_s6 + $0x410] ss:$12 sps:$4 sm:$0xff]  }
 0xa8c   : > { %8192 = vmatprep.mubr.bf16.mxu0 %v14079_v61  ;;  %13403 = vmatprep.mubr.msk.bf16.mxu1 %vm14078_vm1, %v18049_v44 }
 0xa8e   : > { %8163 = vmatpush1.bf16.msra.mxu0 %v13753_v43  ;;  %13390 = vmatpush3.bf16.msra.mxu1 %v13756_v20  ;;  %v13831_v43 = vld [vmem:[%s18085_s6 + $0x424] ss:$12 sps:$4 sm:$0xff]   ;;  %v13829_v20 = vld [vmem:[%s18085_s6 + $0x420] ss:$12 sps:$4 sm:$0xff]  }
 0xa8f   : > { %8164 = vmatprep.subr.bf16.mxu0 %v13759_v47  ;;  %13391 = vmatprep.subr.bf16.mxu1 %v18049_v44  ;;  %v13832_v47 = vld [vmem:[%s18085_s6 + $0x428] ss:$12 sps:$4 sm:$0xff]  }
 0xa92   : > { %8165 = vmatpush1.bf16.msra.mxu0 %v13757_v39  ;;  %13392 = vmatpush3.bf16.msra.mxu1 %v13760_v4  ;;  %v13835_v39 = vld [vmem:[%s18085_s6 + $0x43c] ss:$12 sps:$4 sm:$0xff]   ;;  %v13833_v4 = vld [vmem:[%s18085_s6 + $0x438] ss:$12 sps:$4 sm:$0xff]  }
 0xa93   : > { %8166 = vmatprep.subr.bf16.mxu0 %v13763_v19  ;;  %13393 = vmatprep.subr.bf16.mxu1 %v18049_v44  ;;  %v13836_v19 = vld [vmem:[%s18085_s6 + $0x440] ss:$12 sps:$4 sm:$0xff]  }
 0xa96   : > { %8167 = vmatpush1.bf16.msra.mxu0 %v13761_v60  ;;  %13394 = vmatpush3.bf16.msra.mxu1 %v13764_v49  ;;  %v13839_v60 = vld [vmem:[%s18085_s6 + $0x454] ss:$12 sps:$4 sm:$0xff]   ;;  %v13837_v49 = vld [vmem:[%s18085_s6 + $0x450] ss:$12 sps:$4 sm:$0xff]  }
 0xa97   : > { %8168 = vmatprep.subr.bf16.mxu0 %v13767_v45  ;;  %13395 = vmatprep.subr.bf16.mxu1 %v18049_v44  ;;  %v13840_v45 = vld [vmem:[%s18085_s6 + $0x458] ss:$12 sps:$4 sm:$0xff]  }
 0xa9a   : > { %8169 = vmatpush1.bf16.msra.mxu0 %v13765_v26  ;;  %13396 = vmatpush3.bf16.msra.mxu1 %v13768_v62  ;;  %v13843_v26 = vld [vmem:[%s18085_s6 + $0x46c] ss:$12 sps:$4 sm:$0xff]   ;;  %v13841_v62 = vld [vmem:[%s18085_s6 + $0x468] ss:$12 sps:$4 sm:$0xff]  }
 0xa9b   : > { %8170 = vmatprep.subr.bf16.mxu0 %v13771_v2  ;;  %13397 = vmatprep.subr.bf16.mxu1 %v18049_v44  ;;  %v13844_v2 = vld [vmem:[%s18085_s6 + $0x470] ss:$12 sps:$4 sm:$0xff]  }
 0xa9e   : > { %8171 = vmatpush1.bf16.msra.mxu0 %v13769_v29  ;;  %13398 = vmatpush3.bf16.msra.mxu1 %v13772_v63  ;;  %v13847_v29 = vld [vmem:[%s18085_s6 + $0x484] ss:$12 sps:$4 sm:$0xff]  }
 0xa9f   : > { %8172 = vmatprep.subr.bf16.mxu0 %v13775_v32  ;;  %13399 = vmatprep.subr.bf16.mxu1 %v18049_v44  ;;  %v8503_v63 = vld [vmem:[#allocation4 + $0x6] sm:$0xff]  ;;  %v8504_v32 = vld [vmem:[#allocation4 + $0xe] sm:$0xff] }
 0xaa2   : > { %8173 = vmatpush1.bf16.msra.mxu0 %v13773_v22  ;;  %13400 = vmatpush3.bf16.msra.mxu1 %v13776_v10  ;;  %v13845_v22 = vld [vmem:[%s18085_s6 + $0x480] ss:$12 sps:$4 sm:$0xff]   ;;  %v13848_v10 = vld [vmem:[%s18085_s6 + $0x488] ss:$12 sps:$4 sm:$0xff]  }
 0xaa3   : > { %8174 = vmatprep.subr.bf16.mxu0 %v13779_v24  ;;  %13401 = vmatprep.subr.bf16.mxu1 %v18049_v44  ;;  %v8505_v24 = vpack.c.bf16 %v8504_v32, %v8503_v63  ;;  %v13915_v32 = vld [vmem:[%s18085_s6 + $0x61c] ss:$12 sps:$4 sm:$0xff]  }
 0xaa6   : > { %8175 = vmatpush1.bf16.msra.mxu0 %v13777_v3  ;;  %13402 = vmatpush3.bf16.msra.mxu1 %v13780_v54  ;;  %v13851_v3 = vld [vmem:[%s18085_s6 + $0x49c] ss:$12 sps:$4 sm:$0xff]   ;;  %v13849_v54 = vld [vmem:[%s18085_s6 + $0x498] ss:$12 sps:$4 sm:$0xff]  }
 0xaa7   : > { %8413 = vmatprep.subr.bf16.mxu0 %v13783_v6  ;;  %13407 = vmatprep.subr.bf16.mxu1 %v18049_v44  ;;  %v13852_v6 = vld [vmem:[%s18085_s6 + $0x4a0] ss:$12 sps:$4 sm:$0xff]  }
 0xaa9   : > { %8193 = vmatmul.mubr.bf16.vlgmr.msra.gmra.mrb[80].mxu0 %v7999_v23  ;;  %13404 = vmatmul.mubr.bf16.vlgmr.msra.gmra.mrb[84].mxu1 %v7999_v23  ;;  %v13857_v23 = vld [vmem:[%s18085_s6 + $0x4c8] ss:$12 sps:$4 sm:$0xff]  }
 0xaaa   : > { %8414 = vmatpush1.bf16.msra.mxu0 %v13781_v30  ;;  %13408 = vmatpush3.bf16.msra.mxu1 %v13784_v42  ;;  %v13856_v30 = vld [vmem:[%s18085_s6 + $0x4b8] ss:$12 sps:$4 sm:$0xff]  }
 0xaab   : > { %8415 = vmatprep.subr.bf16.mxu0 %v13787_v5  ;;  %13409 = vmatprep.subr.bf16.mxu1 %v18049_v44  ;;  %v13859_v42 = vld [vmem:[%s18085_s6 + $0x4cc] ss:$12 sps:$4 sm:$0xff]   ;;  %v13860_v5 = vld [vmem:[%s18085_s6 + $0x4d0] ss:$12 sps:$4 sm:$0xff]  }
 0xaac   : > { %8445 = vmatprep.mubr.bf16.mxu0 %v14079_v61  ;;  %13423 = vmatprep.mubr.msk.bf16.mxu1 %vm14078_vm1, %v18049_v44 }
 0xaae   : > { %8416 = vmatpush1.bf16.msra.mxu0 %v13785_v9  ;;  %13410 = vmatpush3.bf16.msra.mxu1 %v13788_v31  ;;  %v13863_v9 = vld [vmem:[%s18085_s6 + $0x4e4] ss:$12 sps:$4 sm:$0xff]   ;;  %v13861_v31 = vld [vmem:[%s18085_s6 + $0x4e0] ss:$12 sps:$4 sm:$0xff]  }
 0xaaf   : > { %8417 = vmatprep.subr.bf16.mxu0 %v13791_v58  ;;  %13411 = vmatprep.subr.bf16.mxu1 %v18049_v44  ;;  %v13864_v58 = vld [vmem:[%s18085_s6 + $0x4e8] ss:$12 sps:$4 sm:$0xff]  }
 0xab2   : > { %8418 = vmatpush1.bf16.msra.mxu0 %v13789_v1  ;;  %13412 = vmatpush3.bf16.msra.mxu1 %v13792_v14  ;;  %v13867_v1 = vld [vmem:[%s18085_s6 + $0x4fc] ss:$12 sps:$4 sm:$0xff]   ;;  %v13865_v14 = vld [vmem:[%s18085_s6 + $0x4f8] ss:$12 sps:$4 sm:$0xff]  }
 0xab3   : > { %8419 = vmatprep.subr.bf16.mxu0 %v13795_v27  ;;  %13413 = vmatprep.subr.bf16.mxu1 %v18049_v44  ;;  %v13868_v27 = vld [vmem:[%s18085_s6 + $0x500] ss:$12 sps:$4 sm:$0xff]  }
 0xab6   : > { %8420 = vmatpush1.bf16.msra.mxu0 %v13793_v53  ;;  %13414 = vmatpush3.bf16.msra.mxu1 %v13796_v12  ;;  %v13871_v53 = vld [vmem:[%s18085_s6 + $0x514] ss:$12 sps:$4 sm:$0xff]   ;;  %v13869_v12 = vld [vmem:[%s18085_s6 + $0x510] ss:$12 sps:$4 sm:$0xff]  }
 0xab7   : > { %8421 = vmatprep.subr.bf16.mxu0 %v13799_v21  ;;  %13415 = vmatprep.subr.bf16.mxu1 %v18049_v44  ;;  %v13872_v21 = vld [vmem:[%s18085_s6 + $0x518] ss:$12 sps:$4 sm:$0xff]  }
 0xaba   : > { %8422 = vmatpush1.bf16.msra.mxu0 %v13797_v15  ;;  %13416 = vmatpush3.bf16.msra.mxu1 %v13800_v13  ;;  %v13875_v15 = vld [vmem:[%s18085_s6 + $0x52c] ss:$12 sps:$4 sm:$0xff]   ;;  %v13873_v13 = vld [vmem:[%s18085_s6 + $0x528] ss:$12 sps:$4 sm:$0xff]  }
 0xabb   : > { %8423 = vmatprep.subr.bf16.mxu0 %v13803_v57  ;;  %13417 = vmatprep.subr.bf16.mxu1 %v18049_v44  ;;  %v13876_v57 = vld [vmem:[%s18085_s6 + $0x530] ss:$12 sps:$4 sm:$0xff]  }
 0xabe   : > { %8424 = vmatpush1.bf16.msra.mxu0 %v13801_v46  ;;  %13418 = vmatpush3.bf16.msra.mxu1 %v13804_v28  ;;  %v13879_v46 = vld [vmem:[%s18085_s6 + $0x544] ss:$12 sps:$4 sm:$0xff]  }
 0xabf   : > { %8425 = vmatprep.subr.bf16.mxu0 %v13807_v55  ;;  %13419 = vmatprep.subr.bf16.mxu1 %v18049_v44  ;;  %v8756_v28 = vld [vmem:[#allocation4 + $0x8] sm:$0xff]  ;;  %v8757_v55 = vld [vmem:[#allocation4 + $0x10] sm:$0xff] }
 0xac2   : > { %8426 = vmatpush1.bf16.msra.mxu0 %v13805_v25  ;;  %13420 = vmatpush3.bf16.msra.mxu1 %v13808_v7  ;;  %v13877_v25 = vld [vmem:[%s18085_s6 + $0x540] ss:$12 sps:$4 sm:$0xff]   ;;  %v13880_v7 = vld [vmem:[%s18085_s6 + $0x548] ss:$12 sps:$4 sm:$0xff]  }
 0xac3   : > { %8427 = vmatprep.subr.bf16.mxu0 %v13811_v33  ;;  %13421 = vmatprep.subr.bf16.mxu1 %v18049_v44  ;;  %v8758_v33 = vpack.c.bf16 %v8757_v55, %v8756_v28  ;;  %v13940_v28 = vld [vmem:[%s18085_s6 + $0x6b0] ss:$12 sps:$4 sm:$0xff]   ;;  %v9262_v55 = vld [vmem:[#allocation4 + $0xa] sm:$0xff] }
 0xac6   : > { %8428 = vmatpush1.bf16.msra.mxu0 %v13809_v37  ;;  %13422 = vmatpush3.bf16.msra.mxu1 %v13812_v41  ;;  %v13883_v37 = vld [vmem:[%s18085_s6 + $0x55c] ss:$12 sps:$4 sm:$0xff]   ;;  %v13881_v41 = vld [vmem:[%s18085_s6 + $0x558] ss:$12 sps:$4 sm:$0xff]  }
 0xac7   : > { %8666 = vmatprep.subr.bf16.mxu0 %v13815_v18  ;;  %13427 = vmatprep.subr.bf16.mxu1 %v18049_v44  ;;  %v13884_v18 = vld [vmem:[%s18085_s6 + $0x560] ss:$12 sps:$4 sm:$0xff]  }
 0xac9   : > { %8446 = vmatmul.mubr.bf16.vlgmr.msra.gmra.mrb[80].mxu0 %v8252_v38  ;;  %13424 = vmatmul.mubr.bf16.vlgmr.msra.gmra.mrb[88].mxu1 %v8252_v38  ;;  %v13889_v38 = vld [vmem:[%s18085_s6 + $0x588] ss:$12 sps:$4 sm:$0xff]  }
 0xaca   : > { %8667 = vmatpush1.bf16.msra.mxu0 %v13813_v40  ;;  %13428 = vmatpush3.bf16.msra.mxu1 %v13816_v51  ;;  %v13888_v40 = vld [vmem:[%s18085_s6 + $0x578] ss:$12 sps:$4 sm:$0xff]  }
 0xacb   : > { %8668 = vmatprep.subr.bf16.mxu0 %v13819_v48  ;;  %13429 = vmatprep.subr.bf16.mxu1 %v18049_v44  ;;  %v13891_v51 = vld [vmem:[%s18085_s6 + $0x58c] ss:$12 sps:$4 sm:$0xff]   ;;  %v13892_v48 = vld [vmem:[%s18085_s6 + $0x590] ss:$12 sps:$4 sm:$0xff]  }
 0xacc   : > { %8698 = vmatprep.mubr.bf16.mxu0 %v14079_v61  ;;  %13443 = vmatprep.mubr.msk.bf16.mxu1 %vm14078_vm1, %v18049_v44 }
 0xace   : > { %8669 = vmatpush1.bf16.msra.mxu0 %v13817_v59  ;;  %13430 = vmatpush3.bf16.msra.mxu1 %v13820_v16  ;;  %v13895_v59 = vld [vmem:[%s18085_s6 + $0x5a4] ss:$12 sps:$4 sm:$0xff]   ;;  %v13893_v16 = vld [vmem:[%s18085_s6 + $0x5a0] ss:$12 sps:$4 sm:$0xff]  }
 0xacf   : > { %8670 = vmatprep.subr.bf16.mxu0 %v13823_v50  ;;  %13431 = vmatprep.subr.bf16.mxu1 %v18049_v44  ;;  %v13896_v50 = vld [vmem:[%s18085_s6 + $0x5a8] ss:$12 sps:$4 sm:$0xff]  }
 0xad2   : > { %8671 = vmatpush1.bf16.msra.mxu0 %v13821_v52  ;;  %13432 = vmatpush3.bf16.msra.mxu1 %v13824_v34  ;;  %v13899_v52 = vld [vmem:[%s18085_s6 + $0x5bc] ss:$12 sps:$4 sm:$0xff]   ;;  %v13897_v34 = vld [vmem:[%s18085_s6 + $0x5b8] ss:$12 sps:$4 sm:$0xff]  }
 0xad3   : > { %8672 = vmatprep.subr.bf16.mxu0 %v13827_v35  ;;  %13433 = vmatprep.subr.bf16.mxu1 %v18049_v44  ;;  %v13900_v35 = vld [vmem:[%s18085_s6 + $0x5c0] ss:$12 sps:$4 sm:$0xff]  }
 0xad6   : > { %8673 = vmatpush1.bf16.msra.mxu0 %v13825_v17  ;;  %13434 = vmatpush3.bf16.msra.mxu1 %v13828_v8  ;;  %v13903_v17 = vld [vmem:[%s18085_s6 + $0x5d4] ss:$12 sps:$4 sm:$0xff]  }
 0xad7   : > { %8674 = vmatprep.subr.bf16.mxu0 %v13831_v43  ;;  %13435 = vmatprep.subr.bf16.mxu1 %v18049_v44 }
 0xada   : > { %8675 = vmatpush1.bf16.msra.mxu0 %v13829_v20  ;;  %13436 = vmatpush3.bf16.msra.mxu1 %v13832_v47  ;;  %v13901_v20 = vld [vmem:[%s18085_s6 + $0x5d0] ss:$12 sps:$4 sm:$0xff]   ;;  %v13904_v47 = vld [vmem:[%s18085_s6 + $0x5d8] ss:$12 sps:$4 sm:$0xff]  }
 0xadb   : > { %8676 = vmatprep.subr.bf16.mxu0 %v13835_v39  ;;  %13437 = vmatprep.subr.bf16.mxu1 %v18049_v44 }
 0xade   : > { %8677 = vmatpush1.bf16.msra.mxu0 %v13833_v4  ;;  %13438 = vmatpush3.bf16.msra.mxu1 %v13836_v19  ;;  %v13907_v4 = vld [vmem:[%s18085_s6 + $0x5ec] ss:$12 sps:$4 sm:$0xff]  }
 0xadf   : > { %8678 = vmatprep.subr.bf16.mxu0 %v13839_v60  ;;  %13439 = vmatprep.subr.bf16.mxu1 %v18049_v44  ;;  %v13905_v60 = vld [vmem:[%s18085_s6 + $0x5e8] ss:$12 sps:$4 sm:$0xff]  }
 0xae2   : > { %8679 = vmatpush1.bf16.msra.mxu0 %v13837_v49  ;;  %13440 = vmatpush3.bf16.msra.mxu1 %v13840_v45  ;;  %v13908_v49 = vld [vmem:[%s18085_s6 + $0x5f0] ss:$12 sps:$4 sm:$0xff]  }
 0xae3   : > { %8680 = vmatprep.subr.bf16.mxu0 %v13843_v26  ;;  %13441 = vmatprep.subr.bf16.mxu1 %v18049_v44  ;;  %v13911_v45 = vld [vmem:[%s18085_s6 + $0x604] ss:$12 sps:$4 sm:$0xff]  }
 0xae4   : > { %v9009_v26 = vld [vmem:[#allocation4 + $0x9] sm:$0xff] }
 0xae6   : > { %8681 = vmatpush1.bf16.msra.mxu0 %v13841_v62  ;;  %13442 = vmatpush3.bf16.msra.mxu1 %v13844_v2  ;;  %v9010_v62 = vld [vmem:[#allocation4 + $0x11] sm:$0xff] }
 0xae7   : > { %8919 = vmatprep.subr.bf16.mxu0 %v13847_v29  ;;  %13447 = vmatprep.subr.bf16.mxu1 %v18049_v44  ;;  %v13909_v2 = vld [vmem:[%s18085_s6 + $0x600] ss:$12 sps:$4 sm:$0xff]   ;;  %v13912_v29 = vld [vmem:[%s18085_s6 + $0x608] ss:$12 sps:$4 sm:$0xff]   ;;  %v9011_v63 = vpack.c.bf16 %v9010_v62, %v9009_v26 }
 0xae9   : > { %8699 = vmatmul.mubr.bf16.vlgmr.msra.gmra.mrb[80].mxu0 %v8505_v24  ;;  %13444 = vmatmul.mubr.bf16.vlgmr.msra.gmra.mrb[92].mxu1 %v8505_v24  ;;  %v13919_v24 = vld [vmem:[%s18085_s6 + $0x634] ss:$12 sps:$4 sm:$0xff]  }
 0xaea   : > { %8920 = vmatpush1.bf16.msra.mxu0 %v13845_v22  ;;  %13448 = vmatpush3.bf16.msra.mxu1 %v13848_v10  ;;  %v13913_v22 = vld [vmem:[%s18085_s6 + $0x618] ss:$12 sps:$4 sm:$0xff]   ;;  %v13916_v10 = vld [vmem:[%s18085_s6 + $0x620] ss:$12 sps:$4 sm:$0xff]  }
 0xaeb   : > { %8921 = vmatprep.subr.bf16.mxu0 %v13851_v3  ;;  %13449 = vmatprep.subr.bf16.mxu1 %v18049_v44  ;;  %v13917_v3 = vld [vmem:[%s18085_s6 + $0x630] ss:$12 sps:$4 sm:$0xff]  }
 0xaec   : > { %8951 = vmatprep.mubr.bf16.mxu0 %v14079_v61  ;;  %13463 = vmatprep.mubr.msk.bf16.mxu1 %vm14078_vm1, %v18049_v44 }
 0xaee   : > { %8922 = vmatpush1.bf16.msra.mxu0 %v13849_v54  ;;  %13450 = vmatpush3.bf16.msra.mxu1 %v13852_v6  ;;  %v13920_v54 = vld [vmem:[%s18085_s6 + $0x638] ss:$12 sps:$4 sm:$0xff]  }
 0xaef   : > { %8923 = vmatprep.subr.bf16.mxu0 %v13855_v36  ;;  %13451 = vmatprep.subr.bf16.mxu1 %v18049_v44  ;;  %v13923_v6 = vld [vmem:[%s18085_s6 + $0x64c] ss:$12 sps:$4 sm:$0xff]   ;;  %v13921_v36 = vld [vmem:[%s18085_s6 + $0x648] ss:$12 sps:$4 sm:$0xff]  }
 0xaf2   : > { %8924 = vmatpush1.bf16.msra.mxu0 %v13853_v56  ;;  %13452 = vmatpush3.bf16.msra.mxu1 %v13856_v30  ;;  %v13924_v56 = vld [vmem:[%s18085_s6 + $0x650] ss:$12 sps:$4 sm:$0xff]  }
 0xaf3   : > { %8925 = vmatprep.subr.bf16.mxu0 %v13859_v42  ;;  %13453 = vmatprep.subr.bf16.mxu1 %v18049_v44  ;;  %v13927_v30 = vld [vmem:[%s18085_s6 + $0x664] ss:$12 sps:$4 sm:$0xff]   ;;  %v13925_v42 = vld [vmem:[%s18085_s6 + $0x660] ss:$12 sps:$4 sm:$0xff]  }
 0xaf6   : > { %8926 = vmatpush1.bf16.msra.mxu0 %v13857_v23  ;;  %13454 = vmatpush3.bf16.msra.mxu1 %v13860_v5  ;;  %v13928_v23 = vld [vmem:[%s18085_s6 + $0x668] ss:$12 sps:$4 sm:$0xff]  }
 0xaf7   : > { %8927 = vmatprep.subr.bf16.mxu0 %v13863_v9  ;;  %13455 = vmatprep.subr.bf16.mxu1 %v18049_v44  ;;  %v13931_v5 = vld [vmem:[%s18085_s6 + $0x67c] ss:$12 sps:$4 sm:$0xff]   ;;  %v13929_v9 = vld [vmem:[%s18085_s6 + $0x678] ss:$12 sps:$4 sm:$0xff]  }
 0xafa   : > { %8928 = vmatpush1.bf16.msra.mxu0 %v13861_v31  ;;  %13456 = vmatpush3.bf16.msra.mxu1 %v13864_v58  ;;  %v13932_v31 = vld [vmem:[%s18085_s6 + $0x680] ss:$12 sps:$4 sm:$0xff]  }
 0xafb   : > { %8929 = vmatprep.subr.bf16.mxu0 %v13867_v1  ;;  %13457 = vmatprep.subr.bf16.mxu1 %v18049_v44  ;;  %v13935_v58 = vld [vmem:[%s18085_s6 + $0x694] ss:$12 sps:$4 sm:$0xff]  }
 0xafe   : > { %8930 = vmatpush1.bf16.msra.mxu0 %v13865_v14  ;;  %13458 = vmatpush3.bf16.msra.mxu1 %v13868_v27 }
 0xaff   : > { %8931 = vmatprep.subr.bf16.mxu0 %v13871_v53  ;;  %13459 = vmatprep.subr.bf16.mxu1 %v18049_v44  ;;  %v13933_v53 = vld [vmem:[%s18085_s6 + $0x690] ss:$12 sps:$4 sm:$0xff]  }
 0xb02   : > { %8932 = vmatpush1.bf16.msra.mxu0 %v13869_v12  ;;  %13460 = vmatpush3.bf16.msra.mxu1 %v13872_v21  ;;  %v13936_v12 = vld [vmem:[%s18085_s6 + $0x698] ss:$12 sps:$4 sm:$0xff]  }
 0xb03   : > { %8933 = vmatprep.subr.bf16.mxu0 %v13875_v15  ;;  %13461 = vmatprep.subr.bf16.mxu1 %v18049_v44  ;;  %v13939_v15 = vld [vmem:[%s18085_s6 + $0x6ac] ss:$12 sps:$4 sm:$0xff]  }
 0xb06   : > { %8934 = vmatpush1.bf16.msra.mxu0 %v13873_v13  ;;  %13462 = vmatpush3.bf16.msra.mxu1 %v13876_v57 }
 0xb07   : > { %9172 = vmatprep.subr.bf16.mxu0 %v13879_v46  ;;  %13467 = vmatprep.subr.bf16.mxu1 %v18049_v44  ;;  %v13937_v46 = vld [vmem:[%s18085_s6 + $0x6a8] ss:$12 sps:$4 sm:$0xff]  }
 0xb09   : > { %8952 = vmatmul.mubr.bf16.vlgmr.msra.gmra.mrb[80].mxu0 %v8758_v33  ;;  %13464 = vmatmul.mubr.bf16.vlgmr.msra.gmra.mrb[96].mxu1 %v8758_v33 }
 0xb0a   : > { %9173 = vmatpush1.bf16.msra.mxu0 %v13877_v25  ;;  %13468 = vmatpush3.bf16.msra.mxu1 %v13880_v7  ;;  %v9263_v25 = vld [vmem:[#allocation4 + $0x12] sm:$0xff] }
 0xb0b   : > { %9174 = vmatprep.subr.bf16.mxu0 %v13883_v37  ;;  %13469 = vmatprep.subr.bf16.mxu1 %v18049_v44  ;;  %v9264_v7 = vpack.c.bf16 %v9263_v25, %v9262_v55 }
 0xb0c   : > { %9204 = vmatprep.mubr.bf16.mxu0 %v14079_v61  ;;  %13483 = vmatprep.mubr.msk.bf16.mxu1 %vm14078_vm1, %v18049_v44 }
 0xb0e   : > { %9175 = vmatpush1.bf16.msra.mxu0 %v13881_v41  ;;  %13470 = vmatpush3.bf16.msra.mxu1 %v13884_v18 }
 0xb0f   : > { %9176 = vmatprep.subr.bf16.mxu0 %v13887_v0  ;;  %13471 = vmatprep.subr.bf16.mxu1 %v18049_v44 }
 0xb12   : > { %9177 = vmatpush1.bf16.msra.mxu0 %v13885_v11  ;;  %13472 = vmatpush3.bf16.msra.mxu1 %v13888_v40 }
 0xb13   : > { %9178 = vmatprep.subr.bf16.mxu0 %v13891_v51  ;;  %13473 = vmatprep.subr.bf16.mxu1 %v18049_v44 }
 0xb16   : > { %9179 = vmatpush1.bf16.msra.mxu0 %v13889_v38  ;;  %13474 = vmatpush3.bf16.msra.mxu1 %v13892_v48 }
 0xb17   : > { %9180 = vmatprep.subr.bf16.mxu0 %v13895_v59  ;;  %13475 = vmatprep.subr.bf16.mxu1 %v18049_v44 }
 0xb1a   : > { %9181 = vmatpush1.bf16.msra.mxu0 %v13893_v16  ;;  %13476 = vmatpush3.bf16.msra.mxu1 %v13896_v50 }
 0xb1b   : > { %9182 = vmatprep.subr.bf16.mxu0 %v13899_v52  ;;  %13477 = vmatprep.subr.bf16.mxu1 %v18049_v44 }
 0xb1c   : > { %v17537_v8 = vpop.f32.mrb[72].mxu1 }
 0xb1d   : > { %v13345_v43 = vpop.f32.mrb[73].mxu1 }
 0xb1e   : > { %9183 = vmatpush1.bf16.msra.mxu0 %v13897_v34  ;;  %13478 = vmatpush3.bf16.msra.mxu1 %v13900_v35  ;;  %v17545_v39 = vpop.f32.mrb[74].mxu1 }
 0xb1f   : > { %9184 = vmatprep.subr.bf16.mxu0 %v13903_v17  ;;  %13479 = vmatprep.subr.bf16.mxu1 %v18049_v44  ;;  %v13346_v19 = vpop.f32.mrb[75].mxu1 }
 0xb22   : > { %9185 = vmatpush1.bf16.msra.mxu0 %v13901_v20  ;;  %13480 = vmatpush3.bf16.msra.mxu1 %v13904_v47 }
 0xb23   : > { %9186 = vmatprep.subr.bf16.mxu0 %v13907_v4  ;;  %13481 = vmatprep.subr.bf16.mxu1 %v18049_v44 }
 0xb26   : > { %9187 = vmatpush1.bf16.msra.mxu0 %v13905_v60  ;;  %13482 = vmatpush3.bf16.msra.mxu1 %v13908_v49 }
 0xb27   : > { %9425 = vmatprep.subr.bf16.mxu0 %v13911_v45  ;;  %13487 = vmatprep.subr.bf16.mxu1 %v18049_v44 }
 0xb29   : > { %9205 = vmatmul.mubr.bf16.vlgmr.msra.gmra.mrb[80].mxu0 %v9011_v63  ;;  %13484 = vmatmul.mubr.bf16.vlgmr.msra.gmra.mrb[100].mxu1 %v9011_v63 }
 0xb2a   : > { %9426 = vmatpush1.bf16.msra.mxu0 %v13909_v2  ;;  %13488 = vmatpush3.bf16.msra.mxu1 %v13912_v29 }
 0xb2b   : > { %9427 = vmatprep.subr.bf16.mxu0 %v13915_v32  ;;  %13489 = vmatprep.subr.bf16.mxu1 %v18049_v44 }
 0xb2c   : > { %9457 = vmatprep.mubr.bf16.mxu0 %v14079_v61  ;;  %13503 = vmatprep.mubr.msk.bf16.mxu1 %vm14078_vm1, %v18049_v44 }
 0xb2e   : > { %9428 = vmatpush1.bf16.msra.mxu0 %v13913_v22  ;;  %13490 = vmatpush3.bf16.msra.mxu1 %v13916_v10 }
 0xb2f   : > { %9429 = vmatprep.subr.bf16.mxu0 %v13919_v24  ;;  %13491 = vmatprep.subr.bf16.mxu1 %v18049_v44  ;;  %v9517_v24 = vlaneseq }
 0xb32   : > { %9430 = vmatpush1.bf16.msra.mxu0 %v13917_v3  ;;  %13492 = vmatpush3.bf16.msra.mxu1 %v13920_v54  ;;  %v9518_v3 = vshrl.u32 %v9517_v24, 7  ;;  %v14000_v24 = vld [vmem:[%s18006_s15 + $0x28] sm:$0xff]  }
 0xb33   : > { %9431 = vmatprep.subr.bf16.mxu0 %v13923_v6  ;;  %13493 = vmatprep.subr.bf16.mxu1 %v18049_v44  ;;  %v9515_v6 = vld [vmem:[%s18087_s1] sm:$0x7] }
 0xb34   : > { %v17647_v54 = vsub.s32 0, %v9518_v3 }
 0xb36   : > { %9432 = vmatpush1.bf16.msra.mxu0 %v13921_v36  ;;  %13494 = vmatpush3.bf16.msra.mxu1 %v13924_v56  ;;  %v17652_v36 = vsub.s32 1, %v9518_v3  ;;  %v9527_v56 = vsub.s32 2, %v9518_v3 }
 0xb37   : > { %9433 = vmatprep.subr.bf16.mxu0 %v13927_v30  ;;  %13495 = vmatprep.subr.bf16.mxu1 %v18049_v44  ;;  %v9520_v30 = vrot.slane %v9515_v6, %v17647_v54 }
 0xb3a   : > { %9434 = vmatpush1.bf16.msra.mxu0 %v13925_v42  ;;  %13496 = vmatpush3.bf16.msra.mxu1 %v13928_v23  ;;  %v9524_v42 = vrot.slane %v9515_v6, %v17652_v36  ;;  %v9528_v23 = vrot.slane %v9515_v6, %v9527_v56  ;;  %v13965_v6 = vld [vmem:[%s18008_s17] ss:$8 sps:$4 sm:$0xff]  }
 0xb3b   : > { %9435 = vmatprep.subr.bf16.mxu0 %v13931_v5  ;;  %13497 = vmatprep.subr.bf16.mxu1 %v18049_v44 }
 0xb3c   : > { %v7737_v1 = vpop.f32.mrb[76].mxu1 }
 0xb3d   : > { %v7738_v14 = vadd.f32 %v7737_v1, %v17537_v8  ;;  %v13365_v27 = vpop.f32.mrb[77].mxu1 }
 0xb3e   : > { %9436 = vmatpush1.bf16.msra.mxu0 %v13929_v9  ;;  %13498 = vmatpush3.bf16.msra.mxu1 %v13932_v31  ;;  %v7740_v21 = vpop.f32.mrb[78].mxu1 }
 0xb3f   : > { %9437 = vmatprep.subr.bf16.mxu0 %v13935_v58  ;;  %13499 = vmatprep.subr.bf16.mxu1 %v18049_v44  ;;  %v7741_v13 = vadd.f32 %v7740_v21, %v17545_v39  ;;  %v13366_v57 = vpop.f32.mrb[79].mxu1 }
 0xb42   : > { %9438 = vmatpush1.bf16.msra.mxu0 %v13933_v53  ;;  %13500 = vmatpush3.bf16.msra.mxu1 %v13936_v12 }
 0xb43   : > { %9439 = vmatprep.subr.bf16.mxu0 %v13939_v15  ;;  %13501 = vmatprep.subr.bf16.mxu1 %v18049_v44 }
 0xb46   : > { %9440 = vmatpush1.bf16.msra.mxu0 %v13937_v46  ;;  %13502 = vmatpush3.bf16.msra.mxu1 %v13940_v28 }
 0xb47   : > { %13507 = vmatprep.subr.bf16.mxu1 %v18049_v44 }
 0xb49   : > { %9458 = vmatmul.mubr.bf16.vlgmr.msra.gmra.mrb[80].mxu0 %v9264_v7  ;;  %13504 = vmatmul.mubr.bf16.vlgmr.msra.gmra.mrb[104].mxu1 %v9264_v7 }
 0xb4a   : > { %9584 = vmatprep.mubr.bf16.mxu0 %v14079_v61  ;;  %13509 = vmatprep.mubr.msk.bf16.mxu1 %vm14078_vm1, %v18049_v44 }
 0xb5c   : > { %v7984_v33 = vpop.f32.mrb[80].mxu1 }
 0xb5d   : > { %v7993_v37 = vadd.f32 %v7984_v33, %v7738_v14  ;;  %v13385_v41 = vpop.f32.mrb[81].mxu1 }
 0xb5e   : > { %v7987_v18 = vpop.f32.mrb[82].mxu1 }
 0xb5f   : > { %v7996_v0 = vadd.f32 %v7987_v18, %v7741_v13  ;;  %v13386_v11 = vpop.f32.mrb[83].mxu1 }
 0xb7c   : > { %v8237_v40 = vpop.f32.mrb[84].mxu1 }
 0xb7d   : > { %v8246_v51 = vadd.f32 %v8237_v40, %v7993_v37  ;;  %v13405_v38 = vpop.f32.mrb[85].mxu1  ;;  %v13943_v40 = vld [vmem:[%s18004_s13 + $0x4] ss:$8 sps:$4 sm:$0xff]  }
 0xb7e   : > { %v8240_v48 = vpop.f32.mrb[86].mxu1  ;;  %v9544_v38 = vld [vmem:[%s18088_s11] sm:$0x1] }
 0xb7f   : > { %v8249_v59 = vadd.f32 %v8240_v48, %v7996_v0  ;;  %v13406_v16 = vpop.f32.mrb[87].mxu1  ;;  %v13941_v48 = vld [vmem:[%s18004_s13] ss:$8 sps:$4 sm:$0xff]  }
 0xb80   : > { %v13944_v16 = vld [vmem:[%s18004_s13 + $0x10] ss:$8 sps:$4 sm:$0xff]  }
 0xb9c   : > { %v8490_v50 = vpop.f32.mrb[88].mxu1 }
 0xb9d   : > { %v8499_v52 = vadd.f32 %v8490_v50, %v8246_v51  ;;  %v13425_v34 = vpop.f32.mrb[89].mxu1  ;;  %v13949_v50 = vld [vmem:[%s18004_s13 + $0x24] ss:$8 sps:$4 sm:$0xff]  }
 0xb9e   : > { %v8493_v35 = vpop.f32.mrb[90].mxu1  ;;  %v13952_v34 = vld [vmem:[%s18004_s13 + $0x34] ss:$8 sps:$4 sm:$0xff]  }
 0xb9f   : > { %v8502_v17 = vadd.f32 %v8493_v35, %v8249_v59  ;;  %v13426_v8 = vpop.f32.mrb[91].mxu1  ;;  %v13946_v59 = vld [vmem:[%s18004_s13 + $0x14] ss:$8 sps:$4 sm:$0xff]   ;;  %v13950_v35 = vld [vmem:[%s18004_s13 + $0x30] ss:$8 sps:$4 sm:$0xff]  }
 0xba0   : > { %v13953_v8 = vld [vmem:[%s18004_s13 + $0x40] ss:$8 sps:$4 sm:$0xff]  }
 0xbbc   : > { %v8743_v43 = vpop.f32.mrb[92].mxu1 }
 0xbbd   : > { %v8752_v44 = vadd.f32 %v8743_v43, %v8499_v52  ;;  %v13445_v20 = vpop.f32.mrb[93].mxu1  ;;  %v13947_v52 = vld [vmem:[%s18004_s13 + $0x20] ss:$8 sps:$4 sm:$0xff]   ;;  %v13958_v43 = vld [vmem:[%s18004_s13 + $0x54] ss:$8 sps:$4 sm:$0xff]  }
 0xbbe   : > { %v8746_v47 = vpop.f32.mrb[94].mxu1  ;;  %v13961_v20 = vld [vmem:[%s18004_s13 + $0x64] ss:$8 sps:$4 sm:$0xff]  }
 0xbbf   : > { %v8755_v39 = vadd.f32 %v8746_v47, %v8502_v17  ;;  %v13446_v4 = vpop.f32.mrb[95].mxu1  ;;  %v13955_v17 = vld [vmem:[%s18004_s13 + $0x44] ss:$8 sps:$4 sm:$0xff]   ;;  %v13959_v47 = vld [vmem:[%s18004_s13 + $0x60] ss:$8 sps:$4 sm:$0xff]  }
 0xbc0   : > { %v13962_v4 = vld [vmem:[%s18004_s13 + $0x70] ss:$8 sps:$4 sm:$0xff]  }
 0xbdc   : > { %v8996_v19 = vpop.f32.mrb[96].mxu1 }
 0xbdd   : > { %v9005_v60 = vadd.f32 %v8996_v19, %v8752_v44  ;;  %v13465_v49 = vpop.f32.mrb[97].mxu1  ;;  %v13956_v44 = vld [vmem:[%s18004_s13 + $0x50] ss:$8 sps:$4 sm:$0xff]   ;;  %v13967_v19 = vld [vmem:[%s18008_s17 + $0x4] ss:$8 sps:$4 sm:$0xff]  }
 0xbde   : > { %v8999_v45 = vpop.f32.mrb[98].mxu1  ;;  %v13990_v49 = vld [vmem:[%s18006_s15] sm:$0xff]  }
 0xbdf   : > { %v9008_v26 = vadd.f32 %v8999_v45, %v8755_v39  ;;  %v13466_v62 = vpop.f32.mrb[99].mxu1  ;;  %v13964_v39 = vld [vmem:[%s18004_s13 + $0x74] ss:$8 sps:$4 sm:$0xff]   ;;  %v13991_v45 = vld [vmem:[%s18006_s15 + $0x48] sm:$0xff]  }
 0xbe0   : > { %v13993_v62 = vld [vmem:[%s18006_s15 + $0x50] sm:$0xff]  }
 0xbfc   : > { %v9249_v2 = vpop.f32.mrb[100].mxu1 }
 0xbfd   : > { %v9258_v29 = vadd.f32 %v9249_v2, %v9005_v60  ;;  %v13485_v63 = vpop.f32.mrb[101].mxu1  ;;  %v13989_v60 = vld [vmem:[%s18006_s15 + $0x40] sm:$0xff]   ;;  %v13994_v2 = vld [vmem:[%s18006_s15 + $0x10] sm:$0xff]  }
 0xbfe   : > { %v9252_v32 = vpop.f32.mrb[102].mxu1  ;;  %v13996_v63 = vld [vmem:[%s18006_s15 + $0x18] sm:$0xff]  }
 0xbff   : > { %v9261_v22 = vadd.f32 %v9252_v32, %v9008_v26  ;;  %v13486_v10 = vpop.f32.mrb[103].mxu1  ;;  %v13992_v26 = vld [vmem:[%s18006_s15 + $0x8] sm:$0xff]   ;;  %v13997_v32 = vld [vmem:[%s18006_s15 + $0x60] sm:$0xff]  }
 0xc00   : > { %v13999_v10 = vld [vmem:[%s18006_s15 + $0x68] sm:$0xff]  }
 0xc1c   : > { %v9459_v5 = vpop.f32.mrb[80].mxu0  ;;  %v9502_v9 = vpop.f32.mrb[104].mxu1 }
 0xc1d   : > { %v9532_v31 = vadd.f32 %v9520_v30, %v9459_v5  ;;  %v9511_v58 = vadd.f32 %v9502_v9, %v9258_v29  ;;  %v9461_v1 = vpop.f32.mrb[81].mxu0  ;;  %v13505_v14 = vpop.f32.mrb[105].mxu1  ;;  %v13995_v29 = vld [vmem:[%s18006_s15 + $0x58] sm:$0xff]  }
 0xc1e   : > { %v9533_v27 = vadd.f32 %v9524_v42, %v9461_v1  ;;  %v9463_v53 = vpop.f32.mrb[82].mxu0  ;;  %v9505_v12 = vpop.f32.mrb[106].mxu1  ;;  %v13968_v9 = vld [vmem:[%s18008_s17 + $0x10] ss:$8 sps:$4 sm:$0xff]   ;;  %v13976_v1 = vld [vmem:[%s18008_s17 + $0x34] ss:$8 sps:$4 sm:$0xff]  }
 0xc1f   : > { %v9534_v21 = vadd.f32 %v9528_v23, %v9511_v58  ;;  %v9535_v15 = vadd.f32 %v9520_v30, %v9463_v53  ;;  %v9514_v13 = vadd.f32 %v9505_v12, %v9261_v22  ;;  %v9465_v57 = vpop.f32.mrb[83].mxu0  ;;  %v13506_v46 = vpop.f32.mrb[107].mxu1  ;;  %v9538_v55 = vmax.f32 %v9532_v31, 0.0  ;;  %v13998_v22 = vld [vmem:[%s18006_s15 + $0x20] sm:$0xff]   ;;  %v13970_v30 = vld [vmem:[%s18008_s17 + $0x14] ss:$8 sps:$4 sm:$0xff]  }
 0xc20   : > { %v9536_v28 = vadd.f32 %v9524_v42, %v9465_v57  ;;  %v9539_v33 = vmax.f32 %v9533_v27, 0.0  ;;  %v13973_v31 = vld [vmem:[%s18008_s17 + $0x24] ss:$8 sps:$4 sm:$0xff]   ;;  %v13971_v58 = vld [vmem:[%s18008_s17 + $0x20] ss:$8 sps:$4 sm:$0xff]  }
 0xc21   : > { %v9541_v25 = vmax.f32 %v9535_v15, 0.0  ;;  %v9537_v7 = vadd.f32 %v9528_v23, %v9514_v13  ;;  %v9540_v41 = vmax.f32 %v9534_v21, 0.0  ;;  %v13974_v14 = vld [vmem:[%s18008_s17 + $0x30] ss:$8 sps:$4 sm:$0xff]   ;;  %v13979_v27 = vld [vmem:[%s18008_s17 + $0x44] ss:$8 sps:$4 sm:$0xff]  }
 0xc22   : > { %v9542_v37 = vmax.f32 %v9536_v28, 0.0  ;;  %v13977_v53 = vld [vmem:[%s18008_s17 + $0x40] ss:$8 sps:$4 sm:$0xff]   ;;  %v13982_v12 = vld [vmem:[%s18008_s17 + $0x54] ss:$8 sps:$4 sm:$0xff]  }
 0xc23   : > { %v9545_v18 = vpack.c.bf16 %v9541_v25, %v9538_v55  ;;  %v9543_v0 = vmax.f32 %v9537_v7, 0.0  ;;  %v13980_v21 = vld [vmem:[%s18008_s17 + $0x50] ss:$8 sps:$4 sm:$0xff]   ;;  %v13985_v15 = vld [vmem:[%s18008_s17 + $0x64] ss:$8 sps:$4 sm:$0xff]  }
 0xc24   : > { %v9546_v11 = vpack.c.bf16 %v9542_v37, %v9539_v33  ;;  %v13983_v13 = vld [vmem:[%s18008_s17 + $0x60] ss:$8 sps:$4 sm:$0xff]   ;;  %v13988_v57 = vld [vmem:[%s18008_s17 + $0x74] ss:$8 sps:$4 sm:$0xff]   ;;  %v13986_v46 = vld [vmem:[%s18008_s17 + $0x70] ss:$8 sps:$4 sm:$0xff]  }
 0xc25   : > { %v9547_v51 = vpack.c.bf16 %v9543_v0, %v9540_v41  ;;  %v14001_v55 = vld [vmem:[%s18006_s15 + $0x70] sm:$0xff]   ;;  %v14003_v7 = vld [vmem:[%s18006_s15 + $0x78] sm:$0xff]   ;;  %v14021_v37 = vld [vmem:[%s18012_s21] ss:$8 sps:$4 sm:$0xff]  }
 0xc26   : > { %9552 = vmatprep.subr.bf16.mxu0 %v9546_v11  ;;  %v14002_v25 = vld [vmem:[%s18006_s15 + $0x30] sm:$0xff]   ;;  %v14004_v33 = vld [vmem:[%s18006_s15 + $0x38] sm:$0xff]   ;;  %v14023_v41 = vld [vmem:[%s18012_s21 + $0x4] ss:$8 sps:$4 sm:$0xff]  }
 0xc27   : > { %9553 = vmatpush1.bf16.msra.mxu0 %v9545_v18  ;;  %13508 = vmatpush3.bf16.msra.mxu1 %v9547_v51  ;;  %v14026_v18 = vld [vmem:[%s18012_s21 + $0x14] ss:$8 sps:$4 sm:$0xff]   ;;  %v14024_v0 = vld [vmem:[%s18012_s21 + $0x10] ss:$8 sps:$4 sm:$0xff]   ;;  %v14029_v11 = vld [vmem:[%s18012_s21 + $0x24] ss:$8 sps:$4 sm:$0xff]  }
 0xc28   : > { %9744 = vmatprep.subr.bf16.mxu0 %v13943_v40  ;;  %11961 = vmatprep.subr.bf16.mxu1 %v13989_v60 }
 0xc2a   : > { %11341 = vmatmul.mubr.msk.bf16.vlgmr.msra.gmra.mrb[84].mxu0 %vm9548_vm10, %v9544_v38  ;;  %13510 = vmatmul.mubr.msk.bf16.vlgmr.msra.gmra.mrb[108].mxu1 %vm9548_vm10, %v9544_v38  ;;  %v14027_v38 = vld [vmem:[%s18012_s21 + $0x20] ss:$8 sps:$4 sm:$0xff]  }
 0xc2b   : > { %9745 = vmatpush1.bf16.msra.mxu0 %v13941_v48  ;;  %9776 = vmatprep.mubr.bf16.mxu0 %v14079_v61 }
 0xc2c   : > { %9746 = vmatprep.subr.bf16.mxu0 %v13946_v59  ;;  %11962 = vmatpush3.bf16.msra.mxu1 %v13990_v49  ;;  %v14032_v59 = vld [vmem:[%s18012_s21 + $0x34] ss:$8 sps:$4 sm:$0xff]  }
 0xc2d   : > { %11963 = vmatprep.subr.bf16.mxu1 %v13991_v45 }
 0xc2f   : > { %9747 = vmatpush1.bf16.msra.mxu0 %v13944_v16 }
 0xc30   : > { %9748 = vmatprep.subr.bf16.mxu0 %v13949_v50  ;;  %11964 = vmatpush3.bf16.msra.mxu1 %v13992_v26  ;;  %v14030_v50 = vld [vmem:[%s18012_s21 + $0x30] ss:$8 sps:$4 sm:$0xff]  }
 0xc31   : > { %11965 = vmatprep.subr.bf16.mxu1 %v13993_v62 }
 0xc33   : > { %9749 = vmatpush1.bf16.msra.mxu0 %v13947_v52  ;;  %v14035_v52 = vld [vmem:[%s18012_s21 + $0x44] ss:$8 sps:$4 sm:$0xff]  }
 0xc34   : > { %9750 = vmatprep.subr.bf16.mxu0 %v13952_v34  ;;  %11966 = vmatpush3.bf16.msra.mxu1 %v13994_v2  ;;  %v14033_v34 = vld [vmem:[%s18012_s21 + $0x40] ss:$8 sps:$4 sm:$0xff]  }
 0xc35   : > { %11967 = vmatprep.subr.bf16.mxu1 %v13995_v29 }
 0xc37   : > { %9751 = vmatpush1.bf16.msra.mxu0 %v13950_v35  ;;  %v14038_v35 = vld [vmem:[%s18012_s21 + $0x54] ss:$8 sps:$4 sm:$0xff]  }
 0xc38   : > { %9752 = vmatprep.subr.bf16.mxu0 %v13955_v17  ;;  %11968 = vmatpush3.bf16.msra.mxu1 %v13996_v63  ;;  %v14036_v17 = vld [vmem:[%s18012_s21 + $0x50] ss:$8 sps:$4 sm:$0xff]  }
 0xc39   : > { %11969 = vmatprep.subr.bf16.mxu1 %v13997_v32 }
 0xc3b   : > { %9753 = vmatpush1.bf16.msra.mxu0 %v13953_v8  ;;  %v14041_v8 = vld [vmem:[%s18012_s21 + $0x64] ss:$8 sps:$4 sm:$0xff]  }
 0xc3c   : > { %9754 = vmatprep.subr.bf16.mxu0 %v13958_v43  ;;  %11970 = vmatpush3.bf16.msra.mxu1 %v13998_v22  ;;  %v14039_v43 = vld [vmem:[%s18012_s21 + $0x60] ss:$8 sps:$4 sm:$0xff]  }
 0xc3d   : > { %11971 = vmatprep.subr.bf16.mxu1 %v13999_v10  ;;  %v14006_v22 = vld [vmem:[%s18010_s19] sm:$0xff]  }
 0xc3f   : > { %9755 = vmatpush1.bf16.msra.mxu0 %v13956_v44  ;;  %v14044_v44 = vld [vmem:[%s18012_s21 + $0x74] ss:$8 sps:$4 sm:$0xff]  }
 0xc40   : > { %9756 = vmatprep.subr.bf16.mxu0 %v13961_v20  ;;  %11972 = vmatpush3.bf16.msra.mxu1 %v14000_v24  ;;  %v14042_v20 = vld [vmem:[%s18012_s21 + $0x70] ss:$8 sps:$4 sm:$0xff]   ;;  %v14007_v24 = vld [vmem:[%s18010_s19 + $0x48] sm:$0xff]  }
 0xc41   : > { %11973 = vmatprep.subr.bf16.mxu1 %v14001_v55 }
 0xc43   : > { %9757 = vmatpush1.bf16.msra.mxu0 %v13959_v47 }
 0xc44   : > { %9758 = vmatprep.subr.bf16.mxu0 %v13964_v39  ;;  %11974 = vmatpush3.bf16.msra.mxu1 %v14002_v25  ;;  %v9652_v39 = vld [vmem:[%s18005_s14] sm:$0x3] }
 0xc45   : > { %11975 = vmatprep.subr.bf16.mxu1 %v14003_v7 }
 0xc47   : > { %9759 = vmatpush1.bf16.msra.mxu0 %v13962_v4  ;;  %v9737_v4 = vrot.slane %v9652_v39, %v17647_v54 }
 0xc48   : > { %10072 = vmatprep.subr.bf16.mxu0 %v13967_v19  ;;  %11976 = vmatpush3.bf16.msra.mxu1 %v14004_v33  ;;  %v9741_v19 = vrot.slane %v9652_v39, %v17652_v36 }
 0xcfd   : > { %v9586_v3 = vpop.f32.mrb[84].mxu0  ;;  %v9627_v40 = vpop.f32.mrb[108].mxu1 }
 0xcfe   : > { %v9633_v56 = vpack.c.bf16 %v9586_v3, %v9586_v3  ;;  %v9588_v42 = vpop.f32.mrb[85].mxu0  ;;  %v13511_v51 = vpop.f32.mrb[109].mxu1  ;;  %v9635_v47 = vpack.c.bf16 %v9627_v40, %v9627_v40  ;;  %v14008_v3 = vld [vmem:[%s18010_s19 + $0x8] sm:$0xff]   ;;  %v14050_v40 = vld [vmem:[%s18015_s24 + $0x10] sm:$0xff]  }
 0xcff   : > { %v9590_v23 = vpop.f32.mrb[86].mxu0  ;;  %v9634_v28 = vpack.c.bf16 %v9588_v42, %v9588_v42  ;;  %v9630_v48 = vpop.f32.mrb[110].mxu1  ;;  %v14012_v42 = vld [vmem:[%s18010_s19 + $0x18] sm:$0xff]  }
 0xd00   : > { %9777 = vmatmul.mubr.bf16.vlgmr.msra.gmra.mrb[88].mxu0 %v9633_v56  ;;  %v9591_v5 = vpop.f32.mrb[87].mxu0  ;;  %v13512_v16 = vpop.f32.mrb[111].mxu1  ;;  %v14010_v56 = vld [vmem:[%s18010_s19 + $0x10] sm:$0xff]   ;;  %v14013_v23 = vld [vmem:[%s18010_s19 + $0x60] sm:$0xff]   ;;  %v14051_v51 = vld [vmem:[%s18015_s24 + $0x58] sm:$0xff]  }
 0xd01   : > { %10073 = vmatpush1.bf16.msra.mxu0 %v13965_v6  ;;  %10104 = vmatprep.mubr.bf16.mxu0 %v14079_v61  ;;  %v14009_v6 = vld [vmem:[%s18010_s19 + $0x50] sm:$0xff]   ;;  %v14014_v5 = vld [vmem:[%s18010_s19 + $0x20] sm:$0xff]   ;;  %v14055_v16 = vld [vmem:[%s18015_s24 + $0x68] sm:$0xff]  }
 0xd02   : > { %10074 = vmatprep.subr.bf16.mxu0 %v13970_v30  ;;  %v14011_v30 = vld [vmem:[%s18010_s19 + $0x58] sm:$0xff]   ;;  %v14053_v48 = vld [vmem:[%s18015_s24 + $0x60] sm:$0xff]  }
 0xd05   : > { %10075 = vmatpush1.bf16.msra.mxu0 %v13968_v9  ;;  %v14015_v9 = vld [vmem:[%s18010_s19 + $0x68] sm:$0xff]  }
 0xd06   : > { %10076 = vmatprep.subr.bf16.mxu0 %v13973_v31  ;;  %v14016_v31 = vld [vmem:[%s18010_s19 + $0x28] sm:$0xff]  }
 0xd09   : > { %10077 = vmatpush1.bf16.msra.mxu0 %v13971_v58  ;;  %v9980_v58 = vld [vmem:[%s18009_s18] sm:$0x3] }
 0xd0a   : > { %10078 = vmatprep.subr.bf16.mxu0 %v13976_v1  ;;  %v14017_v1 = vld [vmem:[%s18010_s19 + $0x70] sm:$0xff]  }
 0xd0d   : > { %10079 = vmatpush1.bf16.msra.mxu0 %v13974_v14  ;;  %v10065_v14 = vrot.slane %v9980_v58, %v17647_v54 }
 0xd0e   : > { %10080 = vmatprep.subr.bf16.mxu0 %v13979_v27  ;;  %v10069_v27 = vrot.slane %v9980_v58, %v17652_v36  ;;  %v10448_v58 = vld [vmem:[%s18014_s23] sm:$0x3] }
 0xd11   : > { %10081 = vmatpush1.bf16.msra.mxu0 %v13977_v53  ;;  %v14018_v53 = vld [vmem:[%s18010_s19 + $0x30] sm:$0xff]  }
 0xd12   : > { %10082 = vmatprep.subr.bf16.mxu0 %v13982_v12  ;;  %v14019_v12 = vld [vmem:[%s18010_s19 + $0x78] sm:$0xff]  }
 0xd15   : > { %10083 = vmatpush1.bf16.msra.mxu0 %v13980_v21 }
 0xd16   : > { %10084 = vmatprep.subr.bf16.mxu0 %v13985_v15 }
 0xd19   : > { %10085 = vmatpush1.bf16.msra.mxu0 %v13983_v13 }
 0xd1a   : > { %10086 = vmatprep.subr.bf16.mxu0 %v13988_v57 }
 0xd1d   : > { %10087 = vmatpush1.bf16.msra.mxu0 %v13986_v46  ;;  %v14020_v46 = vld [vmem:[%s18010_s19 + $0x38] sm:$0xff]  }
 0xd1e   : > { %10407 = vmatprep.subr.bf16.mxu0 %v14023_v41  ;;  %v14046_v41 = vld [vmem:[%s18015_s24] sm:$0xff]  }
 0xd20   : > { %10105 = vmatmul.mubr.bf16.vlgmr.msra.gmra.mrb[92].mxu0 %v9634_v28 }
 0xd21   : > { %10439 = vmatprep.mubr.bf16.mxu0 %v14079_v61  ;;  %v14005_v61 = vld [vmem:[%s18010_s19 + $0x40] sm:$0xff]   ;;  %10408 = vmatpush1.bf16.msra.mxu0 %v14021_v37 }
 0xd22   : > { %11983 = vmatprep.subr.bf16.mxu1 %v14005_v61  ;;  %10409 = vmatprep.subr.bf16.mxu0 %v14026_v18  ;;  %v14045_v37 = vld [vmem:[%s18015_s24 + $0x40] sm:$0xff]   ;;  %v14047_v18 = vld [vmem:[%s18015_s24 + $0x48] sm:$0xff]  }
 0xd25   : > { %10410 = vmatpush1.bf16.msra.mxu0 %v14024_v0  ;;  %v14048_v0 = vld [vmem:[%s18015_s24 + $0x8] sm:$0xff]  }
 0xd26   : > { %10411 = vmatprep.subr.bf16.mxu0 %v14029_v11  ;;  %v14049_v11 = vld [vmem:[%s18015_s24 + $0x50] sm:$0xff]  }
 0xd29   : > { %10412 = vmatpush1.bf16.msra.mxu0 %v14027_v38  ;;  %v14052_v38 = vld [vmem:[%s18015_s24 + $0x18] sm:$0xff]  }
 0xd2a   : > { %10413 = vmatprep.subr.bf16.mxu0 %v14032_v59  ;;  %v14054_v59 = vld [vmem:[%s18015_s24 + $0x20] sm:$0xff]  }
 0xd2d   : > { %10414 = vmatpush1.bf16.msra.mxu0 %v14030_v50 }
 0xd2e   : > { %10415 = vmatprep.subr.bf16.mxu0 %v14035_v52  ;;  %v9821_v52 = vld [vmem:[%s18007_s16] sm:$0x1] }
 0xd31   : > { %10416 = vmatpush1.bf16.msra.mxu0 %v14033_v34 }
 0xd32   : > { %10417 = vmatprep.subr.bf16.mxu0 %v14038_v35 }
 0xd35   : > { %10418 = vmatpush1.bf16.msra.mxu0 %v14036_v17 }
 0xd36   : > { %10419 = vmatprep.subr.bf16.mxu0 %v14041_v8 }
 0xd39   : > { %10420 = vmatpush1.bf16.msra.mxu0 %v14039_v43 }
 0xd3a   : > { %10421 = vmatprep.subr.bf16.mxu0 %v14044_v44 }
 0xd3d   : > { %10422 = vmatpush1.bf16.msra.mxu0 %v14042_v20 }
 0xd40   : > { %10440 = vmatmul.mubr.bf16.vlgmr.msra.gmra.mrb[96].mxu0 %v9635_v47 }
 0xdd3   : > { %v9778_v60 = vpop.f32.mrb[88].mxu0 }
 0xdd4   : > { %v9779_v49 = vadd.f32 %v9778_v60, %v9737_v4  ;;  %v9780_v45 = vpop.f32.mrb[89].mxu0 }
 0xdd5   : > { %v9781_v26 = vadd.f32 %v9780_v45, %v9741_v19  ;;  %v9782_v62 = vpop.f32.mrb[90].mxu0  ;;  %v10149_v19 = vld [vmem:[#allocation5] sm:$0x1] }
 0xdd6   : > { %v9785_v2 = vmax.f32 %v9779_v49, 0.0  ;;  %v9783_v29 = vpop.f32.mrb[91].mxu0 }
 0xdd7   : > { %v9786_v63 = vmax.f32 %v9781_v26, 0.0 }
 0xdd8   : > { %v9787_v10 = vpack.c.bf16 %v9785_v2, %v9785_v2 }
 0xdd9   : > { %v9788_v32 = vpack.c.bf16 %v9786_v63, %v9786_v63 }
 0xddb   : > { %9950 = vmatprep.mubr.bf16.mxu1 %v9788_v32 }
 0xddc   : > { %9951 = vmatmul.mubr.bf16.vlgmr.msra.gmra.mrb[112].mxu1 %v9787_v10  ;;  %v14056_v10 = vld [vmem:[%s18015_s24 + $0x28] sm:$0xff]  }
 0xddd   : > { %11984 = vmatpush3.bf16.msra.mxu1 %v14006_v22 }
 0xdde   : > { %11985 = vmatprep.subr.bf16.mxu1 %v14007_v24 }
 0xde1   : > { %11986 = vmatpush3.bf16.msra.mxu1 %v14008_v3  ;;  %v14057_v3 = vld [vmem:[%s18015_s24 + $0x70] sm:$0xff]  }
 0xde2   : > { %11987 = vmatprep.subr.bf16.mxu1 %v14009_v6 }
 0xde5   : > { %11988 = vmatpush3.bf16.msra.mxu1 %v14010_v56  ;;  %v14058_v56 = vld [vmem:[%s18015_s24 + $0x30] sm:$0xff]  }
 0xde6   : > { %11989 = vmatprep.subr.bf16.mxu1 %v14011_v30 }
 0xde9   : > { %11990 = vmatpush3.bf16.msra.mxu1 %v14012_v42  ;;  %v14059_v42 = vld [vmem:[%s18015_s24 + $0x78] sm:$0xff]  }
 0xdea   : > { %11991 = vmatprep.subr.bf16.mxu1 %v14013_v23  ;;  %v14060_v23 = vld [vmem:[%s18015_s24 + $0x38] sm:$0xff]  }
 0xded   : > { %11992 = vmatpush3.bf16.msra.mxu1 %v14014_v5  ;;  %v10308_v5 = vld [vmem:[%s18013_s22] sm:$0x3] }
 0xdee   : > { %11993 = vmatprep.subr.bf16.mxu1 %v14015_v9  ;;  %v10318_v9 = vrot.slane %v10308_v5, %v17647_v54 }
 0xdf1   : > { %11994 = vmatpush3.bf16.msra.mxu1 %v14016_v31  ;;  %v10322_v31 = vrot.slane %v10308_v5, %v17652_v36 }
 0xdf2   : > { %11995 = vmatprep.subr.bf16.mxu1 %v14017_v1 }
 0xdf3   : > { %v10106_v21 = vpop.f32.mrb[92].mxu0 }
 0xdf4   : > { %v10107_v15 = vadd.f32 %v10106_v21, %v10065_v14  ;;  %v10108_v13 = vpop.f32.mrb[93].mxu0 }
 0xdf5   : > { %v10109_v57 = vadd.f32 %v10108_v13, %v10069_v27  ;;  %11996 = vmatpush3.bf16.msra.mxu1 %v14018_v53  ;;  %v10110_v28 = vpop.f32.mrb[94].mxu0  ;;  %v10453_v53 = vrot.slane %v10448_v58, %v17647_v54 }
 0xdf6   : > { %v10113_v55 = vmax.f32 %v10107_v15, 0.0  ;;  %11997 = vmatprep.subr.bf16.mxu1 %v14019_v12  ;;  %v10111_v25 = vpop.f32.mrb[95].mxu0  ;;  %v10457_v12 = vrot.slane %v10448_v58, %v17652_v36 }
 0xdf7   : > { %v10114_v7 = vmax.f32 %v10109_v57, 0.0 }
 0xdf8   : > { %v10115_v61 = vpack.c.bf16 %v10113_v55, %v10113_v55 }
 0xdf9   : > { %v10116_v33 = vpack.c.bf16 %v10114_v7, %v10114_v7  ;;  %11998 = vmatpush3.bf16.msra.mxu1 %v14020_v46 }
 0xdfa   : > { %12005 = vmatprep.subr.bf16.mxu1 %v14045_v37 }
 0xdfb   : > { %10278 = vmatprep.mubr.bf16.mxu1 %v10116_v33  ;;  %v10498_v33 = vld [vmem:[%s18016_s25] sm:$0x1] }
 0xdfc   : > { %10279 = vmatmul.mubr.bf16.vlgmr.msra.gmra.mrb[116].mxu1 %v10115_v61 }
 0xdfd   : > { %12006 = vmatpush3.bf16.msra.mxu1 %v14046_v41 }
 0xdfe   : > { %12007 = vmatprep.subr.bf16.mxu1 %v14047_v18 }
 0xe01   : > { %12008 = vmatpush3.bf16.msra.mxu1 %v14048_v0 }
 0xe02   : > { %12009 = vmatprep.subr.bf16.mxu1 %v14049_v11 }
 0xe05   : > { %12010 = vmatpush3.bf16.msra.mxu1 %v14050_v40 }
 0xe06   : > { %12011 = vmatprep.subr.bf16.mxu1 %v14051_v51 }
 0xe09   : > { %12012 = vmatpush3.bf16.msra.mxu1 %v14052_v38 }
 0xe0a   : > { %12013 = vmatprep.subr.bf16.mxu1 %v14053_v48 }
 0xe0d   : > { %12014 = vmatpush3.bf16.msra.mxu1 %v14054_v59 }
 0xe0e   : > { %12015 = vmatprep.subr.bf16.mxu1 %v14055_v16 }
 0xe11   : > { %12016 = vmatpush3.bf16.msra.mxu1 %v14056_v10 }
 0xe12   : > { %12017 = vmatprep.subr.bf16.mxu1 %v14057_v3 }
 0xe13   : > { %v10441_v22 = vpop.f32.mrb[96].mxu0 }
 0xe14   : > { %v10443_v24 = vpop.f32.mrb[97].mxu0 }
 0xe15   : > { %v10445_v6 = vpop.f32.mrb[98].mxu0  ;;  %12018 = vmatpush3.bf16.msra.mxu1 %v14058_v56 }
 0xe16   : > { %v10446_v30 = vpop.f32.mrb[99].mxu0  ;;  %12019 = vmatprep.subr.bf16.mxu1 %v14059_v42 }
 0xe19   : > { %12020 = vmatpush3.bf16.msra.mxu1 %v14060_v23 }
 0xeaf   : > { %v11977_v50 = vpop.f32.mrb[112].mxu1 }
 0xeb0   : > { %v11978_v34 = vpop.f32.mrb[113].mxu1 }
 0xeb1   : > { %v11979_v35 = vadd.f32 %v11978_v34, %v11977_v50  ;;  %v11980_v17 = vpop.f32.mrb[114].mxu1 }
 0xeb2   : > { %v11981_v8 = vpop.f32.mrb[115].mxu1 }
 0xeb3   : > { %v9953_v43 = vadd.f32 %v11979_v35, %v9821_v52 }
 0xeb5   : > { %v11375_v44 = vmul.f32 -1.442695, %v9953_v43 }
 0xeb7   : > { %14061 = vpow2.f32 %v11375_v44 }
 0xec1   : > { %v14062_v20 = vpop.eup %14061 }
 0xec2   : > { %v9961_v47 = vadd.f32 1.0, %v14062_v20 }
 0xec4   : > { %14063 = vrcp.f32 %v9961_v47 }
 0xece   : > { %v14064_v39 = vpop.eup %14063 }
 0xecf   : > { %10637 = vst.msk [vmem:[%s854_s4] sm:$0x1] %vm10636_vm11, %v14064_v39  ;;  %v11999_v4 = vpop.f32.mrb[116].mxu1 }
 0xed0   : > { %v12000_v60 = vpop.f32.mrb[117].mxu1 }
 0xed1   : > { %v12001_v49 = vadd.f32 %v12000_v60, %v11999_v4  ;;  %v12002_v45 = vpop.f32.mrb[118].mxu1 }
 0xed2   : > { %v12003_v26 = vpop.f32.mrb[119].mxu1 }
 0xed3   : > { %v10281_v62 = vadd.f32 %v12001_v49, %v10149_v19 }
 0xed5   : > { %v11408_v2 = vmul.f32 -1.442695, %v10281_v62 }
 0xed7   : > { %14065 = vpow2.f32 %v11408_v2 }
 0xee1   : > { %v14066_v29 = vpop.eup %14065 }
 0xee2   : > { %v10289_v63 = vadd.f32 1.0, %v14066_v29 }
 0xee4   : > { %14067 = vrcp.f32 %v10289_v63 }
 0xeee   : > { %v14068_v32 = vpop.eup %14067 }
 0xeef   : > { %10641 = vst.msk [vmem:[%s860_s29] sm:$0x1] %vm10640_vm12, %v14068_v32  ;;  %10311 = vperm.xlu0 %13560, %v14068_v32  }
 0xf6e   : > { %v10312_v1 = vpop.permute.xlu0 %10311 }
 0xf6f   : > { %v10325_v14 = vmul.f32 %v10318_v9, %v10312_v1  ;;  %v10326_v27 = vmul.f32 %v10322_v31, %v10312_v1 }
 0xf71   : > { %v10442_v21 = vadd.f32 %v10441_v22, %v10325_v14  ;;  %v10444_v15 = vadd.f32 %v10443_v24, %v10326_v27 }
 0xf73   : > { %v10460_v13 = vadd.f32 %v10453_v53, %v10442_v21  ;;  %v10461_v57 = vadd.f32 %v10457_v12, %v10444_v15 }
 0xf75   : > { %v10462_v46 = vmax.f32 %v10460_v13, 0.0  ;;  %v10463_v28 = vmax.f32 %v10461_v57, 0.0 }
 0xf77   : > { %v10464_v55 = vpack.c.bf16 %v10462_v46, %v10462_v46  ;;  %v10465_v25 = vpack.c.bf16 %v10463_v28, %v10463_v28 }
 0xf79   : > { %10627 = vmatprep.mubr.bf16.mxu1 %v10465_v25 }
 0xf7a   : > { %10628 = vmatmul.mubr.bf16.vlgmr.msra.gmra.mrb[120].mxu1 %v10464_v55 }
0x104d   : > { %v12021_v7 = vpop.f32.mrb[120].mxu1 }
0x104e   : > { %v12022_v61 = vpop.f32.mrb[121].mxu1 }
0x104f   : > { %v12023_v54 = vadd.f32 %v12022_v61, %v12021_v7  ;;  %v12024_v37 = vpop.f32.mrb[122].mxu1 }
0x1050   : > { %v12025_v36 = vpop.f32.mrb[123].mxu1 }
0x1051   : > { %v10630_v41 = vadd.f32 %v12023_v54, %v10498_v33 }
0x1053   : > { %v10635_v18 = vmul.f32 %v10630_v41, %v10312_v1 }
0x1055   : > { %10639 = vst.msk [vmem:[%s857_s7] sm:$0x1] %vm10638_vm13, %v10635_v18 }
0x1056 PF: > { %s41_s9 = sadd.s32 1, %s14075_s9  }
0x1057   : > { %p38_p4 = scmp.ge.s32.totalorder %s41_s9, 4  }
0x1059   :  { %40 = sbr.rel (!%p38_p4) target bundleno = 14 (0xe), region = 178 }

</bundles_post_ra>
